<compile_context>
chip_gen: v7x
topology: tpu7x:2x2x1
jax: 0.10.0
libtpu: 0.0.40
codegen_flags: <defaults>
</compile_context>

<pallas_src>
import functools

import jax
import jax.numpy as jnp
from jax import lax
from jax.experimental import pallas as pl
from jax.experimental.pallas import tpu as pltpu

HIDDEN_SIZE = 100
INPUT_SIZE = 21
NUM_LAYERS = 3
OUTPUT_SIZE = 1

PAD = 128          # lane-padded width for both input features and hidden
GPAD = 4 * PAD     # 4 gates (i, f, g, o), each padded to 128 lanes -> 512


# ----------------------------- Pallas kernel -------------------------------

def fused_lstm_kernel(x_ref, wih_ref, whh_ref, b_ref, wfc_ref, bfc_ref,
                      out_ref, seq_ref, zin_ref, *, T, B):
    """All LSTM layers + FC head in one kernel; everything stays in VMEM."""
    # Stage the time-major flattened input sequence into the sequence buffer;
    # it is overwritten layer by layer with the produced hidden sequence.
    seq_ref[...] = x_ref[...]

    h = jnp.zeros((B, PAD), jnp.float32)

    for layer in range(NUM_LAYERS):
        # Hoisted input projection for the WHOLE sequence (no recurrent dep):
        # one (T*B,128) x (128,512) matmul, bias folded in once.
        zin_ref[...] = (
            jnp.dot(seq_ref[...], wih_ref[layer],
                    preferred_element_type=jnp.float32)
            + b_ref[layer])

        h = jnp.zeros((B, PAD), jnp.float32)
        c = jnp.zeros((B, PAD), jnp.float32)

        for t in range(T):  # fully unrolled, strictly sequential recurrence
            z = zin_ref[t * B:(t + 1) * B, :] + jnp.dot(
                h, whh_ref[layer], preferred_element_type=jnp.float32)
            i_g = jax.nn.sigmoid(z[:, 0 * PAD:1 * PAD])
            f_g = jax.nn.sigmoid(z[:, 1 * PAD:2 * PAD])
            g_g = jnp.tanh(z[:, 2 * PAD:3 * PAD])
            o_g = jax.nn.sigmoid(z[:, 3 * PAD:4 * PAD])
            c = f_g * c + i_g * g_g
            h = o_g * jnp.tanh(c)
            # The hidden sequence becomes the next layer's input.  In-place is
            # safe: this layer's input was fully consumed by the hoisted
            # projection above.
            seq_ref[t * B:(t + 1) * B, :] = h

    # Final FC on the last layer's last hidden state.  Lane-dense (B, 128)
    # output store; the real scalar lives in column 0, the rest is exactly 0.
    out_ref[...] = (
        jnp.dot(h, wfc_ref[...], preferred_element_type=jnp.float32)
        + bfc_ref[...])


# ------------------------------- wrapper ------------------------------------

def lstm_forward(x, wih_all, whh_all, b_all, wfc_p, bfc_p):
    """x: (B, T, INPUT_SIZE), batch_first — same semantics as the PyTorch module."""
    B, T, F = x.shape
    x_p = jnp.zeros((B, T, PAD), jnp.float32).at[:, :, :F].set(x)
    x_tm = jnp.transpose(x_p, (1, 0, 2)).reshape(T * B, PAD)  # time-major, flat

    out_pad = pl.pallas_call(
        functools.partial(fused_lstm_kernel, T=T, B=B),
        out_shape=jax.ShapeDtypeStruct((B, PAD), jnp.float32),
        in_specs=[pl.BlockSpec(memory_space=pltpu.MemorySpace.VMEM)] * 6,
        out_specs=pl.BlockSpec(memory_space=pltpu.MemorySpace.VMEM),
        scratch_shapes=[
            pltpu.VMEM((T * B, PAD), jnp.float32),    # layer input / hidden seq
            pltpu.VMEM((T * B, GPAD), jnp.float32),   # hoisted input projection
        ],
    )(x_tm, wih_all, whh_all, b_all, wfc_p, bfc_p)

    return out_pad[:, :OUTPUT_SIZE]


# --------------------- deterministic parameter init -------------------------

def init_params(key):
    """PyTorch-style uniform(-1/sqrt(H), 1/sqrt(H)) init for all params."""
    k = 1.0 / jnp.sqrt(jnp.float32(HIDDEN_SIZE))
    raw_layers = []
    for layer in range(NUM_LAYERS):
        in_dim = INPUT_SIZE if layer == 0 else HIDDEN_SIZE
        key, k1, k2, k3, k4 = jax.random.split(key, 5)
        w_ih = jax.random.uniform(k1, (4 * HIDDEN_SIZE, in_dim), jnp.float32, -k, k)
        w_hh = jax.random.uniform(k2, (4 * HIDDEN_SIZE, HIDDEN_SIZE), jnp.float32, -k, k)
        b_ih = jax.random.uniform(k3, (4 * HIDDEN_SIZE,), jnp.float32, -k, k)
        b_hh = jax.random.uniform(k4, (4 * HIDDEN_SIZE,), jnp.float32, -k, k)
        raw_layers.append((w_ih, w_hh, b_ih, b_hh))
    key, k5, k6 = jax.random.split(key, 3)
    w_fc = jax.random.uniform(k5, (OUTPUT_SIZE, HIDDEN_SIZE), jnp.float32, -k, k)
    b_fc = jax.random.uniform(k6, (OUTPUT_SIZE,), jnp.float32, -k, k)
    return raw_layers, w_fc, b_fc


def pack_params(raw_layers, w_fc, b_fc):
    """Pad / transpose raw PyTorch-layout params into the fused kernel layout."""
    H = HIDDEN_SIZE
    wih_list, whh_list, b_list = [], [], []
    for layer, (w_ih, w_hh, b_ih, b_hh) in enumerate(raw_layers):
        in_dim = INPUT_SIZE if layer == 0 else H
        wih_g = w_ih.reshape(4, H, in_dim).transpose(0, 2, 1)   # (4, in_dim, H)
        whh_g = w_hh.reshape(4, H, H).transpose(0, 2, 1)        # (4, H, H)
        b_g = (b_ih + b_hh).reshape(4, H)
        wih_p = jnp.zeros((PAD, GPAD), jnp.float32)
        whh_p = jnp.zeros((PAD, GPAD), jnp.float32)
        b_p = jnp.zeros((1, GPAD), jnp.float32)
        for g in range(4):  # gates concatenated along N, each gate 128-wide
            wih_p = wih_p.at[:in_dim, g * PAD:g * PAD + H].set(wih_g[g])
            whh_p = whh_p.at[:H, g * PAD:g * PAD + H].set(whh_g[g])
            b_p = b_p.at[0, g * PAD:g * PAD + H].set(b_g[g])
        wih_list.append(wih_p)
        whh_list.append(whh_p)
        b_list.append(b_p)
    wih_all = jnp.stack(wih_list)                    # (L, 128, 512)
    whh_all = jnp.stack(whh_list)                    # (L, 128, 512)
    b_all = jnp.stack(b_list)                        # (L, 1, 512)
    wfc_p = jnp.zeros((PAD, PAD), jnp.float32).at[:H, :OUTPUT_SIZE].set(w_fc.T)
    bfc_p = jnp.zeros((1, PAD), jnp.float32).at[0, :OUTPUT_SIZE].set(b_fc)
    return wih_all, whh_all, b_all, wfc_p, bfc_p


# --------------------------- pure-JAX reference ------------------------------

def lstm_ref(x, raw_layers, w_fc, b_fc):
    out = x
    B = x.shape[0]
    for (w_ih, w_hh, b_ih, b_hh) in raw_layers:
        h0 = jnp.zeros((B, HIDDEN_SIZE), jnp.float32)
        c0 = jnp.zeros((B, HIDDEN_SIZE), jnp.float32)

        def step(carry, xt):
            h, c = carry
            z = xt @ w_ih.T + b_ih + h @ w_hh.T + b_hh
            i, f, g, o = jnp.split(z, 4, axis=-1)
            i = jax.nn.sigmoid(i)
            f = jax.nn.sigmoid(f)
            g = jnp.tanh(g)
            o = jax.nn.sigmoid(o)
            c = f * c + i * g
            h = o * jnp.tanh(c)
            return (h, c), h

        (_, _), hs = lax.scan(step, (h0, c0), jnp.transpose(out, (1, 0, 2)))
        out = jnp.transpose(hs, (1, 0, 2))
    return out[:, -1, :] @ w_fc.T + b_fc


# --------------------------------- main --------------------------------------

if __name__ == "__main__":
    key = jax.random.PRNGKey(0)
    key_p, key_x = jax.random.split(key)

    raw_layers, w_fc, b_fc = init_params(key_p)
    wih_all, whh_all, b_all, wfc_p, bfc_p = pack_params(raw_layers, w_fc, b_fc)

    B, T = 2, 8
    x = jax.random.normal(key_x, (B, T, INPUT_SIZE), jnp.float32)

    out = lstm_forward(x, wih_all, whh_all, b_all, wfc_p, bfc_p)
    out = jax.block_until_ready(out)

    ref = lstm_ref(x, raw_layers, w_fc, b_fc)
    assert out.shape == (B, OUTPUT_SIZE)
    assert jnp.allclose(out, ref, atol=1e-5, rtol=1e-5), (out, ref)

    # TODO(synk): optional bf16 weight cast for v6e/v7x MXU throughput would
    # require relaxing the 1e-5 tolerance; kept f32 for exactness here.
    print("KERNEL_OK")
</pallas_src>

<mosaic_0001>
module attributes {stable_mosaic.version = 11 : i64} {
  func.func @fused_lstm_kernel(%arg0: memref<16x128xf32, #tpu.memory_space<vmem>>, %arg1: memref<3x128x512xf32, #tpu.memory_space<vmem>>, %arg2: memref<3x128x512xf32, #tpu.memory_space<vmem>>, %arg3: memref<3x1x512xf32, #tpu.memory_space<vmem>>, %arg4: memref<128x128xf32, #tpu.memory_space<vmem>>, %arg5: memref<1x128xf32, #tpu.memory_space<vmem>>, %arg6: memref<2x128xf32, #tpu.memory_space<vmem>>, %arg7: memref<16x128xf32, #tpu.memory_space<vmem>>, %arg8: memref<16x512xf32, #tpu.memory_space<vmem>>) attributes {dimension_semantics = [], scalar_prefetch = 0 : i64, scratch_operands = 2 : i64, tpu.core_type = #tpu.core_type<tc>} {
    %c0 = arith.constant 0 : index
    %c0_0 = arith.constant 0 : index
    %0 = vector.load %arg0[%c0, %c0_0] : memref<16x128xf32, #tpu.memory_space<vmem>>, vector<16x128xf32>
    %c0_1 = arith.constant 0 : index
    %c0_2 = arith.constant 0 : index
    %1 = vector.load %arg7[%c0_1, %c0_2] : memref<16x128xf32, #tpu.memory_space<vmem>>, vector<16x128xf32>
    tpu.vector_store %arg7[%c0_1, %c0_2], %0 {strides = array<i32>} : memref<16x128xf32, #tpu.memory_space<vmem>>, vector<16x128xf32>,
    %c0_3 = arith.constant 0 : index
    %c0_4 = arith.constant 0 : index
    %2 = vector.load %arg7[%c0_3, %c0_4] : memref<16x128xf32, #tpu.memory_space<vmem>>, vector<16x128xf32>
    %c0_5 = arith.constant 0 : index
    %c0_6 = arith.constant 0 : index
    %c0_7 = arith.constant 0 : index
    %3 = vector.load %arg1[%c0_5, %c0_6, %c0_7] : memref<3x128x512xf32, #tpu.memory_space<vmem>>, vector<1x128x512xf32>
    %4 = vector.shape_cast %3 : vector<1x128x512xf32> to vector<128x512xf32>
    %cst = arith.constant dense<0.000000e+00> : vector<16x512xf32>
    %5 = tpu.matmul %2, %4, %cst {dimension_numbers = #tpu.dot_dimension_numbers<[1], [0], [0], [1], [0, 0, 1, 1], [], []>} : vector<16x128xf32>, vector<128x512xf32>, vector<16x512xf32> -> vector<16x512xf32>
    %c0_8 = arith.constant 0 : index
    %c0_9 = arith.constant 0 : index
    %c0_10 = arith.constant 0 : index
    %6 = vector.load %arg3[%c0_8, %c0_9, %c0_10] : memref<3x1x512xf32, #tpu.memory_space<vmem>>, vector<1x1x512xf32>
    %7 = vector.shape_cast %6 : vector<1x1x512xf32> to vector<1x512xf32>
    %8 = vector.broadcast %7 : vector<1x512xf32> to vector<16x512xf32>
    %9 = arith.addf %5, %8 : vector<16x512xf32>
    %c0_11 = arith.constant 0 : index
    %c0_12 = arith.constant 0 : index
    %10 = vector.load %arg8[%c0_11, %c0_12] : memref<16x512xf32, #tpu.memory_space<vmem>>, vector<16x512xf32>
    tpu.vector_store %arg8[%c0_11, %c0_12], %9 {strides = array<i32>} : memref<16x512xf32, #tpu.memory_space<vmem>>, vector<16x512xf32>,
    %cst_13 = arith.constant 0.000000e+00 : f32
    %11 = vector.broadcast %cst_13 : f32 to vector<2x128xf32>
    %cst_14 = arith.constant 0.000000e+00 : f32
    %12 = vector.broadcast %cst_14 : f32 to vector<2x128xf32>
    %c0_15 = arith.constant 0 : index
    %c0_16 = arith.constant 0 : index
    %13 = vector.load %arg8[%c0_15, %c0_16] : memref<16x512xf32, #tpu.memory_space<vmem>>, vector<2x512xf32>
    %c0_17 = arith.constant 0 : index
    %c0_18 = arith.constant 0 : index
    %c0_19 = arith.constant 0 : index
    %14 = vector.load %arg2[%c0_17, %c0_18, %c0_19] : memref<3x128x512xf32, #tpu.memory_space<vmem>>, vector<1x128x512xf32>
    %15 = vector.shape_cast %14 : vector<1x128x512xf32> to vector<128x512xf32>
    %cst_20 = arith.constant dense<0.000000e+00> : vector<2x512xf32>
    %16 = tpu.matmul %11, %15, %cst_20 {dimension_numbers = #tpu.dot_dimension_numbers<[1], [0], [0], [1], [0, 0, 1, 1], [], []>} : vector<2x128xf32>, vector<128x512xf32>, vector<2x512xf32> -> vector<2x512xf32>
    %17 = arith.addf %13, %16 : vector<2x512xf32>
    %18 = vector.extract_strided_slice %17 {offsets = [0, 0], sizes = [2, 128], strides = [1, 1]} : vector<2x512xf32> to vector<2x128xf32>
    %19 = arith.negf %18 : vector<2x128xf32>
    %20 = math.exp %19 : vector<2x128xf32>
    %cst_21 = arith.constant 1.000000e+00 : f32
    %21 = vector.broadcast %cst_21 : f32 to vector<2x128xf32>
    %22 = arith.addf %21, %20 : vector<2x128xf32>
    %23 = arith.divf %21, %22 : vector<2x128xf32>
    %24 = vector.extract_strided_slice %17 {offsets = [0, 128], sizes = [2, 128], strides = [1, 1]} : vector<2x512xf32> to vector<2x128xf32>
    %25 = arith.negf %24 : vector<2x128xf32>
    %26 = math.exp %25 : vector<2x128xf32>
    %cst_22 = arith.constant 1.000000e+00 : f32
    %27 = vector.broadcast %cst_22 : f32 to vector<2x128xf32>
    %28 = arith.addf %27, %26 : vector<2x128xf32>
    %29 = arith.divf %27, %28 : vector<2x128xf32>
    %30 = vector.extract_strided_slice %17 {offsets = [0, 256], sizes = [2, 128], strides = [1, 1]} : vector<2x512xf32> to vector<2x128xf32>
    %31 = math.tanh %30 : vector<2x128xf32>
    %32 = vector.extract_strided_slice %17 {offsets = [0, 384], sizes = [2, 128], strides = [1, 1]} : vector<2x512xf32> to vector<2x128xf32>
    %33 = arith.negf %32 : vector<2x128xf32>
    %34 = math.exp %33 : vector<2x128xf32>
    %cst_23 = arith.constant 1.000000e+00 : f32
    %35 = vector.broadcast %cst_23 : f32 to vector<2x128xf32>
    %36 = arith.addf %35, %34 : vector<2x128xf32>
    %37 = arith.divf %35, %36 : vector<2x128xf32>
    %38 = arith.mulf %29, %12 : vector<2x128xf32>
    %39 = arith.mulf %23, %31 : vector<2x128xf32>
    %40 = arith.addf %38, %39 : vector<2x128xf32>
    %41 = math.tanh %40 : vector<2x128xf32>
    %42 = arith.mulf %37, %41 : vector<2x128xf32>
    %c0_24 = arith.constant 0 : index
    %c0_25 = arith.constant 0 : index
    %43 = vector.load %arg7[%c0_24, %c0_25] : memref<16x128xf32, #tpu.memory_space<vmem>>, vector<2x128xf32>
    tpu.vector_store %arg7[%c0_24, %c0_25], %42 {strides = array<i32>} : memref<16x128xf32, #tpu.memory_space<vmem>>, vector<2x128xf32>,
    %c2 = arith.constant 2 : index
    %c0_26 = arith.constant 0 : index
    %44 = vector.load %arg8[%c2, %c0_26] : memref<16x512xf32, #tpu.memory_space<vmem>>, vector<2x512xf32>
    %c0_27 = arith.constant 0 : index
    %c0_28 = arith.constant 0 : index
    %c0_29 = arith.constant 0 : index
    %45 = vector.load %arg2[%c0_27, %c0_28, %c0_29] : memref<3x128x512xf32, #tpu.memory_space<vmem>>, vector<1x128x512xf32>
    %46 = vector.shape_cast %45 : vector<1x128x512xf32> to vector<128x512xf32>
    %cst_30 = arith.constant dense<0.000000e+00> : vector<2x512xf32>
    %47 = tpu.matmul %42, %46, %cst_30 {dimension_numbers = #tpu.dot_dimension_numbers<[1], [0], [0], [1], [0, 0, 1, 1], [], []>} : vector<2x128xf32>, vector<128x512xf32>, vector<2x512xf32> -> vector<2x512xf32>
    %48 = arith.addf %44, %47 : vector<2x512xf32>
    %49 = vector.extract_strided_slice %48 {offsets = [0, 0], sizes = [2, 128], strides = [1, 1]} : vector<2x512xf32> to vector<2x128xf32>
    %50 = arith.negf %49 : vector<2x128xf32>
    %51 = math.exp %50 : vector<2x128xf32>
    %cst_31 = arith.constant 1.000000e+00 : f32
    %52 = vector.broadcast %cst_31 : f32 to vector<2x128xf32>
    %53 = arith.addf %52, %51 : vector<2x128xf32>
    %54 = arith.divf %52, %53 : vector<2x128xf32>
    %55 = vector.extract_strided_slice %48 {offsets = [0, 128], sizes = [2, 128], strides = [1, 1]} : vector<2x512xf32> to vector<2x128xf32>
    %56 = arith.negf %55 : vector<2x128xf32>
    %57 = math.exp %56 : vector<2x128xf32>
    %cst_32 = arith.constant 1.000000e+00 : f32
    %58 = vector.broadcast %cst_32 : f32 to vector<2x128xf32>
    %59 = arith.addf %58, %57 : vector<2x128xf32>
    %60 = arith.divf %58, %59 : vector<2x128xf32>
    %61 = vector.extract_strided_slice %48 {offsets = [0, 256], sizes = [2, 128], strides = [1, 1]} : vector<2x512xf32> to vector<2x128xf32>
    %62 = math.tanh %61 : vector<2x128xf32>
    %63 = vector.extract_strided_slice %48 {offsets = [0, 384], sizes = [2, 128], strides = [1, 1]} : vector<2x512xf32> to vector<2x128xf32>
    %64 = arith.negf %63 : vector<2x128xf32>
    %65 = math.exp %64 : vector<2x128xf32>
    %cst_33 = arith.constant 1.000000e+00 : f32
    %66 = vector.broadcast %cst_33 : f32 to vector<2x128xf32>
    %67 = arith.addf %66, %65 : vector<2x128xf32>
    %68 = arith.divf %66, %67 : vector<2x128xf32>
    %69 = arith.mulf %60, %40 : vector<2x128xf32>
    %70 = arith.mulf %54, %62 : vector<2x128xf32>
    %71 = arith.addf %69, %70 : vector<2x128xf32>
    %72 = math.tanh %71 : vector<2x128xf32>
    %73 = arith.mulf %68, %72 : vector<2x128xf32>
    %c2_34 = arith.constant 2 : index
    %c0_35 = arith.constant 0 : index
    %74 = vector.load %arg7[%c2_34, %c0_35] : memref<16x128xf32, #tpu.memory_space<vmem>>, vector<2x128xf32>
    tpu.vector_store %arg7[%c2_34, %c0_35], %73 {strides = array<i32>} : memref<16x128xf32, #tpu.memory_space<vmem>>, vector<2x128xf32>,
    %c4 = arith.constant 4 : index
    %c0_36 = arith.constant 0 : index
    %75 = vector.load %arg8[%c4, %c0_36] : memref<16x512xf32, #tpu.memory_space<vmem>>, vector<2x512xf32>
    %c0_37 = arith.constant 0 : index
    %c0_38 = arith.constant 0 : index
    %c0_39 = arith.constant 0 : index
    %76 = vector.load %arg2[%c0_37, %c0_38, %c0_39] : memref<3x128x512xf32, #tpu.memory_space<vmem>>, vector<1x128x512xf32>
    %77 = vector.shape_cast %76 : vector<1x128x512xf32> to vector<128x512xf32>
    %cst_40 = arith.constant dense<0.000000e+00> : vector<2x512xf32>
    %78 = tpu.matmul %73, %77, %cst_40 {dimension_numbers = #tpu.dot_dimension_numbers<[1], [0], [0], [1], [0, 0, 1, 1], [], []>} : vector<2x128xf32>, vector<128x512xf32>, vector<2x512xf32> -> vector<2x512xf32>
    %79 = arith.addf %75, %78 : vector<2x512xf32>
    %80 = vector.extract_strided_slice %79 {offsets = [0, 0], sizes = [2, 128], strides = [1, 1]} : vector<2x512xf32> to vector<2x128xf32>
    %81 = arith.negf %80 : vector<2x128xf32>
    %82 = math.exp %81 : vector<2x128xf32>
    %cst_41 = arith.constant 1.000000e+00 : f32
    %83 = vector.broadcast %cst_41 : f32 to vector<2x128xf32>
    %84 = arith.addf %83, %82 : vector<2x128xf32>
    %85 = arith.divf %83, %84 : vector<2x128xf32>
    %86 = vector.extract_strided_slice %79 {offsets = [0, 128], sizes = [2, 128], strides = [1, 1]} : vector<2x512xf32> to vector<2x128xf32>
    %87 = arith.negf %86 : vector<2x128xf32>
    %88 = math.exp %87 : vector<2x128xf32>
    %cst_42 = arith.constant 1.000000e+00 : f32
    %89 = vector.broadcast %cst_42 : f32 to vector<2x128xf32>
    %90 = arith.addf %89, %88 : vector<2x128xf32>
    %91 = arith.divf %89, %90 : vector<2x128xf32>
    %92 = vector.extract_strided_slice %79 {offsets = [0, 256], sizes = [2, 128], strides = [1, 1]} : vector<2x512xf32> to vector<2x128xf32>
    %93 = math.tanh %92 : vector<2x128xf32>
    %94 = vector.extract_strided_slice %79 {offsets = [0, 384], sizes = [2, 128], strides = [1, 1]} : vector<2x512xf32> to vector<2x128xf32>
    %95 = arith.negf %94 : vector<2x128xf32>
    %96 = math.exp %95 : vector<2x128xf32>
    %cst_43 = arith.constant 1.000000e+00 : f32
    %97 = vector.broadcast %cst_43 : f32 to vector<2x128xf32>
    %98 = arith.addf %97, %96 : vector<2x128xf32>
    %99 = arith.divf %97, %98 : vector<2x128xf32>
    %100 = arith.mulf %91, %71 : vector<2x128xf32>
    %101 = arith.mulf %85, %93 : vector<2x128xf32>
    %102 = arith.addf %100, %101 : vector<2x128xf32>
    %103 = math.tanh %102 : vector<2x128xf32>
    %104 = arith.mulf %99, %103 : vector<2x128xf32>
    %c4_44 = arith.constant 4 : index
    %c0_45 = arith.constant 0 : index
    %105 = vector.load %arg7[%c4_44, %c0_45] : memref<16x128xf32, #tpu.memory_space<vmem>>, vector<2x128xf32>
    tpu.vector_store %arg7[%c4_44, %c0_45], %104 {strides = array<i32>} : memref<16x128xf32, #tpu.memory_space<vmem>>, vector<2x128xf32>,
    %c6 = arith.constant 6 : index
    %c0_46 = arith.constant 0 : index
    %106 = vector.load %arg8[%c6, %c0_46] : memref<16x512xf32, #tpu.memory_space<vmem>>, vector<2x512xf32>
    %c0_47 = arith.constant 0 : index
    %c0_48 = arith.constant 0 : index
    %c0_49 = arith.constant 0 : index
    %107 = vector.load %arg2[%c0_47, %c0_48, %c0_49] : memref<3x128x512xf32, #tpu.memory_space<vmem>>, vector<1x128x512xf32>
    %108 = vector.shape_cast %107 : vector<1x128x512xf32> to vector<128x512xf32>
    %cst_50 = arith.constant dense<0.000000e+00> : vector<2x512xf32>
    %109 = tpu.matmul %104, %108, %cst_50 {dimension_numbers = #tpu.dot_dimension_numbers<[1], [0], [0], [1], [0, 0, 1, 1], [], []>} : vector<2x128xf32>, vector<128x512xf32>, vector<2x512xf32> -> vector<2x512xf32>
    %110 = arith.addf %106, %109 : vector<2x512xf32>
    %111 = vector.extract_strided_slice %110 {offsets = [0, 0], sizes = [2, 128], strides = [1, 1]} : vector<2x512xf32> to vector<2x128xf32>
    %112 = arith.negf %111 : vector<2x128xf32>
    %113 = math.exp %112 : vector<2x128xf32>
    %cst_51 = arith.constant 1.000000e+00 : f32
    %114 = vector.broadcast %cst_51 : f32 to vector<2x128xf32>
    %115 = arith.addf %114, %113 : vector<2x128xf32>
    %116 = arith.divf %114, %115 : vector<2x128xf32>
    %117 = vector.extract_strided_slice %110 {offsets = [0, 128], sizes = [2, 128], strides = [1, 1]} : vector<2x512xf32> to vector<2x128xf32>
    %118 = arith.negf %117 : vector<2x128xf32>
    %119 = math.exp %118 : vector<2x128xf32>
    %cst_52 = arith.constant 1.000000e+00 : f32
    %120 = vector.broadcast %cst_52 : f32 to vector<2x128xf32>
    %121 = arith.addf %120, %119 : vector<2x128xf32>
    %122 = arith.divf %120, %121 : vector<2x128xf32>
    %123 = vector.extract_strided_slice %110 {offsets = [0, 256], sizes = [2, 128], strides = [1, 1]} : vector<2x512xf32> to vector<2x128xf32>
    %124 = math.tanh %123 : vector<2x128xf32>
    %125 = vector.extract_strided_slice %110 {offsets = [0, 384], sizes = [2, 128], strides = [1, 1]} : vector<2x512xf32> to vector<2x128xf32>
    %126 = arith.negf %125 : vector<2x128xf32>
    %127 = math.exp %126 : vector<2x128xf32>
    %cst_53 = arith.constant 1.000000e+00 : f32
    %128 = vector.broadcast %cst_53 : f32 to vector<2x128xf32>
    %129 = arith.addf %128, %127 : vector<2x128xf32>
    %130 = arith.divf %128, %129 : vector<2x128xf32>
    %131 = arith.mulf %122, %102 : vector<2x128xf32>
    %132 = arith.mulf %116, %124 : vector<2x128xf32>
    %133 = arith.addf %131, %132 : vector<2x128xf32>
    %134 = math.tanh %133 : vector<2x128xf32>
    %135 = arith.mulf %130, %134 : vector<2x128xf32>
    %c6_54 = arith.constant 6 : index
    %c0_55 = arith.constant 0 : index
    %136 = vector.load %arg7[%c6_54, %c0_55] : memref<16x128xf32, #tpu.memory_space<vmem>>, vector<2x128xf32>
    tpu.vector_store %arg7[%c6_54, %c0_55], %135 {strides = array<i32>} : memref<16x128xf32, #tpu.memory_space<vmem>>, vector<2x128xf32>,
    %c8 = arith.constant 8 : index
    %c0_56 = arith.constant 0 : index
    %137 = vector.load %arg8[%c8, %c0_56] : memref<16x512xf32, #tpu.memory_space<vmem>>, vector<2x512xf32>
    %c0_57 = arith.constant 0 : index
    %c0_58 = arith.constant 0 : index
    %c0_59 = arith.constant 0 : index
    %138 = vector.load %arg2[%c0_57, %c0_58, %c0_59] : memref<3x128x512xf32, #tpu.memory_space<vmem>>, vector<1x128x512xf32>
    %139 = vector.shape_cast %138 : vector<1x128x512xf32> to vector<128x512xf32>
    %cst_60 = arith.constant dense<0.000000e+00> : vector<2x512xf32>
    %140 = tpu.matmul %135, %139, %cst_60 {dimension_numbers = #tpu.dot_dimension_numbers<[1], [0], [0], [1], [0, 0, 1, 1], [], []>} : vector<2x128xf32>, vector<128x512xf32>, vector<2x512xf32> -> vector<2x512xf32>
    %141 = arith.addf %137, %140 : vector<2x512xf32>
    %142 = vector.extract_strided_slice %141 {offsets = [0, 0], sizes = [2, 128], strides = [1, 1]} : vector<2x512xf32> to vector<2x128xf32>
    %143 = arith.negf %142 : vector<2x128xf32>
    %144 = math.exp %143 : vector<2x128xf32>
    %cst_61 = arith.constant 1.000000e+00 : f32
    %145 = vector.broadcast %cst_61 : f32 to vector<2x128xf32>
    %146 = arith.addf %145, %144 : vector<2x128xf32>
    %147 = arith.divf %145, %146 : vector<2x128xf32>
    %148 = vector.extract_strided_slice %141 {offsets = [0, 128], sizes = [2, 128], strides = [1, 1]} : vector<2x512xf32> to vector<2x128xf32>
    %149 = arith.negf %148 : vector<2x128xf32>
    %150 = math.exp %149 : vector<2x128xf32>
    %cst_62 = arith.constant 1.000000e+00 : f32
    %151 = vector.broadcast %cst_62 : f32 to vector<2x128xf32>
    %152 = arith.addf %151, %150 : vector<2x128xf32>
    %153 = arith.divf %151, %152 : vector<2x128xf32>
    %154 = vector.extract_strided_slice %141 {offsets = [0, 256], sizes = [2, 128], strides = [1, 1]} : vector<2x512xf32> to vector<2x128xf32>
    %155 = math.tanh %154 : vector<2x128xf32>
    %156 = vector.extract_strided_slice %141 {offsets = [0, 384], sizes = [2, 128], strides = [1, 1]} : vector<2x512xf32> to vector<2x128xf32>
    %157 = arith.negf %156 : vector<2x128xf32>
    %158 = math.exp %157 : vector<2x128xf32>
    %cst_63 = arith.constant 1.000000e+00 : f32
    %159 = vector.broadcast %cst_63 : f32 to vector<2x128xf32>
    %160 = arith.addf %159, %158 : vector<2x128xf32>
    %161 = arith.divf %159, %160 : vector<2x128xf32>
    %162 = arith.mulf %153, %133 : vector<2x128xf32>
    %163 = arith.mulf %147, %155 : vector<2x128xf32>
    %164 = arith.addf %162, %163 : vector<2x128xf32>
    %165 = math.tanh %164 : vector<2x128xf32>
    %166 = arith.mulf %161, %165 : vector<2x128xf32>
    %c8_64 = arith.constant 8 : index
    %c0_65 = arith.constant 0 : index
    %167 = vector.load %arg7[%c8_64, %c0_65] : memref<16x128xf32, #tpu.memory_space<vmem>>, vector<2x128xf32>
    tpu.vector_store %arg7[%c8_64, %c0_65], %166 {strides = array<i32>} : memref<16x128xf32, #tpu.memory_space<vmem>>, vector<2x128xf32>,
    %c10 = arith.constant 10 : index
    %c0_66 = arith.constant 0 : index
    %168 = vector.load %arg8[%c10, %c0_66] : memref<16x512xf32, #tpu.memory_space<vmem>>, vector<2x512xf32>
    %c0_67 = arith.constant 0 : index
    %c0_68 = arith.constant 0 : index
    %c0_69 = arith.constant 0 : index
    %169 = vector.load %arg2[%c0_67, %c0_68, %c0_69] : memref<3x128x512xf32, #tpu.memory_space<vmem>>, vector<1x128x512xf32>
    %170 = vector.shape_cast %169 : vector<1x128x512xf32> to vector<128x512xf32>
    %cst_70 = arith.constant dense<0.000000e+00> : vector<2x512xf32>
    %171 = tpu.matmul %166, %170, %cst_70 {dimension_numbers = #tpu.dot_dimension_numbers<[1], [0], [0], [1], [0, 0, 1, 1], [], []>} : vector<2x128xf32>, vector<128x512xf32>, vector<2x512xf32> -> vector<2x512xf32>
    %172 = arith.addf %168, %171 : vector<2x512xf32>
    %173 = vector.extract_strided_slice %172 {offsets = [0, 0], sizes = [2, 128], strides = [1, 1]} : vector<2x512xf32> to vector<2x128xf32>
    %174 = arith.negf %173 : vector<2x128xf32>
    %175 = math.exp %174 : vector<2x128xf32>
    %cst_71 = arith.constant 1.000000e+00 : f32
    %176 = vector.broadcast %cst_71 : f32 to vector<2x128xf32>
    %177 = arith.addf %176, %175 : vector<2x128xf32>
    %178 = arith.divf %176, %177 : vector<2x128xf32>
    %179 = vector.extract_strided_slice %172 {offsets = [0, 128], sizes = [2, 128], strides = [1, 1]} : vector<2x512xf32> to vector<2x128xf32>
    %180 = arith.negf %179 : vector<2x128xf32>
    %181 = math.exp %180 : vector<2x128xf32>
    %cst_72 = arith.constant 1.000000e+00 : f32
    %182 = vector.broadcast %cst_72 : f32 to vector<2x128xf32>
    %183 = arith.addf %182, %181 : vector<2x128xf32>
    %184 = arith.divf %182, %183 : vector<2x128xf32>
    %185 = vector.extract_strided_slice %172 {offsets = [0, 256], sizes = [2, 128], strides = [1, 1]} : vector<2x512xf32> to vector<2x128xf32>
    %186 = math.tanh %185 : vector<2x128xf32>
    %187 = vector.extract_strided_slice %172 {offsets = [0, 384], sizes = [2, 128], strides = [1, 1]} : vector<2x512xf32> to vector<2x128xf32>
    %188 = arith.negf %187 : vector<2x128xf32>
    %189 = math.exp %188 : vector<2x128xf32>
    %cst_73 = arith.constant 1.000000e+00 : f32
    %190 = vector.broadcast %cst_73 : f32 to vector<2x128xf32>
    %191 = arith.addf %190, %189 : vector<2x128xf32>
    %192 = arith.divf %190, %191 : vector<2x128xf32>
    %193 = arith.mulf %184, %164 : vector<2x128xf32>
    %194 = arith.mulf %178, %186 : vector<2x128xf32>
    %195 = arith.addf %193, %194 : vector<2x128xf32>
    %196 = math.tanh %195 : vector<2x128xf32>
    %197 = arith.mulf %192, %196 : vector<2x128xf32>
    %c10_74 = arith.constant 10 : index
    %c0_75 = arith.constant 0 : index
    %198 = vector.load %arg7[%c10_74, %c0_75] : memref<16x128xf32, #tpu.memory_space<vmem>>, vector<2x128xf32>
    tpu.vector_store %arg7[%c10_74, %c0_75], %197 {strides = array<i32>} : memref<16x128xf32, #tpu.memory_space<vmem>>, vector<2x128xf32>,
    %c12 = arith.constant 12 : index
    %c0_76 = arith.constant 0 : index
    %199 = vector.load %arg8[%c12, %c0_76] : memref<16x512xf32, #tpu.memory_space<vmem>>, vector<2x512xf32>
    %c0_77 = arith.constant 0 : index
    %c0_78 = arith.constant 0 : index
    %c0_79 = arith.constant 0 : index
    %200 = vector.load %arg2[%c0_77, %c0_78, %c0_79] : memref<3x128x512xf32, #tpu.memory_space<vmem>>, vector<1x128x512xf32>
    %201 = vector.shape_cast %200 : vector<1x128x512xf32> to vector<128x512xf32>
    %cst_80 = arith.constant dense<0.000000e+00> : vector<2x512xf32>
    %202 = tpu.matmul %197, %201, %cst_80 {dimension_numbers = #tpu.dot_dimension_numbers<[1], [0], [0], [1], [0, 0, 1, 1], [], []>} : vector<2x128xf32>, vector<128x512xf32>, vector<2x512xf32> -> vector<2x512xf32>
    %203 = arith.addf %199, %202 : vector<2x512xf32>
    %204 = vector.extract_strided_slice %203 {offsets = [0, 0], sizes = [2, 128], strides = [1, 1]} : vector<2x512xf32> to vector<2x128xf32>
    %205 = arith.negf %204 : vector<2x128xf32>
    %206 = math.exp %205 : vector<2x128xf32>
    %cst_81 = arith.constant 1.000000e+00 : f32
    %207 = vector.broadcast %cst_81 : f32 to vector<2x128xf32>
    %208 = arith.addf %207, %206 : vector<2x128xf32>
    %209 = arith.divf %207, %208 : vector<2x128xf32>
    %210 = vector.extract_strided_slice %203 {offsets = [0, 128], sizes = [2, 128], strides = [1, 1]} : vector<2x512xf32> to vector<2x128xf32>
    %211 = arith.negf %210 : vector<2x128xf32>
    %212 = math.exp %211 : vector<2x128xf32>
    %cst_82 = arith.constant 1.000000e+00 : f32
    %213 = vector.broadcast %cst_82 : f32 to vector<2x128xf32>
    %214 = arith.addf %213, %212 : vector<2x128xf32>
    %215 = arith.divf %213, %214 : vector<2x128xf32>
    %216 = vector.extract_strided_slice %203 {offsets = [0, 256], sizes = [2, 128], strides = [1, 1]} : vector<2x512xf32> to vector<2x128xf32>
    %217 = math.tanh %216 : vector<2x128xf32>
    %218 = vector.extract_strided_slice %203 {offsets = [0, 384], sizes = [2, 128], strides = [1, 1]} : vector<2x512xf32> to vector<2x128xf32>
    %219 = arith.negf %218 : vector<2x128xf32>
    %220 = math.exp %219 : vector<2x128xf32>
    %cst_83 = arith.constant 1.000000e+00 : f32
    %221 = vector.broadcast %cst_83 : f32 to vector<2x128xf32>
    %222 = arith.addf %221, %220 : vector<2x128xf32>
    %223 = arith.divf %221, %222 : vector<2x128xf32>
    %224 = arith.mulf %215, %195 : vector<2x128xf32>
    %225 = arith.mulf %209, %217 : vector<2x128xf32>
    %226 = arith.addf %224, %225 : vector<2x128xf32>
    %227 = math.tanh %226 : vector<2x128xf32>
    %228 = arith.mulf %223, %227 : vector<2x128xf32>
    %c12_84 = arith.constant 12 : index
    %c0_85 = arith.constant 0 : index
    %229 = vector.load %arg7[%c12_84, %c0_85] : memref<16x128xf32, #tpu.memory_space<vmem>>, vector<2x128xf32>
    tpu.vector_store %arg7[%c12_84, %c0_85], %228 {strides = array<i32>} : memref<16x128xf32, #tpu.memory_space<vmem>>, vector<2x128xf32>,
    %c14 = arith.constant 14 : index
    %c0_86 = arith.constant 0 : index
    %230 = vector.load %arg8[%c14, %c0_86] : memref<16x512xf32, #tpu.memory_space<vmem>>, vector<2x512xf32>
    %c0_87 = arith.constant 0 : index
    %c0_88 = arith.constant 0 : index
    %c0_89 = arith.constant 0 : index
    %231 = vector.load %arg2[%c0_87, %c0_88, %c0_89] : memref<3x128x512xf32, #tpu.memory_space<vmem>>, vector<1x128x512xf32>
    %232 = vector.shape_cast %231 : vector<1x128x512xf32> to vector<128x512xf32>
    %cst_90 = arith.constant dense<0.000000e+00> : vector<2x512xf32>
    %233 = tpu.matmul %228, %232, %cst_90 {dimension_numbers = #tpu.dot_dimension_numbers<[1], [0], [0], [1], [0, 0, 1, 1], [], []>} : vector<2x128xf32>, vector<128x512xf32>, vector<2x512xf32> -> vector<2x512xf32>
    %234 = arith.addf %230, %233 : vector<2x512xf32>
    %235 = vector.extract_strided_slice %234 {offsets = [0, 0], sizes = [2, 128], strides = [1, 1]} : vector<2x512xf32> to vector<2x128xf32>
    %236 = arith.negf %235 : vector<2x128xf32>
    %237 = math.exp %236 : vector<2x128xf32>
    %cst_91 = arith.constant 1.000000e+00 : f32
    %238 = vector.broadcast %cst_91 : f32 to vector<2x128xf32>
    %239 = arith.addf %238, %237 : vector<2x128xf32>
    %240 = arith.divf %238, %239 : vector<2x128xf32>
    %241 = vector.extract_strided_slice %234 {offsets = [0, 128], sizes = [2, 128], strides = [1, 1]} : vector<2x512xf32> to vector<2x128xf32>
    %242 = arith.negf %241 : vector<2x128xf32>
    %243 = math.exp %242 : vector<2x128xf32>
    %cst_92 = arith.constant 1.000000e+00 : f32
    %244 = vector.broadcast %cst_92 : f32 to vector<2x128xf32>
    %245 = arith.addf %244, %243 : vector<2x128xf32>
    %246 = arith.divf %244, %245 : vector<2x128xf32>
    %247 = vector.extract_strided_slice %234 {offsets = [0, 256], sizes = [2, 128], strides = [1, 1]} : vector<2x512xf32> to vector<2x128xf32>
    %248 = math.tanh %247 : vector<2x128xf32>
    %249 = vector.extract_strided_slice %234 {offsets = [0, 384], sizes = [2, 128], strides = [1, 1]} : vector<2x512xf32> to vector<2x128xf32>
    %250 = arith.negf %249 : vector<2x128xf32>
    %251 = math.exp %250 : vector<2x128xf32>
    %cst_93 = arith.constant 1.000000e+00 : f32
    %252 = vector.broadcast %cst_93 : f32 to vector<2x128xf32>
    %253 = arith.addf %252, %251 : vector<2x128xf32>
    %254 = arith.divf %252, %253 : vector<2x128xf32>
    %255 = arith.mulf %246, %226 : vector<2x128xf32>
    %256 = arith.mulf %240, %248 : vector<2x128xf32>
    %257 = arith.addf %255, %256 : vector<2x128xf32>
    %258 = math.tanh %257 : vector<2x128xf32>
    %259 = arith.mulf %254, %258 : vector<2x128xf32>
    %c14_94 = arith.constant 14 : index
    %c0_95 = arith.constant 0 : index
    %260 = vector.load %arg7[%c14_94, %c0_95] : memref<16x128xf32, #tpu.memory_space<vmem>>, vector<2x128xf32>
    tpu.vector_store %arg7[%c14_94, %c0_95], %259 {strides = array<i32>} : memref<16x128xf32, #tpu.memory_space<vmem>>, vector<2x128xf32>,
    %c0_96 = arith.constant 0 : index
    %c0_97 = arith.constant 0 : index
    %261 = vector.load %arg7[%c0_96, %c0_97] : memref<16x128xf32, #tpu.memory_space<vmem>>, vector<16x128xf32>
    %c1 = arith.constant 1 : index
    %c0_98 = arith.constant 0 : index
    %c0_99 = arith.constant 0 : index
    %262 = vector.load %arg1[%c1, %c0_98, %c0_99] : memref<3x128x512xf32, #tpu.memory_space<vmem>>, vector<1x128x512xf32>
    %263 = vector.shape_cast %262 : vector<1x128x512xf32> to vector<128x512xf32>
    %cst_100 = arith.constant dense<0.000000e+00> : vector<16x512xf32>
    %264 = tpu.matmul %261, %263, %cst_100 {dimension_numbers = #tpu.dot_dimension_numbers<[1], [0], [0], [1], [0, 0, 1, 1], [], []>} : vector<16x128xf32>, vector<128x512xf32>, vector<16x512xf32> -> vector<16x512xf32>
    %c1_101 = arith.constant 1 : index
    %c0_102 = arith.constant 0 : index
    %c0_103 = arith.constant 0 : index
    %265 = vector.load %arg3[%c1_101, %c0_102, %c0_103] : memref<3x1x512xf32, #tpu.memory_space<vmem>>, vector<1x1x512xf32>
    %266 = vector.shape_cast %265 : vector<1x1x512xf32> to vector<1x512xf32>
    %267 = vector.broadcast %266 : vector<1x512xf32> to vector<16x512xf32>
    %268 = arith.addf %264, %267 : vector<16x512xf32>
    %c0_104 = arith.constant 0 : index
    %c0_105 = arith.constant 0 : index
    %269 = vector.load %arg8[%c0_104, %c0_105] : memref<16x512xf32, #tpu.memory_space<vmem>>, vector<16x512xf32>
    tpu.vector_store %arg8[%c0_104, %c0_105], %268 {strides = array<i32>} : memref<16x512xf32, #tpu.memory_space<vmem>>, vector<16x512xf32>,
    %cst_106 = arith.constant 0.000000e+00 : f32
    %270 = vector.broadcast %cst_106 : f32 to vector<2x128xf32>
    %cst_107 = arith.constant 0.000000e+00 : f32
    %271 = vector.broadcast %cst_107 : f32 to vector<2x128xf32>
    %c0_108 = arith.constant 0 : index
    %c0_109 = arith.constant 0 : index
    %272 = vector.load %arg8[%c0_108, %c0_109] : memref<16x512xf32, #tpu.memory_space<vmem>>, vector<2x512xf32>
    %c1_110 = arith.constant 1 : index
    %c0_111 = arith.constant 0 : index
    %c0_112 = arith.constant 0 : index
    %273 = vector.load %arg2[%c1_110, %c0_111, %c0_112] : memref<3x128x512xf32, #tpu.memory_space<vmem>>, vector<1x128x512xf32>
    %274 = vector.shape_cast %273 : vector<1x128x512xf32> to vector<128x512xf32>
    %cst_113 = arith.constant dense<0.000000e+00> : vector<2x512xf32>
    %275 = tpu.matmul %270, %274, %cst_113 {dimension_numbers = #tpu.dot_dimension_numbers<[1], [0], [0], [1], [0, 0, 1, 1], [], []>} : vector<2x128xf32>, vector<128x512xf32>, vector<2x512xf32> -> vector<2x512xf32>
    %276 = arith.addf %272, %275 : vector<2x512xf32>
    %277 = vector.extract_strided_slice %276 {offsets = [0, 0], sizes = [2, 128], strides = [1, 1]} : vector<2x512xf32> to vector<2x128xf32>
    %278 = arith.negf %277 : vector<2x128xf32>
    %279 = math.exp %278 : vector<2x128xf32>
    %cst_114 = arith.constant 1.000000e+00 : f32
    %280 = vector.broadcast %cst_114 : f32 to vector<2x128xf32>
    %281 = arith.addf %280, %279 : vector<2x128xf32>
    %282 = arith.divf %280, %281 : vector<2x128xf32>
    %283 = vector.extract_strided_slice %276 {offsets = [0, 128], sizes = [2, 128], strides = [1, 1]} : vector<2x512xf32> to vector<2x128xf32>
    %284 = arith.negf %283 : vector<2x128xf32>
    %285 = math.exp %284 : vector<2x128xf32>
    %cst_115 = arith.constant 1.000000e+00 : f32
    %286 = vector.broadcast %cst_115 : f32 to vector<2x128xf32>
    %287 = arith.addf %286, %285 : vector<2x128xf32>
    %288 = arith.divf %286, %287 : vector<2x128xf32>
    %289 = vector.extract_strided_slice %276 {offsets = [0, 256], sizes = [2, 128], strides = [1, 1]} : vector<2x512xf32> to vector<2x128xf32>
    %290 = math.tanh %289 : vector<2x128xf32>
    %291 = vector.extract_strided_slice %276 {offsets = [0, 384], sizes = [2, 128], strides = [1, 1]} : vector<2x512xf32> to vector<2x128xf32>
    %292 = arith.negf %291 : vector<2x128xf32>
    %293 = math.exp %292 : vector<2x128xf32>
    %cst_116 = arith.constant 1.000000e+00 : f32
    %294 = vector.broadcast %cst_116 : f32 to vector<2x128xf32>
    %295 = arith.addf %294, %293 : vector<2x128xf32>
    %296 = arith.divf %294, %295 : vector<2x128xf32>
    %297 = arith.mulf %288, %271 : vector<2x128xf32>
    %298 = arith.mulf %282, %290 : vector<2x128xf32>
    %299 = arith.addf %297, %298 : vector<2x128xf32>
    %300 = math.tanh %299 : vector<2x128xf32>
    %301 = arith.mulf %296, %300 : vector<2x128xf32>
    %c0_117 = arith.constant 0 : index
    %c0_118 = arith.constant 0 : index
    %302 = vector.load %arg7[%c0_117, %c0_118] : memref<16x128xf32, #tpu.memory_space<vmem>>, vector<2x128xf32>
    tpu.vector_store %arg7[%c0_117, %c0_118], %301 {strides = array<i32>} : memref<16x128xf32, #tpu.memory_space<vmem>>, vector<2x128xf32>,
    %c2_119 = arith.constant 2 : index
    %c0_120 = arith.constant 0 : index
    %303 = vector.load %arg8[%c2_119, %c0_120] : memref<16x512xf32, #tpu.memory_space<vmem>>, vector<2x512xf32>
    %c1_121 = arith.constant 1 : index
    %c0_122 = arith.constant 0 : index
    %c0_123 = arith.constant 0 : index
    %304 = vector.load %arg2[%c1_121, %c0_122, %c0_123] : memref<3x128x512xf32, #tpu.memory_space<vmem>>, vector<1x128x512xf32>
    %305 = vector.shape_cast %304 : vector<1x128x512xf32> to vector<128x512xf32>
    %cst_124 = arith.constant dense<0.000000e+00> : vector<2x512xf32>
    %306 = tpu.matmul %301, %305, %cst_124 {dimension_numbers = #tpu.dot_dimension_numbers<[1], [0], [0], [1], [0, 0, 1, 1], [], []>} : vector<2x128xf32>, vector<128x512xf32>, vector<2x512xf32> -> vector<2x512xf32>
    %307 = arith.addf %303, %306 : vector<2x512xf32>
    %308 = vector.extract_strided_slice %307 {offsets = [0, 0], sizes = [2, 128], strides = [1, 1]} : vector<2x512xf32> to vector<2x128xf32>
    %309 = arith.negf %308 : vector<2x128xf32>
    %310 = math.exp %309 : vector<2x128xf32>
    %cst_125 = arith.constant 1.000000e+00 : f32
    %311 = vector.broadcast %cst_125 : f32 to vector<2x128xf32>
    %312 = arith.addf %311, %310 : vector<2x128xf32>
    %313 = arith.divf %311, %312 : vector<2x128xf32>
    %314 = vector.extract_strided_slice %307 {offsets = [0, 128], sizes = [2, 128], strides = [1, 1]} : vector<2x512xf32> to vector<2x128xf32>
    %315 = arith.negf %314 : vector<2x128xf32>
    %316 = math.exp %315 : vector<2x128xf32>
    %cst_126 = arith.constant 1.000000e+00 : f32
    %317 = vector.broadcast %cst_126 : f32 to vector<2x128xf32>
    %318 = arith.addf %317, %316 : vector<2x128xf32>
    %319 = arith.divf %317, %318 : vector<2x128xf32>
    %320 = vector.extract_strided_slice %307 {offsets = [0, 256], sizes = [2, 128], strides = [1, 1]} : vector<2x512xf32> to vector<2x128xf32>
    %321 = math.tanh %320 : vector<2x128xf32>
    %322 = vector.extract_strided_slice %307 {offsets = [0, 384], sizes = [2, 128], strides = [1, 1]} : vector<2x512xf32> to vector<2x128xf32>
    %323 = arith.negf %322 : vector<2x128xf32>
    %324 = math.exp %323 : vector<2x128xf32>
    %cst_127 = arith.constant 1.000000e+00 : f32
    %325 = vector.broadcast %cst_127 : f32 to vector<2x128xf32>
    %326 = arith.addf %325, %324 : vector<2x128xf32>
    %327 = arith.divf %325, %326 : vector<2x128xf32>
    %328 = arith.mulf %319, %299 : vector<2x128xf32>
    %329 = arith.mulf %313, %321 : vector<2x128xf32>
    %330 = arith.addf %328, %329 : vector<2x128xf32>
    %331 = math.tanh %330 : vector<2x128xf32>
    %332 = arith.mulf %327, %331 : vector<2x128xf32>
    %c2_128 = arith.constant 2 : index
    %c0_129 = arith.constant 0 : index
    %333 = vector.load %arg7[%c2_128, %c0_129] : memref<16x128xf32, #tpu.memory_space<vmem>>, vector<2x128xf32>
    tpu.vector_store %arg7[%c2_128, %c0_129], %332 {strides = array<i32>} : memref<16x128xf32, #tpu.memory_space<vmem>>, vector<2x128xf32>,
    %c4_130 = arith.constant 4 : index
    %c0_131 = arith.constant 0 : index
    %334 = vector.load %arg8[%c4_130, %c0_131] : memref<16x512xf32, #tpu.memory_space<vmem>>, vector<2x512xf32>
    %c1_132 = arith.constant 1 : index
    %c0_133 = arith.constant 0 : index
    %c0_134 = arith.constant 0 : index
    %335 = vector.load %arg2[%c1_132, %c0_133, %c0_134] : memref<3x128x512xf32, #tpu.memory_space<vmem>>, vector<1x128x512xf32>
    %336 = vector.shape_cast %335 : vector<1x128x512xf32> to vector<128x512xf32>
    %cst_135 = arith.constant dense<0.000000e+00> : vector<2x512xf32>
    %337 = tpu.matmul %332, %336, %cst_135 {dimension_numbers = #tpu.dot_dimension_numbers<[1], [0], [0], [1], [0, 0, 1, 1], [], []>} : vector<2x128xf32>, vector<128x512xf32>, vector<2x512xf32> -> vector<2x512xf32>
    %338 = arith.addf %334, %337 : vector<2x512xf32>
    %339 = vector.extract_strided_slice %338 {offsets = [0, 0], sizes = [2, 128], strides = [1, 1]} : vector<2x512xf32> to vector<2x128xf32>
    %340 = arith.negf %339 : vector<2x128xf32>
    %341 = math.exp %340 : vector<2x128xf32>
    %cst_136 = arith.constant 1.000000e+00 : f32
    %342 = vector.broadcast %cst_136 : f32 to vector<2x128xf32>
    %343 = arith.addf %342, %341 : vector<2x128xf32>
    %344 = arith.divf %342, %343 : vector<2x128xf32>
    %345 = vector.extract_strided_slice %338 {offsets = [0, 128], sizes = [2, 128], strides = [1, 1]} : vector<2x512xf32> to vector<2x128xf32>
    %346 = arith.negf %345 : vector<2x128xf32>
    %347 = math.exp %346 : vector<2x128xf32>
    %cst_137 = arith.constant 1.000000e+00 : f32
    %348 = vector.broadcast %cst_137 : f32 to vector<2x128xf32>
    %349 = arith.addf %348, %347 : vector<2x128xf32>
    %350 = arith.divf %348, %349 : vector<2x128xf32>
    %351 = vector.extract_strided_slice %338 {offsets = [0, 256], sizes = [2, 128], strides = [1, 1]} : vector<2x512xf32> to vector<2x128xf32>
    %352 = math.tanh %351 : vector<2x128xf32>
    %353 = vector.extract_strided_slice %338 {offsets = [0, 384], sizes = [2, 128], strides = [1, 1]} : vector<2x512xf32> to vector<2x128xf32>
    %354 = arith.negf %353 : vector<2x128xf32>
    %355 = math.exp %354 : vector<2x128xf32>
    %cst_138 = arith.constant 1.000000e+00 : f32
    %356 = vector.broadcast %cst_138 : f32 to vector<2x128xf32>
    %357 = arith.addf %356, %355 : vector<2x128xf32>
    %358 = arith.divf %356, %357 : vector<2x128xf32>
    %359 = arith.mulf %350, %330 : vector<2x128xf32>
    %360 = arith.mulf %344, %352 : vector<2x128xf32>
    %361 = arith.addf %359, %360 : vector<2x128xf32>
    %362 = math.tanh %361 : vector<2x128xf32>
    %363 = arith.mulf %358, %362 : vector<2x128xf32>
    %c4_139 = arith.constant 4 : index
    %c0_140 = arith.constant 0 : index
    %364 = vector.load %arg7[%c4_139, %c0_140] : memref<16x128xf32, #tpu.memory_space<vmem>>, vector<2x128xf32>
    tpu.vector_store %arg7[%c4_139, %c0_140], %363 {strides = array<i32>} : memref<16x128xf32, #tpu.memory_space<vmem>>, vector<2x128xf32>,
    %c6_141 = arith.constant 6 : index
    %c0_142 = arith.constant 0 : index
    %365 = vector.load %arg8[%c6_141, %c0_142] : memref<16x512xf32, #tpu.memory_space<vmem>>, vector<2x512xf32>
    %c1_143 = arith.constant 1 : index
    %c0_144 = arith.constant 0 : index
    %c0_145 = arith.constant 0 : index
    %366 = vector.load %arg2[%c1_143, %c0_144, %c0_145] : memref<3x128x512xf32, #tpu.memory_space<vmem>>, vector<1x128x512xf32>
    %367 = vector.shape_cast %366 : vector<1x128x512xf32> to vector<128x512xf32>
    %cst_146 = arith.constant dense<0.000000e+00> : vector<2x512xf32>
    %368 = tpu.matmul %363, %367, %cst_146 {dimension_numbers = #tpu.dot_dimension_numbers<[1], [0], [0], [1], [0, 0, 1, 1], [], []>} : vector<2x128xf32>, vector<128x512xf32>, vector<2x512xf32> -> vector<2x512xf32>
    %369 = arith.addf %365, %368 : vector<2x512xf32>
    %370 = vector.extract_strided_slice %369 {offsets = [0, 0], sizes = [2, 128], strides = [1, 1]} : vector<2x512xf32> to vector<2x128xf32>
    %371 = arith.negf %370 : vector<2x128xf32>
    %372 = math.exp %371 : vector<2x128xf32>
    %cst_147 = arith.constant 1.000000e+00 : f32
    %373 = vector.broadcast %cst_147 : f32 to vector<2x128xf32>
    %374 = arith.addf %373, %372 : vector<2x128xf32>
    %375 = arith.divf %373, %374 : vector<2x128xf32>
    %376 = vector.extract_strided_slice %369 {offsets = [0, 128], sizes = [2, 128], strides = [1, 1]} : vector<2x512xf32> to vector<2x128xf32>
    %377 = arith.negf %376 : vector<2x128xf32>
    %378 = math.exp %377 : vector<2x128xf32>
    %cst_148 = arith.constant 1.000000e+00 : f32
    %379 = vector.broadcast %cst_148 : f32 to vector<2x128xf32>
    %380 = arith.addf %379, %378 : vector<2x128xf32>
    %381 = arith.divf %379, %380 : vector<2x128xf32>
    %382 = vector.extract_strided_slice %369 {offsets = [0, 256], sizes = [2, 128], strides = [1, 1]} : vector<2x512xf32> to vector<2x128xf32>
    %383 = math.tanh %382 : vector<2x128xf32>
    %384 = vector.extract_strided_slice %369 {offsets = [0, 384], sizes = [2, 128], strides = [1, 1]} : vector<2x512xf32> to vector<2x128xf32>
    %385 = arith.negf %384 : vector<2x128xf32>
    %386 = math.exp %385 : vector<2x128xf32>
    %cst_149 = arith.constant 1.000000e+00 : f32
    %387 = vector.broadcast %cst_149 : f32 to vector<2x128xf32>
    %388 = arith.addf %387, %386 : vector<2x128xf32>
    %389 = arith.divf %387, %388 : vector<2x128xf32>
    %390 = arith.mulf %381, %361 : vector<2x128xf32>
    %391 = arith.mulf %375, %383 : vector<2x128xf32>
    %392 = arith.addf %390, %391 : vector<2x128xf32>
    %393 = math.tanh %392 : vector<2x128xf32>
    %394 = arith.mulf %389, %393 : vector<2x128xf32>
    %c6_150 = arith.constant 6 : index
    %c0_151 = arith.constant 0 : index
    %395 = vector.load %arg7[%c6_150, %c0_151] : memref<16x128xf32, #tpu.memory_space<vmem>>, vector<2x128xf32>
    tpu.vector_store %arg7[%c6_150, %c0_151], %394 {strides = array<i32>} : memref<16x128xf32, #tpu.memory_space<vmem>>, vector<2x128xf32>,
    %c8_152 = arith.constant 8 : index
    %c0_153 = arith.constant 0 : index
    %396 = vector.load %arg8[%c8_152, %c0_153] : memref<16x512xf32, #tpu.memory_space<vmem>>, vector<2x512xf32>
    %c1_154 = arith.constant 1 : index
    %c0_155 = arith.constant 0 : index
    %c0_156 = arith.constant 0 : index
    %397 = vector.load %arg2[%c1_154, %c0_155, %c0_156] : memref<3x128x512xf32, #tpu.memory_space<vmem>>, vector<1x128x512xf32>
    %398 = vector.shape_cast %397 : vector<1x128x512xf32> to vector<128x512xf32>
    %cst_157 = arith.constant dense<0.000000e+00> : vector<2x512xf32>
    %399 = tpu.matmul %394, %398, %cst_157 {dimension_numbers = #tpu.dot_dimension_numbers<[1], [0], [0], [1], [0, 0, 1, 1], [], []>} : vector<2x128xf32>, vector<128x512xf32>, vector<2x512xf32> -> vector<2x512xf32>
    %400 = arith.addf %396, %399 : vector<2x512xf32>
    %401 = vector.extract_strided_slice %400 {offsets = [0, 0], sizes = [2, 128], strides = [1, 1]} : vector<2x512xf32> to vector<2x128xf32>
    %402 = arith.negf %401 : vector<2x128xf32>
    %403 = math.exp %402 : vector<2x128xf32>
    %cst_158 = arith.constant 1.000000e+00 : f32
    %404 = vector.broadcast %cst_158 : f32 to vector<2x128xf32>
    %405 = arith.addf %404, %403 : vector<2x128xf32>
    %406 = arith.divf %404, %405 : vector<2x128xf32>
    %407 = vector.extract_strided_slice %400 {offsets = [0, 128], sizes = [2, 128], strides = [1, 1]} : vector<2x512xf32> to vector<2x128xf32>
    %408 = arith.negf %407 : vector<2x128xf32>
    %409 = math.exp %408 : vector<2x128xf32>
    %cst_159 = arith.constant 1.000000e+00 : f32
    %410 = vector.broadcast %cst_159 : f32 to vector<2x128xf32>
    %411 = arith.addf %410, %409 : vector<2x128xf32>
    %412 = arith.divf %410, %411 : vector<2x128xf32>
    %413 = vector.extract_strided_slice %400 {offsets = [0, 256], sizes = [2, 128], strides = [1, 1]} : vector<2x512xf32> to vector<2x128xf32>
    %414 = math.tanh %413 : vector<2x128xf32>
    %415 = vector.extract_strided_slice %400 {offsets = [0, 384], sizes = [2, 128], strides = [1, 1]} : vector<2x512xf32> to vector<2x128xf32>
    %416 = arith.negf %415 : vector<2x128xf32>
    %417 = math.exp %416 : vector<2x128xf32>
    %cst_160 = arith.constant 1.000000e+00 : f32
    %418 = vector.broadcast %cst_160 : f32 to vector<2x128xf32>
    %419 = arith.addf %418, %417 : vector<2x128xf32>
    %420 = arith.divf %418, %419 : vector<2x128xf32>
    %421 = arith.mulf %412, %392 : vector<2x128xf32>
    %422 = arith.mulf %406, %414 : vector<2x128xf32>
    %423 = arith.addf %421, %422 : vector<2x128xf32>
    %424 = math.tanh %423 : vector<2x128xf32>
    %425 = arith.mulf %420, %424 : vector<2x128xf32>
    %c8_161 = arith.constant 8 : index
    %c0_162 = arith.constant 0 : index
    %426 = vector.load %arg7[%c8_161, %c0_162] : memref<16x128xf32, #tpu.memory_space<vmem>>, vector<2x128xf32>
    tpu.vector_store %arg7[%c8_161, %c0_162], %425 {strides = array<i32>} : memref<16x128xf32, #tpu.memory_space<vmem>>, vector<2x128xf32>,
    %c10_163 = arith.constant 10 : index
    %c0_164 = arith.constant 0 : index
    %427 = vector.load %arg8[%c10_163, %c0_164] : memref<16x512xf32, #tpu.memory_space<vmem>>, vector<2x512xf32>
    %c1_165 = arith.constant 1 : index
    %c0_166 = arith.constant 0 : index
    %c0_167 = arith.constant 0 : index
    %428 = vector.load %arg2[%c1_165, %c0_166, %c0_167] : memref<3x128x512xf32, #tpu.memory_space<vmem>>, vector<1x128x512xf32>
    %429 = vector.shape_cast %428 : vector<1x128x512xf32> to vector<128x512xf32>
    %cst_168 = arith.constant dense<0.000000e+00> : vector<2x512xf32>
    %430 = tpu.matmul %425, %429, %cst_168 {dimension_numbers = #tpu.dot_dimension_numbers<[1], [0], [0], [1], [0, 0, 1, 1], [], []>} : vector<2x128xf32>, vector<128x512xf32>, vector<2x512xf32> -> vector<2x512xf32>
    %431 = arith.addf %427, %430 : vector<2x512xf32>
    %432 = vector.extract_strided_slice %431 {offsets = [0, 0], sizes = [2, 128], strides = [1, 1]} : vector<2x512xf32> to vector<2x128xf32>
    %433 = arith.negf %432 : vector<2x128xf32>
    %434 = math.exp %433 : vector<2x128xf32>
    %cst_169 = arith.constant 1.000000e+00 : f32
    %435 = vector.broadcast %cst_169 : f32 to vector<2x128xf32>
    %436 = arith.addf %435, %434 : vector<2x128xf32>
    %437 = arith.divf %435, %436 : vector<2x128xf32>
    %438 = vector.extract_strided_slice %431 {offsets = [0, 128], sizes = [2, 128], strides = [1, 1]} : vector<2x512xf32> to vector<2x128xf32>
    %439 = arith.negf %438 : vector<2x128xf32>
    %440 = math.exp %439 : vector<2x128xf32>
    %cst_170 = arith.constant 1.000000e+00 : f32
    %441 = vector.broadcast %cst_170 : f32 to vector<2x128xf32>
    %442 = arith.addf %441, %440 : vector<2x128xf32>
    %443 = arith.divf %441, %442 : vector<2x128xf32>
    %444 = vector.extract_strided_slice %431 {offsets = [0, 256], sizes = [2, 128], strides = [1, 1]} : vector<2x512xf32> to vector<2x128xf32>
    %445 = math.tanh %444 : vector<2x128xf32>
    %446 = vector.extract_strided_slice %431 {offsets = [0, 384], sizes = [2, 128], strides = [1, 1]} : vector<2x512xf32> to vector<2x128xf32>
    %447 = arith.negf %446 : vector<2x128xf32>
    %448 = math.exp %447 : vector<2x128xf32>
    %cst_171 = arith.constant 1.000000e+00 : f32
    %449 = vector.broadcast %cst_171 : f32 to vector<2x128xf32>
    %450 = arith.addf %449, %448 : vector<2x128xf32>
    %451 = arith.divf %449, %450 : vector<2x128xf32>
    %452 = arith.mulf %443, %423 : vector<2x128xf32>
    %453 = arith.mulf %437, %445 : vector<2x128xf32>
    %454 = arith.addf %452, %453 : vector<2x128xf32>
    %455 = math.tanh %454 : vector<2x128xf32>
    %456 = arith.mulf %451, %455 : vector<2x128xf32>
    %c10_172 = arith.constant 10 : index
    %c0_173 = arith.constant 0 : index
    %457 = vector.load %arg7[%c10_172, %c0_173] : memref<16x128xf32, #tpu.memory_space<vmem>>, vector<2x128xf32>
    tpu.vector_store %arg7[%c10_172, %c0_173], %456 {strides = array<i32>} : memref<16x128xf32, #tpu.memory_space<vmem>>, vector<2x128xf32>,
    %c12_174 = arith.constant 12 : index
    %c0_175 = arith.constant 0 : index
    %458 = vector.load %arg8[%c12_174, %c0_175] : memref<16x512xf32, #tpu.memory_space<vmem>>, vector<2x512xf32>
    %c1_176 = arith.constant 1 : index
    %c0_177 = arith.constant 0 : index
    %c0_178 = arith.constant 0 : index
    %459 = vector.load %arg2[%c1_176, %c0_177, %c0_178] : memref<3x128x512xf32, #tpu.memory_space<vmem>>, vector<1x128x512xf32>
    %460 = vector.shape_cast %459 : vector<1x128x512xf32> to vector<128x512xf32>
    %cst_179 = arith.constant dense<0.000000e+00> : vector<2x512xf32>
    %461 = tpu.matmul %456, %460, %cst_179 {dimension_numbers = #tpu.dot_dimension_numbers<[1], [0], [0], [1], [0, 0, 1, 1], [], []>} : vector<2x128xf32>, vector<128x512xf32>, vector<2x512xf32> -> vector<2x512xf32>
    %462 = arith.addf %458, %461 : vector<2x512xf32>
    %463 = vector.extract_strided_slice %462 {offsets = [0, 0], sizes = [2, 128], strides = [1, 1]} : vector<2x512xf32> to vector<2x128xf32>
    %464 = arith.negf %463 : vector<2x128xf32>
    %465 = math.exp %464 : vector<2x128xf32>
    %cst_180 = arith.constant 1.000000e+00 : f32
    %466 = vector.broadcast %cst_180 : f32 to vector<2x128xf32>
    %467 = arith.addf %466, %465 : vector<2x128xf32>
    %468 = arith.divf %466, %467 : vector<2x128xf32>
    %469 = vector.extract_strided_slice %462 {offsets = [0, 128], sizes = [2, 128], strides = [1, 1]} : vector<2x512xf32> to vector<2x128xf32>
    %470 = arith.negf %469 : vector<2x128xf32>
    %471 = math.exp %470 : vector<2x128xf32>
    %cst_181 = arith.constant 1.000000e+00 : f32
    %472 = vector.broadcast %cst_181 : f32 to vector<2x128xf32>
    %473 = arith.addf %472, %471 : vector<2x128xf32>
    %474 = arith.divf %472, %473 : vector<2x128xf32>
    %475 = vector.extract_strided_slice %462 {offsets = [0, 256], sizes = [2, 128], strides = [1, 1]} : vector<2x512xf32> to vector<2x128xf32>
    %476 = math.tanh %475 : vector<2x128xf32>
    %477 = vector.extract_strided_slice %462 {offsets = [0, 384], sizes = [2, 128], strides = [1, 1]} : vector<2x512xf32> to vector<2x128xf32>
    %478 = arith.negf %477 : vector<2x128xf32>
    %479 = math.exp %478 : vector<2x128xf32>
    %cst_182 = arith.constant 1.000000e+00 : f32
    %480 = vector.broadcast %cst_182 : f32 to vector<2x128xf32>
    %481 = arith.addf %480, %479 : vector<2x128xf32>
    %482 = arith.divf %480, %481 : vector<2x128xf32>
    %483 = arith.mulf %474, %454 : vector<2x128xf32>
    %484 = arith.mulf %468, %476 : vector<2x128xf32>
    %485 = arith.addf %483, %484 : vector<2x128xf32>
    %486 = math.tanh %485 : vector<2x128xf32>
    %487 = arith.mulf %482, %486 : vector<2x128xf32>
    %c12_183 = arith.constant 12 : index
    %c0_184 = arith.constant 0 : index
    %488 = vector.load %arg7[%c12_183, %c0_184] : memref<16x128xf32, #tpu.memory_space<vmem>>, vector<2x128xf32>
    tpu.vector_store %arg7[%c12_183, %c0_184], %487 {strides = array<i32>} : memref<16x128xf32, #tpu.memory_space<vmem>>, vector<2x128xf32>,
    %c14_185 = arith.constant 14 : index
    %c0_186 = arith.constant 0 : index
    %489 = vector.load %arg8[%c14_185, %c0_186] : memref<16x512xf32, #tpu.memory_space<vmem>>, vector<2x512xf32>
    %c1_187 = arith.constant 1 : index
    %c0_188 = arith.constant 0 : index
    %c0_189 = arith.constant 0 : index
    %490 = vector.load %arg2[%c1_187, %c0_188, %c0_189] : memref<3x128x512xf32, #tpu.memory_space<vmem>>, vector<1x128x512xf32>
    %491 = vector.shape_cast %490 : vector<1x128x512xf32> to vector<128x512xf32>
    %cst_190 = arith.constant dense<0.000000e+00> : vector<2x512xf32>
    %492 = tpu.matmul %487, %491, %cst_190 {dimension_numbers = #tpu.dot_dimension_numbers<[1], [0], [0], [1], [0, 0, 1, 1], [], []>} : vector<2x128xf32>, vector<128x512xf32>, vector<2x512xf32> -> vector<2x512xf32>
    %493 = arith.addf %489, %492 : vector<2x512xf32>
    %494 = vector.extract_strided_slice %493 {offsets = [0, 0], sizes = [2, 128], strides = [1, 1]} : vector<2x512xf32> to vector<2x128xf32>
    %495 = arith.negf %494 : vector<2x128xf32>
    %496 = math.exp %495 : vector<2x128xf32>
    %cst_191 = arith.constant 1.000000e+00 : f32
    %497 = vector.broadcast %cst_191 : f32 to vector<2x128xf32>
    %498 = arith.addf %497, %496 : vector<2x128xf32>
    %499 = arith.divf %497, %498 : vector<2x128xf32>
    %500 = vector.extract_strided_slice %493 {offsets = [0, 128], sizes = [2, 128], strides = [1, 1]} : vector<2x512xf32> to vector<2x128xf32>
    %501 = arith.negf %500 : vector<2x128xf32>
    %502 = math.exp %501 : vector<2x128xf32>
    %cst_192 = arith.constant 1.000000e+00 : f32
    %503 = vector.broadcast %cst_192 : f32 to vector<2x128xf32>
    %504 = arith.addf %503, %502 : vector<2x128xf32>
    %505 = arith.divf %503, %504 : vector<2x128xf32>
    %506 = vector.extract_strided_slice %493 {offsets = [0, 256], sizes = [2, 128], strides = [1, 1]} : vector<2x512xf32> to vector<2x128xf32>
    %507 = math.tanh %506 : vector<2x128xf32>
    %508 = vector.extract_strided_slice %493 {offsets = [0, 384], sizes = [2, 128], strides = [1, 1]} : vector<2x512xf32> to vector<2x128xf32>
    %509 = arith.negf %508 : vector<2x128xf32>
    %510 = math.exp %509 : vector<2x128xf32>
    %cst_193 = arith.constant 1.000000e+00 : f32
    %511 = vector.broadcast %cst_193 : f32 to vector<2x128xf32>
    %512 = arith.addf %511, %510 : vector<2x128xf32>
    %513 = arith.divf %511, %512 : vector<2x128xf32>
    %514 = arith.mulf %505, %485 : vector<2x128xf32>
    %515 = arith.mulf %499, %507 : vector<2x128xf32>
    %516 = arith.addf %514, %515 : vector<2x128xf32>
    %517 = math.tanh %516 : vector<2x128xf32>
    %518 = arith.mulf %513, %517 : vector<2x128xf32>
    %c14_194 = arith.constant 14 : index
    %c0_195 = arith.constant 0 : index
    %519 = vector.load %arg7[%c14_194, %c0_195] : memref<16x128xf32, #tpu.memory_space<vmem>>, vector<2x128xf32>
    tpu.vector_store %arg7[%c14_194, %c0_195], %518 {strides = array<i32>} : memref<16x128xf32, #tpu.memory_space<vmem>>, vector<2x128xf32>,
    %c0_196 = arith.constant 0 : index
    %c0_197 = arith.constant 0 : index
    %520 = vector.load %arg7[%c0_196, %c0_197] : memref<16x128xf32, #tpu.memory_space<vmem>>, vector<16x128xf32>
    %c2_198 = arith.constant 2 : index
    %c0_199 = arith.constant 0 : index
    %c0_200 = arith.constant 0 : index
    %521 = vector.load %arg1[%c2_198, %c0_199, %c0_200] : memref<3x128x512xf32, #tpu.memory_space<vmem>>, vector<1x128x512xf32>
    %522 = vector.shape_cast %521 : vector<1x128x512xf32> to vector<128x512xf32>
    %cst_201 = arith.constant dense<0.000000e+00> : vector<16x512xf32>
    %523 = tpu.matmul %520, %522, %cst_201 {dimension_numbers = #tpu.dot_dimension_numbers<[1], [0], [0], [1], [0, 0, 1, 1], [], []>} : vector<16x128xf32>, vector<128x512xf32>, vector<16x512xf32> -> vector<16x512xf32>
    %c2_202 = arith.constant 2 : index
    %c0_203 = arith.constant 0 : index
    %c0_204 = arith.constant 0 : index
    %524 = vector.load %arg3[%c2_202, %c0_203, %c0_204] : memref<3x1x512xf32, #tpu.memory_space<vmem>>, vector<1x1x512xf32>
    %525 = vector.shape_cast %524 : vector<1x1x512xf32> to vector<1x512xf32>
    %526 = vector.broadcast %525 : vector<1x512xf32> to vector<16x512xf32>
    %527 = arith.addf %523, %526 : vector<16x512xf32>
    %c0_205 = arith.constant 0 : index
    %c0_206 = arith.constant 0 : index
    %528 = vector.load %arg8[%c0_205, %c0_206] : memref<16x512xf32, #tpu.memory_space<vmem>>, vector<16x512xf32>
    tpu.vector_store %arg8[%c0_205, %c0_206], %527 {strides = array<i32>} : memref<16x512xf32, #tpu.memory_space<vmem>>, vector<16x512xf32>,
    %cst_207 = arith.constant 0.000000e+00 : f32
    %529 = vector.broadcast %cst_207 : f32 to vector<2x128xf32>
    %cst_208 = arith.constant 0.000000e+00 : f32
    %530 = vector.broadcast %cst_208 : f32 to vector<2x128xf32>
    %c0_209 = arith.constant 0 : index
    %c0_210 = arith.constant 0 : index
    %531 = vector.load %arg8[%c0_209, %c0_210] : memref<16x512xf32, #tpu.memory_space<vmem>>, vector<2x512xf32>
    %c2_211 = arith.constant 2 : index
    %c0_212 = arith.constant 0 : index
    %c0_213 = arith.constant 0 : index
    %532 = vector.load %arg2[%c2_211, %c0_212, %c0_213] : memref<3x128x512xf32, #tpu.memory_space<vmem>>, vector<1x128x512xf32>
    %533 = vector.shape_cast %532 : vector<1x128x512xf32> to vector<128x512xf32>
    %cst_214 = arith.constant dense<0.000000e+00> : vector<2x512xf32>
    %534 = tpu.matmul %529, %533, %cst_214 {dimension_numbers = #tpu.dot_dimension_numbers<[1], [0], [0], [1], [0, 0, 1, 1], [], []>} : vector<2x128xf32>, vector<128x512xf32>, vector<2x512xf32> -> vector<2x512xf32>
    %535 = arith.addf %531, %534 : vector<2x512xf32>
    %536 = vector.extract_strided_slice %535 {offsets = [0, 0], sizes = [2, 128], strides = [1, 1]} : vector<2x512xf32> to vector<2x128xf32>
    %537 = arith.negf %536 : vector<2x128xf32>
    %538 = math.exp %537 : vector<2x128xf32>
    %cst_215 = arith.constant 1.000000e+00 : f32
    %539 = vector.broadcast %cst_215 : f32 to vector<2x128xf32>
    %540 = arith.addf %539, %538 : vector<2x128xf32>
    %541 = arith.divf %539, %540 : vector<2x128xf32>
    %542 = vector.extract_strided_slice %535 {offsets = [0, 128], sizes = [2, 128], strides = [1, 1]} : vector<2x512xf32> to vector<2x128xf32>
    %543 = arith.negf %542 : vector<2x128xf32>
    %544 = math.exp %543 : vector<2x128xf32>
    %cst_216 = arith.constant 1.000000e+00 : f32
    %545 = vector.broadcast %cst_216 : f32 to vector<2x128xf32>
    %546 = arith.addf %545, %544 : vector<2x128xf32>
    %547 = arith.divf %545, %546 : vector<2x128xf32>
    %548 = vector.extract_strided_slice %535 {offsets = [0, 256], sizes = [2, 128], strides = [1, 1]} : vector<2x512xf32> to vector<2x128xf32>
    %549 = math.tanh %548 : vector<2x128xf32>
    %550 = vector.extract_strided_slice %535 {offsets = [0, 384], sizes = [2, 128], strides = [1, 1]} : vector<2x512xf32> to vector<2x128xf32>
    %551 = arith.negf %550 : vector<2x128xf32>
    %552 = math.exp %551 : vector<2x128xf32>
    %cst_217 = arith.constant 1.000000e+00 : f32
    %553 = vector.broadcast %cst_217 : f32 to vector<2x128xf32>
    %554 = arith.addf %553, %552 : vector<2x128xf32>
    %555 = arith.divf %553, %554 : vector<2x128xf32>
    %556 = arith.mulf %547, %530 : vector<2x128xf32>
    %557 = arith.mulf %541, %549 : vector<2x128xf32>
    %558 = arith.addf %556, %557 : vector<2x128xf32>
    %559 = math.tanh %558 : vector<2x128xf32>
    %560 = arith.mulf %555, %559 : vector<2x128xf32>
    %c0_218 = arith.constant 0 : index
    %c0_219 = arith.constant 0 : index
    %561 = vector.load %arg7[%c0_218, %c0_219] : memref<16x128xf32, #tpu.memory_space<vmem>>, vector<2x128xf32>
    tpu.vector_store %arg7[%c0_218, %c0_219], %560 {strides = array<i32>} : memref<16x128xf32, #tpu.memory_space<vmem>>, vector<2x128xf32>,
    %c2_220 = arith.constant 2 : index
    %c0_221 = arith.constant 0 : index
    %562 = vector.load %arg8[%c2_220, %c0_221] : memref<16x512xf32, #tpu.memory_space<vmem>>, vector<2x512xf32>
    %c2_222 = arith.constant 2 : index
    %c0_223 = arith.constant 0 : index
    %c0_224 = arith.constant 0 : index
    %563 = vector.load %arg2[%c2_222, %c0_223, %c0_224] : memref<3x128x512xf32, #tpu.memory_space<vmem>>, vector<1x128x512xf32>
    %564 = vector.shape_cast %563 : vector<1x128x512xf32> to vector<128x512xf32>
    %cst_225 = arith.constant dense<0.000000e+00> : vector<2x512xf32>
    %565 = tpu.matmul %560, %564, %cst_225 {dimension_numbers = #tpu.dot_dimension_numbers<[1], [0], [0], [1], [0, 0, 1, 1], [], []>} : vector<2x128xf32>, vector<128x512xf32>, vector<2x512xf32> -> vector<2x512xf32>
    %566 = arith.addf %562, %565 : vector<2x512xf32>
    %567 = vector.extract_strided_slice %566 {offsets = [0, 0], sizes = [2, 128], strides = [1, 1]} : vector<2x512xf32> to vector<2x128xf32>
    %568 = arith.negf %567 : vector<2x128xf32>
    %569 = math.exp %568 : vector<2x128xf32>
    %cst_226 = arith.constant 1.000000e+00 : f32
    %570 = vector.broadcast %cst_226 : f32 to vector<2x128xf32>
    %571 = arith.addf %570, %569 : vector<2x128xf32>
    %572 = arith.divf %570, %571 : vector<2x128xf32>
    %573 = vector.extract_strided_slice %566 {offsets = [0, 128], sizes = [2, 128], strides = [1, 1]} : vector<2x512xf32> to vector<2x128xf32>
    %574 = arith.negf %573 : vector<2x128xf32>
    %575 = math.exp %574 : vector<2x128xf32>
    %cst_227 = arith.constant 1.000000e+00 : f32
    %576 = vector.broadcast %cst_227 : f32 to vector<2x128xf32>
    %577 = arith.addf %576, %575 : vector<2x128xf32>
    %578 = arith.divf %576, %577 : vector<2x128xf32>
    %579 = vector.extract_strided_slice %566 {offsets = [0, 256], sizes = [2, 128], strides = [1, 1]} : vector<2x512xf32> to vector<2x128xf32>
    %580 = math.tanh %579 : vector<2x128xf32>
    %581 = vector.extract_strided_slice %566 {offsets = [0, 384], sizes = [2, 128], strides = [1, 1]} : vector<2x512xf32> to vector<2x128xf32>
    %582 = arith.negf %581 : vector<2x128xf32>
    %583 = math.exp %582 : vector<2x128xf32>
    %cst_228 = arith.constant 1.000000e+00 : f32
    %584 = vector.broadcast %cst_228 : f32 to vector<2x128xf32>
    %585 = arith.addf %584, %583 : vector<2x128xf32>
    %586 = arith.divf %584, %585 : vector<2x128xf32>
    %587 = arith.mulf %578, %558 : vector<2x128xf32>
    %588 = arith.mulf %572, %580 : vector<2x128xf32>
    %589 = arith.addf %587, %588 : vector<2x128xf32>
    %590 = math.tanh %589 : vector<2x128xf32>
    %591 = arith.mulf %586, %590 : vector<2x128xf32>
    %c2_229 = arith.constant 2 : index
    %c0_230 = arith.constant 0 : index
    %592 = vector.load %arg7[%c2_229, %c0_230] : memref<16x128xf32, #tpu.memory_space<vmem>>, vector<2x128xf32>
    tpu.vector_store %arg7[%c2_229, %c0_230], %591 {strides = array<i32>} : memref<16x128xf32, #tpu.memory_space<vmem>>, vector<2x128xf32>,
    %c4_231 = arith.constant 4 : index
    %c0_232 = arith.constant 0 : index
    %593 = vector.load %arg8[%c4_231, %c0_232] : memref<16x512xf32, #tpu.memory_space<vmem>>, vector<2x512xf32>
    %c2_233 = arith.constant 2 : index
    %c0_234 = arith.constant 0 : index
    %c0_235 = arith.constant 0 : index
    %594 = vector.load %arg2[%c2_233, %c0_234, %c0_235] : memref<3x128x512xf32, #tpu.memory_space<vmem>>, vector<1x128x512xf32>
    %595 = vector.shape_cast %594 : vector<1x128x512xf32> to vector<128x512xf32>
    %cst_236 = arith.constant dense<0.000000e+00> : vector<2x512xf32>
    %596 = tpu.matmul %591, %595, %cst_236 {dimension_numbers = #tpu.dot_dimension_numbers<[1], [0], [0], [1], [0, 0, 1, 1], [], []>} : vector<2x128xf32>, vector<128x512xf32>, vector<2x512xf32> -> vector<2x512xf32>
    %597 = arith.addf %593, %596 : vector<2x512xf32>
    %598 = vector.extract_strided_slice %597 {offsets = [0, 0], sizes = [2, 128], strides = [1, 1]} : vector<2x512xf32> to vector<2x128xf32>
    %599 = arith.negf %598 : vector<2x128xf32>
    %600 = math.exp %599 : vector<2x128xf32>
    %cst_237 = arith.constant 1.000000e+00 : f32
    %601 = vector.broadcast %cst_237 : f32 to vector<2x128xf32>
    %602 = arith.addf %601, %600 : vector<2x128xf32>
    %603 = arith.divf %601, %602 : vector<2x128xf32>
    %604 = vector.extract_strided_slice %597 {offsets = [0, 128], sizes = [2, 128], strides = [1, 1]} : vector<2x512xf32> to vector<2x128xf32>
    %605 = arith.negf %604 : vector<2x128xf32>
    %606 = math.exp %605 : vector<2x128xf32>
    %cst_238 = arith.constant 1.000000e+00 : f32
    %607 = vector.broadcast %cst_238 : f32 to vector<2x128xf32>
    %608 = arith.addf %607, %606 : vector<2x128xf32>
    %609 = arith.divf %607, %608 : vector<2x128xf32>
    %610 = vector.extract_strided_slice %597 {offsets = [0, 256], sizes = [2, 128], strides = [1, 1]} : vector<2x512xf32> to vector<2x128xf32>
    %611 = math.tanh %610 : vector<2x128xf32>
    %612 = vector.extract_strided_slice %597 {offsets = [0, 384], sizes = [2, 128], strides = [1, 1]} : vector<2x512xf32> to vector<2x128xf32>
    %613 = arith.negf %612 : vector<2x128xf32>
    %614 = math.exp %613 : vector<2x128xf32>
    %cst_239 = arith.constant 1.000000e+00 : f32
    %615 = vector.broadcast %cst_239 : f32 to vector<2x128xf32>
    %616 = arith.addf %615, %614 : vector<2x128xf32>
    %617 = arith.divf %615, %616 : vector<2x128xf32>
    %618 = arith.mulf %609, %589 : vector<2x128xf32>
    %619 = arith.mulf %603, %611 : vector<2x128xf32>
    %620 = arith.addf %618, %619 : vector<2x128xf32>
    %621 = math.tanh %620 : vector<2x128xf32>
    %622 = arith.mulf %617, %621 : vector<2x128xf32>
    %c4_240 = arith.constant 4 : index
    %c0_241 = arith.constant 0 : index
    %623 = vector.load %arg7[%c4_240, %c0_241] : memref<16x128xf32, #tpu.memory_space<vmem>>, vector<2x128xf32>
    tpu.vector_store %arg7[%c4_240, %c0_241], %622 {strides = array<i32>} : memref<16x128xf32, #tpu.memory_space<vmem>>, vector<2x128xf32>,
    %c6_242 = arith.constant 6 : index
    %c0_243 = arith.constant 0 : index
    %624 = vector.load %arg8[%c6_242, %c0_243] : memref<16x512xf32, #tpu.memory_space<vmem>>, vector<2x512xf32>
    %c2_244 = arith.constant 2 : index
    %c0_245 = arith.constant 0 : index
    %c0_246 = arith.constant 0 : index
    %625 = vector.load %arg2[%c2_244, %c0_245, %c0_246] : memref<3x128x512xf32, #tpu.memory_space<vmem>>, vector<1x128x512xf32>
    %626 = vector.shape_cast %625 : vector<1x128x512xf32> to vector<128x512xf32>
    %cst_247 = arith.constant dense<0.000000e+00> : vector<2x512xf32>
    %627 = tpu.matmul %622, %626, %cst_247 {dimension_numbers = #tpu.dot_dimension_numbers<[1], [0], [0], [1], [0, 0, 1, 1], [], []>} : vector<2x128xf32>, vector<128x512xf32>, vector<2x512xf32> -> vector<2x512xf32>
    %628 = arith.addf %624, %627 : vector<2x512xf32>
    %629 = vector.extract_strided_slice %628 {offsets = [0, 0], sizes = [2, 128], strides = [1, 1]} : vector<2x512xf32> to vector<2x128xf32>
    %630 = arith.negf %629 : vector<2x128xf32>
    %631 = math.exp %630 : vector<2x128xf32>
    %cst_248 = arith.constant 1.000000e+00 : f32
    %632 = vector.broadcast %cst_248 : f32 to vector<2x128xf32>
    %633 = arith.addf %632, %631 : vector<2x128xf32>
    %634 = arith.divf %632, %633 : vector<2x128xf32>
    %635 = vector.extract_strided_slice %628 {offsets = [0, 128], sizes = [2, 128], strides = [1, 1]} : vector<2x512xf32> to vector<2x128xf32>
    %636 = arith.negf %635 : vector<2x128xf32>
    %637 = math.exp %636 : vector<2x128xf32>
    %cst_249 = arith.constant 1.000000e+00 : f32
    %638 = vector.broadcast %cst_249 : f32 to vector<2x128xf32>
    %639 = arith.addf %638, %637 : vector<2x128xf32>
    %640 = arith.divf %638, %639 : vector<2x128xf32>
    %641 = vector.extract_strided_slice %628 {offsets = [0, 256], sizes = [2, 128], strides = [1, 1]} : vector<2x512xf32> to vector<2x128xf32>
    %642 = math.tanh %641 : vector<2x128xf32>
    %643 = vector.extract_strided_slice %628 {offsets = [0, 384], sizes = [2, 128], strides = [1, 1]} : vector<2x512xf32> to vector<2x128xf32>
    %644 = arith.negf %643 : vector<2x128xf32>
    %645 = math.exp %644 : vector<2x128xf32>
    %cst_250 = arith.constant 1.000000e+00 : f32
    %646 = vector.broadcast %cst_250 : f32 to vector<2x128xf32>
    %647 = arith.addf %646, %645 : vector<2x128xf32>
    %648 = arith.divf %646, %647 : vector<2x128xf32>
    %649 = arith.mulf %640, %620 : vector<2x128xf32>
    %650 = arith.mulf %634, %642 : vector<2x128xf32>
    %651 = arith.addf %649, %650 : vector<2x128xf32>
    %652 = math.tanh %651 : vector<2x128xf32>
    %653 = arith.mulf %648, %652 : vector<2x128xf32>
    %c6_251 = arith.constant 6 : index
    %c0_252 = arith.constant 0 : index
    %654 = vector.load %arg7[%c6_251, %c0_252] : memref<16x128xf32, #tpu.memory_space<vmem>>, vector<2x128xf32>
    tpu.vector_store %arg7[%c6_251, %c0_252], %653 {strides = array<i32>} : memref<16x128xf32, #tpu.memory_space<vmem>>, vector<2x128xf32>,
    %c8_253 = arith.constant 8 : index
    %c0_254 = arith.constant 0 : index
    %655 = vector.load %arg8[%c8_253, %c0_254] : memref<16x512xf32, #tpu.memory_space<vmem>>, vector<2x512xf32>
    %c2_255 = arith.constant 2 : index
    %c0_256 = arith.constant 0 : index
    %c0_257 = arith.constant 0 : index
    %656 = vector.load %arg2[%c2_255, %c0_256, %c0_257] : memref<3x128x512xf32, #tpu.memory_space<vmem>>, vector<1x128x512xf32>
    %657 = vector.shape_cast %656 : vector<1x128x512xf32> to vector<128x512xf32>
    %cst_258 = arith.constant dense<0.000000e+00> : vector<2x512xf32>
    %658 = tpu.matmul %653, %657, %cst_258 {dimension_numbers = #tpu.dot_dimension_numbers<[1], [0], [0], [1], [0, 0, 1, 1], [], []>} : vector<2x128xf32>, vector<128x512xf32>, vector<2x512xf32> -> vector<2x512xf32>
    %659 = arith.addf %655, %658 : vector<2x512xf32>
    %660 = vector.extract_strided_slice %659 {offsets = [0, 0], sizes = [2, 128], strides = [1, 1]} : vector<2x512xf32> to vector<2x128xf32>
    %661 = arith.negf %660 : vector<2x128xf32>
    %662 = math.exp %661 : vector<2x128xf32>
    %cst_259 = arith.constant 1.000000e+00 : f32
    %663 = vector.broadcast %cst_259 : f32 to vector<2x128xf32>
    %664 = arith.addf %663, %662 : vector<2x128xf32>
    %665 = arith.divf %663, %664 : vector<2x128xf32>
    %666 = vector.extract_strided_slice %659 {offsets = [0, 128], sizes = [2, 128], strides = [1, 1]} : vector<2x512xf32> to vector<2x128xf32>
    %667 = arith.negf %666 : vector<2x128xf32>
    %668 = math.exp %667 : vector<2x128xf32>
    %cst_260 = arith.constant 1.000000e+00 : f32
    %669 = vector.broadcast %cst_260 : f32 to vector<2x128xf32>
    %670 = arith.addf %669, %668 : vector<2x128xf32>
    %671 = arith.divf %669, %670 : vector<2x128xf32>
    %672 = vector.extract_strided_slice %659 {offsets = [0, 256], sizes = [2, 128], strides = [1, 1]} : vector<2x512xf32> to vector<2x128xf32>
    %673 = math.tanh %672 : vector<2x128xf32>
    %674 = vector.extract_strided_slice %659 {offsets = [0, 384], sizes = [2, 128], strides = [1, 1]} : vector<2x512xf32> to vector<2x128xf32>
    %675 = arith.negf %674 : vector<2x128xf32>
    %676 = math.exp %675 : vector<2x128xf32>
    %cst_261 = arith.constant 1.000000e+00 : f32
    %677 = vector.broadcast %cst_261 : f32 to vector<2x128xf32>
    %678 = arith.addf %677, %676 : vector<2x128xf32>
    %679 = arith.divf %677, %678 : vector<2x128xf32>
    %680 = arith.mulf %671, %651 : vector<2x128xf32>
    %681 = arith.mulf %665, %673 : vector<2x128xf32>
    %682 = arith.addf %680, %681 : vector<2x128xf32>
    %683 = math.tanh %682 : vector<2x128xf32>
    %684 = arith.mulf %679, %683 : vector<2x128xf32>
    %c8_262 = arith.constant 8 : index
    %c0_263 = arith.constant 0 : index
    %685 = vector.load %arg7[%c8_262, %c0_263] : memref<16x128xf32, #tpu.memory_space<vmem>>, vector<2x128xf32>
    tpu.vector_store %arg7[%c8_262, %c0_263], %684 {strides = array<i32>} : memref<16x128xf32, #tpu.memory_space<vmem>>, vector<2x128xf32>,
    %c10_264 = arith.constant 10 : index
    %c0_265 = arith.constant 0 : index
    %686 = vector.load %arg8[%c10_264, %c0_265] : memref<16x512xf32, #tpu.memory_space<vmem>>, vector<2x512xf32>
    %c2_266 = arith.constant 2 : index
    %c0_267 = arith.constant 0 : index
    %c0_268 = arith.constant 0 : index
    %687 = vector.load %arg2[%c2_266, %c0_267, %c0_268] : memref<3x128x512xf32, #tpu.memory_space<vmem>>, vector<1x128x512xf32>
    %688 = vector.shape_cast %687 : vector<1x128x512xf32> to vector<128x512xf32>
    %cst_269 = arith.constant dense<0.000000e+00> : vector<2x512xf32>
    %689 = tpu.matmul %684, %688, %cst_269 {dimension_numbers = #tpu.dot_dimension_numbers<[1], [0], [0], [1], [0, 0, 1, 1], [], []>} : vector<2x128xf32>, vector<128x512xf32>, vector<2x512xf32> -> vector<2x512xf32>
    %690 = arith.addf %686, %689 : vector<2x512xf32>
    %691 = vector.extract_strided_slice %690 {offsets = [0, 0], sizes = [2, 128], strides = [1, 1]} : vector<2x512xf32> to vector<2x128xf32>
    %692 = arith.negf %691 : vector<2x128xf32>
    %693 = math.exp %692 : vector<2x128xf32>
    %cst_270 = arith.constant 1.000000e+00 : f32
    %694 = vector.broadcast %cst_270 : f32 to vector<2x128xf32>
    %695 = arith.addf %694, %693 : vector<2x128xf32>
    %696 = arith.divf %694, %695 : vector<2x128xf32>
    %697 = vector.extract_strided_slice %690 {offsets = [0, 128], sizes = [2, 128], strides = [1, 1]} : vector<2x512xf32> to vector<2x128xf32>
    %698 = arith.negf %697 : vector<2x128xf32>
    %699 = math.exp %698 : vector<2x128xf32>
    %cst_271 = arith.constant 1.000000e+00 : f32
    %700 = vector.broadcast %cst_271 : f32 to vector<2x128xf32>
    %701 = arith.addf %700, %699 : vector<2x128xf32>
    %702 = arith.divf %700, %701 : vector<2x128xf32>
    %703 = vector.extract_strided_slice %690 {offsets = [0, 256], sizes = [2, 128], strides = [1, 1]} : vector<2x512xf32> to vector<2x128xf32>
    %704 = math.tanh %703 : vector<2x128xf32>
    %705 = vector.extract_strided_slice %690 {offsets = [0, 384], sizes = [2, 128], strides = [1, 1]} : vector<2x512xf32> to vector<2x128xf32>
    %706 = arith.negf %705 : vector<2x128xf32>
    %707 = math.exp %706 : vector<2x128xf32>
    %cst_272 = arith.constant 1.000000e+00 : f32
    %708 = vector.broadcast %cst_272 : f32 to vector<2x128xf32>
    %709 = arith.addf %708, %707 : vector<2x128xf32>
    %710 = arith.divf %708, %709 : vector<2x128xf32>
    %711 = arith.mulf %702, %682 : vector<2x128xf32>
    %712 = arith.mulf %696, %704 : vector<2x128xf32>
    %713 = arith.addf %711, %712 : vector<2x128xf32>
    %714 = math.tanh %713 : vector<2x128xf32>
    %715 = arith.mulf %710, %714 : vector<2x128xf32>
    %c10_273 = arith.constant 10 : index
    %c0_274 = arith.constant 0 : index
    %716 = vector.load %arg7[%c10_273, %c0_274] : memref<16x128xf32, #tpu.memory_space<vmem>>, vector<2x128xf32>
    tpu.vector_store %arg7[%c10_273, %c0_274], %715 {strides = array<i32>} : memref<16x128xf32, #tpu.memory_space<vmem>>, vector<2x128xf32>,
    %c12_275 = arith.constant 12 : index
    %c0_276 = arith.constant 0 : index
    %717 = vector.load %arg8[%c12_275, %c0_276] : memref<16x512xf32, #tpu.memory_space<vmem>>, vector<2x512xf32>
    %c2_277 = arith.constant 2 : index
    %c0_278 = arith.constant 0 : index
    %c0_279 = arith.constant 0 : index
    %718 = vector.load %arg2[%c2_277, %c0_278, %c0_279] : memref<3x128x512xf32, #tpu.memory_space<vmem>>, vector<1x128x512xf32>
    %719 = vector.shape_cast %718 : vector<1x128x512xf32> to vector<128x512xf32>
    %cst_280 = arith.constant dense<0.000000e+00> : vector<2x512xf32>
    %720 = tpu.matmul %715, %719, %cst_280 {dimension_numbers = #tpu.dot_dimension_numbers<[1], [0], [0], [1], [0, 0, 1, 1], [], []>} : vector<2x128xf32>, vector<128x512xf32>, vector<2x512xf32> -> vector<2x512xf32>
    %721 = arith.addf %717, %720 : vector<2x512xf32>
    %722 = vector.extract_strided_slice %721 {offsets = [0, 0], sizes = [2, 128], strides = [1, 1]} : vector<2x512xf32> to vector<2x128xf32>
    %723 = arith.negf %722 : vector<2x128xf32>
    %724 = math.exp %723 : vector<2x128xf32>
    %cst_281 = arith.constant 1.000000e+00 : f32
    %725 = vector.broadcast %cst_281 : f32 to vector<2x128xf32>
    %726 = arith.addf %725, %724 : vector<2x128xf32>
    %727 = arith.divf %725, %726 : vector<2x128xf32>
    %728 = vector.extract_strided_slice %721 {offsets = [0, 128], sizes = [2, 128], strides = [1, 1]} : vector<2x512xf32> to vector<2x128xf32>
    %729 = arith.negf %728 : vector<2x128xf32>
    %730 = math.exp %729 : vector<2x128xf32>
    %cst_282 = arith.constant 1.000000e+00 : f32
    %731 = vector.broadcast %cst_282 : f32 to vector<2x128xf32>
    %732 = arith.addf %731, %730 : vector<2x128xf32>
    %733 = arith.divf %731, %732 : vector<2x128xf32>
    %734 = vector.extract_strided_slice %721 {offsets = [0, 256], sizes = [2, 128], strides = [1, 1]} : vector<2x512xf32> to vector<2x128xf32>
    %735 = math.tanh %734 : vector<2x128xf32>
    %736 = vector.extract_strided_slice %721 {offsets = [0, 384], sizes = [2, 128], strides = [1, 1]} : vector<2x512xf32> to vector<2x128xf32>
    %737 = arith.negf %736 : vector<2x128xf32>
    %738 = math.exp %737 : vector<2x128xf32>
    %cst_283 = arith.constant 1.000000e+00 : f32
    %739 = vector.broadcast %cst_283 : f32 to vector<2x128xf32>
    %740 = arith.addf %739, %738 : vector<2x128xf32>
    %741 = arith.divf %739, %740 : vector<2x128xf32>
    %742 = arith.mulf %733, %713 : vector<2x128xf32>
    %743 = arith.mulf %727, %735 : vector<2x128xf32>
    %744 = arith.addf %742, %743 : vector<2x128xf32>
    %745 = math.tanh %744 : vector<2x128xf32>
    %746 = arith.mulf %741, %745 : vector<2x128xf32>
    %c12_284 = arith.constant 12 : index
    %c0_285 = arith.constant 0 : index
    %747 = vector.load %arg7[%c12_284, %c0_285] : memref<16x128xf32, #tpu.memory_space<vmem>>, vector<2x128xf32>
    tpu.vector_store %arg7[%c12_284, %c0_285], %746 {strides = array<i32>} : memref<16x128xf32, #tpu.memory_space<vmem>>, vector<2x128xf32>,
    %c14_286 = arith.constant 14 : index
    %c0_287 = arith.constant 0 : index
    %748 = vector.load %arg8[%c14_286, %c0_287] : memref<16x512xf32, #tpu.memory_space<vmem>>, vector<2x512xf32>
    %c2_288 = arith.constant 2 : index
    %c0_289 = arith.constant 0 : index
    %c0_290 = arith.constant 0 : index
    %749 = vector.load %arg2[%c2_288, %c0_289, %c0_290] : memref<3x128x512xf32, #tpu.memory_space<vmem>>, vector<1x128x512xf32>
    %750 = vector.shape_cast %749 : vector<1x128x512xf32> to vector<128x512xf32>
    %cst_291 = arith.constant dense<0.000000e+00> : vector<2x512xf32>
    %751 = tpu.matmul %746, %750, %cst_291 {dimension_numbers = #tpu.dot_dimension_numbers<[1], [0], [0], [1], [0, 0, 1, 1], [], []>} : vector<2x128xf32>, vector<128x512xf32>, vector<2x512xf32> -> vector<2x512xf32>
    %752 = arith.addf %748, %751 : vector<2x512xf32>
    %753 = vector.extract_strided_slice %752 {offsets = [0, 0], sizes = [2, 128], strides = [1, 1]} : vector<2x512xf32> to vector<2x128xf32>
    %754 = arith.negf %753 : vector<2x128xf32>
    %755 = math.exp %754 : vector<2x128xf32>
    %cst_292 = arith.constant 1.000000e+00 : f32
    %756 = vector.broadcast %cst_292 : f32 to vector<2x128xf32>
    %757 = arith.addf %756, %755 : vector<2x128xf32>
    %758 = arith.divf %756, %757 : vector<2x128xf32>
    %759 = vector.extract_strided_slice %752 {offsets = [0, 128], sizes = [2, 128], strides = [1, 1]} : vector<2x512xf32> to vector<2x128xf32>
    %760 = arith.negf %759 : vector<2x128xf32>
    %761 = math.exp %760 : vector<2x128xf32>
    %cst_293 = arith.constant 1.000000e+00 : f32
    %762 = vector.broadcast %cst_293 : f32 to vector<2x128xf32>
    %763 = arith.addf %762, %761 : vector<2x128xf32>
    %764 = arith.divf %762, %763 : vector<2x128xf32>
    %765 = vector.extract_strided_slice %752 {offsets = [0, 256], sizes = [2, 128], strides = [1, 1]} : vector<2x512xf32> to vector<2x128xf32>
    %766 = math.tanh %765 : vector<2x128xf32>
    %767 = vector.extract_strided_slice %752 {offsets = [0, 384], sizes = [2, 128], strides = [1, 1]} : vector<2x512xf32> to vector<2x128xf32>
    %768 = arith.negf %767 : vector<2x128xf32>
    %769 = math.exp %768 : vector<2x128xf32>
    %cst_294 = arith.constant 1.000000e+00 : f32
    %770 = vector.broadcast %cst_294 : f32 to vector<2x128xf32>
    %771 = arith.addf %770, %769 : vector<2x128xf32>
    %772 = arith.divf %770, %771 : vector<2x128xf32>
    %773 = arith.mulf %764, %744 : vector<2x128xf32>
    %774 = arith.mulf %758, %766 : vector<2x128xf32>
    %775 = arith.addf %773, %774 : vector<2x128xf32>
    %776 = math.tanh %775 : vector<2x128xf32>
    %777 = arith.mulf %772, %776 : vector<2x128xf32>
    %c14_295 = arith.constant 14 : index
    %c0_296 = arith.constant 0 : index
    %778 = vector.load %arg7[%c14_295, %c0_296] : memref<16x128xf32, #tpu.memory_space<vmem>>, vector<2x128xf32>
    tpu.vector_store %arg7[%c14_295, %c0_296], %777 {strides = array<i32>} : memref<16x128xf32, #tpu.memory_space<vmem>>, vector<2x128xf32>,
    %c0_297 = arith.constant 0 : index
    %c0_298 = arith.constant 0 : index
    %779 = vector.load %arg4[%c0_297, %c0_298] : memref<128x128xf32, #tpu.memory_space<vmem>>, vector<128x128xf32>
    %cst_299 = arith.constant dense<0.000000e+00> : vector<2x128xf32>
    %780 = tpu.matmul %777, %779, %cst_299 {dimension_numbers = #tpu.dot_dimension_numbers<[1], [0], [0], [1], [0, 0, 1, 1], [], []>} : vector<2x128xf32>, vector<128x128xf32>, vector<2x128xf32> -> vector<2x128xf32>
    %c0_300 = arith.constant 0 : index
    %c0_301 = arith.constant 0 : index
    %781 = vector.load %arg5[%c0_300, %c0_301] : memref<1x128xf32, #tpu.memory_space<vmem>>, vector<1x128xf32>
    %782 = vector.broadcast %781 : vector<1x128xf32> to vector<2x128xf32>
    %783 = arith.addf %780, %782 : vector<2x128xf32>
    %c0_302 = arith.constant 0 : index
    %c0_303 = arith.constant 0 : index
    %784 = vector.load %arg6[%c0_302, %c0_303] : memref<2x128xf32, #tpu.memory_space<vmem>>, vector<2x128xf32>
    tpu.vector_store %arg6[%c0_302, %c0_303], %783 {strides = array<i32>} : memref<2x128xf32, #tpu.memory_space<vmem>>, vector<2x128xf32>,
    return
  }
}

</mosaic_0001>

<bundles_post_ra>
// kernel: tpu_custom_call.1
= control target key start
LH: loop header
LB: loop body
LE: loop exit
PB: predicated region body
PF: predicated region fallthrough
CT: control target
= control target key end

     0   :  { %11 = vsyncpa [#allocation5], 0  ;;  %s10846_s0 = inlined_call_operand.hbm [shape: f32[16,128], index: 0, kind: input, shape index: {}]   ;;  %s10847_s1 = inlined_call_operand.hbm [shape: f32[3,128,512], index: 1, kind: input, shape index: {}]   ;;  %s10848_s2 = inlined_call_operand.hbm [shape: f32[3,128,512], index: 2, kind: input, shape index: {}]   ;;  %s10849_s3 = inlined_call_operand.hbm [shape: f32[3,1,512], index: 3, kind: input, shape index: {}]   ;;  %s10850_s4 = inlined_call_operand.hbm [shape: f32[128,128], index: 4, kind: input, shape index: {}]   ;;  %s10851_s5 = inlined_call_operand.vmem [shape: f32[1,128], index: 5, kind: input, shape index: {}]   ;;  %s10852_s6 = inlined_call_operand.hbm [shape: f32[2,128], index: 6, kind: output, shape index: {}]  }
   0x1   :  { %12 = vsyncpa [#allocation8], 0 }
   0x2   :  { %13 = vsyncpa [#allocation11], 0 }
   0x3   :  { %14 = vsyncpa [#allocation6], 0  ;;  %s9442_s21 = smov [#allocation7]   ;;  %s9302_s25 = scalar_lea.hbm %s10847_s1, 24576 }
   0x4   :  { %s32_s22 = sshll.u32 %s9442_s21, 4  ;;  %p9303_p0 = scmp.ne.s32.totalorder %s10847_s1, %s9302_s25  ;;  %s33_s22 = int_to_ptr.vmem [resolvable:$true] %s32_s22 }
   0x5   :  { %p9306_p1 = scmp.lt.u32.totalorder %s9302_s25, %s10847_s1 }
   0x7   :  { %p9308_p2 = pnand %p9306_p1, %p9303_p0 }
   0x9   :  { %9311 = shalt.err (!%p9308_p2)
}
   0xa   :  { %s9312_s30 = scalar_lea.vmem %s33_s22, 24576  ;;  %p9317_p4 = scmp.lt.s32.totalorder %s33_s22, %s33_s22 }
   0xb   :  { %p9313_p3 = scmp.ne.s32.totalorder %s33_s22, %s9312_s30  ;;  %p9318_p5 = scmp.lt.s32.totalorder %s9312_s30, %s9312_s30 }
   0xd   :  { %p9319_p6 = por %p9318_p5, %p9317_p4 }
   0xf   :  { %p9320_p7 = pnand %p9319_p6, %p9313_p3 }
  0x11   :  { %9323 = shalt.err (!%p9320_p7)
}
  0x12   :  { %s9443_s7 = smov 512   ;;  %s9444_s8 = smov 32  }
  0x13   :  { %38 = dma.hbm_to_vmem [thread:$0]  %s10847_s1, 24576, %s33_s22, [#allocation8], %s9443_s7, %s9443_s7, %s9444_s8  }
  0x14   :  { %s9445_s11 = smov [#allocation10]   ;;  %s9324_s15 = scalar_lea.hbm %s10849_s3, 192 }
  0x15   :  { %s56_s12 = sshll.u32 %s9445_s11, 4  ;;  %p9325_p8 = scmp.ne.s32.totalorder %s10849_s3, %s9324_s15  ;;  %s57_s12 = int_to_ptr.vmem [resolvable:$true] %s56_s12 }
  0x16   :  { %p9328_p9 = scmp.lt.u32.totalorder %s9324_s15, %s10849_s3 }
  0x18   :  { %p9330_p10 = pnand %p9328_p9, %p9325_p8 }
  0x1a   :  { %9333 = shalt.err (!%p9330_p10)
}
  0x1b   :  { %s9334_s20 = scalar_lea.vmem %s57_s12, 192  ;;  %p9339_p12 = scmp.lt.s32.totalorder %s57_s12, %s57_s12 }
  0x1c   :  { %p9335_p11 = scmp.ne.s32.totalorder %s57_s12, %s9334_s20  ;;  %p9340_p13 = scmp.lt.s32.totalorder %s9334_s20, %s9334_s20 }
  0x1e   :  { %p9341_p0 = por %p9340_p13, %p9339_p12 }
  0x20   :  { %p9342_p1 = pnand %p9341_p0, %p9335_p11 }
  0x22   :  { %9345 = shalt.err (!%p9342_p1)
}
  0x23   :  { %s9446_s1 = smov 64   ;;  %s9447_s21 = smov 4  }
  0x24   :  { %62 = dma.hbm_to_vmem [thread:$0]  %s10849_s3, 192, %s57_s12, [#allocation11], %s9446_s1, %s9446_s1, %s9447_s21  }
  0x25   :  { %s9448_s24 = smov [#allocation4]   ;;  %s9346_s28 = scalar_lea.hbm %s10846_s0, 256 }
  0x26   :  { %s20_s25 = sshll.u32 %s9448_s24, 4  ;;  %p9347_p2 = scmp.ne.s32.totalorder %s10846_s0, %s9346_s28  ;;  %s21_s25 = int_to_ptr.vmem [resolvable:$true] %s20_s25 }
  0x27   :  { %p9350_p3 = scmp.lt.u32.totalorder %s9346_s28, %s10846_s0 }
  0x29   :  { %p9352_p4 = pnand %p9350_p3, %p9347_p2 }
  0x2b   :  { %9355 = shalt.err (!%p9352_p4)
}
  0x2c   :  { %s9356_s11 = scalar_lea.vmem %s21_s25, 256  ;;  %p9361_p6 = scmp.lt.s32.totalorder %s21_s25, %s21_s25 }
  0x2d   :  { %p9357_p5 = scmp.ne.s32.totalorder %s21_s25, %s9356_s11  ;;  %p9362_p7 = scmp.lt.s32.totalorder %s9356_s11, %s9356_s11 }
  0x2f   :  { %p9363_p8 = por %p9362_p7, %p9361_p6 }
  0x31   :  { %p9364_p9 = pnand %p9363_p8, %p9357_p5 }
  0x33   :  { %9367 = shalt.err (!%p9364_p9)
}
  0x34   :  { %s9449_s3 = smov 128   ;;  %s9450_s12 = smov 8  }
  0x35   :  { %26 = dma.hbm_to_vmem [thread:$0]  %s10846_s0, 256, %s21_s25, [#allocation5], %s9449_s3, %s9449_s3, %s9450_s12  }
  0x36   :  { %s9451_s15 = smov [#allocation9]   ;;  %s9452_s17 = smov [#allocation12]  }
  0x37   :  { %s44_s16 = sshll.u32 %s9451_s15, 4  ;;  %s68_s18 = sshll.u32 %s9452_s17, 4  ;;  %s45_s16 = int_to_ptr.vmem [resolvable:$true] %s44_s16  ;;  %s69_s18 = int_to_ptr.vmem [resolvable:$true] %s68_s18 }
  0x38   :  { %s9368_s1 = scalar_lea.hbm %s10848_s2, 24576 }
  0x39   :  { %p9369_p10 = scmp.ne.s32.totalorder %s10848_s2, %s9368_s1  ;;  %p9372_p11 = scmp.lt.u32.totalorder %s9368_s1, %s10848_s2 }
  0x3b   :  { %p9374_p12 = pnand %p9372_p11, %p9369_p10 }
  0x3d   :  { %9377 = shalt.err (!%p9374_p12)
}
  0x3e   :  { %s9378_s0 = scalar_lea.vmem %s45_s16, 24576  ;;  %p9383_p0 = scmp.lt.s32.totalorder %s45_s16, %s45_s16 }
  0x3f   :  { %p9379_p13 = scmp.ne.s32.totalorder %s45_s16, %s9378_s0  ;;  %p9384_p1 = scmp.lt.s32.totalorder %s9378_s0, %s9378_s0 }
  0x41   :  { %p9385_p2 = por %p9384_p1, %p9383_p0 }
  0x43   :  { %p9386_p3 = pnand %p9385_p2, %p9379_p13 }
  0x45   :  { %9389 = shalt.err (!%p9386_p3)
}
  0x46   :  { %50 = dma.hbm_to_vmem [thread:$0]  %s10848_s2, 24576, %s45_s16, [#allocation8], %s9443_s7, %s9443_s7, %s9444_s8  }
  0x47   :  { %s9390_s29 = scalar_lea.hbm %s10850_s4, 2048 }
  0x48   :  { %p9391_p4 = scmp.ne.s32.totalorder %s10850_s4, %s9390_s29  ;;  %p9394_p5 = scmp.lt.u32.totalorder %s9390_s29, %s10850_s4 }
  0x4a   :  { %p9396_p6 = pnand %p9394_p5, %p9391_p4 }
  0x4c   :  { %9399 = shalt.err (!%p9396_p6)
}
  0x4d   :  { %s9400_s13 = scalar_lea.vmem %s69_s18, 2048  ;;  %p9405_p8 = scmp.lt.s32.totalorder %s69_s18, %s69_s18 }
  0x4e   :  { %p9401_p7 = scmp.ne.s32.totalorder %s69_s18, %s9400_s13  ;;  %p9406_p9 = scmp.lt.s32.totalorder %s9400_s13, %s9400_s13 }
  0x50   :  { %p9407_p10 = por %p9406_p9, %p9405_p8 }
  0x52   :  { %p9408_p11 = pnand %p9407_p10, %p9401_p7 }
  0x54   :  { %9411 = shalt.err (!%p9408_p11)
}
  0x55   :  { %74 = dma.hbm_to_vmem [thread:$0]  %s10850_s4, 2048, %s69_s18, [#allocation11], %s9449_s3, %s9449_s3, %s9450_s12  }
  0x56   :  { %9434 = dma.done.wait [#allocation5], 256  }
  0x57   :  { %9435 = vsyncadd [#allocation5], 4294967040 }
  0x58   :  { %9436 = dma.done.wait [#allocation8], 49152  }
  0x59   :  { %9437 = vsyncadd [#allocation8], 4294918144 }
  0x5a   :  { %9438 = dma.done.wait [#allocation11], 2240  }
  0x5b   :  { %9439 = vsyncadd [#allocation11], 4294965056  ;;  %v9453_v0 = vmov 0.0   ;;  %v99_v1 = vld [vmem:[#allocation7 + $0x8] sm:$0xff]  ;;  %v101_v3 = vld [vmem:[#allocation7 + $0x18] sm:$0xff]  ;;  %vm9455_vm0 = vmmov 0  }
  0x5c   :  { %248 = vmatprep.mubr.f32.mxu0 %v9453_v0  ;;  %325 = vmatprep.mubr.f32.mxu1 %v9453_v0  ;;  %v103_v2 = vld [vmem:[#allocation7 + $0x28] sm:$0xff]  ;;  %v105_v5 = vld [vmem:[#allocation7 + $0x38] sm:$0xff]  ;;  %v98_v6 = vld [vmem:[#allocation7] sm:$0xff]  ;;  %s9456_s3 = smov [#allocation13]  }
  0x5d   :  { %v7151_v4 = vpack.c.bf16 %v103_v2, %v99_v1  ;;  %v102_v7 = vld [vmem:[#allocation7 + $0x20] sm:$0xff]  ;;  %v7183_v8 = vpack.c.bf16 %v105_v5, %v101_v3  ;;  %v100_v10 = vld [vmem:[#allocation7 + $0x10] sm:$0xff]  ;;  %v107_v12 = vld [vmem:[#allocation7 + $0x48] sm:$0xff]  ;;  %s7015_s12 = sshll.u32 %s9456_s3, 4  ;;  %s7016_s12 = int_to_ptr.vmem [resolvable:$true] %s7015_s12 }
  0x5e   :  { %v7153_v9 = vpack.c.bf16 %v102_v7, %v98_v6  ;;  %v104_v11 = vld [vmem:[#allocation7 + $0x30] sm:$0xff]  ;;  %v111_v14 = vld [vmem:[#allocation7 + $0x68] sm:$0xff]  ;;  %v109_v15 = vld [vmem:[#allocation7 + $0x58] sm:$0xff]  ;;  %s9412_s14 = scalar_lea.vmem %s7016_s12, 32  ;;  %p9417_p13 = scmp.lt.s32.totalorder %s7016_s12, %s7016_s12 }
  0x5f   :  { %7152 = vmatprep.subr.bf16.mxu0 %v7151_v4  ;;  %v7185_v13 = vpack.c.bf16 %v104_v11, %v100_v10  ;;  %v113_v16 = vld [vmem:[#allocation7 + $0x78] sm:$0xff]  ;;  %7184 = vmatprep.subr.bf16.mxu1 %v7183_v8  ;;  %v7155_v17 = vpack.c.bf16 %v111_v14, %v107_v12  ;;  %v106_v19 = vld [vmem:[#allocation7 + $0x40] sm:$0xff]  ;;  %v108_v21 = vld [vmem:[#allocation7 + $0x50] sm:$0xff]  ;;  %p9413_p12 = scmp.ne.s32.totalorder %s7016_s12, %s9412_s14  ;;  %p9418_p0 = scmp.lt.s32.totalorder %s9412_s14, %s9412_s14 }
  0x60   :  { %7154 = vmatpush1.bf16.msra.mxu0 %v7153_v9  ;;  %v7187_v18 = vpack.c.bf16 %v113_v16, %v109_v15  ;;  %v110_v20 = vld [vmem:[#allocation7 + $0x60] sm:$0xff]  ;;  %v112_v23 = vld [vmem:[#allocation7 + $0x70] sm:$0xff]  ;;  %v115_v24 = vld [vmem:[#allocation7 + $0x88] sm:$0xff] }
  0x61   :  { %7186 = vmatpush1.bf16.msra.mxu1 %v7185_v13  ;;  %v7157_v22 = vpack.c.bf16 %v110_v20, %v106_v19  ;;  %v119_v25 = vld [vmem:[#allocation7 + $0xa8] sm:$0xff]  ;;  %7156 = vmatprep.subr.bf16.mxu0 %v7155_v17  ;;  %v7189_v26 = vpack.c.bf16 %v112_v23, %v108_v21  ;;  %v117_v28 = vld [vmem:[#allocation7 + $0x98] sm:$0xff]  ;;  %v114_v30 = vld [vmem:[#allocation7 + $0x80] sm:$0xff]  ;;  %p9419_p1 = por %p9418_p0, %p9417_p13 }
  0x62   :  { %7188 = vmatprep.subr.bf16.mxu1 %v7187_v18  ;;  %v7159_v27 = vpack.c.bf16 %v119_v25, %v115_v24  ;;  %v121_v29 = vld [vmem:[#allocation7 + $0xb8] sm:$0xff]  ;;  %v118_v32 = vld [vmem:[#allocation7 + $0xa0] sm:$0xff]  ;;  %v116_v33 = vld [vmem:[#allocation7 + $0x90] sm:$0xff] }
  0x63   :  { %v7191_v31 = vpack.c.bf16 %v121_v29, %v117_v28  ;;  %v120_v34 = vld [vmem:[#allocation7 + $0xb0] sm:$0xff]  ;;  %v7161_v35 = vpack.c.bf16 %v118_v32, %v114_v30  ;;  %v123_v36 = vld [vmem:[#allocation7 + $0xc8] sm:$0xff]  ;;  %v125_v38 = vld [vmem:[#allocation7 + $0xd8] sm:$0xff]  ;;  %p9420_p2 = pnand %p9419_p1, %p9413_p12 }
  0x64   :  { %7158 = vmatpush1.bf16.msra.mxu0 %v7157_v22  ;;  %v127_v37 = vld [vmem:[#allocation7 + $0xe8] sm:$0xff]  ;;  %v7193_v39 = vpack.c.bf16 %v120_v34, %v116_v33  ;;  %v129_v41 = vld [vmem:[#allocation7 + $0xf8] sm:$0xff]  ;;  %v122_v42 = vld [vmem:[#allocation7 + $0xc0] sm:$0xff] }
  0x65   :  { %7190 = vmatpush1.bf16.msra.mxu1 %v7189_v26  ;;  %7160 = vmatprep.subr.bf16.mxu0 %v7159_v27  ;;  %v7163_v40 = vpack.c.bf16 %v127_v37, %v123_v36  ;;  %v126_v43 = vld [vmem:[#allocation7 + $0xe0] sm:$0xff]  ;;  %v7195_v44 = vpack.c.bf16 %v129_v41, %v125_v38  ;;  %v124_v45 = vld [vmem:[#allocation7 + $0xd0] sm:$0xff]  ;;  %v131_v47 = vld [vmem:[#allocation7 + $0x108] sm:$0xff] }
  0x66   :  { %7192 = vmatprep.subr.bf16.mxu1 %v7191_v31  ;;  %v128_v46 = vld [vmem:[#allocation7 + $0xf0] sm:$0xff]  ;;  %v135_v48 = vld [vmem:[#allocation7 + $0x128] sm:$0xff]  ;;  %v133_v49 = vld [vmem:[#allocation7 + $0x118] sm:$0xff]  ;;  %v7165_v51 = vpack.c.bf16 %v126_v43, %v122_v42 }
  0x67   :  { %v137_v50 = vld [vmem:[#allocation7 + $0x138] sm:$0xff]  ;;  %v7197_v52 = vpack.c.bf16 %v128_v46, %v124_v45  ;;  %v7167_v53 = vpack.c.bf16 %v135_v48, %v131_v47  ;;  %v130_v54 = vld [vmem:[#allocation7 + $0x100] sm:$0xff]  ;;  %v132_v56 = vld [vmem:[#allocation7 + $0x110] sm:$0xff] }
  0x68   :  { %7162 = vmatpush1.bf16.msra.mxu0 %v7161_v35  ;;  %v134_v55 = vld [vmem:[#allocation7 + $0x120] sm:$0xff]  ;;  %v7199_v57 = vpack.c.bf16 %v137_v50, %v133_v49  ;;  %v136_v58 = vld [vmem:[#allocation7 + $0x130] sm:$0xff]  ;;  %v139_v59 = vld [vmem:[#allocation7 + $0x148] sm:$0xff] }
  0x69   :  { %7194 = vmatpush1.bf16.msra.mxu1 %v7193_v39  ;;  %7164 = vmatprep.subr.bf16.mxu0 %v7163_v40  ;;  %v143_v60 = vld [vmem:[#allocation7 + $0x168] sm:$0xff]  ;;  %v141_v61 = vld [vmem:[#allocation7 + $0x158] sm:$0xff]  ;;  %v7169_v63 = vpack.c.bf16 %v134_v55, %v130_v54  ;;  %v7201_v1 = vpack.c.bf16 %v136_v58, %v132_v56  ;;  %v138_v3 = vld [vmem:[#allocation7 + $0x140] sm:$0xff] }
  0x6a   :  { %7196 = vmatprep.subr.bf16.mxu1 %v7195_v44  ;;  %v145_v62 = vld [vmem:[#allocation7 + $0x178] sm:$0xff]  ;;  %v7171_v2 = vpack.c.bf16 %v143_v60, %v139_v59  ;;  %v142_v4 = vld [vmem:[#allocation7 + $0x160] sm:$0xff]  ;;  %v140_v5 = vld [vmem:[#allocation7 + $0x150] sm:$0xff] }
  0x6b   :  { %v7203_v6 = vpack.c.bf16 %v145_v62, %v141_v61  ;;  %v144_v7 = vld [vmem:[#allocation7 + $0x170] sm:$0xff]  ;;  %v147_v8 = vld [vmem:[#allocation7 + $0x188] sm:$0xff]  ;;  %v149_v10 = vld [vmem:[#allocation7 + $0x198] sm:$0xff]  ;;  %v7173_v12 = vpack.c.bf16 %v142_v4, %v138_v3 }
  0x6c   :  { %7166 = vmatpush1.bf16.msra.mxu0 %v7165_v51  ;;  %v151_v9 = vld [vmem:[#allocation7 + $0x1a8] sm:$0xff]  ;;  %v153_v11 = vld [vmem:[#allocation7 + $0x1b8] sm:$0xff]  ;;  %v146_v13 = vld [vmem:[#allocation7 + $0x180] sm:$0xff]  ;;  %v7205_v14 = vpack.c.bf16 %v144_v7, %v140_v5 }
  0x6d   :  { %7198 = vmatpush1.bf16.msra.mxu1 %v7197_v52  ;;  %7168 = vmatprep.subr.bf16.mxu0 %v7167_v53  ;;  %v7175_v15 = vpack.c.bf16 %v151_v9, %v147_v8  ;;  %v150_v16 = vld [vmem:[#allocation7 + $0x1a0] sm:$0xff]  ;;  %v148_v17 = vld [vmem:[#allocation7 + $0x190] sm:$0xff]  ;;  %v7207_v19 = vpack.c.bf16 %v153_v11, %v149_v10  ;;  %v155_v21 = vld [vmem:[#allocation7 + $0x1c8] sm:$0xff] }
  0x6e   :  { %7200 = vmatprep.subr.bf16.mxu1 %v7199_v57  ;;  %v92_v18 = vld [vmem:[#allocation4] sm:$0xff]  ;;  %v159_v22 = vld [vmem:[#allocation7 + $0x1e8] sm:$0xff]  ;;  %v157_v23 = vld [vmem:[#allocation7 + $0x1d8] sm:$0xff]  ;;  %v7177_v25 = vpack.c.bf16 %v150_v16, %v146_v13 }
  0x6f   :  { %v152_v20 = vld [vmem:[#allocation7 + $0x1b0] sm:$0xff]  ;;  %94 = vst [vmem:[#allocation2] sm:$0xff] %v92_v18  ;;  %v161_v24 = vld [vmem:[#allocation7 + $0x1f8] sm:$0xff]  ;;  %v7179_v27 = vpack.c.bf16 %v159_v22, %v155_v21  ;;  %v154_v28 = vld [vmem:[#allocation7 + $0x1c0] sm:$0xff] }
  0x70   :  { %7170 = vmatpush1.bf16.msra.mxu0 %v7169_v63  ;;  %v7209_v26 = vpack.c.bf16 %v152_v20, %v148_v17  ;;  %v158_v29 = vld [vmem:[#allocation7 + $0x1e0] sm:$0xff]  ;;  %v156_v30 = vld [vmem:[#allocation7 + $0x1d0] sm:$0xff]  ;;  %v7211_v31 = vpack.c.bf16 %v161_v24, %v157_v23  ;;  %v351_v33 = vld [vmem:[#allocation9 + $0x8] sm:$0xff] }
  0x71   :  { %7202 = vmatpush1.bf16.msra.mxu1 %v7201_v1  ;;  %7172 = vmatprep.subr.bf16.mxu0 %v7171_v2  ;;  %v160_v32 = vld [vmem:[#allocation7 + $0x1f0] sm:$0xff]  ;;  %v355_v34 = vld [vmem:[#allocation9 + $0x28] sm:$0xff]  ;;  %v353_v35 = vld [vmem:[#allocation9 + $0x18] sm:$0xff]  ;;  %v7181_v37 = vpack.c.bf16 %v158_v29, %v154_v28 }
  0x72   :  { %7204 = vmatprep.subr.bf16.mxu1 %v7203_v6  ;;  %v357_v36 = vld [vmem:[#allocation9 + $0x38] sm:$0xff]  ;;  %v7213_v38 = vpack.c.bf16 %v160_v32, %v156_v30  ;;  %v9566_v39 = vpack.c.bf16 %v355_v34, %v351_v33  ;;  %v350_v40 = vld [vmem:[#allocation9] sm:$0xff]  ;;  %v352_v42 = vld [vmem:[#allocation9 + $0x10] sm:$0xff] }
  0x73   :  { %v354_v41 = vld [vmem:[#allocation9 + $0x20] sm:$0xff]  ;;  %v9568_v43 = vpack.c.bf16 %v357_v36, %v353_v35  ;;  %v356_v44 = vld [vmem:[#allocation9 + $0x30] sm:$0xff]  ;;  %v359_v45 = vld [vmem:[#allocation9 + $0x48] sm:$0xff] }
  0x74   :  { %7174 = vmatpush1.bf16.msra.mxu0 %v7173_v12  ;;  %v363_v46 = vld [vmem:[#allocation9 + $0x68] sm:$0xff]  ;;  %v361_v47 = vld [vmem:[#allocation9 + $0x58] sm:$0xff]  ;;  %v9570_v49 = vpack.c.bf16 %v354_v41, %v350_v40  ;;  %v9573_v50 = vpack.c.bf16 %v356_v44, %v352_v42  ;;  %v358_v52 = vld [vmem:[#allocation9 + $0x40] sm:$0xff] }
  0x75   :  { %7206 = vmatpush1.bf16.msra.mxu1 %v7205_v14  ;;  %7176 = vmatprep.subr.bf16.mxu0 %v7175_v15  ;;  %v365_v48 = vld [vmem:[#allocation9 + $0x78] sm:$0xff]  ;;  %v9575_v51 = vpack.c.bf16 %v363_v46, %v359_v45  ;;  %v362_v53 = vld [vmem:[#allocation9 + $0x60] sm:$0xff]  ;;  %v360_v54 = vld [vmem:[#allocation9 + $0x50] sm:$0xff] }
  0x76   :  { %7208 = vmatprep.subr.bf16.mxu1 %v7207_v19  ;;  %v9578_v55 = vpack.c.bf16 %v365_v48, %v361_v47  ;;  %v364_v56 = vld [vmem:[#allocation9 + $0x70] sm:$0xff]  ;;  %v367_v57 = vld [vmem:[#allocation9 + $0x88] sm:$0xff]  ;;  %v369_v59 = vld [vmem:[#allocation9 + $0x98] sm:$0xff]  ;;  %v9581_v61 = vpack.c.bf16 %v362_v53, %v358_v52 }
  0x77   :  { %v371_v58 = vld [vmem:[#allocation9 + $0xa8] sm:$0xff]  ;;  %v373_v60 = vld [vmem:[#allocation9 + $0xb8] sm:$0xff]  ;;  %v9585_v62 = vpack.c.bf16 %v364_v56, %v360_v54  ;;  %v366_v1 = vld [vmem:[#allocation9 + $0x80] sm:$0xff] }
  0x78   :  { %7178 = vmatpush1.bf16.msra.mxu0 %v7177_v25  ;;  %v9587_v63 = vpack.c.bf16 %v371_v58, %v367_v57  ;;  %v370_v2 = vld [vmem:[#allocation9 + $0xa0] sm:$0xff]  ;;  %v368_v3 = vld [vmem:[#allocation9 + $0x90] sm:$0xff]  ;;  %v9590_v4 = vpack.c.bf16 %v373_v60, %v369_v59  ;;  %v375_v6 = vld [vmem:[#allocation9 + $0xc8] sm:$0xff] }
  0x79   :  { %7210 = vmatpush1.bf16.msra.mxu1 %v7209_v26  ;;  %7180 = vmatprep.subr.bf16.mxu0 %v7179_v27  ;;  %v372_v5 = vld [vmem:[#allocation9 + $0xb0] sm:$0xff]  ;;  %v379_v7 = vld [vmem:[#allocation9 + $0xe8] sm:$0xff]  ;;  %v377_v8 = vld [vmem:[#allocation9 + $0xd8] sm:$0xff]  ;;  %v9595_v10 = vpack.c.bf16 %v370_v2, %v366_v1 }
  0x7a   :  { %7212 = vmatprep.subr.bf16.mxu1 %v7211_v31  ;;  %v381_v9 = vld [vmem:[#allocation9 + $0xf8] sm:$0xff]  ;;  %v9599_v12 = vpack.c.bf16 %v372_v5, %v368_v3  ;;  %v9601_v13 = vpack.c.bf16 %v379_v7, %v375_v6  ;;  %v374_v14 = vld [vmem:[#allocation9 + $0xc0] sm:$0xff]  ;;  %v376_v16 = vld [vmem:[#allocation9 + $0xd0] sm:$0xff] }
  0x7b   :  { %v93_v11 = vld [vmem:[#allocation4 + $0x8] sm:$0xff]  ;;  %v378_v15 = vld [vmem:[#allocation9 + $0xe0] sm:$0xff]  ;;  %v9604_v17 = vpack.c.bf16 %v381_v9, %v377_v8  ;;  %v383_v19 = vld [vmem:[#allocation9 + $0x108] sm:$0xff] }
  0x7c   :  { %7182 = vmatpush1.bf16.msra.mxu0 %v7181_v37  ;;  %95 = vst [vmem:[#allocation2 + $0x8] sm:$0xff] %v93_v11  ;;  %v387_v20 = vld [vmem:[#allocation9 + $0x128] sm:$0xff]  ;;  %v385_v21 = vld [vmem:[#allocation9 + $0x118] sm:$0xff]  ;;  %v9608_v23 = vpack.c.bf16 %v378_v15, %v374_v14  ;;  %v382_v26 = vld [vmem:[#allocation9 + $0x100] sm:$0xff] }
  0x7d   :  { %7214 = vmatpush1.bf16.msra.mxu1 %v7213_v38  ;;  %7216 = vmatprep.subr.bf16.mxu0 %v9566_v39  ;;  %v389_v22 = vld [vmem:[#allocation9 + $0x138] sm:$0xff]  ;;  %v9615_v25 = vpack.c.bf16 %v387_v20, %v383_v19  ;;  %v386_v27 = vld [vmem:[#allocation9 + $0x120] sm:$0xff]  ;;  %v384_v28 = vld [vmem:[#allocation9 + $0x110] sm:$0xff]  ;;  %v164_v20 = vlaneseq }
  0x7e   :  { %7248 = vmatprep.subr.bf16.mxu1 %v9568_v43  ;;  %v9618_v29 = vpack.c.bf16 %v389_v22, %v385_v21  ;;  %v388_v30 = vld [vmem:[#allocation9 + $0x130] sm:$0xff]  ;;  %v391_v31 = vld [vmem:[#allocation9 + $0x148] sm:$0xff]  ;;  %v393_v33 = vld [vmem:[#allocation9 + $0x158] sm:$0xff]  ;;  %v9621_v35 = vpack.c.bf16 %v386_v27, %v382_v26 }
  0x7f   :  { %249 = vmatmul.mubr.f32.vlgmr.msra.gmra.mrb[0].mxu0 %v92_v18  ;;  %v395_v32 = vld [vmem:[#allocation9 + $0x168] sm:$0xff]  ;;  %v397_v34 = vld [vmem:[#allocation9 + $0x178] sm:$0xff]  ;;  %v9625_v36 = vpack.c.bf16 %v388_v30, %v384_v28  ;;  %v390_v38 = vld [vmem:[#allocation9 + $0x140] sm:$0xff]  ;;  %v165_v21 = vshrl.u32 %v164_v20, 7 }
  0x80   :  { %326 = vmatmul.mubr.f32.vlgmr.msra.gmra.mrb[0].mxu1 %v92_v18  ;;  %7218 = vmatpush1.bf16.msra.mxu0 %v9570_v49  ;;  %v380_v18 = vld [vmem:[#allocation9 + $0xf0] sm:$0xff]  ;;  %v9627_v37 = vpack.c.bf16 %v395_v32, %v391_v31  ;;  %v394_v40 = vld [vmem:[#allocation9 + $0x160] sm:$0xff]  ;;  %v9630_v42 = vpack.c.bf16 %v397_v34, %v393_v33  ;;  %v399_v45 = vld [vmem:[#allocation9 + $0x188] sm:$0xff] }
  0x81   :  { %7250 = vmatpush1.bf16.msra.mxu1 %v9573_v50  ;;  %7220 = vmatprep.subr.bf16.mxu0 %v9575_v51  ;;  %v9613_v24 = vpack.c.bf16 %v380_v18, %v376_v16  ;;  %v392_v41 = vld [vmem:[#allocation9 + $0x150] sm:$0xff]  ;;  %v403_v46 = vld [vmem:[#allocation9 + $0x1a8] sm:$0xff]  ;;  %v401_v47 = vld [vmem:[#allocation9 + $0x198] sm:$0xff]  ;;  %v9633_v52 = vpack.c.bf16 %v394_v40, %v390_v38  ;;  %v9704_v22 = vsub.s32 0, %v165_v21  ;;  %v9706_v27 = vsub.s32 1, %v165_v21 }
  0x82   :  { %7252 = vmatprep.subr.bf16.mxu1 %v9578_v55  ;;  %254 = vmatprep.mubr.f32.mxu0 %v9453_v0  ;;  %v396_v44 = vld [vmem:[#allocation9 + $0x170] sm:$0xff]  ;;  %v405_v48 = vld [vmem:[#allocation9 + $0x1b8] sm:$0xff]  ;;  %v9639_v54 = vpack.c.bf16 %v403_v46, %v399_v45  ;;  %v398_v56 = vld [vmem:[#allocation9 + $0x180] sm:$0xff]  ;;  %v9708_v28 = vsub.s32 2, %v165_v21  ;;  %v9710_v30 = vsub.s32 3, %v165_v21 }
  0x83   :  { %331 = vmatprep.mubr.f32.mxu1 %v9453_v0  ;;  %255 = vmatmul.mubr.f32.gmra.mrb[2].mxu0 %v93_v11  ;;  %v9637_v53 = vpack.c.bf16 %v396_v44, %v392_v41  ;;  %v402_v57 = vld [vmem:[#allocation9 + $0x1a0] sm:$0xff]  ;;  %v400_v58 = vld [vmem:[#allocation9 + $0x190] sm:$0xff]  ;;  %v9642_v59 = vpack.c.bf16 %v405_v48, %v401_v47  ;;  %v407_v1 = vld [vmem:[#allocation9 + $0x1c8] sm:$0xff] }
  0x84   :  { %7222 = vmatpush1.bf16.msra.mxu0 %v9581_v61  ;;  %332 = vmatmul.mubr.f32.gmra.mrb[2].mxu1 %v93_v11  ;;  %v404_v60 = vld [vmem:[#allocation9 + $0x1b0] sm:$0xff]  ;;  %v411_v2 = vld [vmem:[#allocation9 + $0x1e8] sm:$0xff]  ;;  %v409_v3 = vld [vmem:[#allocation9 + $0x1d8] sm:$0xff]  ;;  %v9645_v6 = vpack.c.bf16 %v402_v57, %v398_v56 }
  0x85   :  { %7254 = vmatpush1.bf16.msra.mxu1 %v9585_v62  ;;  %7224 = vmatprep.subr.bf16.mxu0 %v9587_v63  ;;  %v413_v5 = vld [vmem:[#allocation9 + $0x1f8] sm:$0xff]  ;;  %v9649_v7 = vpack.c.bf16 %v404_v60, %v400_v58  ;;  %v9651_v8 = vpack.c.bf16 %v411_v2, %v407_v1  ;;  %v406_v9 = vld [vmem:[#allocation9 + $0x1c0] sm:$0xff]  ;;  %v408_v15 = vld [vmem:[#allocation9 + $0x1d0] sm:$0xff] }
  0x86   :  { %7256 = vmatprep.subr.bf16.mxu1 %v9590_v4  ;;  %478 = vmatprep.mubr.f32.mxu0 %v9453_v0  ;;  %v410_v11 = vld [vmem:[#allocation9 + $0x1e0] sm:$0xff]  ;;  %v9654_v14 = vpack.c.bf16 %v413_v5, %v409_v3  ;;  %v412_v16 = vld [vmem:[#allocation9 + $0x1f0] sm:$0xff] }
  0x87   :  { %549 = vmatprep.mubr.f32.mxu1 %v9453_v0  ;;  %v9657_v18 = vpack.c.bf16 %v410_v11, %v406_v9  ;;  %v9661_v19 = vpack.c.bf16 %v412_v16, %v408_v15  ;;  %v162_v26 = vld [vmem:[#allocation10] sm:$0xf] }
  0x88   :  { %7226 = vmatpush1.bf16.msra.mxu0 %v9595_v10  ;;  %v167_v31 = vrot.slane %v162_v26, %v9704_v22  ;;  %v171_v32 = vrot.slane %v162_v26, %v9706_v27  ;;  %v175_v33 = vrot.slane %v162_v26, %v9708_v28 }
  0x89   :  { %7258 = vmatpush1.bf16.msra.mxu1 %v9599_v12  ;;  %7228 = vmatprep.subr.bf16.mxu0 %v9601_v13 }
  0x8a   :  { %7260 = vmatprep.subr.bf16.mxu1 %v9604_v17 }
  0x8c   :  { %7230 = vmatpush1.bf16.msra.mxu0 %v9608_v23 }
  0x8d   :  { %7262 = vmatpush1.bf16.msra.mxu1 %v9613_v24  ;;  %7232 = vmatprep.subr.bf16.mxu0 %v9615_v25 }
  0x8e   :  { %7264 = vmatprep.subr.bf16.mxu1 %v9618_v29 }
  0x90   :  { %7234 = vmatpush1.bf16.msra.mxu0 %v9621_v35 }
  0x91   :  { %7266 = vmatpush1.bf16.msra.mxu1 %v9625_v36  ;;  %7236 = vmatprep.subr.bf16.mxu0 %v9627_v37 }
  0x92   :  { %7268 = vmatprep.subr.bf16.mxu1 %v9630_v42 }
  0x94   :  { %7238 = vmatpush1.bf16.msra.mxu0 %v9633_v52 }
  0x95   :  { %7270 = vmatpush1.bf16.msra.mxu1 %v9637_v53  ;;  %7240 = vmatprep.subr.bf16.mxu0 %v9639_v54 }
  0x96   :  { %7272 = vmatprep.subr.bf16.mxu1 %v9642_v59 }
  0x98   :  { %7242 = vmatpush1.bf16.msra.mxu0 %v9645_v6 }
  0x99   :  { %7274 = vmatpush1.bf16.msra.mxu1 %v9649_v7  ;;  %7244 = vmatprep.subr.bf16.mxu0 %v9651_v8 }
  0x9a   :  { %7276 = vmatprep.subr.bf16.mxu1 %v9654_v14 }
  0x9c   :  { %7246 = vmatpush1.bf16.msra.mxu0 %v9657_v18 }
  0x9d   :  { %7278 = vmatpush1.bf16.msra.mxu1 %v9661_v19  ;;  %7280 = vmatprep.subr.bf16.mxu0 %v9566_v39 }
  0x9e   :  { %7312 = vmatprep.subr.bf16.mxu1 %v9568_v43 }
  0x9f   :  { %479 = vmatmul.mubr.f32.vlgmr.msra.gmra.mrb[4].mxu0 %v9453_v0 }
  0xa0   :  { %550 = vmatmul.mubr.f32.vlgmr.msra.gmra.mrb[4].mxu1 %v9453_v0  ;;  %7282 = vmatpush1.bf16.msra.mxu0 %v9570_v49 }
  0xa1   :  { %7314 = vmatpush1.bf16.msra.mxu1 %v9573_v50  ;;  %7284 = vmatprep.subr.bf16.mxu0 %v9575_v51 }
  0xa2   :  { %7316 = vmatprep.subr.bf16.mxu1 %v9578_v55  ;;  %717 = vmatprep.mubr.f32.mxu0 %v9453_v0 }
  0xa3   :  { %788 = vmatprep.mubr.f32.mxu1 %v9453_v0 }
  0xa4   :  { %7286 = vmatpush1.bf16.msra.mxu0 %v9581_v61 }
  0xa5   :  { %7318 = vmatpush1.bf16.msra.mxu1 %v9585_v62  ;;  %7288 = vmatprep.subr.bf16.mxu0 %v9587_v63 }
  0xa6   :  { %7320 = vmatprep.subr.bf16.mxu1 %v9590_v4 }
  0xa8   :  { %7290 = vmatpush1.bf16.msra.mxu0 %v9595_v10 }
  0xa9   :  { %7322 = vmatpush1.bf16.msra.mxu1 %v9599_v12  ;;  %7292 = vmatprep.subr.bf16.mxu0 %v9601_v13 }
  0xaa   :  { %7324 = vmatprep.subr.bf16.mxu1 %v9604_v17 }
  0xac   :  { %7294 = vmatpush1.bf16.msra.mxu0 %v9608_v23 }
  0xad   :  { %7326 = vmatpush1.bf16.msra.mxu1 %v9613_v24  ;;  %7296 = vmatprep.subr.bf16.mxu0 %v9615_v25 }
  0xae   :  { %7328 = vmatprep.subr.bf16.mxu1 %v9618_v29 }
  0xb0   :  { %7298 = vmatpush1.bf16.msra.mxu0 %v9621_v35 }
  0xb1   :  { %7330 = vmatpush1.bf16.msra.mxu1 %v9625_v36  ;;  %7300 = vmatprep.subr.bf16.mxu0 %v9627_v37 }
  0xb2   :  { %7332 = vmatprep.subr.bf16.mxu1 %v9630_v42 }
  0xb4   :  { %7302 = vmatpush1.bf16.msra.mxu0 %v9633_v52 }
  0xb5   :  { %7334 = vmatpush1.bf16.msra.mxu1 %v9637_v53  ;;  %7304 = vmatprep.subr.bf16.mxu0 %v9639_v54 }
  0xb6   :  { %7336 = vmatprep.subr.bf16.mxu1 %v9642_v59 }
  0xb8   :  { %7306 = vmatpush1.bf16.msra.mxu0 %v9645_v6 }
  0xb9   :  { %7338 = vmatpush1.bf16.msra.mxu1 %v9649_v7  ;;  %7308 = vmatprep.subr.bf16.mxu0 %v9651_v8 }
  0xba   :  { %7340 = vmatprep.subr.bf16.mxu1 %v9654_v14 }
  0xbc   :  { %7310 = vmatpush1.bf16.msra.mxu0 %v9657_v18 }
  0xbd   :  { %7342 = vmatpush1.bf16.msra.mxu1 %v9661_v19  ;;  %7344 = vmatprep.subr.bf16.mxu0 %v9566_v39  ;;  %v179_v39 = vrot.slane %v162_v26, %v9710_v30 }
  0xbe   :  { %7376 = vmatprep.subr.bf16.mxu1 %v9568_v43 }
 0x152   :  { %v250_v43 = vpop.f32.mrb[0].mxu0 }
 0x153   :  { %v251_v34 = vadd.f32 %v250_v43, %v167_v31  ;;  %v252_v38 = vpop.f32.mrb[1].mxu0  ;;  %v327_v40 = vpop.f32.mrb[0].mxu1 }
 0x154   :  { %v253_v41 = vadd.f32 %v252_v38, %v171_v32  ;;  %v328_v44 = vadd.f32 %v327_v40, %v175_v33  ;;  %v329_v45 = vpop.f32.mrb[1].mxu1 }
 0x155   :  { %338 = vst [vmem:[#allocation3] sm:$0xff] %v251_v34  ;;  %v330_v46 = vadd.f32 %v329_v45, %v179_v39 }
 0x156   :  { %339 = vst [vmem:[#allocation3 + $0x8] sm:$0xff] %v253_v41  ;;  %340 = vst [vmem:[#allocation3 + $0x10] sm:$0xff] %v328_v44  ;;  %v256_v47 = vpop.f32.mrb[2].mxu0 }
 0x157   :  { %341 = vst [vmem:[#allocation3 + $0x18] sm:$0xff] %v330_v46  ;;  %v257_v48 = vadd.f32 %v256_v47, %v167_v31  ;;  %v258_v56 = vpop.f32.mrb[3].mxu0  ;;  %v333_v57 = vpop.f32.mrb[2].mxu1 }
 0x158   :  { %v259_v58 = vadd.f32 %v258_v56, %v171_v32  ;;  %v334_v60 = vadd.f32 %v333_v57, %v175_v33  ;;  %v335_v1 = vpop.f32.mrb[3].mxu1 }
 0x159   :  { %342 = vst [vmem:[#allocation3 + $0x20] sm:$0xff] %v257_v48  ;;  %v336_v2 = vadd.f32 %v335_v1, %v179_v39 }
 0x15a   :  { %343 = vst [vmem:[#allocation3 + $0x28] sm:$0xff] %v259_v58  ;;  %344 = vst [vmem:[#allocation3 + $0x30] sm:$0xff] %v334_v60 }
 0x15b   :  { %345 = vst [vmem:[#allocation3 + $0x38] sm:$0xff] %v336_v2 }
 0x15c   :  { %v346_v3 = vld [vmem:[#allocation3] sm:$0x3] }
 0x15d   :  { %v347_v15 = vld [vmem:[#allocation3 + $0x8] sm:$0x3]  ;;  %v348_v43 = vld [vmem:[#allocation3 + $0x10] sm:$0x3] }
 0x15e   :  { %v349_v32 = vld [vmem:[#allocation3 + $0x18] sm:$0x3] }
 0x172   :  { %v480_v5 = vpop.f32.mrb[4].mxu0 }
 0x173   :  { %v556_v9 = vadd.f32 %v480_v5, %v346_v3  ;;  %v551_v11 = vpop.f32.mrb[4].mxu1  ;;  %v482_v16 = vpop.f32.mrb[5].mxu0 }
 0x174   :  { %v557_v20 = vadd.f32 %v482_v16, %v347_v15  ;;  %v553_v21 = vpop.f32.mrb[5].mxu1  ;;  %v558_v39 = vadd.f32 %v551_v11, %v348_v43  ;;  %v1100_v43 = vld [vmem:[#allocation9] sm:$0xff] }
 0x175   :  { %v7026_v26 = vmul.f32 -1.442695, %v556_v9  ;;  %v559_v33 = vadd.f32 %v553_v21, %v349_v32  ;;  %v1101_v21 = vld [vmem:[#allocation9 + $0x8] sm:$0xff] }
 0x176   :  { %v7027_v31 = vmul.f32 -1.442695, %v557_v20 }
 0x177   :  { %8918 = vpow2.f32 %v7026_v26  ;;  %v7028_v34 = vmul.f32 -1.442695, %v559_v33  ;;  %v1105_v26 = vld [vmem:[#allocation9 + $0x28] sm:$0xff]  ;;  %v1107_v33 = vld [vmem:[#allocation9 + $0x38] sm:$0xff] }
 0x178   :  { %8920 = vpow2.f32 %v7027_v31  ;;  %v1103_v31 = vld [vmem:[#allocation9 + $0x18] sm:$0xff]  ;;  %v9757_v32 = vpack.c.bf16 %v1105_v26, %v1101_v21  ;;  %v1138_v21 = vld [vmem:[#allocation9 + $0x130] sm:$0xff]  ;;  %v1141_v26 = vld [vmem:[#allocation9 + $0x148] sm:$0xff] }
 0x179   :  { %8922 = vpow2.f32 %v7028_v34  ;;  %v1104_v34 = vld [vmem:[#allocation9 + $0x20] sm:$0xff] }
 0x17a   :  { %8924 = vtanh.f32 %v558_v39  ;;  %v9759_v39 = vpack.c.bf16 %v1107_v33, %v1103_v31  ;;  %v1145_v33 = vld [vmem:[#allocation9 + $0x168] sm:$0xff] }
 0x181   :  { %v8919_v38 = vpop.eup %8918 }
 0x182   :  { %v8921_v40 = vpop.eup %8920  ;;  %v563_v41 = vadd.f32 1.0, %v8919_v38  ;;  %v9761_v38 = vpack.c.bf16 %v1104_v34, %v1100_v43  ;;  %v1143_v43 = vld [vmem:[#allocation9 + $0x158] sm:$0xff] }
 0x183   :  { %v569_v44 = vadd.f32 1.0, %v8921_v40  ;;  %v8923_v45 = vpop.eup %8922  ;;  %v1102_v40 = vld [vmem:[#allocation9 + $0x10] sm:$0xff]  ;;  %v1147_v34 = vld [vmem:[#allocation9 + $0x178] sm:$0xff] }
 0x184   :  { %8926 = vrcp.f32 %v563_v41  ;;  %v8925_v46 = vpop.eup %8924  ;;  %v576_v57 = vadd.f32 1.0, %v8923_v45  ;;  %v1106_v41 = vld [vmem:[#allocation9 + $0x30] sm:$0xff]  ;;  %v1109_v45 = vld [vmem:[#allocation9 + $0x48] sm:$0xff] }
 0x185   :  { %8928 = vrcp.f32 %v569_v44  ;;  %v9764_v44 = vpack.c.bf16 %v1106_v41, %v1102_v40  ;;  %v9816_v40 = vpack.c.bf16 %v1145_v33, %v1141_v26  ;;  %v9818_v41 = vpack.c.bf16 %v1147_v34, %v1143_v43  ;;  %v839_v34 = vld [vmem:[#allocation3] sm:$0x30] }
 0x186   :  { %8930 = vrcp.f32 %v576_v57  ;;  %v1108_v57 = vld [vmem:[#allocation9 + $0x40] sm:$0xff] }
 0x18e   :  { %v8927_v47 = vpop.eup %8926 }
 0x18f   :  { %v8929_v48 = vpop.eup %8928  ;;  %v580_v56 = vmul.f32 %v8927_v47, %v8925_v46  ;;  %v1113_v46 = vld [vmem:[#allocation9 + $0x68] sm:$0xff]  ;;  %v1111_v47 = vld [vmem:[#allocation9 + $0x58] sm:$0xff] }
 0x190   :  { %v579_v58 = vmul.f32 0.0, %v8929_v48  ;;  %v8931_v1 = vpop.eup %8930  ;;  %v9769_v48 = vpack.c.bf16 %v1113_v46, %v1109_v45  ;;  %v1140_v45 = vld [vmem:[#allocation9 + $0x140] sm:$0xff] }
 0x191   :  { %v1144_v46 = vld [vmem:[#allocation9 + $0x160] sm:$0xff] }
 0x192   :  { %v9716_v60 = vadd.f32 %v580_v56, %v579_v58  ;;  %v1115_v56 = vld [vmem:[#allocation9 + $0x78] sm:$0xff]  ;;  %v1112_v58 = vld [vmem:[#allocation9 + $0x60] sm:$0xff] }
 0x194   :  { %8932 = vtanh.f32 %v9716_v60 }
 0x19e   :  { %v8933_v2 = vpop.eup %8932 }
 0x19f   :  { %v583_v3 = vmul.f32 %v8933_v2, %v8931_v1  ;;  %v9773_v1 = vpack.c.bf16 %v1112_v58, %v1108_v57  ;;  %v1110_v2 = vld [vmem:[#allocation9 + $0x50] sm:$0xff]  ;;  %v1149_v58 = vld [vmem:[#allocation9 + $0x188] sm:$0xff] }
 0x1a0   :  { %v1146_v57 = vld [vmem:[#allocation9 + $0x170] sm:$0xff] }
 0x1a1   :  { %584 = vst [vmem:[#allocation2] sm:$0x3] %v583_v3  ;;  %718 = vmatmul.mubr.f32.vlgmr.msra.gmra.mrb[6].mxu0 %v583_v3  ;;  %789 = vmatmul.mubr.f32.vlgmr.msra.gmra.mrb[6].mxu1 %v583_v3  ;;  %v1114_v3 = vld [vmem:[#allocation9 + $0x70] sm:$0xff] }
 0x1a2   :  { %7346 = vmatpush1.bf16.msra.mxu0 %v9570_v49  ;;  %7378 = vmatpush1.bf16.msra.mxu1 %v9573_v50 }
 0x1a3   :  { %7348 = vmatprep.subr.bf16.mxu0 %v9575_v51  ;;  %7380 = vmatprep.subr.bf16.mxu1 %v9578_v55 }
 0x1a4   :  { %974 = vmatprep.mubr.f32.mxu0 %v9453_v0  ;;  %1045 = vmatprep.mubr.f32.mxu1 %v9453_v0 }
 0x1a6   :  { %7350 = vmatpush1.bf16.msra.mxu0 %v9581_v61  ;;  %7382 = vmatpush1.bf16.msra.mxu1 %v9585_v62  ;;  %v585_v62 = vld [vmem:[#allocation3] sm:$0xc] }
 0x1a7   :  { %7352 = vmatprep.subr.bf16.mxu0 %v9587_v63  ;;  %7384 = vmatprep.subr.bf16.mxu1 %v9590_v4 }
 0x1aa   :  { %7354 = vmatpush1.bf16.msra.mxu0 %v9595_v10  ;;  %7386 = vmatpush1.bf16.msra.mxu1 %v9599_v12  ;;  %v586_v10 = vld [vmem:[#allocation3 + $0x8] sm:$0xc] }
 0x1ab   :  { %7356 = vmatprep.subr.bf16.mxu0 %v9601_v13  ;;  %7388 = vmatprep.subr.bf16.mxu1 %v9604_v17 }
 0x1ae   :  { %7358 = vmatpush1.bf16.msra.mxu0 %v9608_v23  ;;  %7390 = vmatpush1.bf16.msra.mxu1 %v9613_v24  ;;  %v588_v24 = vld [vmem:[#allocation3 + $0x18] sm:$0xc] }
 0x1af   :  { %7360 = vmatprep.subr.bf16.mxu0 %v9615_v25  ;;  %7392 = vmatprep.subr.bf16.mxu1 %v9618_v29 }
 0x1b2   :  { %7362 = vmatpush1.bf16.msra.mxu0 %v9621_v35  ;;  %7394 = vmatpush1.bf16.msra.mxu1 %v9625_v36  ;;  %v587_v35 = vld [vmem:[#allocation3 + $0x10] sm:$0xc] }
 0x1b3   :  { %7364 = vmatprep.subr.bf16.mxu0 %v9627_v37  ;;  %7396 = vmatprep.subr.bf16.mxu1 %v9630_v42 }
 0x1b6   :  { %7366 = vmatpush1.bf16.msra.mxu0 %v9633_v52  ;;  %7398 = vmatpush1.bf16.msra.mxu1 %v9637_v53 }
 0x1b7   :  { %7368 = vmatprep.subr.bf16.mxu0 %v9639_v54  ;;  %7400 = vmatprep.subr.bf16.mxu1 %v9642_v59 }
 0x1ba   :  { %7370 = vmatpush1.bf16.msra.mxu0 %v9645_v6  ;;  %7402 = vmatpush1.bf16.msra.mxu1 %v9649_v7 }
 0x1bb   :  { %7372 = vmatprep.subr.bf16.mxu0 %v9651_v8  ;;  %7404 = vmatprep.subr.bf16.mxu1 %v9654_v14  ;;  %v831_v8 = vrot.slane %v9716_v60, 6  ;;  %v9771_v60 = vpack.c.bf16 %v1115_v56, %v1111_v47  ;;  %v1142_v47 = vld [vmem:[#allocation9 + $0x150] sm:$0xff]  ;;  %v9821_v56 = vpack.c.bf16 %v1144_v46, %v1140_v45 }
 0x1be   :  { %7374 = vmatpush1.bf16.msra.mxu0 %v9657_v18  ;;  %7406 = vmatpush1.bf16.msra.mxu1 %v9661_v19 }
 0x1bf   :  { %7408 = vmatprep.subr.bf16.mxu0 %v9757_v32  ;;  %7440 = vmatprep.subr.bf16.mxu1 %v9759_v39 }
 0x274   :  { %v719_v49 = vpop.f32.mrb[6].mxu0  ;;  %v790_v50 = vpop.f32.mrb[6].mxu1 }
 0x275   :  { %v799_v51 = vrot.slane %v719_v49, 6  ;;  %v721_v55 = vpop.f32.mrb[7].mxu0  ;;  %v792_v61 = vpop.f32.mrb[7].mxu1  ;;  %v801_v29 = vrot.slane %v790_v50, 6  ;;  %v9776_v49 = vpack.c.bf16 %v1114_v3, %v1110_v2  ;;  %v1117_v50 = vld [vmem:[#allocation9 + $0x88] sm:$0xff]  ;;  %v9825_v3 = vpack.c.bf16 %v1146_v57, %v1142_v47 }
 0x276   :  { %v800_v63 = vrot.slane %v721_v55, 6  ;;  %v802_v23 = vrot.slane %v792_v61, 6  ;;  %v1119_v55 = vld [vmem:[#allocation9 + $0x98] sm:$0xff]  ;;  %v1153_v2 = vld [vmem:[#allocation9 + $0x1a8] sm:$0xff] }
 0x277   :  { %v807_v4 = vadd.f32 %v799_v51, %v585_v62  ;;  %v809_v37 = vadd.f32 %v801_v29, %v587_v35  ;;  %v1121_v51 = vld [vmem:[#allocation9 + $0xa8] sm:$0xff]  ;;  %v1123_v62 = vld [vmem:[#allocation9 + $0xb8] sm:$0xff] }
 0x278   :  { %v808_v12 = vadd.f32 %v800_v63, %v586_v10  ;;  %v810_v25 = vadd.f32 %v802_v23, %v588_v24  ;;  %v9781_v61 = vpack.c.bf16 %v1121_v51, %v1117_v50  ;;  %v1116_v63 = vld [vmem:[#allocation9 + $0x80] sm:$0xff]  ;;  %v9783_v10 = vpack.c.bf16 %v1123_v62, %v1119_v55  ;;  %v1125_v24 = vld [vmem:[#allocation9 + $0xc8] sm:$0xff]  ;;  %v1127_v29 = vld [vmem:[#allocation9 + $0xd8] sm:$0xff] }
 0x279   :  { %v7029_v13 = vmul.f32 -1.442695, %v807_v4  ;;  %v1120_v4 = vld [vmem:[#allocation9 + $0xa0] sm:$0xff]  ;;  %v9827_v50 = vpack.c.bf16 %v1153_v2, %v1149_v58  ;;  %v1151_v51 = vld [vmem:[#allocation9 + $0x198] sm:$0xff] }
 0x27a   :  { %v7030_v17 = vmul.f32 -1.442695, %v808_v12  ;;  %v7031_v36 = vmul.f32 -1.442695, %v810_v25  ;;  %v9785_v12 = vpack.c.bf16 %v1120_v4, %v1116_v63  ;;  %v1129_v25 = vld [vmem:[#allocation9 + $0xe8] sm:$0xff]  ;;  %v1155_v55 = vld [vmem:[#allocation9 + $0x1b8] sm:$0xff] }
 0x27b   :  { %8934 = vpow2.f32 %v7029_v13  ;;  %v1118_v13 = vld [vmem:[#allocation9 + $0x90] sm:$0xff]  ;;  %v9793_v35 = vpack.c.bf16 %v1129_v25, %v1125_v24  ;;  %v1148_v62 = vld [vmem:[#allocation9 + $0x180] sm:$0xff]  ;;  %v9829_v63 = vpack.c.bf16 %v1155_v55, %v1151_v51  ;;  %v1157_v25 = vld [vmem:[#allocation9 + $0x1c8] sm:$0xff] }
 0x27c   :  { %8936 = vpow2.f32 %v7030_v17  ;;  %v1122_v17 = vld [vmem:[#allocation9 + $0xb0] sm:$0xff]  ;;  %v1152_v4 = vld [vmem:[#allocation9 + $0x1a0] sm:$0xff]  ;;  %v840_v47 = vld [vmem:[#allocation3 + $0x8] sm:$0x30] }
 0x27d   :  { %8938 = vpow2.f32 %v7031_v36  ;;  %v9788_v23 = vpack.c.bf16 %v1122_v17, %v1118_v13  ;;  %v1131_v36 = vld [vmem:[#allocation9 + $0xf8] sm:$0xff]  ;;  %v1150_v13 = vld [vmem:[#allocation9 + $0x190] sm:$0xff]  ;;  %v9832_v24 = vpack.c.bf16 %v1152_v4, %v1148_v62  ;;  %v842_v55 = vld [vmem:[#allocation3 + $0x18] sm:$0x30] }
 0x27e   :  { %8940 = vtanh.f32 %v809_v37  ;;  %v1124_v37 = vld [vmem:[#allocation9 + $0xc0] sm:$0xff]  ;;  %v1154_v17 = vld [vmem:[#allocation9 + $0x1b0] sm:$0xff] }
 0x285   :  { %v8935_v42 = vpop.eup %8934 }
 0x286   :  { %v8937_v52 = vpop.eup %8936  ;;  %v814_v53 = vadd.f32 1.0, %v8935_v42  ;;  %v1128_v42 = vld [vmem:[#allocation9 + $0xe0] sm:$0xff] }
 0x287   :  { %v820_v54 = vadd.f32 1.0, %v8937_v52  ;;  %v8939_v59 = vpop.eup %8938  ;;  %v9795_v52 = vpack.c.bf16 %v1131_v36, %v1127_v29  ;;  %v1161_v29 = vld [vmem:[#allocation9 + $0x1e8] sm:$0xff]  ;;  %v1159_v36 = vld [vmem:[#allocation9 + $0x1d8] sm:$0xff] }
 0x288   :  { %8942 = vrcp.f32 %v814_v53  ;;  %v8941_v6 = vpop.eup %8940  ;;  %v827_v19 = vadd.f32 1.0, %v8939_v59  ;;  %v9797_v53 = vpack.c.bf16 %v1128_v42, %v1124_v37  ;;  %v1130_v59 = vld [vmem:[#allocation9 + $0xf0] sm:$0xff]  ;;  %v9836_v37 = vpack.c.bf16 %v1154_v17, %v1150_v13  ;;  %v841_v13 = vld [vmem:[#allocation3 + $0x10] sm:$0x30] }
 0x289   :  { %8944 = vrcp.f32 %v820_v54  ;;  %v1126_v54 = vld [vmem:[#allocation9 + $0xd0] sm:$0xff]  ;;  %v9838_v42 = vpack.c.bf16 %v1161_v29, %v1157_v25 }
 0x28a   :  { %8946 = vrcp.f32 %v827_v19  ;;  %v1139_v19 = vld [vmem:[#allocation9 + $0x138] sm:$0xff] }
 0x292   :  { %v8943_v7 = vpop.eup %8942 }
 0x293   :  { %v8945_v14 = vpop.eup %8944  ;;  %v834_v18 = vmul.f32 %v8943_v7, %v8941_v6  ;;  %v9800_v6 = vpack.c.bf16 %v1130_v59, %v1126_v54  ;;  %v1133_v7 = vld [vmem:[#allocation9 + $0x108] sm:$0xff]  ;;  %v1163_v54 = vld [vmem:[#allocation9 + $0x1f8] sm:$0xff]  ;;  %v1156_v59 = vld [vmem:[#allocation9 + $0x1c0] sm:$0xff] }
 0x294   :  { %v833_v5 = vmul.f32 %v8945_v14, %v831_v8  ;;  %v8947_v11 = vpop.eup %8946  ;;  %v1137_v8 = vld [vmem:[#allocation9 + $0x128] sm:$0xff]  ;;  %v1135_v14 = vld [vmem:[#allocation9 + $0x118] sm:$0xff] }
 0x296   :  { %v9752_v9 = vadd.f32 %v834_v18, %v833_v5  ;;  %v9805_v18 = vpack.c.bf16 %v1137_v8, %v1133_v7  ;;  %v1132_v5 = vld [vmem:[#allocation9 + $0x100] sm:$0xff]  ;;  %v9841_v8 = vpack.c.bf16 %v1163_v54, %v1159_v36 }
 0x297   :  { %v1160_v7 = vld [vmem:[#allocation9 + $0x1e0] sm:$0xff] }
 0x298   :  { %8948 = vtanh.f32 %v9752_v9 }
 0x2a2   :  { %v8949_v15 = vpop.eup %8948 }
 0x2a3   :  { %v837_v16 = vmul.f32 %v8949_v15, %v8947_v11  ;;  %v1136_v11 = vld [vmem:[#allocation9 + $0x120] sm:$0xff]  ;;  %v9807_v15 = vpack.c.bf16 %v1139_v19, %v1135_v14  ;;  %v1158_v14 = vld [vmem:[#allocation9 + $0x1d0] sm:$0xff] }
 0x2a4   :  { %v1162_v19 = vld [vmem:[#allocation9 + $0x1f0] sm:$0xff] }
 0x2a5   :  { %838 = vst [vmem:[#allocation2] sm:$0xc] %v837_v16  ;;  %v908_v20 = vrot.slane %v837_v16, 2  ;;  %v9809_v16 = vpack.c.bf16 %v1136_v11, %v1132_v5  ;;  %v9844_v5 = vpack.c.bf16 %v1160_v7, %v1156_v59  ;;  %v9848_v11 = vpack.c.bf16 %v1162_v19, %v1158_v14 }
 0x2a7   :  { %975 = vmatmul.mubr.f32.vlgmr.msra.gmra.mrb[8].mxu0 %v908_v20  ;;  %1046 = vmatmul.mubr.f32.vlgmr.msra.gmra.mrb[8].mxu1 %v908_v20  ;;  %v1134_v20 = vld [vmem:[#allocation9 + $0x110] sm:$0xff] }
 0x2a8   :  { %1231 = vmatprep.mubr.f32.mxu0 %v9453_v0  ;;  %1302 = vmatprep.mubr.f32.mxu1 %v9453_v0  ;;  %v9812_v31 = vpack.c.bf16 %v1138_v21, %v1134_v20 }
 0x2a9   :  { %7410 = vmatpush1.bf16.msra.mxu0 %v9761_v38  ;;  %7442 = vmatpush1.bf16.msra.mxu1 %v9764_v44 }
 0x2aa   :  { %7412 = vmatprep.subr.bf16.mxu0 %v9769_v48  ;;  %7444 = vmatprep.subr.bf16.mxu1 %v9771_v60 }
 0x2ad   :  { %7414 = vmatpush1.bf16.msra.mxu0 %v9773_v1  ;;  %7446 = vmatpush1.bf16.msra.mxu1 %v9776_v49 }
 0x2ae   :  { %7416 = vmatprep.subr.bf16.mxu0 %v9781_v61  ;;  %7448 = vmatprep.subr.bf16.mxu1 %v9783_v10 }
 0x2b1   :  { %7418 = vmatpush1.bf16.msra.mxu0 %v9785_v12  ;;  %7450 = vmatpush1.bf16.msra.mxu1 %v9788_v23 }
 0x2b2   :  { %7420 = vmatprep.subr.bf16.mxu0 %v9793_v35  ;;  %7452 = vmatprep.subr.bf16.mxu1 %v9795_v52 }
 0x2b5   :  { %7422 = vmatpush1.bf16.msra.mxu0 %v9797_v53  ;;  %7454 = vmatpush1.bf16.msra.mxu1 %v9800_v6 }
 0x2b6   :  { %7424 = vmatprep.subr.bf16.mxu0 %v9805_v18  ;;  %7456 = vmatprep.subr.bf16.mxu1 %v9807_v15 }
 0x2b9   :  { %7426 = vmatpush1.bf16.msra.mxu0 %v9809_v16  ;;  %7458 = vmatpush1.bf16.msra.mxu1 %v9812_v31 }
 0x2ba   :  { %7428 = vmatprep.subr.bf16.mxu0 %v9816_v40  ;;  %7460 = vmatprep.subr.bf16.mxu1 %v9818_v41 }
 0x2bd   :  { %7430 = vmatpush1.bf16.msra.mxu0 %v9821_v56  ;;  %7462 = vmatpush1.bf16.msra.mxu1 %v9825_v3 }
 0x2be   :  { %7432 = vmatprep.subr.bf16.mxu0 %v9827_v50  ;;  %7464 = vmatprep.subr.bf16.mxu1 %v9829_v63 }
 0x2c1   :  { %7434 = vmatpush1.bf16.msra.mxu0 %v9832_v24  ;;  %7466 = vmatpush1.bf16.msra.mxu1 %v9836_v37 }
 0x2c2   :  { %7436 = vmatprep.subr.bf16.mxu0 %v9838_v42  ;;  %7468 = vmatprep.subr.bf16.mxu1 %v9841_v8 }
 0x2c5   :  { %7438 = vmatpush1.bf16.msra.mxu0 %v9844_v5  ;;  %7470 = vmatpush1.bf16.msra.mxu1 %v9848_v11 }
 0x2c6   :  { %7472 = vmatprep.subr.bf16.mxu0 %v9757_v32  ;;  %7504 = vmatprep.subr.bf16.mxu1 %v9759_v39 }
 0x37a   :  { %v976_v20 = vpop.f32.mrb[8].mxu0  ;;  %v1047_v21 = vpop.f32.mrb[8].mxu1 }
 0x37b   :  { %v1056_v26 = vrot.slane %v976_v20, 4  ;;  %v978_v33 = vpop.f32.mrb[9].mxu0  ;;  %v1049_v43 = vpop.f32.mrb[9].mxu1  ;;  %v1058_v4 = vrot.slane %v1047_v21, 4  ;;  %v1088_v20 = vrot.slane %v9752_v9, 6 }
 0x37c   :  { %v1057_v45 = vrot.slane %v978_v33, 4  ;;  %v1059_v51 = vrot.slane %v1049_v43, 4 }
 0x37d   :  { %v1064_v46 = vadd.f32 %v1056_v26, %v839_v34  ;;  %v1066_v25 = vadd.f32 %v1058_v4, %v841_v13 }
 0x37e   :  { %v1065_v57 = vadd.f32 %v1057_v45, %v840_v47  ;;  %v1067_v62 = vadd.f32 %v1059_v51, %v842_v55 }
 0x37f   :  { %v7032_v58 = vmul.f32 -1.442695, %v1064_v46 }
 0x380   :  { %v7033_v2 = vmul.f32 -1.442695, %v1065_v57  ;;  %v7034_v17 = vmul.f32 -1.442695, %v1067_v62  ;;  %v1096_v62 = vld [vmem:[#allocation3] sm:$0xc0] }
 0x381   :  { %8950 = vpow2.f32 %v7032_v58 }
 0x382   :  { %8952 = vpow2.f32 %v7033_v2 }
 0x383   :  { %8954 = vpow2.f32 %v7034_v17  ;;  %v1097_v17 = vld [vmem:[#allocation3 + $0x8] sm:$0xc0] }
 0x384   :  { %8956 = vtanh.f32 %v1066_v25 }
 0x38b   :  { %v8951_v29 = vpop.eup %8950 }
 0x38c   :  { %v8953_v36 = vpop.eup %8952  ;;  %v1071_v54 = vadd.f32 1.0, %v8951_v29 }
 0x38d   :  { %v1077_v59 = vadd.f32 1.0, %v8953_v36  ;;  %v8955_v7 = vpop.eup %8954 }
 0x38e   :  { %8958 = vrcp.f32 %v1071_v54  ;;  %v8957_v14 = vpop.eup %8956  ;;  %v1084_v43 = vadd.f32 1.0, %v8955_v7 }
 0x38f   :  { %8960 = vrcp.f32 %v1077_v59  ;;  %v1099_v59 = vld [vmem:[#allocation3 + $0x18] sm:$0xc0] }
 0x390   :  { %8962 = vrcp.f32 %v1084_v43 }
 0x398   :  { %v8959_v19 = vpop.eup %8958 }
 0x399   :  { %v8961_v26 = vpop.eup %8960  ;;  %v1091_v33 = vmul.f32 %v8959_v19, %v8957_v14  ;;  %v1098_v19 = vld [vmem:[#allocation3 + $0x10] sm:$0xc0] }
 0x39a   :  { %v1090_v21 = vmul.f32 %v8961_v26, %v1088_v20  ;;  %v8963_v45 = vpop.eup %8962 }
 0x39c   :  { %v9856_v34 = vadd.f32 %v1091_v33, %v1090_v21 }
 0x39e   :  { %8964 = vtanh.f32 %v9856_v34 }
 0x3a8   :  { %v8965_v46 = vpop.eup %8964 }
 0x3a9   :  { %v1094_v47 = vmul.f32 %v8965_v46, %v8963_v45 }
 0x3ab   :  { %1095 = vst [vmem:[#allocation2] sm:$0x30] %v1094_v47  ;;  %v1165_v57 = vrot.slane %v1094_v47, 4 }
 0x3ad   :  { %1232 = vmatmul.mubr.f32.vlgmr.msra.gmra.mrb[10].mxu0 %v1165_v57  ;;  %1303 = vmatmul.mubr.f32.vlgmr.msra.gmra.mrb[10].mxu1 %v1165_v57 }
 0x3ae   :  { %7474 = vmatpush1.bf16.msra.mxu0 %v9761_v38  ;;  %7506 = vmatpush1.bf16.msra.mxu1 %v9764_v44 }
 0x3af   :  { %7476 = vmatprep.subr.bf16.mxu0 %v9769_v48  ;;  %7508 = vmatprep.subr.bf16.mxu1 %v9771_v60 }
 0x3b0   :  { %1488 = vmatprep.mubr.f32.mxu0 %v9453_v0  ;;  %1559 = vmatprep.mubr.f32.mxu1 %v9453_v0 }
 0x3b2   :  { %7478 = vmatpush1.bf16.msra.mxu0 %v9773_v1  ;;  %7510 = vmatpush1.bf16.msra.mxu1 %v9776_v49 }
 0x3b3   :  { %7480 = vmatprep.subr.bf16.mxu0 %v9781_v61  ;;  %7512 = vmatprep.subr.bf16.mxu1 %v9783_v10 }
 0x3b6   :  { %7482 = vmatpush1.bf16.msra.mxu0 %v9785_v12  ;;  %7514 = vmatpush1.bf16.msra.mxu1 %v9788_v23 }
 0x3b7   :  { %7484 = vmatprep.subr.bf16.mxu0 %v9793_v35  ;;  %7516 = vmatprep.subr.bf16.mxu1 %v9795_v52 }
 0x3ba   :  { %7486 = vmatpush1.bf16.msra.mxu0 %v9797_v53  ;;  %7518 = vmatpush1.bf16.msra.mxu1 %v9800_v6 }
 0x3bb   :  { %7488 = vmatprep.subr.bf16.mxu0 %v9805_v18  ;;  %7520 = vmatprep.subr.bf16.mxu1 %v9807_v15 }
 0x3be   :  { %7490 = vmatpush1.bf16.msra.mxu0 %v9809_v16  ;;  %7522 = vmatpush1.bf16.msra.mxu1 %v9812_v31 }
 0x3bf   :  { %7492 = vmatprep.subr.bf16.mxu0 %v9816_v40  ;;  %7524 = vmatprep.subr.bf16.mxu1 %v9818_v41 }
 0x3c2   :  { %7494 = vmatpush1.bf16.msra.mxu0 %v9821_v56  ;;  %7526 = vmatpush1.bf16.msra.mxu1 %v9825_v3 }
 0x3c3   :  { %7496 = vmatprep.subr.bf16.mxu0 %v9827_v50  ;;  %7528 = vmatprep.subr.bf16.mxu1 %v9829_v63 }
 0x3c6   :  { %7498 = vmatpush1.bf16.msra.mxu0 %v9832_v24  ;;  %7530 = vmatpush1.bf16.msra.mxu1 %v9836_v37 }
 0x3c7   :  { %7500 = vmatprep.subr.bf16.mxu0 %v9838_v42  ;;  %7532 = vmatprep.subr.bf16.mxu1 %v9841_v8 }
 0x3ca   :  { %7502 = vmatpush1.bf16.msra.mxu0 %v9844_v5  ;;  %7534 = vmatpush1.bf16.msra.mxu1 %v9848_v11 }
 0x3cb   :  { %7536 = vmatprep.subr.bf16.mxu0 %v9757_v32  ;;  %7568 = vmatprep.subr.bf16.mxu1 %v9759_v39 }
 0x480   :  { %v1233_v9 = vpop.f32.mrb[10].mxu0  ;;  %v1304_v58 = vpop.f32.mrb[10].mxu1 }
 0x481   :  { %v1313_v2 = vrot.slane %v1233_v9, 2  ;;  %v1235_v51 = vpop.f32.mrb[11].mxu0  ;;  %v1306_v55 = vpop.f32.mrb[11].mxu1  ;;  %v1315_v14 = vrot.slane %v1304_v58, 2  ;;  %v1345_v9 = vrot.slane %v9856_v34, 6 }
 0x482   :  { %v1314_v4 = vrot.slane %v1235_v51, 2  ;;  %v1316_v54 = vrot.slane %v1306_v55, 2  ;;  %v1353_v34 = vld [vmem:[#allocation3 + $0x20] sm:$0x3] }
 0x483   :  { %v1321_v13 = vadd.f32 %v1313_v2, %v1096_v62  ;;  %v1323_v26 = vadd.f32 %v1315_v14, %v1098_v19 }
 0x484   :  { %v1322_v25 = vadd.f32 %v1314_v4, %v1097_v17  ;;  %v1324_v7 = vadd.f32 %v1316_v54, %v1099_v59  ;;  %v1354_v59 = vld [vmem:[#allocation3 + $0x28] sm:$0x3] }
 0x485   :  { %v7035_v29 = vmul.f32 -1.442695, %v1321_v13 }
 0x486   :  { %v7036_v36 = vmul.f32 -1.442695, %v1322_v25  ;;  %v7037_v20 = vmul.f32 -1.442695, %v1324_v7 }
 0x487   :  { %8966 = vpow2.f32 %v7035_v29 }
 0x488   :  { %8968 = vpow2.f32 %v7036_v36 }
 0x489   :  { %8970 = vpow2.f32 %v7037_v20 }
 0x48a   :  { %8972 = vtanh.f32 %v1323_v26 }
 0x491   :  { %v8967_v33 = vpop.eup %8966 }
 0x492   :  { %v8969_v43 = vpop.eup %8968  ;;  %v1328_v21 = vadd.f32 1.0, %v8967_v33  ;;  %v1356_v33 = vld [vmem:[#allocation3 + $0x38] sm:$0x3] }
 0x493   :  { %v1334_v45 = vadd.f32 1.0, %v8969_v43  ;;  %v8971_v46 = vpop.eup %8970 }
 0x494   :  { %8974 = vrcp.f32 %v1328_v21  ;;  %v8973_v47 = vpop.eup %8972  ;;  %v1341_v55 = vadd.f32 1.0, %v8971_v46  ;;  %v1355_v21 = vld [vmem:[#allocation3 + $0x30] sm:$0x3] }
 0x495   :  { %8976 = vrcp.f32 %v1334_v45 }
 0x496   :  { %8978 = vrcp.f32 %v1341_v55 }
 0x49e   :  { %v8975_v57 = vpop.eup %8974 }
 0x49f   :  { %v8977_v2 = vpop.eup %8976  ;;  %v1348_v51 = vmul.f32 %v8975_v57, %v8973_v47 }
 0x4a0   :  { %v1347_v58 = vmul.f32 %v8977_v2, %v1345_v9  ;;  %v8979_v4 = vpop.eup %8978 }
 0x4a2   :  { %v9894_v62 = vadd.f32 %v1348_v51, %v1347_v58 }
 0x4a4   :  { %8980 = vtanh.f32 %v9894_v62  ;;  %v1590_v55 = vrot.slane %v9894_v62, 6 }
 0x4ae   :  { %v8981_v13 = vpop.eup %8980 }
 0x4af   :  { %v1351_v17 = vmul.f32 %v8981_v13, %v8979_v4 }
 0x4b1   :  { %1352 = vst [vmem:[#allocation2] sm:$0xc0] %v1351_v17  ;;  %v1422_v25 = vrot.slane %v1351_v17, 6 }
 0x4b3   :  { %1489 = vmatmul.mubr.f32.vlgmr.msra.gmra.mrb[12].mxu0 %v1422_v25  ;;  %1560 = vmatmul.mubr.f32.vlgmr.msra.gmra.mrb[12].mxu1 %v1422_v25 }
 0x4b4   :  { %7538 = vmatpush1.bf16.msra.mxu0 %v9761_v38  ;;  %7570 = vmatpush1.bf16.msra.mxu1 %v9764_v44 }
 0x4b5   :  { %7540 = vmatprep.subr.bf16.mxu0 %v9769_v48  ;;  %7572 = vmatprep.subr.bf16.mxu1 %v9771_v60 }
 0x4b6   :  { %1730 = vmatprep.mubr.f32.mxu0 %v9453_v0  ;;  %1801 = vmatprep.mubr.f32.mxu1 %v9453_v0 }
 0x4b8   :  { %7542 = vmatpush1.bf16.msra.mxu0 %v9773_v1  ;;  %7574 = vmatpush1.bf16.msra.mxu1 %v9776_v49 }
 0x4b9   :  { %7544 = vmatprep.subr.bf16.mxu0 %v9781_v61  ;;  %7576 = vmatprep.subr.bf16.mxu1 %v9783_v10 }
 0x4bc   :  { %7546 = vmatpush1.bf16.msra.mxu0 %v9785_v12  ;;  %7578 = vmatpush1.bf16.msra.mxu1 %v9788_v23 }
 0x4bd   :  { %7548 = vmatprep.subr.bf16.mxu0 %v9793_v35  ;;  %7580 = vmatprep.subr.bf16.mxu1 %v9795_v52 }
 0x4c0   :  { %7550 = vmatpush1.bf16.msra.mxu0 %v9797_v53  ;;  %7582 = vmatpush1.bf16.msra.mxu1 %v9800_v6 }
 0x4c1   :  { %7552 = vmatprep.subr.bf16.mxu0 %v9805_v18  ;;  %7584 = vmatprep.subr.bf16.mxu1 %v9807_v15 }
 0x4c4   :  { %7554 = vmatpush1.bf16.msra.mxu0 %v9809_v16  ;;  %7586 = vmatpush1.bf16.msra.mxu1 %v9812_v31 }
 0x4c5   :  { %7556 = vmatprep.subr.bf16.mxu0 %v9816_v40  ;;  %7588 = vmatprep.subr.bf16.mxu1 %v9818_v41 }
 0x4c8   :  { %7558 = vmatpush1.bf16.msra.mxu0 %v9821_v56  ;;  %7590 = vmatpush1.bf16.msra.mxu1 %v9825_v3 }
 0x4c9   :  { %7560 = vmatprep.subr.bf16.mxu0 %v9827_v50  ;;  %7592 = vmatprep.subr.bf16.mxu1 %v9829_v63 }
 0x4cc   :  { %7562 = vmatpush1.bf16.msra.mxu0 %v9832_v24  ;;  %7594 = vmatpush1.bf16.msra.mxu1 %v9836_v37 }
 0x4cd   :  { %7564 = vmatprep.subr.bf16.mxu0 %v9838_v42  ;;  %7596 = vmatprep.subr.bf16.mxu1 %v9841_v8 }
 0x4d0   :  { %7566 = vmatpush1.bf16.msra.mxu0 %v9844_v5  ;;  %7598 = vmatpush1.bf16.msra.mxu1 %v9848_v11 }
 0x4d1   :  { %7600 = vmatprep.subr.bf16.mxu0 %v9757_v32  ;;  %7632 = vmatprep.subr.bf16.mxu1 %v9759_v39 }
 0x586   :  { %v1490_v29 = vpop.f32.mrb[12].mxu0  ;;  %v1561_v36 = vpop.f32.mrb[12].mxu1 }
 0x587   :  { %v1566_v54 = vadd.f32 %v1490_v29, %v1353_v34  ;;  %v1492_v7 = vpop.f32.mrb[13].mxu0  ;;  %v1563_v14 = vpop.f32.mrb[13].mxu1  ;;  %v1568_v46 = vadd.f32 %v1561_v36, %v1355_v21  ;;  %v2120_v21 = vld [vmem:[#allocation9 + $0x38] sm:$0xff] }
 0x588   :  { %v1567_v19 = vadd.f32 %v1492_v7, %v1354_v59  ;;  %v1569_v43 = vadd.f32 %v1563_v14, %v1356_v33  ;;  %v2116_v33 = vld [vmem:[#allocation9 + $0x18] sm:$0xff] }
 0x589   :  { %v7038_v20 = vmul.f32 -1.442695, %v1566_v54 }
 0x58a   :  { %v7039_v26 = vmul.f32 -1.442695, %v1567_v19  ;;  %v7040_v45 = vmul.f32 -1.442695, %v1569_v43 }
 0x58b   :  { %8982 = vpow2.f32 %v7038_v20  ;;  %v2114_v20 = vld [vmem:[#allocation9 + $0x8] sm:$0xff] }
 0x58c   :  { %8984 = vpow2.f32 %v7039_v26  ;;  %v2118_v26 = vld [vmem:[#allocation9 + $0x28] sm:$0xff] }
 0x58d   :  { %8986 = vpow2.f32 %v7040_v45  ;;  %v7663_v43 = vpack.c.bf16 %v2118_v26, %v2114_v20  ;;  %v2113_v45 = vld [vmem:[#allocation9] sm:$0xff]  ;;  %v2151_v20 = vld [vmem:[#allocation9 + $0x130] sm:$0xff]  ;;  %v2154_v26 = vld [vmem:[#allocation9 + $0x148] sm:$0xff] }
 0x58e   :  { %8988 = vtanh.f32 %v1568_v46  ;;  %v2117_v46 = vld [vmem:[#allocation9 + $0x20] sm:$0xff] }
 0x595   :  { %v8983_v32 = vpop.eup %8982 }
 0x596   :  { %v8985_v47 = vpop.eup %8984  ;;  %v1573_v39 = vadd.f32 1.0, %v8983_v32  ;;  %v7695_v32 = vpack.c.bf16 %v2120_v21, %v2116_v33  ;;  %v2156_v21 = vld [vmem:[#allocation9 + $0x158] sm:$0xff] }
 0x597   :  { %v1579_v57 = vadd.f32 1.0, %v8985_v47  ;;  %v8987_v9 = vpop.eup %8986  ;;  %v7665_v47 = vpack.c.bf16 %v2117_v46, %v2113_v45  ;;  %v2160_v45 = vld [vmem:[#allocation9 + $0x178] sm:$0xff] }
 0x598   :  { %8990 = vrcp.f32 %v1573_v39  ;;  %v8989_v2 = vpop.eup %8988  ;;  %v1586_v13 = vadd.f32 1.0, %v8987_v9  ;;  %v2115_v39 = vld [vmem:[#allocation9 + $0x10] sm:$0xff] }
 0x599   :  { %8992 = vrcp.f32 %v1579_v57  ;;  %v2119_v57 = vld [vmem:[#allocation9 + $0x30] sm:$0xff] }
 0x59a   :  { %8994 = vrcp.f32 %v1586_v13  ;;  %v7697_v9 = vpack.c.bf16 %v2119_v57, %v2115_v39  ;;  %v2121_v13 = vld [vmem:[#allocation9 + $0x40] sm:$0xff]  ;;  %v2155_v57 = vld [vmem:[#allocation9 + $0x150] sm:$0xff] }
 0x59b   :  { %v2157_v39 = vld [vmem:[#allocation9 + $0x160] sm:$0xff] }
 0x5a2   :  { %v8991_v51 = vpop.eup %8990 }
 0x5a3   :  { %v8993_v58 = vpop.eup %8992  ;;  %v1593_v4 = vmul.f32 %v8991_v51, %v8989_v2  ;;  %v2122_v2 = vld [vmem:[#allocation9 + $0x48] sm:$0xff] }
 0x5a4   :  { %v1592_v17 = vmul.f32 %v8993_v58, %v1590_v55  ;;  %v8995_v34 = vpop.eup %8994  ;;  %v2126_v51 = vld [vmem:[#allocation9 + $0x68] sm:$0xff]  ;;  %v2124_v55 = vld [vmem:[#allocation9 + $0x58] sm:$0xff] }
 0x5a5   :  { %v7667_v58 = vpack.c.bf16 %v2126_v51, %v2122_v2  ;;  %v2159_v2 = vld [vmem:[#allocation9 + $0x170] sm:$0xff]  ;;  %v2162_v51 = vld [vmem:[#allocation9 + $0x188] sm:$0xff] }
 0x5a6   :  { %v9932_v25 = vadd.f32 %v1593_v4, %v1592_v17  ;;  %v2128_v4 = vld [vmem:[#allocation9 + $0x78] sm:$0xff]  ;;  %v2125_v17 = vld [vmem:[#allocation9 + $0x60] sm:$0xff] }
 0x5a8   :  { %8996 = vtanh.f32 %v9932_v25 }
 0x5b2   :  { %v8997_v29 = vpop.eup %8996 }
 0x5b3   :  { %v1596_v36 = vmul.f32 %v8997_v29, %v8995_v34  ;;  %v7669_v34 = vpack.c.bf16 %v2125_v17, %v2121_v13  ;;  %v2123_v29 = vld [vmem:[#allocation9 + $0x50] sm:$0xff]  ;;  %v2164_v13 = vld [vmem:[#allocation9 + $0x198] sm:$0xff] }
 0x5b4   :  { %v2168_v17 = vld [vmem:[#allocation9 + $0x1b8] sm:$0xff] }
 0x5b5   :  { %1597 = vst [vmem:[#allocation2 + $0x8] sm:$0x3] %v1596_v36  ;;  %1731 = vmatmul.mubr.f32.vlgmr.msra.gmra.mrb[14].mxu0 %v1596_v36  ;;  %1802 = vmatmul.mubr.f32.vlgmr.msra.gmra.mrb[14].mxu1 %v1596_v36  ;;  %v2127_v36 = vld [vmem:[#allocation9 + $0x70] sm:$0xff] }
 0x5b6   :  { %7602 = vmatpush1.bf16.msra.mxu0 %v9761_v38  ;;  %7634 = vmatpush1.bf16.msra.mxu1 %v9764_v44 }
 0x5b7   :  { %7604 = vmatprep.subr.bf16.mxu0 %v9769_v48  ;;  %7636 = vmatprep.subr.bf16.mxu1 %v9771_v60 }
 0x5b8   :  { %1987 = vmatprep.mubr.f32.mxu0 %v9453_v0  ;;  %2058 = vmatprep.mubr.f32.mxu1 %v9453_v0 }
 0x5ba   :  { %7606 = vmatpush1.bf16.msra.mxu0 %v9773_v1  ;;  %7638 = vmatpush1.bf16.msra.mxu1 %v9776_v49  ;;  %v1598_v49 = vld [vmem:[#allocation3 + $0x20] sm:$0xc] }
 0x5bb   :  { %7608 = vmatprep.subr.bf16.mxu0 %v9781_v61  ;;  %7640 = vmatprep.subr.bf16.mxu1 %v9783_v10 }
 0x5be   :  { %7610 = vmatpush1.bf16.msra.mxu0 %v9785_v12  ;;  %7642 = vmatpush1.bf16.msra.mxu1 %v9788_v23  ;;  %v1599_v12 = vld [vmem:[#allocation3 + $0x28] sm:$0xc] }
 0x5bf   :  { %7612 = vmatprep.subr.bf16.mxu0 %v9793_v35  ;;  %7644 = vmatprep.subr.bf16.mxu1 %v9795_v52 }
 0x5c2   :  { %7614 = vmatpush1.bf16.msra.mxu0 %v9797_v53  ;;  %7646 = vmatpush1.bf16.msra.mxu1 %v9800_v6  ;;  %v1601_v6 = vld [vmem:[#allocation3 + $0x38] sm:$0xc] }
 0x5c3   :  { %7616 = vmatprep.subr.bf16.mxu0 %v9805_v18  ;;  %7648 = vmatprep.subr.bf16.mxu1 %v9807_v15 }
 0x5c6   :  { %7618 = vmatpush1.bf16.msra.mxu0 %v9809_v16  ;;  %7650 = vmatpush1.bf16.msra.mxu1 %v9812_v31  ;;  %v1600_v16 = vld [vmem:[#allocation3 + $0x30] sm:$0xc] }
 0x5c7   :  { %7620 = vmatprep.subr.bf16.mxu0 %v9816_v40  ;;  %7652 = vmatprep.subr.bf16.mxu1 %v9818_v41 }
 0x5ca   :  { %7622 = vmatpush1.bf16.msra.mxu0 %v9821_v56  ;;  %7654 = vmatpush1.bf16.msra.mxu1 %v9825_v3 }
 0x5cb   :  { %7624 = vmatprep.subr.bf16.mxu0 %v9827_v50  ;;  %7656 = vmatprep.subr.bf16.mxu1 %v9829_v63 }
 0x5ce   :  { %7626 = vmatpush1.bf16.msra.mxu0 %v9832_v24  ;;  %7658 = vmatpush1.bf16.msra.mxu1 %v9836_v37 }
 0x5cf   :  { %7628 = vmatprep.subr.bf16.mxu0 %v9838_v42  ;;  %7660 = vmatprep.subr.bf16.mxu1 %v9841_v8  ;;  %v1844_v42 = vrot.slane %v9932_v25, 6  ;;  %v7699_v25 = vpack.c.bf16 %v2128_v4, %v2124_v55  ;;  %v2166_v55 = vld [vmem:[#allocation9 + $0x1a8] sm:$0xff] }
 0x5d0   :  { %v7687_v4 = vpack.c.bf16 %v2166_v55, %v2162_v51 }
 0x5d2   :  { %7630 = vmatpush1.bf16.msra.mxu0 %v9844_v5  ;;  %7662 = vmatpush1.bf16.msra.mxu1 %v9848_v11 }
 0x5d3   :  { %7664 = vmatprep.subr.bf16.mxu0 %v7663_v43  ;;  %7696 = vmatprep.subr.bf16.mxu1 %v7695_v32  ;;  %v2158_v43 = vld [vmem:[#allocation9 + $0x168] sm:$0xff]  ;;  %v7715_v32 = vpack.c.bf16 %v2160_v45, %v2156_v21 }
 0x5d4   :  { %v7683_v46 = vpack.c.bf16 %v2158_v43, %v2154_v26 }
 0x688   :  { %v1732_v38 = vpop.f32.mrb[14].mxu0  ;;  %v1803_v44 = vpop.f32.mrb[14].mxu1 }
 0x689   :  { %v1812_v48 = vrot.slane %v1732_v38, 6  ;;  %v1734_v60 = vpop.f32.mrb[15].mxu0  ;;  %v1805_v1 = vpop.f32.mrb[15].mxu1  ;;  %v1814_v15 = vrot.slane %v1803_v44, 6  ;;  %v7701_v38 = vpack.c.bf16 %v2127_v36, %v2123_v29  ;;  %v2130_v44 = vld [vmem:[#allocation9 + $0x88] sm:$0xff]  ;;  %v2165_v29 = vld [vmem:[#allocation9 + $0x1a0] sm:$0xff] }
 0x68a   :  { %v1813_v61 = vrot.slane %v1734_v60, 6  ;;  %v1815_v53 = vrot.slane %v1805_v1, 6  ;;  %v2132_v60 = vld [vmem:[#allocation9 + $0x98] sm:$0xff]  ;;  %v2163_v36 = vld [vmem:[#allocation9 + $0x190] sm:$0xff] }
 0x68b   :  { %v1820_v10 = vadd.f32 %v1812_v48, %v1598_v49  ;;  %v1822_v40 = vadd.f32 %v1814_v15, %v1600_v16  ;;  %v2134_v48 = vld [vmem:[#allocation9 + $0xa8] sm:$0xff]  ;;  %v2136_v49 = vld [vmem:[#allocation9 + $0xb8] sm:$0xff] }
 0x68c   :  { %v1821_v23 = vadd.f32 %v1813_v61, %v1599_v12  ;;  %v1823_v18 = vadd.f32 %v1815_v53, %v1601_v6  ;;  %v7671_v1 = vpack.c.bf16 %v2134_v48, %v2130_v44  ;;  %v2129_v61 = vld [vmem:[#allocation9 + $0x80] sm:$0xff]  ;;  %v7703_v12 = vpack.c.bf16 %v2136_v49, %v2132_v60  ;;  %v2138_v6 = vld [vmem:[#allocation9 + $0xc8] sm:$0xff]  ;;  %v2140_v15 = vld [vmem:[#allocation9 + $0xd8] sm:$0xff] }
 0x68d   :  { %v7041_v35 = vmul.f32 -1.442695, %v1820_v10  ;;  %v2133_v10 = vld [vmem:[#allocation9 + $0xa0] sm:$0xff]  ;;  %v2170_v48 = vld [vmem:[#allocation9 + $0x1c8] sm:$0xff] }
 0x68e   :  { %v7042_v52 = vmul.f32 -1.442695, %v1821_v23  ;;  %v7043_v31 = vmul.f32 -1.442695, %v1823_v18  ;;  %v7673_v23 = vpack.c.bf16 %v2133_v10, %v2129_v61  ;;  %v2142_v18 = vld [vmem:[#allocation9 + $0xe8] sm:$0xff]  ;;  %v2176_v10 = vld [vmem:[#allocation9 + $0x1f8] sm:$0xff] }
 0x68f   :  { %8998 = vpow2.f32 %v7041_v35  ;;  %v2131_v35 = vld [vmem:[#allocation9 + $0x90] sm:$0xff]  ;;  %v7675_v16 = vpack.c.bf16 %v2142_v18, %v2138_v6  ;;  %v2174_v60 = vld [vmem:[#allocation9 + $0x1e8] sm:$0xff] }
 0x690   :  { %9000 = vpow2.f32 %v7042_v52  ;;  %v2135_v52 = vld [vmem:[#allocation9 + $0xb0] sm:$0xff]  ;;  %v7691_v61 = vpack.c.bf16 %v2174_v60, %v2170_v48  ;;  %v2370_v6 = vld [vmem:[#allocation7 + $0x208] sm:$0xff]  ;;  %v2380_v60 = vld [vmem:[#allocation7 + $0x258] sm:$0xff] }
 0x691   :  { %9002 = vpow2.f32 %v7043_v31  ;;  %v7705_v53 = vpack.c.bf16 %v2135_v52, %v2131_v35  ;;  %v2144_v31 = vld [vmem:[#allocation9 + $0xf8] sm:$0xff]  ;;  %v2171_v52 = vld [vmem:[#allocation9 + $0x1d0] sm:$0xff]  ;;  %v2374_v18 = vld [vmem:[#allocation7 + $0x228] sm:$0xff] }
 0x692   :  { %9004 = vtanh.f32 %v1822_v40  ;;  %v2137_v40 = vld [vmem:[#allocation9 + $0xc0] sm:$0xff]  ;;  %v2382_v48 = vld [vmem:[#allocation7 + $0x268] sm:$0xff] }
 0x699   :  { %v8999_v41 = vpop.eup %8998 }
 0x69a   :  { %v9001_v56 = vpop.eup %9000  ;;  %v1827_v3 = vadd.f32 1.0, %v8999_v41  ;;  %v2141_v41 = vld [vmem:[#allocation9 + $0xe0] sm:$0xff] }
 0x69b   :  { %v1833_v50 = vadd.f32 1.0, %v9001_v56  ;;  %v9003_v63 = vpop.eup %9002  ;;  %v7707_v56 = vpack.c.bf16 %v2144_v31, %v2140_v15  ;;  %v2372_v15 = vld [vmem:[#allocation7 + $0x218] sm:$0xff] }
 0x69c   :  { %9006 = vrcp.f32 %v1827_v3  ;;  %v9005_v24 = vpop.eup %9004  ;;  %v1840_v11 = vadd.f32 1.0, %v9003_v63  ;;  %v7677_v3 = vpack.c.bf16 %v2141_v41, %v2137_v40  ;;  %v2143_v63 = vld [vmem:[#allocation9 + $0xf0] sm:$0xff]  ;;  %v7727_v41 = vpack.c.bf16 %v2374_v18, %v2370_v6  ;;  %v2386_v18 = vld [vmem:[#allocation7 + $0x288] sm:$0xff] }
 0x69d   :  { %9008 = vrcp.f32 %v1833_v50  ;;  %v2139_v50 = vld [vmem:[#allocation9 + $0xd0] sm:$0xff] }
 0x69e   :  { %9010 = vrcp.f32 %v1840_v11  ;;  %v2152_v11 = vld [vmem:[#allocation9 + $0x138] sm:$0xff]  ;;  %v2383_v6 = vld [vmem:[#allocation7 + $0x270] sm:$0xff] }
 0x6a6   :  { %v9007_v37 = vpop.eup %9006 }
 0x6a7   :  { %v9009_v8 = vpop.eup %9008  ;;  %v1847_v5 = vmul.f32 %v9007_v37, %v9005_v24  ;;  %v7709_v24 = vpack.c.bf16 %v2143_v63, %v2139_v50  ;;  %v2146_v37 = vld [vmem:[#allocation9 + $0x108] sm:$0xff] }
 0x6a8   :  { %v1846_v62 = vmul.f32 %v9009_v8, %v1844_v42  ;;  %v9011_v59 = vpop.eup %9010  ;;  %v2150_v42 = vld [vmem:[#allocation9 + $0x128] sm:$0xff]  ;;  %v2148_v8 = vld [vmem:[#allocation9 + $0x118] sm:$0xff] }
 0x6aa   :  { %v9968_v54 = vadd.f32 %v1847_v5, %v1846_v62  ;;  %v7679_v5 = vpack.c.bf16 %v2150_v42, %v2146_v37  ;;  %v2145_v62 = vld [vmem:[#allocation9 + $0x100] sm:$0xff]  ;;  %v1852_v42 = vld [vmem:[#allocation3 + $0x20] sm:$0x30] }
 0x6ac   :  { %9012 = vtanh.f32 %v9968_v54 }
 0x6b6   :  { %v9013_v7 = vpop.eup %9012 }
 0x6b7   :  { %v1850_v14 = vmul.f32 %v9013_v7, %v9011_v59  ;;  %v2149_v59 = vld [vmem:[#allocation9 + $0x120] sm:$0xff]  ;;  %v7711_v7 = vpack.c.bf16 %v2152_v11, %v2148_v8  ;;  %v1853_v11 = vld [vmem:[#allocation3 + $0x28] sm:$0x30] }
 0x6b9   :  { %1851 = vst [vmem:[#allocation2 + $0x8] sm:$0xc] %v1850_v14  ;;  %v1921_v19 = vrot.slane %v1850_v14, 2  ;;  %v7681_v14 = vpack.c.bf16 %v2149_v59, %v2145_v62 }
 0x6bb   :  { %1988 = vmatmul.mubr.f32.vlgmr.msra.gmra.mrb[16].mxu0 %v1921_v19  ;;  %2059 = vmatmul.mubr.f32.vlgmr.msra.gmra.mrb[16].mxu1 %v1921_v19  ;;  %v2147_v19 = vld [vmem:[#allocation9 + $0x110] sm:$0xff] }
 0x6bc   :  { %2244 = vmatprep.mubr.f32.mxu0 %v9453_v0  ;;  %2315 = vmatprep.mubr.f32.mxu1 %v9453_v0  ;;  %v7713_v33 = vpack.c.bf16 %v2151_v20, %v2147_v19  ;;  %v1855_v19 = vld [vmem:[#allocation3 + $0x38] sm:$0x30] }
 0x6bd   :  { %7666 = vmatpush1.bf16.msra.mxu0 %v7665_v47  ;;  %7698 = vmatpush1.bf16.msra.mxu1 %v7697_v9  ;;  %v2153_v47 = vld [vmem:[#allocation9 + $0x140] sm:$0xff] }
 0x6be   :  { %7668 = vmatprep.subr.bf16.mxu0 %v7667_v58  ;;  %7700 = vmatprep.subr.bf16.mxu1 %v7699_v25  ;;  %v7685_v9 = vpack.c.bf16 %v2157_v39, %v2153_v47  ;;  %v7717_v58 = vpack.c.bf16 %v2159_v2, %v2155_v57  ;;  %v2161_v25 = vld [vmem:[#allocation9 + $0x180] sm:$0xff]  ;;  %v2101_v2 = vrot.slane %v9968_v54, 6 }
 0x6bf   :  { %v7689_v44 = vpack.c.bf16 %v2165_v29, %v2161_v25  ;;  %v2373_v25 = vld [vmem:[#allocation7 + $0x220] sm:$0xff]  ;;  %v2371_v29 = vld [vmem:[#allocation7 + $0x210] sm:$0xff] }
 0x6c1   :  { %7670 = vmatpush1.bf16.msra.mxu0 %v7669_v34  ;;  %7702 = vmatpush1.bf16.msra.mxu1 %v7701_v38  ;;  %v7719_v34 = vpack.c.bf16 %v2168_v17, %v2164_v13  ;;  %v2167_v38 = vld [vmem:[#allocation9 + $0x1b0] sm:$0xff]  ;;  %v2369_v17 = vld [vmem:[#allocation7 + $0x200] sm:$0xff] }
 0x6c2   :  { %7672 = vmatprep.subr.bf16.mxu0 %v7671_v1  ;;  %7704 = vmatprep.subr.bf16.mxu1 %v7703_v12  ;;  %v2172_v1 = vld [vmem:[#allocation9 + $0x1d8] sm:$0xff]  ;;  %v7721_v49 = vpack.c.bf16 %v2167_v38, %v2163_v36  ;;  %v2169_v12 = vld [vmem:[#allocation9 + $0x1c0] sm:$0xff]  ;;  %v2375_v36 = vld [vmem:[#allocation7 + $0x230] sm:$0xff] }
 0x6c3   :  { %v7723_v35 = vpack.c.bf16 %v2176_v10, %v2172_v1  ;;  %v2378_v38 = vld [vmem:[#allocation7 + $0x248] sm:$0xff]  ;;  %v2384_v1 = vld [vmem:[#allocation7 + $0x278] sm:$0xff]  ;;  %v2377_v10 = vld [vmem:[#allocation7 + $0x240] sm:$0xff] }
 0x6c5   :  { %7674 = vmatpush1.bf16.msra.mxu0 %v7673_v23  ;;  %7706 = vmatpush1.bf16.msra.mxu1 %v7705_v53  ;;  %v2173_v23 = vld [vmem:[#allocation9 + $0x1e0] sm:$0xff]  ;;  %v2175_v53 = vld [vmem:[#allocation9 + $0x1f0] sm:$0xff] }
 0x6c6   :  { %7676 = vmatprep.subr.bf16.mxu0 %v7675_v16  ;;  %7708 = vmatprep.subr.bf16.mxu1 %v7707_v56  ;;  %v2376_v16 = vld [vmem:[#allocation7 + $0x238] sm:$0xff]  ;;  %v7693_v31 = vpack.c.bf16 %v2173_v23, %v2169_v12  ;;  %v7725_v40 = vpack.c.bf16 %v2175_v53, %v2171_v52  ;;  %v2381_v12 = vld [vmem:[#allocation7 + $0x260] sm:$0xff]  ;;  %v7763_v52 = vpack.c.bf16 %v2384_v1, %v2380_v60  ;;  %v2379_v53 = vld [vmem:[#allocation7 + $0x250] sm:$0xff] }
 0x6c7   :  { %v7759_v56 = vpack.c.bf16 %v2376_v16, %v2372_v15  ;;  %v2390_v15 = vld [vmem:[#allocation7 + $0x2a8] sm:$0xff]  ;;  %v2388_v16 = vld [vmem:[#allocation7 + $0x298] sm:$0xff]  ;;  %v2411_v60 = vld [vmem:[#allocation7 + $0x350] sm:$0xff] }
 0x6c8   :  { %v2415_v1 = vld [vmem:[#allocation7 + $0x370] sm:$0xff] }
 0x6c9   :  { %7678 = vmatpush1.bf16.msra.mxu0 %v7677_v3  ;;  %7710 = vmatpush1.bf16.msra.mxu1 %v7709_v24 }
 0x6ca   :  { %7680 = vmatprep.subr.bf16.mxu0 %v7679_v5  ;;  %7712 = vmatprep.subr.bf16.mxu1 %v7711_v7 }
 0x6cd   :  { %7682 = vmatpush1.bf16.msra.mxu0 %v7681_v14  ;;  %7714 = vmatpush1.bf16.msra.mxu1 %v7713_v33  ;;  %v1854_v33 = vld [vmem:[#allocation3 + $0x30] sm:$0x30] }
 0x6ce   :  { %7684 = vmatprep.subr.bf16.mxu0 %v7683_v46  ;;  %7716 = vmatprep.subr.bf16.mxu1 %v7715_v32 }
 0x6d1   :  { %7686 = vmatpush1.bf16.msra.mxu0 %v7685_v9  ;;  %7718 = vmatpush1.bf16.msra.mxu1 %v7717_v58 }
 0x6d2   :  { %7688 = vmatprep.subr.bf16.mxu0 %v7687_v4  ;;  %7720 = vmatprep.subr.bf16.mxu1 %v7719_v34 }
 0x6d5   :  { %7690 = vmatpush1.bf16.msra.mxu0 %v7689_v44  ;;  %7722 = vmatpush1.bf16.msra.mxu1 %v7721_v49  ;;  %v7729_v49 = vpack.c.bf16 %v2373_v25, %v2369_v17  ;;  %v2412_v17 = vld [vmem:[#allocation7 + $0x358] sm:$0xff] }
 0x6d6   :  { %7692 = vmatprep.subr.bf16.mxu0 %v7691_v61  ;;  %7724 = vmatprep.subr.bf16.mxu1 %v7723_v35  ;;  %v7761_v61 = vpack.c.bf16 %v2375_v36, %v2371_v29  ;;  %v7731_v35 = vpack.c.bf16 %v2382_v48, %v2378_v38  ;;  %v2416_v25 = vld [vmem:[#allocation7 + $0x378] sm:$0xff]  ;;  %v2409_v36 = vld [vmem:[#allocation7 + $0x340] sm:$0xff] }
 0x6d7   :  { %v2413_v38 = vld [vmem:[#allocation7 + $0x360] sm:$0xff]  ;;  %v7779_v48 = vpack.c.bf16 %v2416_v25, %v2412_v17  ;;  %v2633_v17 = vld [vmem:[#allocation9 + $0x250] sm:$0xff] }
 0x6d8   :  { %v2637_v25 = vld [vmem:[#allocation9 + $0x270] sm:$0xff] }
 0x6d9   :  { %7694 = vmatpush1.bf16.msra.mxu0 %v7693_v31  ;;  %7726 = vmatpush1.bf16.msra.mxu1 %v7725_v40  ;;  %v2392_v31 = vld [vmem:[#allocation7 + $0x2b8] sm:$0xff]  ;;  %v7733_v40 = vpack.c.bf16 %v2381_v12, %v2377_v10  ;;  %v7749_v12 = vpack.c.bf16 %v2413_v38, %v2409_v36  ;;  %v2644_v36 = vld [vmem:[#allocation9 + $0x2a8] sm:$0xff] }
 0x6da   :  { %7728 = vmatprep.subr.bf16.mxu0 %v7727_v41  ;;  %7760 = vmatprep.subr.bf16.mxu1 %v7759_v56  ;;  %v7765_v41 = vpack.c.bf16 %v2383_v6, %v2379_v53  ;;  %v2385_v56 = vld [vmem:[#allocation7 + $0x280] sm:$0xff]  ;;  %v2424_v10 = vld [vmem:[#allocation7 + $0x3b8] sm:$0xff] }
 0x6db   :  { %v2642_v38 = vld [vmem:[#allocation9 + $0x298] sm:$0xff] }
 0x78e   :  { %v1989_v3 = vpop.f32.mrb[16].mxu0  ;;  %v2060_v50 = vpop.f32.mrb[16].mxu1 }
 0x78f   :  { %v2069_v63 = vrot.slane %v1989_v3, 4  ;;  %v1991_v24 = vpop.f32.mrb[17].mxu0  ;;  %v2062_v37 = vpop.f32.mrb[17].mxu1  ;;  %v2071_v26 = vrot.slane %v2060_v50, 4  ;;  %v2389_v3 = vld [vmem:[#allocation7 + $0x2a0] sm:$0xff]  ;;  %v7735_v50 = vpack.c.bf16 %v2390_v15, %v2386_v18  ;;  %v2419_v18 = vld [vmem:[#allocation7 + $0x390] sm:$0xff] }
 0x790   :  { %v2070_v8 = vrot.slane %v1991_v24, 4  ;;  %v2072_v14 = vrot.slane %v2062_v37, 4  ;;  %v2387_v24 = vld [vmem:[#allocation7 + $0x290] sm:$0xff] }
 0x791   :  { %v2077_v5 = vadd.f32 %v2069_v63, %v1852_v42  ;;  %v2079_v21 = vadd.f32 %v2071_v26, %v1854_v33  ;;  %v7767_v63 = vpack.c.bf16 %v2392_v31, %v2388_v16  ;;  %v2391_v37 = vld [vmem:[#allocation7 + $0x2b0] sm:$0xff]  ;;  %v2394_v42 = vld [vmem:[#allocation7 + $0x2c8] sm:$0xff] }
 0x792   :  { %v2078_v62 = vadd.f32 %v2070_v8, %v1853_v11  ;;  %v2080_v20 = vadd.f32 %v2072_v14, %v1855_v19  ;;  %v2398_v8 = vld [vmem:[#allocation7 + $0x2e8] sm:$0xff]  ;;  %v2400_v11 = vld [vmem:[#allocation7 + $0x2f8] sm:$0xff]  ;;  %v2397_v14 = vld [vmem:[#allocation7 + $0x2e0] sm:$0xff] }
 0x793   :  { %v7044_v59 = vmul.f32 -1.442695, %v2077_v5  ;;  %v2396_v5 = vld [vmem:[#allocation7 + $0x2d8] sm:$0xff]  ;;  %v7739_v19 = vpack.c.bf16 %v2398_v8, %v2394_v42  ;;  %v2395_v26 = vld [vmem:[#allocation7 + $0x2d0] sm:$0xff]  ;;  %v2426_v16 = vld [vmem:[#allocation7 + $0x3c8] sm:$0xff] }
 0x794   :  { %v7045_v7 = vmul.f32 -1.442695, %v2078_v62  ;;  %v7046_v43 = vmul.f32 -1.442695, %v2080_v20  ;;  %v7737_v62 = vpack.c.bf16 %v2389_v3, %v2385_v56  ;;  %v7771_v20 = vpack.c.bf16 %v2400_v11, %v2396_v5  ;;  %v2399_v33 = vld [vmem:[#allocation7 + $0x2f0] sm:$0xff]  ;;  %v2430_v31 = vld [vmem:[#allocation7 + $0x3e8] sm:$0xff] }
 0x795   :  { %9014 = vpow2.f32 %v7044_v59  ;;  %v7769_v59 = vpack.c.bf16 %v2391_v37, %v2387_v24  ;;  %v2423_v15 = vld [vmem:[#allocation7 + $0x3b0] sm:$0xff]  ;;  %v2429_v37 = vld [vmem:[#allocation7 + $0x3e0] sm:$0xff] }
 0x796   :  { %9016 = vpow2.f32 %v7045_v7  ;;  %v2393_v7 = vld [vmem:[#allocation7 + $0x2c0] sm:$0xff]  ;;  %v7785_v3 = vpack.c.bf16 %v2423_v15, %v2419_v18  ;;  %v2427_v42 = vld [vmem:[#allocation7 + $0x3d0] sm:$0xff] }
 0x797   :  { %9018 = vpow2.f32 %v7046_v43  ;;  %v2402_v43 = vld [vmem:[#allocation7 + $0x308] sm:$0xff]  ;;  %v2431_v8 = vld [vmem:[#allocation7 + $0x3f0] sm:$0xff]  ;;  %v2647_v18 = vld [vmem:[#allocation9 + $0x2c0] sm:$0xff] }
 0x798   :  { %9020 = vtanh.f32 %v2079_v21  ;;  %v2406_v21 = vld [vmem:[#allocation7 + $0x328] sm:$0xff]  ;;  %v7789_v11 = vpack.c.bf16 %v2431_v8, %v2427_v42  ;;  %v2651_v15 = vld [vmem:[#allocation9 + $0x2e0] sm:$0xff] }
 0x799   :  { %v2655_v42 = vld [vmem:[#allocation9 + $0x300] sm:$0xff] }
 0x79a   :  { %v2659_v8 = vld [vmem:[#allocation9 + $0x320] sm:$0xff] }
 0x79f   :  { %v9015_v45 = vpop.eup %9014 }
 0x7a0   :  { %v9017_v46 = vpop.eup %9016  ;;  %v2084_v32 = vadd.f32 1.0, %v9015_v45  ;;  %v2404_v45 = vld [vmem:[#allocation7 + $0x318] sm:$0xff] }
 0x7a1   :  { %v2090_v47 = vadd.f32 1.0, %v9017_v46  ;;  %v9019_v39 = vpop.eup %9018  ;;  %v2408_v46 = vld [vmem:[#allocation7 + $0x338] sm:$0xff] }
 0x7a2   :  { %9022 = vrcp.f32 %v2084_v32  ;;  %v9021_v57 = vpop.eup %9020  ;;  %v2097_v58 = vadd.f32 1.0, %v9019_v39  ;;  %v7741_v32 = vpack.c.bf16 %v2397_v14, %v2393_v7  ;;  %v2401_v39 = vld [vmem:[#allocation7 + $0x300] sm:$0xff]  ;;  %v2628_v7 = vld [vmem:[#allocation9 + $0x228] sm:$0xff]  ;;  %v2626_v14 = vld [vmem:[#allocation9 + $0x218] sm:$0xff] }
 0x7a3   :  { %9024 = vrcp.f32 %v2090_v47  ;;  %v7773_v47 = vpack.c.bf16 %v2399_v33, %v2395_v26  ;;  %v2623_v26 = vld [vmem:[#allocation9 + $0x200] sm:$0xff] }
 0x7a4   :  { %9026 = vrcp.f32 %v2097_v58  ;;  %v2410_v58 = vld [vmem:[#allocation7 + $0x348] sm:$0xff]  ;;  %v2627_v33 = vld [vmem:[#allocation9 + $0x220] sm:$0xff] }
 0x7ac   :  { %v9023_v9 = vpop.eup %9022 }
 0x7ad   :  { %v9025_v51 = vpop.eup %9024  ;;  %v2104_v55 = vmul.f32 %v9023_v9, %v9021_v57  ;;  %v2405_v57 = vld [vmem:[#allocation7 + $0x320] sm:$0xff]  ;;  %v7743_v9 = vpack.c.bf16 %v2406_v21, %v2402_v43  ;;  %v9985_v21 = vpack.c.bf16 %v2627_v33, %v2623_v26  ;;  %v2666_v26 = vld [vmem:[#allocation9 + $0x358] sm:$0xff] }
 0x7ae   :  { %v2103_v4 = vmul.f32 %v9025_v51, %v2101_v2  ;;  %v9027_v34 = vpop.eup %9026  ;;  %v7775_v2 = vpack.c.bf16 %v2408_v46, %v2404_v45  ;;  %v2403_v51 = vld [vmem:[#allocation7 + $0x310] sm:$0xff] }
 0x7af   :  { %v2625_v45 = vld [vmem:[#allocation9 + $0x210] sm:$0xff] }
 0x7b0   :  { %v9974_v13 = vadd.f32 %v2104_v55, %v2103_v4  ;;  %v2407_v55 = vld [vmem:[#allocation7 + $0x330] sm:$0xff]  ;;  %v2414_v4 = vld [vmem:[#allocation7 + $0x368] sm:$0xff] }
 0x7b1   :  { %v7777_v29 = vpack.c.bf16 %v2407_v55, %v2403_v51  ;;  %v2629_v46 = vld [vmem:[#allocation9 + $0x230] sm:$0xff]  ;;  %v2631_v51 = vld [vmem:[#allocation9 + $0x240] sm:$0xff] }
 0x7b2   :  { %9028 = vtanh.f32 %v9974_v13  ;;  %v2635_v55 = vld [vmem:[#allocation9 + $0x260] sm:$0xff] }
 0x7bc   :  { %v9029_v44 = vpop.eup %9028 }
 0x7bd   :  { %v2107_v54 = vmul.f32 %v9029_v44, %v9027_v34  ;;  %v7745_v34 = vpack.c.bf16 %v2405_v57, %v2401_v39  ;;  %v7747_v44 = vpack.c.bf16 %v2414_v4, %v2410_v58  ;;  %v2636_v39 = vld [vmem:[#allocation9 + $0x268] sm:$0xff]  ;;  %v2634_v57 = vld [vmem:[#allocation9 + $0x258] sm:$0xff]  ;;  %v9997_v4 = vpack.c.bf16 %v2635_v55, %v2631_v51  ;;  %v2669_v51 = vld [vmem:[#allocation9 + $0x370] sm:$0xff] }
 0x7be   :  { %v2672_v55 = vld [vmem:[#allocation9 + $0x388] sm:$0xff] }
 0x7bf   :  { %2108 = vst [vmem:[#allocation2 + $0x8] sm:$0x30] %v2107_v54  ;;  %v2178_v23 = vrot.slane %v2107_v54, 4  ;;  %v2418_v54 = vld [vmem:[#allocation7 + $0x388] sm:$0xff] }
 0x7c1   :  { %2245 = vmatmul.mubr.f32.vlgmr.msra.gmra.mrb[18].mxu0 %v2178_v23  ;;  %2316 = vmatmul.mubr.f32.vlgmr.msra.gmra.mrb[18].mxu1 %v2178_v23  ;;  %v7781_v23 = vpack.c.bf16 %v2415_v1, %v2411_v60  ;;  %v2639_v60 = vld [vmem:[#allocation9 + $0x280] sm:$0xff] }
 0x7c2   :  { %7730 = vmatpush1.bf16.msra.mxu0 %v7729_v49  ;;  %7762 = vmatpush1.bf16.msra.mxu1 %v7761_v61  ;;  %v2422_v49 = vld [vmem:[#allocation7 + $0x3a8] sm:$0xff]  ;;  %v2420_v61 = vld [vmem:[#allocation7 + $0x398] sm:$0xff]  ;;  %v2643_v1 = vld [vmem:[#allocation9 + $0x2a0] sm:$0xff] }
 0x7c3   :  { %7732 = vmatprep.subr.bf16.mxu0 %v7731_v35  ;;  %7764 = vmatprep.subr.bf16.mxu1 %v7763_v52  ;;  %v2417_v35 = vld [vmem:[#allocation7 + $0x380] sm:$0xff]  ;;  %v7751_v53 = vpack.c.bf16 %v2422_v49, %v2418_v54  ;;  %v7783_v6 = vpack.c.bf16 %v2424_v10, %v2420_v61  ;;  %v10009_v49 = vpack.c.bf16 %v2643_v1, %v2639_v60  ;;  %v2641_v61 = vld [vmem:[#allocation9 + $0x290] sm:$0xff] }
 0x7c4   :  { %2520 = vmatprep.mubr.f32.mxu0 %v9453_v0  ;;  %2597 = vmatprep.mubr.f32.mxu1 %v9453_v0  ;;  %v2421_v52 = vld [vmem:[#allocation7 + $0x3a0] sm:$0xff]  ;;  %v2645_v10 = vld [vmem:[#allocation9 + $0x2b0] sm:$0xff] }
 0x7c5   :  { %v7753_v56 = vpack.c.bf16 %v2421_v52, %v2417_v35  ;;  %v2652_v35 = vld [vmem:[#allocation9 + $0x2e8] sm:$0xff]  ;;  %v2650_v52 = vld [vmem:[#allocation9 + $0x2d8] sm:$0xff]  ;;  %v2671_v60 = vld [vmem:[#allocation9 + $0x380] sm:$0xff] }
 0x7c6   :  { %7734 = vmatpush1.bf16.msra.mxu0 %v7733_v40  ;;  %7766 = vmatpush1.bf16.msra.mxu1 %v7765_v41  ;;  %v2428_v40 = vld [vmem:[#allocation7 + $0x3d8] sm:$0xff]  ;;  %v2675_v1 = vld [vmem:[#allocation9 + $0x3a0] sm:$0xff] }
 0x7c7   :  { %7736 = vmatprep.subr.bf16.mxu0 %v7735_v50  ;;  %7768 = vmatprep.subr.bf16.mxu1 %v7767_v63  ;;  %v2432_v41 = vld [vmem:[#allocation7 + $0x3f8] sm:$0xff]  ;;  %v2425_v50 = vld [vmem:[#allocation7 + $0x3c0] sm:$0xff]  ;;  %v7755_v63 = vpack.c.bf16 %v2430_v31, %v2426_v16  ;;  %v10021_v31 = vpack.c.bf16 %v2651_v15, %v2647_v18 }
 0x7c8   :  { %v7787_v24 = vpack.c.bf16 %v2432_v41, %v2428_v40  ;;  %v7757_v5 = vpack.c.bf16 %v2429_v37, %v2425_v50  ;;  %v2649_v40 = vld [vmem:[#allocation9 + $0x2d0] sm:$0xff]  ;;  %v2660_v50 = vld [vmem:[#allocation9 + $0x328] sm:$0xff]  ;;  %v2662_v37 = vld [vmem:[#allocation9 + $0x338] sm:$0xff] }
 0x7c9   :  { %v2653_v41 = vld [vmem:[#allocation9 + $0x2f0] sm:$0xff]  ;;  %v2682_v18 = vld [vmem:[#allocation9 + $0x3d8] sm:$0xff] }
 0x7ca   :  { %7738 = vmatpush1.bf16.msra.mxu0 %v7737_v62  ;;  %7770 = vmatpush1.bf16.msra.mxu1 %v7769_v59  ;;  %v2366_v62 = vld [vmem:[#allocation2] sm:$0xff]  ;;  %v2624_v59 = vld [vmem:[#allocation9 + $0x208] sm:$0xff] }
 0x7cb   :  { %7740 = vmatprep.subr.bf16.mxu0 %v7739_v19  ;;  %7772 = vmatprep.subr.bf16.mxu1 %v7771_v20  ;;  %v9981_v19 = vpack.c.bf16 %v2628_v7, %v2624_v59  ;;  %v2630_v20 = vld [vmem:[#allocation9 + $0x238] sm:$0xff]  ;;  %v2661_v59 = vld [vmem:[#allocation9 + $0x330] sm:$0xff] }
 0x7cc   :  { %v9983_v43 = vpack.c.bf16 %v2630_v20, %v2626_v14  ;;  %v2664_v14 = vld [vmem:[#allocation9 + $0x348] sm:$0xff] }
 0x7cd   :  { %v2668_v20 = vld [vmem:[#allocation9 + $0x368] sm:$0xff] }
 0x7ce   :  { %7742 = vmatpush1.bf16.msra.mxu0 %v7741_v32  ;;  %7774 = vmatpush1.bf16.msra.mxu1 %v7773_v47  ;;  %v9988_v32 = vpack.c.bf16 %v2629_v46, %v2625_v45  ;;  %v2632_v47 = vld [vmem:[#allocation9 + $0x248] sm:$0xff]  ;;  %v10041_v33 = vpack.c.bf16 %v2668_v20, %v2664_v14  ;;  %v2670_v45 = vld [vmem:[#allocation9 + $0x378] sm:$0xff]  ;;  %v2663_v46 = vld [vmem:[#allocation9 + $0x340] sm:$0xff] }
 0x7cf   :  { %7744 = vmatprep.subr.bf16.mxu0 %v7743_v9  ;;  %7776 = vmatprep.subr.bf16.mxu1 %v7775_v2  ;;  %v9993_v9 = vpack.c.bf16 %v2636_v39, %v2632_v47  ;;  %v2638_v2 = vld [vmem:[#allocation9 + $0x278] sm:$0xff]  ;;  %v2667_v47 = vld [vmem:[#allocation9 + $0x360] sm:$0xff]  ;;  %v10043_v39 = vpack.c.bf16 %v2670_v45, %v2666_v26  ;;  %v2109_v45 = vld [vmem:[#allocation3 + $0x20] sm:$0xc0] }
 0x7d0   :  { %v9995_v58 = vpack.c.bf16 %v2638_v2, %v2634_v57  ;;  %v10045_v57 = vpack.c.bf16 %v2667_v47, %v2663_v46  ;;  %v2665_v2 = vld [vmem:[#allocation9 + $0x350] sm:$0xff] }
 0x7d2   :  { %7746 = vmatpush1.bf16.msra.mxu0 %v7745_v34  ;;  %7778 = vmatpush1.bf16.msra.mxu1 %v7777_v29  ;;  %v10000_v34 = vpack.c.bf16 %v2637_v25, %v2633_v17  ;;  %v2640_v29 = vld [vmem:[#allocation9 + $0x288] sm:$0xff]  ;;  %v10048_v17 = vpack.c.bf16 %v2669_v51, %v2665_v2  ;;  %v2110_v2 = vld [vmem:[#allocation3 + $0x28] sm:$0xc0] }
 0x7d3   :  { %7748 = vmatprep.subr.bf16.mxu0 %v7747_v44  ;;  %7780 = vmatprep.subr.bf16.mxu1 %v7779_v48  ;;  %v10005_v44 = vpack.c.bf16 %v2644_v36, %v2640_v29  ;;  %v2646_v48 = vld [vmem:[#allocation9 + $0x2b8] sm:$0xff]  ;;  %v2676_v25 = vld [vmem:[#allocation9 + $0x3a8] sm:$0xff] }
 0x7d4   :  { %v10007_v54 = vpack.c.bf16 %v2646_v48, %v2642_v38  ;;  %v2674_v29 = vld [vmem:[#allocation9 + $0x398] sm:$0xff]  ;;  %v10052_v38 = vpack.c.bf16 %v2676_v25, %v2672_v55 }
 0x7d5   :  { %v2678_v36 = vld [vmem:[#allocation9 + $0x3b8] sm:$0xff] }
 0x7d6   :  { %7750 = vmatpush1.bf16.msra.mxu0 %v7749_v12  ;;  %7782 = vmatpush1.bf16.msra.mxu1 %v7781_v23  ;;  %v10012_v12 = vpack.c.bf16 %v2645_v10, %v2641_v61  ;;  %v2648_v23 = vld [vmem:[#allocation9 + $0x2c8] sm:$0xff]  ;;  %v10054_v48 = vpack.c.bf16 %v2678_v36, %v2674_v29  ;;  %v2673_v61 = vld [vmem:[#allocation9 + $0x390] sm:$0xff]  ;;  %v10057_v10 = vpack.c.bf16 %v2675_v1, %v2671_v60 }
 0x7d7   :  { %7752 = vmatprep.subr.bf16.mxu0 %v7751_v53  ;;  %7784 = vmatprep.subr.bf16.mxu1 %v7783_v6  ;;  %v10017_v53 = vpack.c.bf16 %v2652_v35, %v2648_v23  ;;  %v2654_v6 = vld [vmem:[#allocation9 + $0x2f8] sm:$0xff]  ;;  %v2677_v23 = vld [vmem:[#allocation9 + $0x3b0] sm:$0xff]  ;;  %v2112_v36 = vld [vmem:[#allocation3 + $0x38] sm:$0xc0] }
 0x7d8   :  { %v10019_v16 = vpack.c.bf16 %v2654_v6, %v2650_v52  ;;  %v10061_v35 = vpack.c.bf16 %v2677_v23, %v2673_v61  ;;  %v2680_v52 = vld [vmem:[#allocation9 + $0x3c8] sm:$0xff]  ;;  %v2111_v61 = vld [vmem:[#allocation3 + $0x30] sm:$0xc0] }
 0x7d9   :  { %v2684_v6 = vld [vmem:[#allocation9 + $0x3e8] sm:$0xff] }
 0x7da   :  { %7754 = vmatpush1.bf16.msra.mxu0 %v7753_v56  ;;  %7786 = vmatpush1.bf16.msra.mxu1 %v7785_v3  ;;  %v10024_v56 = vpack.c.bf16 %v2653_v41, %v2649_v40  ;;  %v2656_v3 = vld [vmem:[#allocation9 + $0x308] sm:$0xff]  ;;  %v10065_v15 = vpack.c.bf16 %v2684_v6, %v2680_v52  ;;  %v2686_v40 = vld [vmem:[#allocation9 + $0x3f8] sm:$0xff]  ;;  %v2679_v41 = vld [vmem:[#allocation9 + $0x3c0] sm:$0xff] }
 0x7db   :  { %7756 = vmatprep.subr.bf16.mxu0 %v7755_v63  ;;  %7788 = vmatprep.subr.bf16.mxu1 %v7787_v24  ;;  %v2658_v63 = vld [vmem:[#allocation9 + $0x318] sm:$0xff]  ;;  %v10029_v24 = vpack.c.bf16 %v2660_v50, %v2656_v3  ;;  %v2683_v3 = vld [vmem:[#allocation9 + $0x3e0] sm:$0xff]  ;;  %v10067_v50 = vpack.c.bf16 %v2686_v40, %v2682_v18 }
 0x7de   :  { %7758 = vmatpush1.bf16.msra.mxu0 %v7757_v5  ;;  %7790 = vmatpush1.bf16.msra.mxu1 %v7789_v11  ;;  %v10031_v5 = vpack.c.bf16 %v2662_v37, %v2658_v63  ;;  %v10033_v11 = vpack.c.bf16 %v2659_v8, %v2655_v42  ;;  %v10069_v63 = vpack.c.bf16 %v2683_v3, %v2679_v41  ;;  %v2681_v37 = vld [vmem:[#allocation9 + $0x3d0] sm:$0xff]  ;;  %v2434_v3 = vld [vmem:[#allocation10 + $0x4] sm:$0xf] }
 0x7df   :  { %7792 = vmatprep.subr.bf16.mxu0 %v9981_v19  ;;  %7824 = vmatprep.subr.bf16.mxu1 %v9983_v43  ;;  %v2685_v42 = vld [vmem:[#allocation9 + $0x3f0] sm:$0xff] }
 0x7e0   :  { %v10072_v8 = vpack.c.bf16 %v2685_v42, %v2681_v37 }
 0x7e1   :  { %2521 = vmatmul.mubr.f32.vlgmr.msra.gmra.mrb[20].mxu0 %v2366_v62  ;;  %2598 = vmatmul.mubr.f32.vlgmr.msra.gmra.mrb[20].mxu1 %v2366_v62  ;;  %v2657_v62 = vld [vmem:[#allocation9 + $0x310] sm:$0xff] }
 0x7e2   :  { %2526 = vmatprep.mubr.f32.mxu0 %v9453_v0  ;;  %2603 = vmatprep.mubr.f32.mxu1 %v9453_v0  ;;  %v10036_v7 = vpack.c.bf16 %v2661_v59, %v2657_v62 }
 0x7e3   :  { %7794 = vmatpush1.bf16.msra.mxu0 %v9985_v21  ;;  %7826 = vmatpush1.bf16.msra.mxu1 %v9988_v32 }
 0x7e4   :  { %7796 = vmatprep.subr.bf16.mxu0 %v9993_v9  ;;  %7828 = vmatprep.subr.bf16.mxu1 %v9995_v58 }
 0x7e7   :  { %7798 = vmatpush1.bf16.msra.mxu0 %v9997_v4  ;;  %7830 = vmatpush1.bf16.msra.mxu1 %v10000_v34 }
 0x7e8   :  { %7800 = vmatprep.subr.bf16.mxu0 %v10005_v44  ;;  %7832 = vmatprep.subr.bf16.mxu1 %v10007_v54 }
 0x7eb   :  { %7802 = vmatpush1.bf16.msra.mxu0 %v10009_v49  ;;  %7834 = vmatpush1.bf16.msra.mxu1 %v10012_v12 }
 0x7ec   :  { %7804 = vmatprep.subr.bf16.mxu0 %v10017_v53  ;;  %7836 = vmatprep.subr.bf16.mxu1 %v10019_v16 }
 0x7ef   :  { %7806 = vmatpush1.bf16.msra.mxu0 %v10021_v31  ;;  %7838 = vmatpush1.bf16.msra.mxu1 %v10024_v56 }
 0x7f0   :  { %7808 = vmatprep.subr.bf16.mxu0 %v10029_v24  ;;  %7840 = vmatprep.subr.bf16.mxu1 %v10031_v5 }
 0x7f3   :  { %7810 = vmatpush1.bf16.msra.mxu0 %v10033_v11  ;;  %7842 = vmatpush1.bf16.msra.mxu1 %v10036_v7 }
 0x7f4   :  { %7812 = vmatprep.subr.bf16.mxu0 %v10041_v33  ;;  %7844 = vmatprep.subr.bf16.mxu1 %v10043_v39 }
 0x7f7   :  { %7814 = vmatpush1.bf16.msra.mxu0 %v10045_v57  ;;  %7846 = vmatpush1.bf16.msra.mxu1 %v10048_v17 }
 0x7f8   :  { %7816 = vmatprep.subr.bf16.mxu0 %v10052_v38  ;;  %7848 = vmatprep.subr.bf16.mxu1 %v10054_v48 }
 0x7fb   :  { %7818 = vmatpush1.bf16.msra.mxu0 %v10057_v10  ;;  %7850 = vmatpush1.bf16.msra.mxu1 %v10061_v35 }
 0x7fc   :  { %7820 = vmatprep.subr.bf16.mxu0 %v10065_v15  ;;  %7852 = vmatprep.subr.bf16.mxu1 %v10067_v50 }
 0x7ff   :  { %7822 = vmatpush1.bf16.msra.mxu0 %v10069_v63  ;;  %7854 = vmatpush1.bf16.msra.mxu1 %v10072_v8 }
 0x800   :  { %7856 = vmatprep.subr.bf16.mxu0 %v9981_v19  ;;  %7888 = vmatprep.subr.bf16.mxu1 %v9983_v43 }
 0x894   :  { %v2246_v62 = vpop.f32.mrb[18].mxu0  ;;  %v2317_v59 = vpop.f32.mrb[18].mxu1 }
 0x895   :  { %v2326_v14 = vrot.slane %v2246_v62, 2  ;;  %v2248_v20 = vpop.f32.mrb[19].mxu0  ;;  %v2319_v26 = vpop.f32.mrb[19].mxu1  ;;  %v2328_v1 = vrot.slane %v2317_v59, 2  ;;  %v10080_v62 = vrot.slane %v2434_v3, %v9704_v22 }
 0x896   :  { %v2327_v46 = vrot.slane %v2248_v20, 2  ;;  %v2329_v29 = vrot.slane %v2319_v26, 2  ;;  %v2358_v20 = vrot.slane %v9974_v13, 6  ;;  %v10087_v26 = vrot.slane %v2434_v3, %v9706_v27 }
 0x897   :  { %v2334_v47 = vadd.f32 %v2326_v14, %v2109_v45  ;;  %v2336_v52 = vadd.f32 %v2328_v1, %v2111_v61  ;;  %v10083_v14 = vrot.slane %v2434_v3, %v9708_v28  ;;  %v10090_v45 = vrot.slane %v2434_v3, %v9710_v30 }
 0x898   :  { %v2335_v51 = vadd.f32 %v2327_v46, %v2110_v2  ;;  %v2337_v60 = vadd.f32 %v2329_v29, %v2112_v36 }
 0x899   :  { %v7047_v55 = vmul.f32 -1.442695, %v2334_v47 }
 0x89a   :  { %v7048_v25 = vmul.f32 -1.442695, %v2335_v51  ;;  %v7049_v23 = vmul.f32 -1.442695, %v2337_v60 }
 0x89b   :  { %9030 = vpow2.f32 %v7047_v55 }
 0x89c   :  { %9032 = vpow2.f32 %v7048_v25 }
 0x89d   :  { %9034 = vpow2.f32 %v7049_v23 }
 0x89e   :  { %9036 = vtanh.f32 %v2336_v52 }
 0x8a5   :  { %v9031_v6 = vpop.eup %9030 }
 0x8a6   :  { %v9033_v18 = vpop.eup %9032  ;;  %v2341_v40 = vadd.f32 1.0, %v9031_v6 }
 0x8a7   :  { %v2347_v41 = vadd.f32 1.0, %v9033_v18  ;;  %v9035_v37 = vpop.eup %9034 }
 0x8a8   :  { %9038 = vrcp.f32 %v2341_v40  ;;  %v9037_v42 = vpop.eup %9036  ;;  %v2354_v2 = vadd.f32 1.0, %v9035_v37 }
 0x8a9   :  { %9040 = vrcp.f32 %v2347_v41 }
 0x8aa   :  { %9042 = vrcp.f32 %v2354_v2 }
 0x8b2   :  { %v9039_v59 = vpop.eup %9038 }
 0x8b3   :  { %v9041_v46 = vpop.eup %9040  ;;  %v2361_v47 = vmul.f32 %v9039_v59, %v9037_v42 }
 0x8b4   :  { %v2360_v51 = vmul.f32 %v9041_v46, %v2358_v20  ;;  %v2522_v55 = vpop.f32.mrb[20].mxu0  ;;  %v2599_v25 = vpop.f32.mrb[20].mxu1 }
 0x8b5   :  { %v2523_v29 = vadd.f32 %v2522_v55, %v10080_v62  ;;  %v2600_v36 = vadd.f32 %v2599_v25, %v10083_v14  ;;  %v2524_v60 = vpop.f32.mrb[21].mxu0  ;;  %v2601_v1 = vpop.f32.mrb[21].mxu1 }
 0x8b6   :  { %v2362_v61 = vadd.f32 %v2361_v47, %v2360_v51  ;;  %v2525_v13 = vadd.f32 %v2524_v60, %v10087_v26  ;;  %v2602_v23 = vadd.f32 %v2601_v1, %v10090_v45  ;;  %v9043_v52 = vpop.eup %9042 }
 0x8b7   :  { %2610 = vst [vmem:[#allocation3] sm:$0xff] %v2523_v29  ;;  %2612 = vst [vmem:[#allocation3 + $0x10] sm:$0xff] %v2600_v36 }
 0x8b8   :  { %9044 = vtanh.f32 %v2362_v61  ;;  %2611 = vst [vmem:[#allocation3 + $0x8] sm:$0xff] %v2525_v13  ;;  %2613 = vst [vmem:[#allocation3 + $0x18] sm:$0xff] %v2602_v23 }
 0x8be   :  { %v2618_v2 = vld [vmem:[#allocation3] sm:$0x3]  ;;  %v2620_v1 = vld [vmem:[#allocation3 + $0x10] sm:$0x3] }
 0x8bf   :  { %v2619_v55 = vld [vmem:[#allocation3 + $0x8] sm:$0x3]  ;;  %v2621_v60 = vld [vmem:[#allocation3 + $0x18] sm:$0x3] }
 0x8c2   :  { %v9045_v6 = vpop.eup %9044 }
 0x8c3   :  { %v2364_v18 = vmul.f32 %v9045_v6, %v9043_v52 }
 0x8c5   :  { %2365 = vst [vmem:[#allocation2 + $0x8] sm:$0xc0] %v2364_v18 }
 0x8cc   :  { %v2367_v40 = vld [vmem:[#allocation2 + $0x8] sm:$0xff] }
 0x8cd   :  { %2527 = vmatmul.mubr.f32.gmra.mrb[22].mxu0 %v2367_v40  ;;  %2604 = vmatmul.mubr.f32.gmra.mrb[22].mxu1 %v2367_v40 }
 0x8ce   :  { %2751 = vmatprep.mubr.f32.mxu0 %v9453_v0  ;;  %2822 = vmatprep.mubr.f32.mxu1 %v9453_v0 }
 0x8d1   :  { %2752 = vmatmul.mubr.f32.vlgmr.msra.gmra.mrb[24].mxu0 %v9453_v0  ;;  %2823 = vmatmul.mubr.f32.vlgmr.msra.gmra.mrb[24].mxu1 %v9453_v0 }
 0x8d2   :  { %7858 = vmatpush1.bf16.msra.mxu0 %v9985_v21  ;;  %7890 = vmatpush1.bf16.msra.mxu1 %v9988_v32 }
 0x8d3   :  { %7860 = vmatprep.subr.bf16.mxu0 %v9993_v9  ;;  %7892 = vmatprep.subr.bf16.mxu1 %v9995_v58 }
 0x8d4   :  { %2990 = vmatprep.mubr.f32.mxu0 %v9453_v0  ;;  %3061 = vmatprep.mubr.f32.mxu1 %v9453_v0 }
 0x8d6   :  { %7862 = vmatpush1.bf16.msra.mxu0 %v9997_v4  ;;  %7894 = vmatpush1.bf16.msra.mxu1 %v10000_v34 }
 0x8d7   :  { %7864 = vmatprep.subr.bf16.mxu0 %v10005_v44  ;;  %7896 = vmatprep.subr.bf16.mxu1 %v10007_v54 }
 0x8da   :  { %7866 = vmatpush1.bf16.msra.mxu0 %v10009_v49  ;;  %7898 = vmatpush1.bf16.msra.mxu1 %v10012_v12 }
 0x8db   :  { %7868 = vmatprep.subr.bf16.mxu0 %v10017_v53  ;;  %7900 = vmatprep.subr.bf16.mxu1 %v10019_v16 }
 0x8de   :  { %7870 = vmatpush1.bf16.msra.mxu0 %v10021_v31  ;;  %7902 = vmatpush1.bf16.msra.mxu1 %v10024_v56 }
 0x8df   :  { %7872 = vmatprep.subr.bf16.mxu0 %v10029_v24  ;;  %7904 = vmatprep.subr.bf16.mxu1 %v10031_v5 }
 0x8e2   :  { %7874 = vmatpush1.bf16.msra.mxu0 %v10033_v11  ;;  %7906 = vmatpush1.bf16.msra.mxu1 %v10036_v7 }
 0x8e3   :  { %7876 = vmatprep.subr.bf16.mxu0 %v10041_v33  ;;  %7908 = vmatprep.subr.bf16.mxu1 %v10043_v39 }
 0x8e6   :  { %7878 = vmatpush1.bf16.msra.mxu0 %v10045_v57  ;;  %7910 = vmatpush1.bf16.msra.mxu1 %v10048_v17 }
 0x8e7   :  { %7880 = vmatprep.subr.bf16.mxu0 %v10052_v38  ;;  %7912 = vmatprep.subr.bf16.mxu1 %v10054_v48 }
 0x8ea   :  { %7882 = vmatpush1.bf16.msra.mxu0 %v10057_v10  ;;  %7914 = vmatpush1.bf16.msra.mxu1 %v10061_v35 }
 0x8eb   :  { %7884 = vmatprep.subr.bf16.mxu0 %v10065_v15  ;;  %7916 = vmatprep.subr.bf16.mxu1 %v10067_v50 }
 0x8ee   :  { %7886 = vmatpush1.bf16.msra.mxu0 %v10069_v63  ;;  %7918 = vmatpush1.bf16.msra.mxu1 %v10072_v8 }
 0x8ef   :  { %7920 = vmatprep.subr.bf16.mxu0 %v9981_v19  ;;  %7952 = vmatprep.subr.bf16.mxu1 %v9983_v43 }
 0x9a0   :  { %v2528_v41 = vpop.f32.mrb[22].mxu0  ;;  %v2605_v3 = vpop.f32.mrb[22].mxu1 }
 0x9a1   :  { %v2529_v37 = vadd.f32 %v2528_v41, %v10080_v62  ;;  %v2606_v42 = vadd.f32 %v2605_v3, %v10083_v14  ;;  %v2530_v59 = vpop.f32.mrb[23].mxu0  ;;  %v2607_v20 = vpop.f32.mrb[23].mxu1 }
 0x9a2   :  { %v2531_v46 = vadd.f32 %v2530_v59, %v10087_v26  ;;  %v2608_v47 = vadd.f32 %v2607_v20, %v10090_v45 }
 0x9a3   :  { %2614 = vst [vmem:[#allocation3 + $0x20] sm:$0xff] %v2529_v37  ;;  %2616 = vst [vmem:[#allocation3 + $0x30] sm:$0xff] %v2606_v42 }
 0x9a4   :  { %2615 = vst [vmem:[#allocation3 + $0x28] sm:$0xff] %v2531_v46  ;;  %2617 = vst [vmem:[#allocation3 + $0x38] sm:$0xff] %v2608_v47  ;;  %v2753_v19 = vpop.f32.mrb[24].mxu0  ;;  %v2824_v51 = vpop.f32.mrb[24].mxu1 }
 0x9a5   :  { %v2829_v43 = vadd.f32 %v2753_v19, %v2618_v2  ;;  %v2755_v25 = vpop.f32.mrb[25].mxu0  ;;  %v2826_v29 = vpop.f32.mrb[25].mxu1  ;;  %v2831_v61 = vadd.f32 %v2824_v51, %v2620_v1  ;;  %v3378_v1 = vld [vmem:[#allocation9 + $0x228] sm:$0xff] }
 0x9a6   :  { %v2830_v62 = vadd.f32 %v2755_v25, %v2619_v55  ;;  %v2832_v26 = vadd.f32 %v2826_v29, %v2621_v60 }
 0x9a7   :  { %v7050_v36 = vmul.f32 -1.442695, %v2829_v43 }
 0x9a8   :  { %v7051_v14 = vmul.f32 -1.442695, %v2830_v62  ;;  %v7052_v45 = vmul.f32 -1.442695, %v2832_v26  ;;  %v3374_v26 = vld [vmem:[#allocation9 + $0x208] sm:$0xff] }
 0x9a9   :  { %9046 = vpow2.f32 %v7050_v36 }
 0x9aa   :  { %9048 = vpow2.f32 %v7051_v14 }
 0x9ab   :  { %9050 = vpow2.f32 %v7052_v45  ;;  %v3376_v45 = vld [vmem:[#allocation9 + $0x218] sm:$0xff] }
 0x9ac   :  { %9052 = vtanh.f32 %v2831_v61  ;;  %v10179_v61 = vpack.c.bf16 %v3378_v1, %v3374_v26  ;;  %v3405_v26 = vld [vmem:[#allocation9 + $0x300] sm:$0xff] }
 0x9ad   :  { %v3409_v1 = vld [vmem:[#allocation9 + $0x320] sm:$0xff] }
 0x9b3   :  { %v9047_v13 = vpop.eup %9046 }
 0x9b4   :  { %v9049_v23 = vpop.eup %9048  ;;  %v2836_v52 = vadd.f32 1.0, %v9047_v13  ;;  %v3380_v13 = vld [vmem:[#allocation9 + $0x238] sm:$0xff] }
 0x9b5   :  { %v2842_v6 = vadd.f32 1.0, %v9049_v23  ;;  %v9051_v18 = vpop.eup %9050  ;;  %v3373_v23 = vld [vmem:[#allocation9 + $0x200] sm:$0xff] }
 0x9b6   :  { %9054 = vrcp.f32 %v2836_v52  ;;  %v9053_v40 = vpop.eup %9052  ;;  %v2849_v42 = vadd.f32 1.0, %v9051_v18  ;;  %v3377_v52 = vld [vmem:[#allocation9 + $0x220] sm:$0xff] }
 0x9b7   :  { %9056 = vrcp.f32 %v2842_v6  ;;  %v10181_v6 = vpack.c.bf16 %v3380_v13, %v3376_v45  ;;  %v10183_v18 = vpack.c.bf16 %v3377_v52, %v3373_v23  ;;  %v3407_v45 = vld [vmem:[#allocation9 + $0x310] sm:$0xff]  ;;  %v10231_v13 = vpack.c.bf16 %v3409_v1, %v3405_v26  ;;  %v3414_v52 = vld [vmem:[#allocation9 + $0x348] sm:$0xff] }
 0x9b8   :  { %9058 = vrcp.f32 %v2849_v42  ;;  %v3386_v42 = vld [vmem:[#allocation9 + $0x268] sm:$0xff]  ;;  %v3411_v23 = vld [vmem:[#allocation9 + $0x330] sm:$0xff] }
 0x9c0   :  { %v9055_v41 = vpop.eup %9054 }
 0x9c1   :  { %v9057_v3 = vpop.eup %9056  ;;  %v2853_v37 = vmul.f32 %v9055_v41, %v9053_v40  ;;  %v3375_v40 = vld [vmem:[#allocation9 + $0x210] sm:$0xff] }
 0x9c2   :  { %v2852_v59 = vmul.f32 0.0, %v9057_v3  ;;  %v9059_v46 = vpop.eup %9058  ;;  %v3379_v41 = vld [vmem:[#allocation9 + $0x230] sm:$0xff] }
 0x9c3   :  { %v10186_v3 = vpack.c.bf16 %v3379_v41, %v3375_v40  ;;  %v3418_v40 = vld [vmem:[#allocation9 + $0x368] sm:$0xff]  ;;  %v10235_v41 = vpack.c.bf16 %v3411_v23, %v3407_v45  ;;  %v3113_v45 = vld [vmem:[#allocation3 + $0x8] sm:$0x30] }
 0x9c4   :  { %v10138_v20 = vadd.f32 %v2853_v37, %v2852_v59  ;;  %v3382_v37 = vld [vmem:[#allocation9 + $0x248] sm:$0xff]  ;;  %v3384_v59 = vld [vmem:[#allocation9 + $0x258] sm:$0xff] }
 0x9c6   :  { %9060 = vtanh.f32 %v10138_v20  ;;  %v3104_v19 = vrot.slane %v10138_v20, 6  ;;  %v10191_v20 = vpack.c.bf16 %v3386_v42, %v3382_v37  ;;  %v10237_v37 = vpack.c.bf16 %v3418_v40, %v3414_v52  ;;  %v3416_v42 = vld [vmem:[#allocation9 + $0x358] sm:$0xff] }
 0x9d0   :  { %v9061_v47 = vpop.eup %9060 }
 0x9d1   :  { %v2856_v2 = vmul.f32 %v9061_v47, %v9059_v46  ;;  %v3388_v46 = vld [vmem:[#allocation9 + $0x278] sm:$0xff]  ;;  %v3381_v47 = vld [vmem:[#allocation9 + $0x240] sm:$0xff] }
 0x9d3   :  { %2857 = vst [vmem:[#allocation2] sm:$0x3] %v2856_v2  ;;  %2991 = vmatmul.mubr.f32.vlgmr.msra.gmra.mrb[26].mxu0 %v2856_v2  ;;  %3062 = vmatmul.mubr.f32.vlgmr.msra.gmra.mrb[26].mxu1 %v2856_v2  ;;  %v3385_v2 = vld [vmem:[#allocation9 + $0x260] sm:$0xff] }
 0x9d4   :  { %7922 = vmatpush1.bf16.msra.mxu0 %v9985_v21  ;;  %7954 = vmatpush1.bf16.msra.mxu1 %v9988_v32 }
 0x9d5   :  { %7924 = vmatprep.subr.bf16.mxu0 %v9993_v9  ;;  %7956 = vmatprep.subr.bf16.mxu1 %v9995_v58 }
 0x9d6   :  { %3247 = vmatprep.mubr.f32.mxu0 %v9453_v0  ;;  %3318 = vmatprep.mubr.f32.mxu1 %v9453_v0 }
 0x9d8   :  { %7926 = vmatpush1.bf16.msra.mxu0 %v9997_v4  ;;  %7958 = vmatpush1.bf16.msra.mxu1 %v10000_v34  ;;  %v2858_v34 = vld [vmem:[#allocation3] sm:$0xc] }
 0x9d9   :  { %7928 = vmatprep.subr.bf16.mxu0 %v10005_v44  ;;  %7960 = vmatprep.subr.bf16.mxu1 %v10007_v54 }
 0x9dc   :  { %7930 = vmatpush1.bf16.msra.mxu0 %v10009_v49  ;;  %7962 = vmatpush1.bf16.msra.mxu1 %v10012_v12  ;;  %v2859_v49 = vld [vmem:[#allocation3 + $0x8] sm:$0xc] }
 0x9dd   :  { %7932 = vmatprep.subr.bf16.mxu0 %v10017_v53  ;;  %7964 = vmatprep.subr.bf16.mxu1 %v10019_v16 }
 0x9e0   :  { %7934 = vmatpush1.bf16.msra.mxu0 %v10021_v31  ;;  %7966 = vmatpush1.bf16.msra.mxu1 %v10024_v56  ;;  %v2861_v56 = vld [vmem:[#allocation3 + $0x18] sm:$0xc] }
 0x9e1   :  { %7936 = vmatprep.subr.bf16.mxu0 %v10029_v24  ;;  %7968 = vmatprep.subr.bf16.mxu1 %v10031_v5 }
 0x9e4   :  { %7938 = vmatpush1.bf16.msra.mxu0 %v10033_v11  ;;  %7970 = vmatpush1.bf16.msra.mxu1 %v10036_v7  ;;  %v2860_v11 = vld [vmem:[#allocation3 + $0x10] sm:$0xc] }
 0x9e5   :  { %7940 = vmatprep.subr.bf16.mxu0 %v10041_v33  ;;  %7972 = vmatprep.subr.bf16.mxu1 %v10043_v39 }
 0x9e8   :  { %7942 = vmatpush1.bf16.msra.mxu0 %v10045_v57  ;;  %7974 = vmatpush1.bf16.msra.mxu1 %v10048_v17 }
 0x9e9   :  { %7944 = vmatprep.subr.bf16.mxu0 %v10052_v38  ;;  %7976 = vmatprep.subr.bf16.mxu1 %v10054_v48 }
 0x9ec   :  { %7946 = vmatpush1.bf16.msra.mxu0 %v10057_v10  ;;  %7978 = vmatpush1.bf16.msra.mxu1 %v10061_v35 }
 0x9ed   :  { %7948 = vmatprep.subr.bf16.mxu0 %v10065_v15  ;;  %7980 = vmatprep.subr.bf16.mxu1 %v10067_v50 }
 0x9f0   :  { %7950 = vmatpush1.bf16.msra.mxu0 %v10069_v63  ;;  %7982 = vmatpush1.bf16.msra.mxu1 %v10072_v8 }
 0x9f1   :  { %7984 = vmatprep.subr.bf16.mxu0 %v10179_v61  ;;  %8016 = vmatprep.subr.bf16.mxu1 %v10181_v6 }
 0xaa6   :  { %v2992_v21 = vpop.f32.mrb[26].mxu0  ;;  %v3063_v32 = vpop.f32.mrb[26].mxu1 }
 0xaa7   :  { %v3072_v9 = vrot.slane %v2992_v21, 6  ;;  %v2994_v58 = vpop.f32.mrb[27].mxu0  ;;  %v3065_v4 = vpop.f32.mrb[27].mxu1  ;;  %v3074_v5 = vrot.slane %v3063_v32, 6  ;;  %v10193_v21 = vpack.c.bf16 %v3388_v46, %v3384_v59  ;;  %v10195_v32 = vpack.c.bf16 %v3385_v2, %v3381_v47  ;;  %v3420_v59 = vld [vmem:[#allocation9 + $0x378] sm:$0xff]  ;;  %v3413_v46 = vld [vmem:[#allocation9 + $0x340] sm:$0xff] }
 0xaa8   :  { %v3073_v44 = vrot.slane %v2994_v58, 6  ;;  %v3075_v31 = vrot.slane %v3065_v4, 6  ;;  %v3387_v58 = vld [vmem:[#allocation9 + $0x270] sm:$0xff]  ;;  %v10239_v47 = vpack.c.bf16 %v3420_v59, %v3416_v42  ;;  %v3417_v2 = vld [vmem:[#allocation9 + $0x360] sm:$0xff] }
 0xaa9   :  { %v3080_v54 = vadd.f32 %v3072_v9, %v2858_v34  ;;  %v3082_v33 = vadd.f32 %v3074_v5, %v2860_v11  ;;  %v3383_v9 = vld [vmem:[#allocation9 + $0x250] sm:$0xff]  ;;  %v3390_v34 = vld [vmem:[#allocation9 + $0x288] sm:$0xff]  ;;  %v3114_v42 = vld [vmem:[#allocation3 + $0x10] sm:$0x30] }
 0xaaa   :  { %v3081_v12 = vadd.f32 %v3073_v44, %v2859_v49  ;;  %v3083_v24 = vadd.f32 %v3075_v31, %v2861_v56  ;;  %v10198_v4 = vpack.c.bf16 %v3387_v58, %v3383_v9  ;;  %v3394_v44 = vld [vmem:[#allocation9 + $0x2a8] sm:$0xff]  ;;  %v3395_v5 = vld [vmem:[#allocation9 + $0x2b0] sm:$0xff] }
 0xaab   :  { %v7053_v53 = vmul.f32 -1.442695, %v3080_v54  ;;  %v3392_v54 = vld [vmem:[#allocation9 + $0x298] sm:$0xff]  ;;  %v10203_v49 = vpack.c.bf16 %v3394_v44, %v3390_v34  ;;  %v3415_v9 = vld [vmem:[#allocation9 + $0x350] sm:$0xff]  ;;  %v10242_v34 = vpack.c.bf16 %v3417_v2, %v3413_v46  ;;  %v3422_v44 = vld [vmem:[#allocation9 + $0x388] sm:$0xff] }
 0xaac   :  { %v7054_v16 = vmul.f32 -1.442695, %v3081_v12  ;;  %v7055_v7 = vmul.f32 -1.442695, %v3083_v24  ;;  %v3396_v12 = vld [vmem:[#allocation9 + $0x2b8] sm:$0xff]  ;;  %v3391_v24 = vld [vmem:[#allocation9 + $0x290] sm:$0xff] }
 0xaad   :  { %9062 = vpow2.f32 %v7053_v53  ;;  %v3389_v53 = vld [vmem:[#allocation9 + $0x280] sm:$0xff]  ;;  %v10205_v31 = vpack.c.bf16 %v3396_v12, %v3392_v54  ;;  %v10210_v11 = vpack.c.bf16 %v3395_v5, %v3391_v24  ;;  %v3419_v58 = vld [vmem:[#allocation9 + $0x370] sm:$0xff]  ;;  %v3426_v54 = vld [vmem:[#allocation9 + $0x3a8] sm:$0xff] }
 0xaae   :  { %9064 = vpow2.f32 %v7054_v16  ;;  %v3393_v16 = vld [vmem:[#allocation9 + $0x2a0] sm:$0xff]  ;;  %v3424_v12 = vld [vmem:[#allocation9 + $0x398] sm:$0xff] }
 0xaaf   :  { %9066 = vpow2.f32 %v7055_v7  ;;  %v10207_v56 = vpack.c.bf16 %v3393_v16, %v3389_v53  ;;  %v3398_v7 = vld [vmem:[#allocation9 + $0x2c8] sm:$0xff]  ;;  %v10246_v53 = vpack.c.bf16 %v3419_v58, %v3415_v9  ;;  %v10248_v16 = vpack.c.bf16 %v3426_v54, %v3422_v44  ;;  %v3428_v24 = vld [vmem:[#allocation9 + $0x3b8] sm:$0xff]  ;;  %v3421_v5 = vld [vmem:[#allocation9 + $0x380] sm:$0xff] }
 0xab0   :  { %9068 = vtanh.f32 %v3082_v33  ;;  %v3402_v33 = vld [vmem:[#allocation9 + $0x2e8] sm:$0xff] }
 0xab7   :  { %v9063_v39 = vpop.eup %9062 }
 0xab8   :  { %v9065_v57 = vpop.eup %9064  ;;  %v3087_v17 = vadd.f32 1.0, %v9063_v39  ;;  %v3400_v39 = vld [vmem:[#allocation9 + $0x2d8] sm:$0xff] }
 0xab9   :  { %v3093_v38 = vadd.f32 1.0, %v9065_v57  ;;  %v9067_v48 = vpop.eup %9066  ;;  %v10215_v57 = vpack.c.bf16 %v3402_v33, %v3398_v7  ;;  %v3425_v7 = vld [vmem:[#allocation9 + $0x3a0] sm:$0xff]  ;;  %v10251_v33 = vpack.c.bf16 %v3428_v24, %v3424_v12 }
 0xaba   :  { %9070 = vrcp.f32 %v3087_v17  ;;  %v9069_v10 = vpop.eup %9068  ;;  %v3100_v55 = vadd.f32 1.0, %v9067_v48  ;;  %v3404_v17 = vld [vmem:[#allocation9 + $0x2f8] sm:$0xff]  ;;  %v3401_v48 = vld [vmem:[#allocation9 + $0x2e0] sm:$0xff] }
 0xabb   :  { %9072 = vrcp.f32 %v3093_v38  ;;  %v3397_v38 = vld [vmem:[#allocation9 + $0x2c0] sm:$0xff] }
 0xabc   :  { %9074 = vrcp.f32 %v3100_v55 }
 0xac4   :  { %v9071_v35 = vpop.eup %9070 }
 0xac5   :  { %v9073_v51 = vpop.eup %9072  ;;  %v3107_v43 = vmul.f32 %v9071_v35, %v9069_v10  ;;  %v10217_v10 = vpack.c.bf16 %v3404_v17, %v3400_v39  ;;  %v10219_v35 = vpack.c.bf16 %v3401_v48, %v3397_v38  ;;  %v3423_v39 = vld [vmem:[#allocation9 + $0x390] sm:$0xff]  ;;  %v10254_v38 = vpack.c.bf16 %v3425_v7, %v3421_v5 }
 0xac6   :  { %v3106_v25 = vmul.f32 %v9073_v51, %v3104_v19  ;;  %v9075_v62 = vpop.eup %9074  ;;  %v3399_v19 = vld [vmem:[#allocation9 + $0x2d0] sm:$0xff] }
 0xac7   :  { %v3403_v51 = vld [vmem:[#allocation9 + $0x2f0] sm:$0xff] }
 0xac8   :  { %v10174_v29 = vadd.f32 %v3107_v43, %v3106_v25  ;;  %v3406_v43 = vld [vmem:[#allocation9 + $0x308] sm:$0xff]  ;;  %v10222_v55 = vpack.c.bf16 %v3403_v51, %v3399_v19  ;;  %v3427_v17 = vld [vmem:[#allocation9 + $0x3b0] sm:$0xff] }
 0xac9   :  { %v3410_v25 = vld [vmem:[#allocation9 + $0x328] sm:$0xff]  ;;  %v10258_v48 = vpack.c.bf16 %v3427_v17, %v3423_v39 }
 0xaca   :  { %9076 = vtanh.f32 %v10174_v29  ;;  %v3361_v5 = vrot.slane %v10174_v29, 6  ;;  %v3687_v29 = vld [vmem:[#allocation9 + $0x3c8] sm:$0xff] }
 0xad4   :  { %v9077_v36 = vpop.eup %9076 }
 0xad5   :  { %v3110_v14 = vmul.f32 %v9077_v36, %v9075_v62  ;;  %v3408_v62 = vld [vmem:[#allocation9 + $0x318] sm:$0xff] }
 0xad6   :  { %v3412_v36 = vld [vmem:[#allocation9 + $0x338] sm:$0xff] }
 0xad7   :  { %3111 = vst [vmem:[#allocation2] sm:$0xc] %v3110_v14  ;;  %v3181_v60 = vrot.slane %v3110_v14, 2  ;;  %v10226_v14 = vpack.c.bf16 %v3410_v25, %v3406_v43 }
 0xad9   :  { %3248 = vmatmul.mubr.f32.vlgmr.msra.gmra.mrb[28].mxu0 %v3181_v60  ;;  %3319 = vmatmul.mubr.f32.vlgmr.msra.gmra.mrb[28].mxu1 %v3181_v60  ;;  %v10228_v60 = vpack.c.bf16 %v3412_v36, %v3408_v62  ;;  %v3112_v36 = vld [vmem:[#allocation3] sm:$0x30] }
 0xada   :  { %3504 = vmatprep.mubr.f32.mxu0 %v9453_v0  ;;  %3575 = vmatprep.mubr.f32.mxu1 %v9453_v0 }
 0xadb   :  { %7986 = vmatpush1.bf16.msra.mxu0 %v10183_v18  ;;  %8018 = vmatpush1.bf16.msra.mxu1 %v10186_v3 }
 0xadc   :  { %7988 = vmatprep.subr.bf16.mxu0 %v10191_v20  ;;  %8020 = vmatprep.subr.bf16.mxu1 %v10193_v21 }
 0xadf   :  { %7990 = vmatpush1.bf16.msra.mxu0 %v10195_v32  ;;  %8022 = vmatpush1.bf16.msra.mxu1 %v10198_v4 }
 0xae0   :  { %7992 = vmatprep.subr.bf16.mxu0 %v10203_v49  ;;  %8024 = vmatprep.subr.bf16.mxu1 %v10205_v31 }
 0xae3   :  { %7994 = vmatpush1.bf16.msra.mxu0 %v10207_v56  ;;  %8026 = vmatpush1.bf16.msra.mxu1 %v10210_v11 }
 0xae4   :  { %7996 = vmatprep.subr.bf16.mxu0 %v10215_v57  ;;  %8028 = vmatprep.subr.bf16.mxu1 %v10217_v10 }
 0xae7   :  { %7998 = vmatpush1.bf16.msra.mxu0 %v10219_v35  ;;  %8030 = vmatpush1.bf16.msra.mxu1 %v10222_v55 }
 0xae8   :  { %8000 = vmatprep.subr.bf16.mxu0 %v10226_v14  ;;  %8032 = vmatprep.subr.bf16.mxu1 %v10228_v60 }
 0xaeb   :  { %8002 = vmatpush1.bf16.msra.mxu0 %v10231_v13  ;;  %8034 = vmatpush1.bf16.msra.mxu1 %v10235_v41 }
 0xaec   :  { %8004 = vmatprep.subr.bf16.mxu0 %v10237_v37  ;;  %8036 = vmatprep.subr.bf16.mxu1 %v10239_v47 }
 0xaef   :  { %8006 = vmatpush1.bf16.msra.mxu0 %v10242_v34  ;;  %8038 = vmatpush1.bf16.msra.mxu1 %v10246_v53 }
 0xaf0   :  { %8008 = vmatprep.subr.bf16.mxu0 %v10248_v16  ;;  %8040 = vmatprep.subr.bf16.mxu1 %v10251_v33 }
 0xaf3   :  { %8010 = vmatpush1.bf16.msra.mxu0 %v10254_v38  ;;  %8042 = vmatpush1.bf16.msra.mxu1 %v10258_v48 }
 0xaf4   :  { %8012 = vmatprep.subr.bf16.mxu0 %v10065_v15  ;;  %8044 = vmatprep.subr.bf16.mxu1 %v10067_v50 }
 0xaf7   :  { %8014 = vmatpush1.bf16.msra.mxu0 %v10069_v63  ;;  %8046 = vmatpush1.bf16.msra.mxu1 %v10072_v8  ;;  %v3115_v63 = vld [vmem:[#allocation3 + $0x18] sm:$0x30] }
 0xaf8   :  { %8048 = vmatprep.subr.bf16.mxu0 %v10179_v61  ;;  %8080 = vmatprep.subr.bf16.mxu1 %v10181_v6 }
 0xbac   :  { %v3249_v19 = vpop.f32.mrb[28].mxu0  ;;  %v3320_v51 = vpop.f32.mrb[28].mxu1 }
 0xbad   :  { %v3329_v43 = vrot.slane %v3249_v19, 4  ;;  %v3251_v25 = vpop.f32.mrb[29].mxu0  ;;  %v3322_v62 = vpop.f32.mrb[29].mxu1  ;;  %v3331_v40 = vrot.slane %v3320_v51, 4 }
 0xbae   :  { %v3330_v26 = vrot.slane %v3251_v25, 4  ;;  %v3332_v52 = vrot.slane %v3322_v62, 4 }
 0xbaf   :  { %v3337_v1 = vadd.f32 %v3329_v43, %v3112_v36  ;;  %v3339_v46 = vadd.f32 %v3331_v40, %v3114_v42  ;;  %v3692_v40 = vld [vmem:[#allocation9 + $0x3f0] sm:$0xff] }
 0xbb0   :  { %v3338_v15 = vadd.f32 %v3330_v26, %v3113_v45  ;;  %v3340_v8 = vadd.f32 %v3332_v52, %v3115_v63  ;;  %v3691_v26 = vld [vmem:[#allocation9 + $0x3e8] sm:$0xff] }
 0xbb1   :  { %v7056_v23 = vmul.f32 -1.442695, %v3337_v1  ;;  %v3689_v1 = vld [vmem:[#allocation9 + $0x3d8] sm:$0xff]  ;;  %v10301_v45 = vpack.c.bf16 %v3691_v26, %v3687_v29 }
 0xbb2   :  { %v7057_v50 = vmul.f32 -1.442695, %v3338_v15  ;;  %v7058_v59 = vmul.f32 -1.442695, %v3340_v8  ;;  %v3693_v15 = vld [vmem:[#allocation9 + $0x3f8] sm:$0xff]  ;;  %v3688_v8 = vld [vmem:[#allocation9 + $0x3d0] sm:$0xff] }
 0xbb3   :  { %9078 = vpow2.f32 %v7056_v23  ;;  %v3686_v23 = vld [vmem:[#allocation9 + $0x3c0] sm:$0xff]  ;;  %v10303_v52 = vpack.c.bf16 %v3693_v15, %v3689_v1  ;;  %v10308_v42 = vpack.c.bf16 %v3692_v40, %v3688_v8 }
 0xbb4   :  { %9080 = vpow2.f32 %v7057_v50  ;;  %v3690_v50 = vld [vmem:[#allocation9 + $0x3e0] sm:$0xff] }
 0xbb5   :  { %9082 = vpow2.f32 %v7058_v59  ;;  %v10305_v63 = vpack.c.bf16 %v3690_v50, %v3686_v23 }
 0xbb6   :  { %9084 = vtanh.f32 %v3339_v46 }
 0xbbd   :  { %v9079_v2 = vpop.eup %9078 }
 0xbbe   :  { %v9081_v9 = vpop.eup %9080  ;;  %v3344_v58 = vadd.f32 1.0, %v9079_v2 }
 0xbbf   :  { %v3350_v44 = vadd.f32 1.0, %v9081_v9  ;;  %v9083_v54 = vpop.eup %9082 }
 0xbc0   :  { %9086 = vrcp.f32 %v3344_v58  ;;  %v9085_v12 = vpop.eup %9084  ;;  %v3357_v17 = vadd.f32 1.0, %v9083_v54 }
 0xbc1   :  { %9088 = vrcp.f32 %v3350_v44  ;;  %v3369_v44 = vld [vmem:[#allocation3] sm:$0xc0] }
 0xbc2   :  { %9090 = vrcp.f32 %v3357_v17 }
 0xbca   :  { %v9087_v24 = vpop.eup %9086 }
 0xbcb   :  { %v9089_v7 = vpop.eup %9088  ;;  %v3364_v39 = vmul.f32 %v9087_v24, %v9085_v12  ;;  %v3370_v24 = vld [vmem:[#allocation3 + $0x8] sm:$0xc0] }
 0xbcc   :  { %v3363_v19 = vmul.f32 %v9089_v7, %v3361_v5  ;;  %v9091_v43 = vpop.eup %9090 }
 0xbce   :  { %v10270_v51 = vadd.f32 %v3364_v39, %v3363_v19  ;;  %v3372_v19 = vld [vmem:[#allocation3 + $0x18] sm:$0xc0] }
 0xbd0   :  { %9092 = vtanh.f32 %v10270_v51 }
 0xbda   :  { %v9093_v25 = vpop.eup %9092 }
 0xbdb   :  { %v3367_v62 = vmul.f32 %v9093_v25, %v9091_v43 }
 0xbdd   :  { %3368 = vst [vmem:[#allocation2] sm:$0x30] %v3367_v62  ;;  %v3438_v36 = vrot.slane %v3367_v62, 4  ;;  %v3371_v62 = vld [vmem:[#allocation3 + $0x10] sm:$0xc0] }
 0xbdf   :  { %3505 = vmatmul.mubr.f32.vlgmr.msra.gmra.mrb[30].mxu0 %v3438_v36  ;;  %3576 = vmatmul.mubr.f32.vlgmr.msra.gmra.mrb[30].mxu1 %v3438_v36 }
 0xbe0   :  { %8050 = vmatpush1.bf16.msra.mxu0 %v10183_v18  ;;  %8082 = vmatpush1.bf16.msra.mxu1 %v10186_v3 }
 0xbe1   :  { %8052 = vmatprep.subr.bf16.mxu0 %v10191_v20  ;;  %8084 = vmatprep.subr.bf16.mxu1 %v10193_v21 }
 0xbe2   :  { %3761 = vmatprep.mubr.f32.mxu0 %v9453_v0  ;;  %3832 = vmatprep.mubr.f32.mxu1 %v9453_v0 }
 0xbe4   :  { %8054 = vmatpush1.bf16.msra.mxu0 %v10195_v32  ;;  %8086 = vmatpush1.bf16.msra.mxu1 %v10198_v4 }
 0xbe5   :  { %8056 = vmatprep.subr.bf16.mxu0 %v10203_v49  ;;  %8088 = vmatprep.subr.bf16.mxu1 %v10205_v31 }
 0xbe8   :  { %8058 = vmatpush1.bf16.msra.mxu0 %v10207_v56  ;;  %8090 = vmatpush1.bf16.msra.mxu1 %v10210_v11 }
 0xbe9   :  { %8060 = vmatprep.subr.bf16.mxu0 %v10215_v57  ;;  %8092 = vmatprep.subr.bf16.mxu1 %v10217_v10 }
 0xbec   :  { %8062 = vmatpush1.bf16.msra.mxu0 %v10219_v35  ;;  %8094 = vmatpush1.bf16.msra.mxu1 %v10222_v55 }
 0xbed   :  { %8064 = vmatprep.subr.bf16.mxu0 %v10226_v14  ;;  %8096 = vmatprep.subr.bf16.mxu1 %v10228_v60 }
 0xbf0   :  { %8066 = vmatpush1.bf16.msra.mxu0 %v10231_v13  ;;  %8098 = vmatpush1.bf16.msra.mxu1 %v10235_v41 }
 0xbf1   :  { %8068 = vmatprep.subr.bf16.mxu0 %v10237_v37  ;;  %8100 = vmatprep.subr.bf16.mxu1 %v10239_v47 }
 0xbf4   :  { %8070 = vmatpush1.bf16.msra.mxu0 %v10242_v34  ;;  %8102 = vmatpush1.bf16.msra.mxu1 %v10246_v53 }
 0xbf5   :  { %8072 = vmatprep.subr.bf16.mxu0 %v10248_v16  ;;  %8104 = vmatprep.subr.bf16.mxu1 %v10251_v33 }
 0xbf8   :  { %8074 = vmatpush1.bf16.msra.mxu0 %v10254_v38  ;;  %8106 = vmatpush1.bf16.msra.mxu1 %v10258_v48 }
 0xbf9   :  { %8076 = vmatprep.subr.bf16.mxu0 %v10301_v45  ;;  %8108 = vmatprep.subr.bf16.mxu1 %v10303_v52 }
 0xbfc   :  { %8078 = vmatpush1.bf16.msra.mxu0 %v10305_v63  ;;  %8110 = vmatpush1.bf16.msra.mxu1 %v10308_v42 }
 0xbfd   :  { %8112 = vmatprep.subr.bf16.mxu0 %v10179_v61  ;;  %8144 = vmatprep.subr.bf16.mxu1 %v10181_v6 }
 0xcb2   :  { %v3506_v59 = vpop.f32.mrb[30].mxu0  ;;  %v3577_v46 = vpop.f32.mrb[30].mxu1 }
 0xcb3   :  { %v3586_v2 = vrot.slane %v3506_v59, 2  ;;  %v3508_v9 = vpop.f32.mrb[31].mxu0  ;;  %v3579_v58 = vpop.f32.mrb[31].mxu1  ;;  %v3588_v25 = vrot.slane %v3577_v46, 2  ;;  %v3618_v59 = vrot.slane %v10270_v51, 6 }
 0xcb4   :  { %v3587_v54 = vrot.slane %v3508_v9, 2  ;;  %v3589_v17 = vrot.slane %v3579_v58, 2  ;;  %v3626_v51 = vld [vmem:[#allocation3 + $0x20] sm:$0x3] }
 0xcb5   :  { %v3594_v12 = vadd.f32 %v3586_v2, %v3369_v44  ;;  %v3596_v29 = vadd.f32 %v3588_v25, %v3371_v62 }
 0xcb6   :  { %v3595_v5 = vadd.f32 %v3587_v54, %v3370_v24  ;;  %v3597_v43 = vadd.f32 %v3589_v17, %v3372_v19  ;;  %v3627_v19 = vld [vmem:[#allocation3 + $0x28] sm:$0x3] }
 0xcb7   :  { %v7059_v7 = vmul.f32 -1.442695, %v3594_v12 }
 0xcb8   :  { %v7060_v39 = vmul.f32 -1.442695, %v3595_v5  ;;  %v7061_v36 = vmul.f32 -1.442695, %v3597_v43 }
 0xcb9   :  { %9094 = vpow2.f32 %v7059_v7 }
 0xcba   :  { %9096 = vpow2.f32 %v7060_v39 }
 0xcbb   :  { %9098 = vpow2.f32 %v7061_v36 }
 0xcbc   :  { %9100 = vtanh.f32 %v3596_v29 }
 0xcc3   :  { %v9095_v26 = vpop.eup %9094 }
 0xcc4   :  { %v9097_v1 = vpop.eup %9096  ;;  %v3601_v15 = vadd.f32 1.0, %v9095_v26  ;;  %v3629_v26 = vld [vmem:[#allocation3 + $0x38] sm:$0x3] }
 0xcc5   :  { %v3607_v23 = vadd.f32 1.0, %v9097_v1  ;;  %v9099_v50 = vpop.eup %9098 }
 0xcc6   :  { %9102 = vrcp.f32 %v3601_v15  ;;  %v9101_v8 = vpop.eup %9100  ;;  %v3614_v58 = vadd.f32 1.0, %v9099_v50  ;;  %v3628_v15 = vld [vmem:[#allocation3 + $0x30] sm:$0x3] }
 0xcc7   :  { %9104 = vrcp.f32 %v3607_v23 }
 0xcc8   :  { %9106 = vrcp.f32 %v3614_v58 }
 0xcd0   :  { %v9103_v40 = vpop.eup %9102 }
 0xcd1   :  { %v9105_v2 = vpop.eup %9104  ;;  %v3621_v9 = vmul.f32 %v9103_v40, %v9101_v8 }
 0xcd2   :  { %v3620_v46 = vmul.f32 %v9105_v2, %v3618_v59  ;;  %v9107_v54 = vpop.eup %9106 }
 0xcd4   :  { %v10316_v44 = vadd.f32 %v3621_v9, %v3620_v46 }
 0xcd6   :  { %9108 = vtanh.f32 %v10316_v44  ;;  %v3863_v58 = vrot.slane %v10316_v44, 6 }
 0xce0   :  { %v9109_v12 = vpop.eup %9108 }
 0xce1   :  { %v3624_v24 = vmul.f32 %v9109_v12, %v9107_v54 }
 0xce3   :  { %3625 = vst [vmem:[#allocation2] sm:$0xc0] %v3624_v24  ;;  %v3695_v5 = vrot.slane %v3624_v24, 6 }
 0xce5   :  { %3762 = vmatmul.mubr.f32.vlgmr.msra.gmra.mrb[32].mxu0 %v3695_v5  ;;  %3833 = vmatmul.mubr.f32.vlgmr.msra.gmra.mrb[32].mxu1 %v3695_v5 }
 0xce6   :  { %8114 = vmatpush1.bf16.msra.mxu0 %v10183_v18  ;;  %8146 = vmatpush1.bf16.msra.mxu1 %v10186_v3 }
 0xce7   :  { %8116 = vmatprep.subr.bf16.mxu0 %v10191_v20  ;;  %8148 = vmatprep.subr.bf16.mxu1 %v10193_v21 }
 0xce8   :  { %4003 = vmatprep.mubr.f32.mxu0 %v9453_v0  ;;  %4074 = vmatprep.mubr.f32.mxu1 %v9453_v0 }
 0xcea   :  { %8118 = vmatpush1.bf16.msra.mxu0 %v10195_v32  ;;  %8150 = vmatpush1.bf16.msra.mxu1 %v10198_v4 }
 0xceb   :  { %8120 = vmatprep.subr.bf16.mxu0 %v10203_v49  ;;  %8152 = vmatprep.subr.bf16.mxu1 %v10205_v31 }
 0xcee   :  { %8122 = vmatpush1.bf16.msra.mxu0 %v10207_v56  ;;  %8154 = vmatpush1.bf16.msra.mxu1 %v10210_v11 }
 0xcef   :  { %8124 = vmatprep.subr.bf16.mxu0 %v10215_v57  ;;  %8156 = vmatprep.subr.bf16.mxu1 %v10217_v10 }
 0xcf2   :  { %8126 = vmatpush1.bf16.msra.mxu0 %v10219_v35  ;;  %8158 = vmatpush1.bf16.msra.mxu1 %v10222_v55 }
 0xcf3   :  { %8128 = vmatprep.subr.bf16.mxu0 %v10226_v14  ;;  %8160 = vmatprep.subr.bf16.mxu1 %v10228_v60 }
 0xcf6   :  { %8130 = vmatpush1.bf16.msra.mxu0 %v10231_v13  ;;  %8162 = vmatpush1.bf16.msra.mxu1 %v10235_v41 }
 0xcf7   :  { %8132 = vmatprep.subr.bf16.mxu0 %v10237_v37  ;;  %8164 = vmatprep.subr.bf16.mxu1 %v10239_v47 }
 0xcfa   :  { %8134 = vmatpush1.bf16.msra.mxu0 %v10242_v34  ;;  %8166 = vmatpush1.bf16.msra.mxu1 %v10246_v53 }
 0xcfb   :  { %8136 = vmatprep.subr.bf16.mxu0 %v10248_v16  ;;  %8168 = vmatprep.subr.bf16.mxu1 %v10251_v33 }
 0xcfe   :  { %8138 = vmatpush1.bf16.msra.mxu0 %v10254_v38  ;;  %8170 = vmatpush1.bf16.msra.mxu1 %v10258_v48 }
 0xcff   :  { %8140 = vmatprep.subr.bf16.mxu0 %v10301_v45  ;;  %8172 = vmatprep.subr.bf16.mxu1 %v10303_v52 }
 0xd02   :  { %8142 = vmatpush1.bf16.msra.mxu0 %v10305_v63  ;;  %8174 = vmatpush1.bf16.msra.mxu1 %v10308_v42 }
 0xd03   :  { %8176 = vmatprep.subr.bf16.mxu0 %v10179_v61  ;;  %8208 = vmatprep.subr.bf16.mxu1 %v10181_v6 }
 0xdb8   :  { %v3763_v7 = vpop.f32.mrb[32].mxu0  ;;  %v3834_v39 = vpop.f32.mrb[32].mxu1 }
 0xdb9   :  { %v3839_v17 = vadd.f32 %v3763_v7, %v3626_v51  ;;  %v3765_v43 = vpop.f32.mrb[33].mxu0  ;;  %v3836_v25 = vpop.f32.mrb[33].mxu1  ;;  %v3841_v50 = vadd.f32 %v3834_v39, %v3628_v15  ;;  %v4387_v15 = vld [vmem:[#allocation9 + $0x208] sm:$0xff] }
 0xdba   :  { %v3840_v62 = vadd.f32 %v3765_v43, %v3627_v19  ;;  %v3842_v1 = vadd.f32 %v3836_v25, %v3629_v26 }
 0xdbb   :  { %v7062_v36 = vmul.f32 -1.442695, %v3839_v17 }
 0xdbc   :  { %v7063_v29 = vmul.f32 -1.442695, %v3840_v62  ;;  %v7064_v23 = vmul.f32 -1.442695, %v3842_v1 }
 0xdbd   :  { %9110 = vpow2.f32 %v7062_v36 }
 0xdbe   :  { %9112 = vpow2.f32 %v7063_v29 }
 0xdbf   :  { %9114 = vpow2.f32 %v7064_v23  ;;  %v4391_v23 = vld [vmem:[#allocation9 + $0x228] sm:$0xff] }
 0xdc0   :  { %9116 = vtanh.f32 %v3841_v50  ;;  %v4389_v50 = vld [vmem:[#allocation9 + $0x218] sm:$0xff] }
 0xdc7   :  { %v9111_v61 = vpop.eup %9110 }
 0xdc8   :  { %v9113_v8 = vpop.eup %9112  ;;  %v3846_v6 = vadd.f32 1.0, %v9111_v61  ;;  %v8239_v61 = vpack.c.bf16 %v4391_v23, %v4387_v15  ;;  %v4418_v15 = vld [vmem:[#allocation9 + $0x300] sm:$0xff] }
 0xdc9   :  { %v3852_v40 = vadd.f32 1.0, %v9113_v8  ;;  %v9115_v59 = vpop.eup %9114  ;;  %v4393_v8 = vld [vmem:[#allocation9 + $0x238] sm:$0xff]  ;;  %v4422_v23 = vld [vmem:[#allocation9 + $0x320] sm:$0xff] }
 0xdca   :  { %9118 = vrcp.f32 %v3846_v6  ;;  %v9117_v2 = vpop.eup %9116  ;;  %v3859_v12 = vadd.f32 1.0, %v9115_v59  ;;  %v4386_v6 = vld [vmem:[#allocation9 + $0x200] sm:$0xff]  ;;  %v8271_v59 = vpack.c.bf16 %v4393_v8, %v4389_v50  ;;  %v4420_v50 = vld [vmem:[#allocation9 + $0x310] sm:$0xff] }
 0xdcb   :  { %9120 = vrcp.f32 %v3852_v40  ;;  %v4390_v40 = vld [vmem:[#allocation9 + $0x220] sm:$0xff]  ;;  %v4424_v8 = vld [vmem:[#allocation9 + $0x330] sm:$0xff] }
 0xdcc   :  { %9122 = vrcp.f32 %v3859_v12  ;;  %v4399_v12 = vld [vmem:[#allocation9 + $0x268] sm:$0xff] }
 0xdd4   :  { %v9119_v9 = vpop.eup %9118 }
 0xdd5   :  { %v9121_v46 = vpop.eup %9120  ;;  %v3866_v54 = vmul.f32 %v9119_v9, %v9117_v2  ;;  %v8241_v2 = vpack.c.bf16 %v4390_v40, %v4386_v6  ;;  %v4388_v9 = vld [vmem:[#allocation9 + $0x210] sm:$0xff]  ;;  %v4427_v6 = vld [vmem:[#allocation9 + $0x348] sm:$0xff] }
 0xdd6   :  { %v3865_v24 = vmul.f32 %v9121_v46, %v3863_v58  ;;  %v9123_v51 = vpop.eup %9122  ;;  %v4392_v58 = vld [vmem:[#allocation9 + $0x230] sm:$0xff]  ;;  %v4431_v40 = vld [vmem:[#allocation9 + $0x368] sm:$0xff] }
 0xdd7   :  { %v8273_v46 = vpack.c.bf16 %v4392_v58, %v4388_v9  ;;  %v4429_v9 = vld [vmem:[#allocation9 + $0x358] sm:$0xff] }
 0xdd8   :  { %v10354_v5 = vadd.f32 %v3866_v54, %v3865_v24  ;;  %v4395_v54 = vld [vmem:[#allocation9 + $0x248] sm:$0xff]  ;;  %v4397_v24 = vld [vmem:[#allocation9 + $0x258] sm:$0xff] }
 0xdd9   :  { %v4433_v58 = vld [vmem:[#allocation9 + $0x378] sm:$0xff] }
 0xdda   :  { %9124 = vtanh.f32 %v10354_v5  ;;  %v4117_v44 = vrot.slane %v10354_v5, 6  ;;  %v8243_v5 = vpack.c.bf16 %v4399_v12, %v4395_v54  ;;  %v8291_v54 = vpack.c.bf16 %v4433_v58, %v4429_v9  ;;  %v4430_v12 = vld [vmem:[#allocation9 + $0x360] sm:$0xff] }
 0xddb   :  { %v4642_v58 = vld [vmem:[#allocation7 + $0x400] sm:$0xff] }
 0xde4   :  { %v9125_v7 = vpop.eup %9124 }
 0xde5   :  { %v3869_v39 = vmul.f32 %v9125_v7, %v9123_v51  ;;  %v4401_v51 = vld [vmem:[#allocation9 + $0x278] sm:$0xff]  ;;  %v4394_v7 = vld [vmem:[#allocation9 + $0x240] sm:$0xff] }
 0xde7   :  { %3870 = vst [vmem:[#allocation2 + $0x8] sm:$0x3] %v3869_v39  ;;  %4004 = vmatmul.mubr.f32.vlgmr.msra.gmra.mrb[34].mxu0 %v3869_v39  ;;  %4075 = vmatmul.mubr.f32.vlgmr.msra.gmra.mrb[34].mxu1 %v3869_v39  ;;  %v4398_v39 = vld [vmem:[#allocation9 + $0x260] sm:$0xff] }
 0xde8   :  { %8178 = vmatpush1.bf16.msra.mxu0 %v10183_v18  ;;  %8210 = vmatpush1.bf16.msra.mxu1 %v10186_v3 }
 0xde9   :  { %8180 = vmatprep.subr.bf16.mxu0 %v10191_v20  ;;  %8212 = vmatprep.subr.bf16.mxu1 %v10193_v21 }
 0xdea   :  { %4260 = vmatprep.mubr.f32.mxu0 %v9453_v0  ;;  %4331 = vmatprep.mubr.f32.mxu1 %v9453_v0 }
 0xdec   :  { %8182 = vmatpush1.bf16.msra.mxu0 %v10195_v32  ;;  %8214 = vmatpush1.bf16.msra.mxu1 %v10198_v4  ;;  %v3871_v4 = vld [vmem:[#allocation3 + $0x20] sm:$0xc] }
 0xded   :  { %8184 = vmatprep.subr.bf16.mxu0 %v10203_v49  ;;  %8216 = vmatprep.subr.bf16.mxu1 %v10205_v31 }
 0xdf0   :  { %8186 = vmatpush1.bf16.msra.mxu0 %v10207_v56  ;;  %8218 = vmatpush1.bf16.msra.mxu1 %v10210_v11  ;;  %v3872_v56 = vld [vmem:[#allocation3 + $0x28] sm:$0xc] }
 0xdf1   :  { %8188 = vmatprep.subr.bf16.mxu0 %v10215_v57  ;;  %8220 = vmatprep.subr.bf16.mxu1 %v10217_v10 }
 0xdf4   :  { %8190 = vmatpush1.bf16.msra.mxu0 %v10219_v35  ;;  %8222 = vmatpush1.bf16.msra.mxu1 %v10222_v55  ;;  %v3874_v55 = vld [vmem:[#allocation3 + $0x38] sm:$0xc] }
 0xdf5   :  { %8192 = vmatprep.subr.bf16.mxu0 %v10226_v14  ;;  %8224 = vmatprep.subr.bf16.mxu1 %v10228_v60 }
 0xdf8   :  { %8194 = vmatpush1.bf16.msra.mxu0 %v10231_v13  ;;  %8226 = vmatpush1.bf16.msra.mxu1 %v10235_v41  ;;  %v3873_v13 = vld [vmem:[#allocation3 + $0x30] sm:$0xc] }
 0xdf9   :  { %8196 = vmatprep.subr.bf16.mxu0 %v10237_v37  ;;  %8228 = vmatprep.subr.bf16.mxu1 %v10239_v47 }
 0xdfc   :  { %8198 = vmatpush1.bf16.msra.mxu0 %v10242_v34  ;;  %8230 = vmatpush1.bf16.msra.mxu1 %v10246_v53 }
 0xdfd   :  { %8200 = vmatprep.subr.bf16.mxu0 %v10248_v16  ;;  %8232 = vmatprep.subr.bf16.mxu1 %v10251_v33 }
 0xe00   :  { %8202 = vmatpush1.bf16.msra.mxu0 %v10254_v38  ;;  %8234 = vmatpush1.bf16.msra.mxu1 %v10258_v48 }
 0xe01   :  { %8204 = vmatprep.subr.bf16.mxu0 %v10301_v45  ;;  %8236 = vmatprep.subr.bf16.mxu1 %v10303_v52 }
 0xe04   :  { %8206 = vmatpush1.bf16.msra.mxu0 %v10305_v63  ;;  %8238 = vmatpush1.bf16.msra.mxu1 %v10308_v42 }
 0xe05   :  { %8240 = vmatprep.subr.bf16.mxu0 %v8239_v61  ;;  %8272 = vmatprep.subr.bf16.mxu1 %v8271_v59  ;;  %v8257_v61 = vpack.c.bf16 %v4422_v23, %v4418_v15  ;;  %v8289_v59 = vpack.c.bf16 %v4424_v8, %v4420_v50 }
 0xeba   :  { %v4005_v18 = vpop.f32.mrb[34].mxu0  ;;  %v4076_v3 = vpop.f32.mrb[34].mxu1 }
 0xebb   :  { %v4085_v20 = vrot.slane %v4005_v18, 6  ;;  %v4007_v21 = vpop.f32.mrb[35].mxu0  ;;  %v4078_v32 = vpop.f32.mrb[35].mxu1  ;;  %v4087_v60 = vrot.slane %v4076_v3, 6  ;;  %v8275_v18 = vpack.c.bf16 %v4401_v51, %v4397_v24  ;;  %v8245_v3 = vpack.c.bf16 %v4398_v39, %v4394_v7  ;;  %v4428_v24 = vld [vmem:[#allocation9 + $0x350] sm:$0xff]  ;;  %v4435_v7 = vld [vmem:[#allocation9 + $0x388] sm:$0xff] }
 0xebc   :  { %v4086_v49 = vrot.slane %v4007_v21, 6  ;;  %v4088_v35 = vrot.slane %v4078_v32, 6  ;;  %v4400_v21 = vld [vmem:[#allocation9 + $0x270] sm:$0xff]  ;;  %v4439_v39 = vld [vmem:[#allocation9 + $0x3a8] sm:$0xff] }
 0xebd   :  { %v4093_v31 = vadd.f32 %v4085_v20, %v3871_v4  ;;  %v4095_v37 = vadd.f32 %v4087_v60, %v3873_v13  ;;  %v4396_v20 = vld [vmem:[#allocation9 + $0x250] sm:$0xff]  ;;  %v4403_v4 = vld [vmem:[#allocation9 + $0x288] sm:$0xff] }
 0xebe   :  { %v4094_v11 = vadd.f32 %v4086_v49, %v3872_v56  ;;  %v4096_v14 = vadd.f32 %v4088_v35, %v3874_v55  ;;  %v8277_v32 = vpack.c.bf16 %v4400_v21, %v4396_v20  ;;  %v4407_v49 = vld [vmem:[#allocation9 + $0x2a8] sm:$0xff]  ;;  %v4408_v60 = vld [vmem:[#allocation9 + $0x2b0] sm:$0xff]  ;;  %v8263_v20 = vpack.c.bf16 %v4439_v39, %v4435_v7  ;;  %v4441_v21 = vld [vmem:[#allocation9 + $0x3b8] sm:$0xff] }
 0xebf   :  { %v7065_v57 = vmul.f32 -1.442695, %v4093_v31  ;;  %v4405_v31 = vld [vmem:[#allocation9 + $0x298] sm:$0xff]  ;;  %v8247_v56 = vpack.c.bf16 %v4407_v49, %v4403_v4  ;;  %v4438_v4 = vld [vmem:[#allocation9 + $0x3a0] sm:$0xff]  ;;  %v4655_v7 = vld [vmem:[#allocation7 + $0x468] sm:$0xff] }
 0xec0   :  { %v7066_v10 = vmul.f32 -1.442695, %v4094_v11  ;;  %v7067_v41 = vmul.f32 -1.442695, %v4096_v14  ;;  %v4409_v11 = vld [vmem:[#allocation9 + $0x2b8] sm:$0xff]  ;;  %v4404_v14 = vld [vmem:[#allocation9 + $0x290] sm:$0xff] }
 0xec1   :  { %9126 = vpow2.f32 %v7065_v57  ;;  %v4402_v57 = vld [vmem:[#allocation9 + $0x280] sm:$0xff]  ;;  %v8279_v35 = vpack.c.bf16 %v4409_v11, %v4405_v31  ;;  %v8281_v13 = vpack.c.bf16 %v4408_v60, %v4404_v14  ;;  %v4436_v31 = vld [vmem:[#allocation9 + $0x390] sm:$0xff]  ;;  %v4649_v14 = vld [vmem:[#allocation7 + $0x438] sm:$0xff] }
 0xec2   :  { %9128 = vpow2.f32 %v7066_v10  ;;  %v4406_v10 = vld [vmem:[#allocation9 + $0x2a0] sm:$0xff]  ;;  %v4653_v39 = vld [vmem:[#allocation7 + $0x458] sm:$0xff] }
 0xec3   :  { %9130 = vpow2.f32 %v7067_v41  ;;  %v8249_v55 = vpack.c.bf16 %v4406_v10, %v4402_v57  ;;  %v4411_v41 = vld [vmem:[#allocation9 + $0x2c8] sm:$0xff] }
 0xec4   :  { %9132 = vtanh.f32 %v4095_v37  ;;  %v4415_v37 = vld [vmem:[#allocation9 + $0x2e8] sm:$0xff] }
 0xec5   :  { %v4643_v10 = vld [vmem:[#allocation7 + $0x408] sm:$0xff] }
 0xecb   :  { %v9127_v47 = vpop.eup %9126 }
 0xecc   :  { %v9129_v34 = vpop.eup %9128  ;;  %v4100_v53 = vadd.f32 1.0, %v9127_v47  ;;  %v4413_v47 = vld [vmem:[#allocation9 + $0x2d8] sm:$0xff] }
 0xecd   :  { %v4106_v16 = vadd.f32 1.0, %v9129_v34  ;;  %v9131_v33 = vpop.eup %9130  ;;  %v8251_v34 = vpack.c.bf16 %v4415_v37, %v4411_v41 }
 0xece   :  { %9134 = vrcp.f32 %v4100_v53  ;;  %v9133_v38 = vpop.eup %9132  ;;  %v4113_v43 = vadd.f32 1.0, %v9131_v33  ;;  %v4417_v53 = vld [vmem:[#allocation9 + $0x2f8] sm:$0xff]  ;;  %v4414_v33 = vld [vmem:[#allocation9 + $0x2e0] sm:$0xff] }
 0xecf   :  { %9136 = vrcp.f32 %v4106_v16  ;;  %v4410_v16 = vld [vmem:[#allocation9 + $0x2c0] sm:$0xff] }
 0xed0   :  { %9138 = vrcp.f32 %v4113_v43 }
 0xed8   :  { %v9135_v48 = vpop.eup %9134 }
 0xed9   :  { %v9137_v17 = vpop.eup %9136  ;;  %v4120_v19 = vmul.f32 %v9135_v48, %v9133_v38  ;;  %v8283_v38 = vpack.c.bf16 %v4417_v53, %v4413_v47  ;;  %v8253_v48 = vpack.c.bf16 %v4414_v33, %v4410_v16  ;;  %v4125_v16 = vld [vmem:[#allocation3 + $0x20] sm:$0x30] }
 0xeda   :  { %v4119_v25 = vmul.f32 %v9137_v17, %v4117_v44  ;;  %v9139_v36 = vpop.eup %9138  ;;  %v4412_v44 = vld [vmem:[#allocation9 + $0x2d0] sm:$0xff] }
 0xedb   :  { %v4416_v17 = vld [vmem:[#allocation9 + $0x2f0] sm:$0xff] }
 0xedc   :  { %v10390_v62 = vadd.f32 %v4120_v19, %v4119_v25  ;;  %v4419_v19 = vld [vmem:[#allocation9 + $0x308] sm:$0xff]  ;;  %v8285_v43 = vpack.c.bf16 %v4416_v17, %v4412_v44 }
 0xedd   :  { %v4423_v25 = vld [vmem:[#allocation9 + $0x328] sm:$0xff] }
 0xede   :  { %9140 = vtanh.f32 %v10390_v62  ;;  %v4374_v8 = vrot.slane %v10390_v62, 6 }
 0xee8   :  { %v9141_v29 = vpop.eup %9140 }
 0xee9   :  { %v4123_v26 = vmul.f32 %v9141_v29, %v9139_v36  ;;  %v4421_v36 = vld [vmem:[#allocation9 + $0x318] sm:$0xff] }
 0xeea   :  { %v4425_v29 = vld [vmem:[#allocation9 + $0x338] sm:$0xff] }
 0xeeb   :  { %4124 = vst [vmem:[#allocation2 + $0x8] sm:$0xc] %v4123_v26  ;;  %v4194_v1 = vrot.slane %v4123_v26, 2  ;;  %v8255_v26 = vpack.c.bf16 %v4423_v25, %v4419_v19 }
 0xeed   :  { %4261 = vmatmul.mubr.f32.vlgmr.msra.gmra.mrb[36].mxu0 %v4194_v1  ;;  %4332 = vmatmul.mubr.f32.vlgmr.msra.gmra.mrb[36].mxu1 %v4194_v1  ;;  %v8287_v1 = vpack.c.bf16 %v4425_v29, %v4421_v36 }
 0xeee   :  { %4517 = vmatprep.mubr.f32.mxu0 %v9453_v0  ;;  %4588 = vmatprep.mubr.f32.mxu1 %v9453_v0 }
 0xeef   :  { %8242 = vmatpush1.bf16.msra.mxu0 %v8241_v2  ;;  %8274 = vmatpush1.bf16.msra.mxu1 %v8273_v46  ;;  %v8259_v2 = vpack.c.bf16 %v4431_v40, %v4427_v6  ;;  %v4426_v46 = vld [vmem:[#allocation9 + $0x340] sm:$0xff] }
 0xef0   :  { %8244 = vmatprep.subr.bf16.mxu0 %v8243_v5  ;;  %8276 = vmatprep.subr.bf16.mxu1 %v8275_v18  ;;  %v4432_v5 = vld [vmem:[#allocation9 + $0x370] sm:$0xff]  ;;  %v8261_v51 = vpack.c.bf16 %v4430_v12, %v4426_v46  ;;  %v4437_v18 = vld [vmem:[#allocation9 + $0x398] sm:$0xff]  ;;  %v4646_v46 = vld [vmem:[#allocation7 + $0x420] sm:$0xff] }
 0xef1   :  { %v8295_v49 = vpack.c.bf16 %v4441_v21, %v4437_v18  ;;  %v4644_v12 = vld [vmem:[#allocation7 + $0x410] sm:$0xff]  ;;  %v4657_v18 = vld [vmem:[#allocation7 + $0x478] sm:$0xff]  ;;  %v4650_v21 = vld [vmem:[#allocation7 + $0x440] sm:$0xff] }
 0xef3   :  { %8246 = vmatpush1.bf16.msra.mxu0 %v8245_v3  ;;  %8278 = vmatpush1.bf16.msra.mxu1 %v8277_v32  ;;  %v8293_v3 = vpack.c.bf16 %v4432_v5, %v4428_v24  ;;  %v4434_v32 = vld [vmem:[#allocation9 + $0x380] sm:$0xff]  ;;  %v4648_v24 = vld [vmem:[#allocation7 + $0x430] sm:$0xff]  ;;  %v4651_v5 = vld [vmem:[#allocation7 + $0x448] sm:$0xff] }
 0xef4   :  { %8248 = vmatprep.subr.bf16.mxu0 %v8247_v56  ;;  %8280 = vmatprep.subr.bf16.mxu1 %v8279_v35  ;;  %v4440_v56 = vld [vmem:[#allocation9 + $0x3b0] sm:$0xff]  ;;  %v8265_v11 = vpack.c.bf16 %v4438_v4, %v4434_v32  ;;  %v4647_v35 = vld [vmem:[#allocation7 + $0x428] sm:$0xff]  ;;  %v4654_v32 = vld [vmem:[#allocation7 + $0x460] sm:$0xff] }
 0xef5   :  { %v8297_v57 = vpack.c.bf16 %v4440_v56, %v4436_v31  ;;  %v8303_v60 = vpack.c.bf16 %v4647_v35, %v4643_v10  ;;  %v8339_v31 = vpack.c.bf16 %v4657_v18, %v4653_v39  ;;  %v4652_v56 = vld [vmem:[#allocation7 + $0x450] sm:$0xff]  ;;  %v4663_v10 = vld [vmem:[#allocation7 + $0x4a8] sm:$0xff]  ;;  %v4661_v35 = vld [vmem:[#allocation7 + $0x498] sm:$0xff] }
 0xef6   :  { %v4684_v39 = vld [vmem:[#allocation7 + $0x550] sm:$0xff] }
 0xef7   :  { %8250 = vmatpush1.bf16.msra.mxu0 %v8249_v55  ;;  %8282 = vmatpush1.bf16.msra.mxu1 %v8281_v13  ;;  %v4645_v55 = vld [vmem:[#allocation7 + $0x418] sm:$0xff]  ;;  %v4688_v18 = vld [vmem:[#allocation7 + $0x570] sm:$0xff] }
 0xef8   :  { %8252 = vmatprep.subr.bf16.mxu0 %v8251_v34  ;;  %8284 = vmatprep.subr.bf16.mxu1 %v8283_v38  ;;  %v8335_v13 = vpack.c.bf16 %v4649_v14, %v4645_v55  ;;  %v4665_v55 = vld [vmem:[#allocation7 + $0x4b8] sm:$0xff]  ;;  %v8309_v14 = vpack.c.bf16 %v4654_v32, %v4650_v21 }
 0xef9   :  { %v4697_v21 = vld [vmem:[#allocation7 + $0x5b8] sm:$0xff] }
 0xefb   :  { %8254 = vmatpush1.bf16.msra.mxu0 %v8253_v48  ;;  %8286 = vmatpush1.bf16.msra.mxu1 %v8285_v43  ;;  %v4126_v48 = vld [vmem:[#allocation3 + $0x28] sm:$0x30]  ;;  %v4127_v43 = vld [vmem:[#allocation3 + $0x30] sm:$0x30] }
 0xefc   :  { %8256 = vmatprep.subr.bf16.mxu0 %v8255_v26  ;;  %8288 = vmatprep.subr.bf16.mxu1 %v8287_v1 }
 0xeff   :  { %8258 = vmatpush1.bf16.msra.mxu0 %v8257_v61  ;;  %8290 = vmatpush1.bf16.msra.mxu1 %v8289_v59 }
 0xf00   :  { %8260 = vmatprep.subr.bf16.mxu0 %v8259_v2  ;;  %8292 = vmatprep.subr.bf16.mxu1 %v8291_v54 }
 0xf03   :  { %8262 = vmatpush1.bf16.msra.mxu0 %v8261_v51  ;;  %8294 = vmatpush1.bf16.msra.mxu1 %v8293_v3  ;;  %v8305_v3 = vpack.c.bf16 %v4646_v46, %v4642_v58  ;;  %v4685_v58 = vld [vmem:[#allocation7 + $0x558] sm:$0xff] }
 0xf04   :  { %8264 = vmatprep.subr.bf16.mxu0 %v8263_v20  ;;  %8296 = vmatprep.subr.bf16.mxu1 %v8295_v49  ;;  %v8337_v20 = vpack.c.bf16 %v4648_v24, %v4644_v12  ;;  %v8307_v49 = vpack.c.bf16 %v4655_v7, %v4651_v5  ;;  %v4689_v46 = vld [vmem:[#allocation7 + $0x578] sm:$0xff]  ;;  %v4682_v24 = vld [vmem:[#allocation7 + $0x540] sm:$0xff] }
 0xf05   :  { %v4686_v5 = vld [vmem:[#allocation7 + $0x560] sm:$0xff]  ;;  %v8355_v7 = vpack.c.bf16 %v4689_v46, %v4685_v58  ;;  %v4906_v58 = vld [vmem:[#allocation9 + $0x450] sm:$0xff] }
 0xf06   :  { %v8325_v32 = vpack.c.bf16 %v4686_v5, %v4682_v24  ;;  %v4910_v46 = vld [vmem:[#allocation9 + $0x470] sm:$0xff]  ;;  %v4917_v24 = vld [vmem:[#allocation9 + $0x4a8] sm:$0xff]  ;;  %v4915_v5 = vld [vmem:[#allocation9 + $0x498] sm:$0xff] }
 0xf07   :  { %8266 = vmatpush1.bf16.msra.mxu0 %v8265_v11  ;;  %8298 = vmatpush1.bf16.msra.mxu1 %v8297_v57  ;;  %v4656_v11 = vld [vmem:[#allocation7 + $0x470] sm:$0xff]  ;;  %v4659_v57 = vld [vmem:[#allocation7 + $0x488] sm:$0xff] }
 0xf08   :  { %8268 = vmatprep.subr.bf16.mxu0 %v10301_v45  ;;  %8300 = vmatprep.subr.bf16.mxu1 %v10303_v52 }
 0xf0b   :  { %8270 = vmatpush1.bf16.msra.mxu0 %v10305_v63  ;;  %8302 = vmatpush1.bf16.msra.mxu1 %v10308_v42  ;;  %v4128_v63 = vld [vmem:[#allocation3 + $0x38] sm:$0x30] }
 0xf0c   :  { %8304 = vmatprep.subr.bf16.mxu0 %v8303_v60  ;;  %8336 = vmatprep.subr.bf16.mxu1 %v8335_v13  ;;  %v8341_v60 = vpack.c.bf16 %v4656_v11, %v4652_v56  ;;  %v4658_v13 = vld [vmem:[#allocation7 + $0x480] sm:$0xff] }
 0xfc0   :  { %v4262_v41 = vpop.f32.mrb[36].mxu0  ;;  %v4333_v37 = vpop.f32.mrb[36].mxu1 }
 0xfc1   :  { %v4342_v47 = vrot.slane %v4262_v41, 4  ;;  %v4264_v34 = vpop.f32.mrb[37].mxu0  ;;  %v4335_v53 = vpop.f32.mrb[37].mxu1  ;;  %v4344_v42 = vrot.slane %v4333_v37, 4  ;;  %v4662_v41 = vld [vmem:[#allocation7 + $0x4a0] sm:$0xff]  ;;  %v8311_v37 = vpack.c.bf16 %v4663_v10, %v4659_v57  ;;  %v4692_v57 = vld [vmem:[#allocation7 + $0x590] sm:$0xff] }
 0xfc2   :  { %v4343_v33 = vrot.slane %v4264_v34, 4  ;;  %v4345_v52 = vrot.slane %v4335_v53, 4  ;;  %v4660_v34 = vld [vmem:[#allocation7 + $0x490] sm:$0xff] }
 0xfc3   :  { %v4350_v38 = vadd.f32 %v4342_v47, %v4125_v16  ;;  %v4352_v36 = vadd.f32 %v4344_v42, %v4127_v43  ;;  %v8343_v47 = vpack.c.bf16 %v4665_v55, %v4661_v35  ;;  %v4664_v53 = vld [vmem:[#allocation7 + $0x4b0] sm:$0xff]  ;;  %v4667_v16 = vld [vmem:[#allocation7 + $0x4c8] sm:$0xff] }
 0xfc4   :  { %v4351_v45 = vadd.f32 %v4343_v33, %v4126_v48  ;;  %v4353_v19 = vadd.f32 %v4345_v52, %v4128_v63  ;;  %v4671_v33 = vld [vmem:[#allocation7 + $0x4e8] sm:$0xff]  ;;  %v4673_v48 = vld [vmem:[#allocation7 + $0x4f8] sm:$0xff]  ;;  %v4670_v52 = vld [vmem:[#allocation7 + $0x4e0] sm:$0xff] }
 0xfc5   :  { %v7068_v44 = vmul.f32 -1.442695, %v4350_v38  ;;  %v4669_v38 = vld [vmem:[#allocation7 + $0x4d8] sm:$0xff]  ;;  %v8315_v63 = vpack.c.bf16 %v4671_v33, %v4667_v16  ;;  %v4668_v42 = vld [vmem:[#allocation7 + $0x4d0] sm:$0xff]  ;;  %v4699_v35 = vld [vmem:[#allocation7 + $0x5c8] sm:$0xff] }
 0xfc6   :  { %v7069_v17 = vmul.f32 -1.442695, %v4351_v45  ;;  %v7070_v25 = vmul.f32 -1.442695, %v4353_v19  ;;  %v8313_v45 = vpack.c.bf16 %v4662_v41, %v4658_v13  ;;  %v8347_v19 = vpack.c.bf16 %v4673_v48, %v4669_v38  ;;  %v4672_v43 = vld [vmem:[#allocation7 + $0x4f0] sm:$0xff]  ;;  %v4703_v55 = vld [vmem:[#allocation7 + $0x5e8] sm:$0xff] }
 0xfc7   :  { %9142 = vpow2.f32 %v7068_v44  ;;  %v8345_v44 = vpack.c.bf16 %v4664_v53, %v4660_v34  ;;  %v4696_v10 = vld [vmem:[#allocation7 + $0x5b0] sm:$0xff]  ;;  %v4702_v53 = vld [vmem:[#allocation7 + $0x5e0] sm:$0xff] }
 0xfc8   :  { %9144 = vpow2.f32 %v7069_v17  ;;  %v4666_v17 = vld [vmem:[#allocation7 + $0x4c0] sm:$0xff]  ;;  %v8361_v41 = vpack.c.bf16 %v4696_v10, %v4692_v57  ;;  %v4700_v16 = vld [vmem:[#allocation7 + $0x5d0] sm:$0xff] }
 0xfc9   :  { %9146 = vpow2.f32 %v7070_v25  ;;  %v4675_v25 = vld [vmem:[#allocation7 + $0x508] sm:$0xff]  ;;  %v4704_v33 = vld [vmem:[#allocation7 + $0x5f0] sm:$0xff]  ;;  %v4920_v57 = vld [vmem:[#allocation9 + $0x4c0] sm:$0xff] }
 0xfca   :  { %9148 = vtanh.f32 %v4352_v36  ;;  %v4679_v36 = vld [vmem:[#allocation7 + $0x528] sm:$0xff]  ;;  %v8365_v48 = vpack.c.bf16 %v4704_v33, %v4700_v16  ;;  %v4924_v10 = vld [vmem:[#allocation9 + $0x4e0] sm:$0xff] }
 0xfcb   :  { %v4928_v16 = vld [vmem:[#allocation9 + $0x500] sm:$0xff] }
 0xfcc   :  { %v4932_v33 = vld [vmem:[#allocation9 + $0x520] sm:$0xff] }
 0xfd1   :  { %v9143_v29 = vpop.eup %9142 }
 0xfd2   :  { %v9145_v26 = vpop.eup %9144  ;;  %v4357_v1 = vadd.f32 1.0, %v9143_v29  ;;  %v4677_v29 = vld [vmem:[#allocation7 + $0x518] sm:$0xff] }
 0xfd3   :  { %v4363_v15 = vadd.f32 1.0, %v9145_v26  ;;  %v9147_v23 = vpop.eup %9146  ;;  %v4681_v26 = vld [vmem:[#allocation7 + $0x538] sm:$0xff] }
 0xfd4   :  { %9150 = vrcp.f32 %v4357_v1  ;;  %v9149_v50 = vpop.eup %9148  ;;  %v4370_v59 = vadd.f32 1.0, %v9147_v23  ;;  %v8317_v1 = vpack.c.bf16 %v4670_v52, %v4666_v17  ;;  %v4674_v23 = vld [vmem:[#allocation7 + $0x500] sm:$0xff]  ;;  %v4901_v17 = vld [vmem:[#allocation9 + $0x428] sm:$0xff]  ;;  %v4899_v52 = vld [vmem:[#allocation9 + $0x418] sm:$0xff] }
 0xfd5   :  { %9152 = vrcp.f32 %v4363_v15  ;;  %v8349_v15 = vpack.c.bf16 %v4672_v43, %v4668_v42  ;;  %v4896_v42 = vld [vmem:[#allocation9 + $0x400] sm:$0xff] }
 0xfd6   :  { %9154 = vrcp.f32 %v4370_v59  ;;  %v4683_v59 = vld [vmem:[#allocation7 + $0x548] sm:$0xff]  ;;  %v4900_v43 = vld [vmem:[#allocation9 + $0x420] sm:$0xff] }
 0xfde   :  { %v9151_v61 = vpop.eup %9150 }
 0xfdf   :  { %v9153_v6 = vpop.eup %9152  ;;  %v4377_v40 = vmul.f32 %v9151_v61, %v9149_v50  ;;  %v4678_v50 = vld [vmem:[#allocation7 + $0x520] sm:$0xff]  ;;  %v8319_v61 = vpack.c.bf16 %v4679_v36, %v4675_v25  ;;  %v10411_v36 = vpack.c.bf16 %v4900_v43, %v4896_v42  ;;  %v4939_v42 = vld [vmem:[#allocation9 + $0x558] sm:$0xff] }
 0xfe0   :  { %v4376_v2 = vmul.f32 %v9153_v6, %v4374_v8  ;;  %v9155_v54 = vpop.eup %9154  ;;  %v8351_v8 = vpack.c.bf16 %v4681_v26, %v4677_v29  ;;  %v4676_v6 = vld [vmem:[#allocation7 + $0x510] sm:$0xff]  ;;  %v4943_v43 = vld [vmem:[#allocation9 + $0x578] sm:$0xff] }
 0xfe1   :  { %v4898_v29 = vld [vmem:[#allocation9 + $0x410] sm:$0xff] }
 0xfe2   :  { %v10400_v9 = vadd.f32 %v4377_v40, %v4376_v2  ;;  %v4680_v40 = vld [vmem:[#allocation7 + $0x530] sm:$0xff]  ;;  %v4687_v2 = vld [vmem:[#allocation7 + $0x568] sm:$0xff] }
 0xfe3   :  { %v8353_v12 = vpack.c.bf16 %v4680_v40, %v4676_v6  ;;  %v4902_v26 = vld [vmem:[#allocation9 + $0x430] sm:$0xff]  ;;  %v4904_v6 = vld [vmem:[#allocation9 + $0x440] sm:$0xff] }
 0xfe4   :  { %9156 = vtanh.f32 %v10400_v9  ;;  %v4908_v40 = vld [vmem:[#allocation9 + $0x460] sm:$0xff] }
 0xfee   :  { %v9157_v51 = vpop.eup %9156 }
 0xfef   :  { %v4380_v62 = vmul.f32 %v9157_v51, %v9155_v54  ;;  %v8321_v54 = vpack.c.bf16 %v4678_v50, %v4674_v23  ;;  %v8323_v51 = vpack.c.bf16 %v4687_v2, %v4683_v59  ;;  %v4909_v23 = vld [vmem:[#allocation9 + $0x468] sm:$0xff]  ;;  %v4907_v50 = vld [vmem:[#allocation9 + $0x458] sm:$0xff]  ;;  %v10423_v2 = vpack.c.bf16 %v4908_v40, %v4904_v6  ;;  %v4942_v6 = vld [vmem:[#allocation9 + $0x570] sm:$0xff] }
 0xff0   :  { %v4945_v40 = vld [vmem:[#allocation9 + $0x588] sm:$0xff] }
 0xff1   :  { %4381 = vst [vmem:[#allocation2 + $0x8] sm:$0x30] %v4380_v62  ;;  %v4451_v4 = vrot.slane %v4380_v62, 4  ;;  %v4691_v62 = vld [vmem:[#allocation7 + $0x588] sm:$0xff] }
 0xff3   :  { %4518 = vmatmul.mubr.f32.vlgmr.msra.gmra.mrb[38].mxu0 %v4451_v4  ;;  %4589 = vmatmul.mubr.f32.vlgmr.msra.gmra.mrb[38].mxu1 %v4451_v4  ;;  %v8357_v4 = vpack.c.bf16 %v4688_v18, %v4684_v39  ;;  %v4912_v39 = vld [vmem:[#allocation9 + $0x480] sm:$0xff] }
 0xff4   :  { %8306 = vmatpush1.bf16.msra.mxu0 %v8305_v3  ;;  %8338 = vmatpush1.bf16.msra.mxu1 %v8337_v20  ;;  %v4695_v3 = vld [vmem:[#allocation7 + $0x5a8] sm:$0xff]  ;;  %v4693_v20 = vld [vmem:[#allocation7 + $0x598] sm:$0xff]  ;;  %v4916_v18 = vld [vmem:[#allocation9 + $0x4a0] sm:$0xff] }
 0xff5   :  { %8308 = vmatprep.subr.bf16.mxu0 %v8307_v49  ;;  %8340 = vmatprep.subr.bf16.mxu1 %v8339_v31  ;;  %v4690_v49 = vld [vmem:[#allocation7 + $0x580] sm:$0xff]  ;;  %v8327_v56 = vpack.c.bf16 %v4695_v3, %v4691_v62  ;;  %v8359_v11 = vpack.c.bf16 %v4697_v21, %v4693_v20  ;;  %v10435_v3 = vpack.c.bf16 %v4916_v18, %v4912_v39  ;;  %v4914_v20 = vld [vmem:[#allocation9 + $0x490] sm:$0xff] }
 0xff6   :  { %4793 = vmatprep.mubr.f32.mxu0 %v9453_v0  ;;  %4870 = vmatprep.mubr.f32.mxu1 %v9453_v0  ;;  %v4694_v31 = vld [vmem:[#allocation7 + $0x5a0] sm:$0xff]  ;;  %v4918_v21 = vld [vmem:[#allocation9 + $0x4b0] sm:$0xff] }
 0xff7   :  { %v8329_v13 = vpack.c.bf16 %v4694_v31, %v4690_v49  ;;  %v4925_v49 = vld [vmem:[#allocation9 + $0x4e8] sm:$0xff]  ;;  %v4923_v31 = vld [vmem:[#allocation9 + $0x4d8] sm:$0xff]  ;;  %v4948_v18 = vld [vmem:[#allocation9 + $0x5a0] sm:$0xff] }
 0xff8   :  { %8310 = vmatpush1.bf16.msra.mxu0 %v8309_v14  ;;  %8342 = vmatpush1.bf16.msra.mxu1 %v8341_v60  ;;  %v4701_v14 = vld [vmem:[#allocation7 + $0x5d8] sm:$0xff] }
 0xff9   :  { %8312 = vmatprep.subr.bf16.mxu0 %v8311_v37  ;;  %8344 = vmatprep.subr.bf16.mxu1 %v8343_v47  ;;  %v4705_v60 = vld [vmem:[#allocation7 + $0x5f8] sm:$0xff]  ;;  %v4698_v37 = vld [vmem:[#allocation7 + $0x5c0] sm:$0xff]  ;;  %v8331_v47 = vpack.c.bf16 %v4703_v55, %v4699_v35  ;;  %v10447_v55 = vpack.c.bf16 %v4924_v10, %v4920_v57 }
 0xffa   :  { %v8363_v34 = vpack.c.bf16 %v4705_v60, %v4701_v14  ;;  %v8333_v38 = vpack.c.bf16 %v4702_v53, %v4698_v37  ;;  %v4922_v14 = vld [vmem:[#allocation9 + $0x4d0] sm:$0xff]  ;;  %v4933_v37 = vld [vmem:[#allocation9 + $0x528] sm:$0xff]  ;;  %v4935_v53 = vld [vmem:[#allocation9 + $0x538] sm:$0xff] }
 0xffb   :  { %v4926_v60 = vld [vmem:[#allocation9 + $0x4f0] sm:$0xff]  ;;  %v4955_v57 = vld [vmem:[#allocation9 + $0x5d8] sm:$0xff] }
 0xffc   :  { %8314 = vmatpush1.bf16.msra.mxu0 %v8313_v45  ;;  %8346 = vmatpush1.bf16.msra.mxu1 %v8345_v44  ;;  %v4639_v45 = vld [vmem:[#allocation2] sm:$0xff]  ;;  %v4897_v44 = vld [vmem:[#allocation9 + $0x408] sm:$0xff] }
 0xffd   :  { %8316 = vmatprep.subr.bf16.mxu0 %v8315_v63  ;;  %8348 = vmatprep.subr.bf16.mxu1 %v8347_v19  ;;  %v10407_v63 = vpack.c.bf16 %v4901_v17, %v4897_v44  ;;  %v4903_v19 = vld [vmem:[#allocation9 + $0x438] sm:$0xff]  ;;  %v4934_v44 = vld [vmem:[#allocation9 + $0x530] sm:$0xff]  ;;  %v4937_v17 = vld [vmem:[#allocation9 + $0x548] sm:$0xff] }
 0xffe   :  { %v10409_v25 = vpack.c.bf16 %v4903_v19, %v4899_v52  ;;  %v4941_v19 = vld [vmem:[#allocation9 + $0x568] sm:$0xff] }
0x1000   :  { %8318 = vmatpush1.bf16.msra.mxu0 %v8317_v1  ;;  %8350 = vmatpush1.bf16.msra.mxu1 %v8349_v15  ;;  %v10414_v1 = vpack.c.bf16 %v4902_v26, %v4898_v29  ;;  %v4905_v15 = vld [vmem:[#allocation9 + $0x448] sm:$0xff]  ;;  %v10466_v29 = vpack.c.bf16 %v4941_v19, %v4937_v17  ;;  %v10468_v26 = vpack.c.bf16 %v4943_v43, %v4939_v42  ;;  %v4382_v43 = vld [vmem:[#allocation3 + $0x20] sm:$0xc0] }
0x1001   :  { %8320 = vmatprep.subr.bf16.mxu0 %v8319_v61  ;;  %8352 = vmatprep.subr.bf16.mxu1 %v8351_v8  ;;  %v10419_v61 = vpack.c.bf16 %v4909_v23, %v4905_v15  ;;  %v4911_v8 = vld [vmem:[#allocation9 + $0x478] sm:$0xff]  ;;  %v4936_v15 = vld [vmem:[#allocation9 + $0x540] sm:$0xff] }
0x1002   :  { %v10421_v59 = vpack.c.bf16 %v4911_v8, %v4907_v50  ;;  %v4940_v23 = vld [vmem:[#allocation9 + $0x560] sm:$0xff]  ;;  %v4938_v50 = vld [vmem:[#allocation9 + $0x550] sm:$0xff] }
0x1003   :  { %v10471_v8 = vpack.c.bf16 %v4940_v23, %v4936_v15 }
0x1004   :  { %8322 = vmatpush1.bf16.msra.mxu0 %v8321_v54  ;;  %8354 = vmatpush1.bf16.msra.mxu1 %v8353_v12  ;;  %v10426_v54 = vpack.c.bf16 %v4910_v46, %v4906_v58  ;;  %v4913_v12 = vld [vmem:[#allocation9 + $0x488] sm:$0xff]  ;;  %v10475_v46 = vpack.c.bf16 %v4942_v6, %v4938_v50  ;;  %v4383_v50 = vld [vmem:[#allocation3 + $0x28] sm:$0xc0] }
0x1005   :  { %8324 = vmatprep.subr.bf16.mxu0 %v8323_v51  ;;  %8356 = vmatprep.subr.bf16.mxu1 %v8355_v7  ;;  %v10431_v51 = vpack.c.bf16 %v4917_v24, %v4913_v12  ;;  %v4919_v7 = vld [vmem:[#allocation9 + $0x4b8] sm:$0xff]  ;;  %v4949_v58 = vld [vmem:[#allocation9 + $0x5a8] sm:$0xff] }
0x1006   :  { %v10433_v62 = vpack.c.bf16 %v4919_v7, %v4915_v5  ;;  %v10477_v12 = vpack.c.bf16 %v4949_v58, %v4945_v40  ;;  %v4947_v24 = vld [vmem:[#allocation9 + $0x598] sm:$0xff]  ;;  %v4944_v7 = vld [vmem:[#allocation9 + $0x580] sm:$0xff] }
0x1007   :  { %v4951_v5 = vld [vmem:[#allocation9 + $0x5b8] sm:$0xff] }
0x1008   :  { %8326 = vmatpush1.bf16.msra.mxu0 %v8325_v32  ;;  %8358 = vmatpush1.bf16.msra.mxu1 %v8357_v4  ;;  %v10438_v32 = vpack.c.bf16 %v4918_v21, %v4914_v20  ;;  %v4921_v4 = vld [vmem:[#allocation9 + $0x4c8] sm:$0xff]  ;;  %v10479_v39 = vpack.c.bf16 %v4951_v5, %v4947_v24  ;;  %v4946_v20 = vld [vmem:[#allocation9 + $0x590] sm:$0xff] }
0x1009   :  { %8328 = vmatprep.subr.bf16.mxu0 %v8327_v56  ;;  %8360 = vmatprep.subr.bf16.mxu1 %v8359_v11  ;;  %v10443_v56 = vpack.c.bf16 %v4925_v49, %v4921_v4  ;;  %v4927_v11 = vld [vmem:[#allocation9 + $0x4f8] sm:$0xff]  ;;  %v4950_v21 = vld [vmem:[#allocation9 + $0x5b0] sm:$0xff]  ;;  %v10482_v4 = vpack.c.bf16 %v4948_v18, %v4944_v7  ;;  %v4385_v5 = vld [vmem:[#allocation3 + $0x38] sm:$0xc0] }
0x100a   :  { %v10445_v35 = vpack.c.bf16 %v4927_v11, %v4923_v31  ;;  %v10486_v49 = vpack.c.bf16 %v4950_v21, %v4946_v20  ;;  %v4953_v31 = vld [vmem:[#allocation9 + $0x5c8] sm:$0xff]  ;;  %v4384_v20 = vld [vmem:[#allocation3 + $0x30] sm:$0xc0] }
0x100b   :  { %v4957_v11 = vld [vmem:[#allocation9 + $0x5e8] sm:$0xff] }
0x100c   :  { %8330 = vmatpush1.bf16.msra.mxu0 %v8329_v13  ;;  %8362 = vmatpush1.bf16.msra.mxu1 %v8361_v41  ;;  %v10450_v13 = vpack.c.bf16 %v4926_v60, %v4922_v14  ;;  %v4929_v41 = vld [vmem:[#allocation9 + $0x508] sm:$0xff]  ;;  %v10489_v10 = vpack.c.bf16 %v4957_v11, %v4953_v31  ;;  %v4959_v14 = vld [vmem:[#allocation9 + $0x5f8] sm:$0xff]  ;;  %v4952_v60 = vld [vmem:[#allocation9 + $0x5c0] sm:$0xff] }
0x100d   :  { %8332 = vmatprep.subr.bf16.mxu0 %v8331_v47  ;;  %8364 = vmatprep.subr.bf16.mxu1 %v8363_v34  ;;  %v4931_v47 = vld [vmem:[#allocation9 + $0x518] sm:$0xff]  ;;  %v10455_v34 = vpack.c.bf16 %v4933_v37, %v4929_v41  ;;  %v4956_v41 = vld [vmem:[#allocation9 + $0x5e0] sm:$0xff]  ;;  %v10492_v37 = vpack.c.bf16 %v4959_v14, %v4955_v57 }
0x1010   :  { %8334 = vmatpush1.bf16.msra.mxu0 %v8333_v38  ;;  %8366 = vmatpush1.bf16.msra.mxu1 %v8365_v48  ;;  %v10457_v38 = vpack.c.bf16 %v4935_v53, %v4931_v47  ;;  %v10459_v48 = vpack.c.bf16 %v4932_v33, %v4928_v16  ;;  %v10494_v47 = vpack.c.bf16 %v4956_v41, %v4952_v60  ;;  %v4954_v53 = vld [vmem:[#allocation9 + $0x5d0] sm:$0xff]  ;;  %v4707_v41 = vld [vmem:[#allocation10 + $0x8] sm:$0xf] }
0x1011   :  { %8368 = vmatprep.subr.bf16.mxu0 %v10407_v63  ;;  %8400 = vmatprep.subr.bf16.mxu1 %v10409_v25  ;;  %v4958_v16 = vld [vmem:[#allocation9 + $0x5f0] sm:$0xff] }
0x1012   :  { %v10498_v33 = vpack.c.bf16 %v4958_v16, %v4954_v53 }
0x1013   :  { %4794 = vmatmul.mubr.f32.vlgmr.msra.gmra.mrb[40].mxu0 %v4639_v45  ;;  %4871 = vmatmul.mubr.f32.vlgmr.msra.gmra.mrb[40].mxu1 %v4639_v45  ;;  %v4930_v45 = vld [vmem:[#allocation9 + $0x510] sm:$0xff] }
0x1014   :  { %4799 = vmatprep.mubr.f32.mxu0 %v9453_v0  ;;  %4876 = vmatprep.mubr.f32.mxu1 %v9453_v0  ;;  %v10462_v52 = vpack.c.bf16 %v4934_v44, %v4930_v45 }
0x1015   :  { %8370 = vmatpush1.bf16.msra.mxu0 %v10411_v36  ;;  %8402 = vmatpush1.bf16.msra.mxu1 %v10414_v1 }
0x1016   :  { %8372 = vmatprep.subr.bf16.mxu0 %v10419_v61  ;;  %8404 = vmatprep.subr.bf16.mxu1 %v10421_v59 }
0x1019   :  { %8374 = vmatpush1.bf16.msra.mxu0 %v10423_v2  ;;  %8406 = vmatpush1.bf16.msra.mxu1 %v10426_v54 }
0x101a   :  { %8376 = vmatprep.subr.bf16.mxu0 %v10431_v51  ;;  %8408 = vmatprep.subr.bf16.mxu1 %v10433_v62 }
0x101d   :  { %8378 = vmatpush1.bf16.msra.mxu0 %v10435_v3  ;;  %8410 = vmatpush1.bf16.msra.mxu1 %v10438_v32 }
0x101e   :  { %8380 = vmatprep.subr.bf16.mxu0 %v10443_v56  ;;  %8412 = vmatprep.subr.bf16.mxu1 %v10445_v35 }
0x1021   :  { %8382 = vmatpush1.bf16.msra.mxu0 %v10447_v55  ;;  %8414 = vmatpush1.bf16.msra.mxu1 %v10450_v13 }
0x1022   :  { %8384 = vmatprep.subr.bf16.mxu0 %v10455_v34  ;;  %8416 = vmatprep.subr.bf16.mxu1 %v10457_v38 }
0x1025   :  { %8386 = vmatpush1.bf16.msra.mxu0 %v10459_v48  ;;  %8418 = vmatpush1.bf16.msra.mxu1 %v10462_v52 }
0x1026   :  { %8388 = vmatprep.subr.bf16.mxu0 %v10466_v29  ;;  %8420 = vmatprep.subr.bf16.mxu1 %v10468_v26 }
0x1029   :  { %8390 = vmatpush1.bf16.msra.mxu0 %v10471_v8  ;;  %8422 = vmatpush1.bf16.msra.mxu1 %v10475_v46 }
0x102a   :  { %8392 = vmatprep.subr.bf16.mxu0 %v10477_v12  ;;  %8424 = vmatprep.subr.bf16.mxu1 %v10479_v39 }
0x102d   :  { %8394 = vmatpush1.bf16.msra.mxu0 %v10482_v4  ;;  %8426 = vmatpush1.bf16.msra.mxu1 %v10486_v49 }
0x102e   :  { %8396 = vmatprep.subr.bf16.mxu0 %v10489_v10  ;;  %8428 = vmatprep.subr.bf16.mxu1 %v10492_v37 }
0x1031   :  { %8398 = vmatpush1.bf16.msra.mxu0 %v10494_v47  ;;  %8430 = vmatpush1.bf16.msra.mxu1 %v10498_v33 }
0x1032   :  { %8432 = vmatprep.subr.bf16.mxu0 %v10407_v63  ;;  %8464 = vmatprep.subr.bf16.mxu1 %v10409_v25 }
0x10c6   :  { %v4519_v45 = vpop.f32.mrb[38].mxu0  ;;  %v4590_v44 = vpop.f32.mrb[38].mxu1 }
0x10c7   :  { %v4599_v17 = vrot.slane %v4519_v45, 2  ;;  %v4521_v19 = vpop.f32.mrb[39].mxu0  ;;  %v4592_v42 = vpop.f32.mrb[39].mxu1  ;;  %v4601_v18 = vrot.slane %v4590_v44, 2  ;;  %v10506_v45 = vrot.slane %v4707_v41, %v9704_v22 }
0x10c8   :  { %v4600_v15 = vrot.slane %v4521_v19, 2  ;;  %v4602_v24 = vrot.slane %v4592_v42, 2  ;;  %v4631_v19 = vrot.slane %v10400_v9, 6  ;;  %v10513_v42 = vrot.slane %v4707_v41, %v9706_v27 }
0x10c9   :  { %v4607_v23 = vadd.f32 %v4599_v17, %v4382_v43  ;;  %v4609_v31 = vadd.f32 %v4601_v18, %v4384_v20  ;;  %v10509_v17 = vrot.slane %v4707_v41, %v9708_v28  ;;  %v10516_v43 = vrot.slane %v4707_v41, %v9710_v30 }
0x10ca   :  { %v4608_v6 = vadd.f32 %v4600_v15, %v4383_v50  ;;  %v4610_v7 = vadd.f32 %v4602_v24, %v4385_v5 }
0x10cb   :  { %v7071_v40 = vmul.f32 -1.442695, %v4607_v23 }
0x10cc   :  { %v7072_v58 = vmul.f32 -1.442695, %v4608_v6  ;;  %v7073_v21 = vmul.f32 -1.442695, %v4610_v7 }
0x10cd   :  { %9158 = vpow2.f32 %v7071_v40 }
0x10ce   :  { %9160 = vpow2.f32 %v7072_v58 }
0x10cf   :  { %9162 = vpow2.f32 %v7073_v21 }
0x10d0   :  { %9164 = vtanh.f32 %v4609_v31 }
0x10d7   :  { %v9159_v11 = vpop.eup %9158 }
0x10d8   :  { %v9161_v57 = vpop.eup %9160  ;;  %v4614_v14 = vadd.f32 1.0, %v9159_v11 }
0x10d9   :  { %v4620_v60 = vadd.f32 1.0, %v9161_v57  ;;  %v9163_v53 = vpop.eup %9162 }
0x10da   :  { %9166 = vrcp.f32 %v4614_v14  ;;  %v9165_v16 = vpop.eup %9164  ;;  %v4627_v50 = vadd.f32 1.0, %v9163_v53 }
0x10db   :  { %9168 = vrcp.f32 %v4620_v60 }
0x10dc   :  { %9170 = vrcp.f32 %v4627_v50 }
0x10e4   :  { %v9167_v44 = vpop.eup %9166 }
0x10e5   :  { %v9169_v15 = vpop.eup %9168  ;;  %v4634_v23 = vmul.f32 %v9167_v44, %v9165_v16 }
0x10e6   :  { %v4633_v6 = vmul.f32 %v9169_v15, %v4631_v19  ;;  %v4795_v40 = vpop.f32.mrb[40].mxu0  ;;  %v4872_v58 = vpop.f32.mrb[40].mxu1 }
0x10e7   :  { %v4796_v22 = vadd.f32 %v4795_v40, %v10506_v45  ;;  %v4873_v28 = vadd.f32 %v4872_v58, %v10509_v17  ;;  %v4797_v24 = vpop.f32.mrb[41].mxu0  ;;  %v4874_v5 = vpop.f32.mrb[41].mxu1 }
0x10e8   :  { %v4635_v7 = vadd.f32 %v4634_v23, %v4633_v6  ;;  %v4798_v9 = vadd.f32 %v4797_v24, %v10513_v42  ;;  %v4875_v27 = vadd.f32 %v4874_v5, %v10516_v43  ;;  %v9171_v30 = vpop.eup %9170 }
0x10e9   :  { %4883 = vst [vmem:[#allocation3] sm:$0xff] %v4796_v22  ;;  %4885 = vst [vmem:[#allocation3 + $0x10] sm:$0xff] %v4873_v28 }
0x10ea   :  { %9172 = vtanh.f32 %v4635_v7  ;;  %4884 = vst [vmem:[#allocation3 + $0x8] sm:$0xff] %v4798_v9  ;;  %4886 = vst [vmem:[#allocation3 + $0x18] sm:$0xff] %v4875_v27 }
0x10f0   :  { %v4891_v44 = vld [vmem:[#allocation3] sm:$0x3]  ;;  %v4893_v58 = vld [vmem:[#allocation3 + $0x10] sm:$0x3] }
0x10f1   :  { %v4892_v15 = vld [vmem:[#allocation3 + $0x8] sm:$0x3]  ;;  %v4894_v40 = vld [vmem:[#allocation3 + $0x18] sm:$0x3] }
0x10f4   :  { %v9173_v18 = vpop.eup %9172 }
0x10f5   :  { %v4637_v20 = vmul.f32 %v9173_v18, %v9171_v30 }
0x10f7   :  { %4638 = vst [vmem:[#allocation2 + $0x8] sm:$0xc0] %v4637_v20 }
0x10fe   :  { %v4640_v21 = vld [vmem:[#allocation2 + $0x8] sm:$0xff] }
0x10ff   :  { %4800 = vmatmul.mubr.f32.gmra.mrb[42].mxu0 %v4640_v21  ;;  %4877 = vmatmul.mubr.f32.gmra.mrb[42].mxu1 %v4640_v21 }
0x1100   :  { %5024 = vmatprep.mubr.f32.mxu0 %v9453_v0  ;;  %5095 = vmatprep.mubr.f32.mxu1 %v9453_v0 }
0x1103   :  { %5025 = vmatmul.mubr.f32.vlgmr.msra.gmra.mrb[44].mxu0 %v9453_v0  ;;  %5096 = vmatmul.mubr.f32.vlgmr.msra.gmra.mrb[44].mxu1 %v9453_v0 }
0x1104   :  { %8434 = vmatpush1.bf16.msra.mxu0 %v10411_v36  ;;  %8466 = vmatpush1.bf16.msra.mxu1 %v10414_v1 }
0x1105   :  { %8436 = vmatprep.subr.bf16.mxu0 %v10419_v61  ;;  %8468 = vmatprep.subr.bf16.mxu1 %v10421_v59 }
0x1106   :  { %5263 = vmatprep.mubr.f32.mxu0 %v9453_v0  ;;  %5334 = vmatprep.mubr.f32.mxu1 %v9453_v0 }
0x1108   :  { %8438 = vmatpush1.bf16.msra.mxu0 %v10423_v2  ;;  %8470 = vmatpush1.bf16.msra.mxu1 %v10426_v54 }
0x1109   :  { %8440 = vmatprep.subr.bf16.mxu0 %v10431_v51  ;;  %8472 = vmatprep.subr.bf16.mxu1 %v10433_v62 }
0x110c   :  { %8442 = vmatpush1.bf16.msra.mxu0 %v10435_v3  ;;  %8474 = vmatpush1.bf16.msra.mxu1 %v10438_v32 }
0x110d   :  { %8444 = vmatprep.subr.bf16.mxu0 %v10443_v56  ;;  %8476 = vmatprep.subr.bf16.mxu1 %v10445_v35 }
0x1110   :  { %8446 = vmatpush1.bf16.msra.mxu0 %v10447_v55  ;;  %8478 = vmatpush1.bf16.msra.mxu1 %v10450_v13 }
0x1111   :  { %8448 = vmatprep.subr.bf16.mxu0 %v10455_v34  ;;  %8480 = vmatprep.subr.bf16.mxu1 %v10457_v38 }
0x1114   :  { %8450 = vmatpush1.bf16.msra.mxu0 %v10459_v48  ;;  %8482 = vmatpush1.bf16.msra.mxu1 %v10462_v52 }
0x1115   :  { %8452 = vmatprep.subr.bf16.mxu0 %v10466_v29  ;;  %8484 = vmatprep.subr.bf16.mxu1 %v10468_v26 }
0x1118   :  { %8454 = vmatpush1.bf16.msra.mxu0 %v10471_v8  ;;  %8486 = vmatpush1.bf16.msra.mxu1 %v10475_v46 }
0x1119   :  { %8456 = vmatprep.subr.bf16.mxu0 %v10477_v12  ;;  %8488 = vmatprep.subr.bf16.mxu1 %v10479_v39 }
0x111c   :  { %8458 = vmatpush1.bf16.msra.mxu0 %v10482_v4  ;;  %8490 = vmatpush1.bf16.msra.mxu1 %v10486_v49 }
0x111d   :  { %8460 = vmatprep.subr.bf16.mxu0 %v10489_v10  ;;  %8492 = vmatprep.subr.bf16.mxu1 %v10492_v37 }
0x1120   :  { %8462 = vmatpush1.bf16.msra.mxu0 %v10494_v47  ;;  %8494 = vmatpush1.bf16.msra.mxu1 %v10498_v33 }
0x1121   :  { %8496 = vmatprep.subr.bf16.mxu0 %v10407_v63  ;;  %8528 = vmatprep.subr.bf16.mxu1 %v10409_v25 }
0x11d2   :  { %v4801_v31 = vpop.f32.mrb[42].mxu0  ;;  %v4878_v11 = vpop.f32.mrb[42].mxu1 }
0x11d3   :  { %v4802_v57 = vadd.f32 %v4801_v31, %v10506_v45  ;;  %v4879_v14 = vadd.f32 %v4878_v11, %v10509_v17  ;;  %v4803_v60 = vpop.f32.mrb[43].mxu0  ;;  %v4880_v41 = vpop.f32.mrb[43].mxu1 }
0x11d4   :  { %v4804_v53 = vadd.f32 %v4803_v60, %v10513_v42  ;;  %v4881_v16 = vadd.f32 %v4880_v41, %v10516_v43 }
0x11d5   :  { %4887 = vst [vmem:[#allocation3 + $0x20] sm:$0xff] %v4802_v57  ;;  %4889 = vst [vmem:[#allocation3 + $0x30] sm:$0xff] %v4879_v14 }
0x11d6   :  { %4888 = vst [vmem:[#allocation3 + $0x28] sm:$0xff] %v4804_v53  ;;  %4890 = vst [vmem:[#allocation3 + $0x38] sm:$0xff] %v4881_v16  ;;  %v5026_v63 = vpop.f32.mrb[44].mxu0  ;;  %v5097_v19 = vpop.f32.mrb[44].mxu1 }
0x11d7   :  { %v5102_v25 = vadd.f32 %v5026_v63, %v4891_v44  ;;  %v5028_v23 = vpop.f32.mrb[45].mxu0  ;;  %v5099_v50 = vpop.f32.mrb[45].mxu1  ;;  %v5104_v22 = vadd.f32 %v5097_v19, %v4893_v58  ;;  %v5646_v58 = vld [vmem:[#allocation9 + $0x400] sm:$0xff] }
0x11d8   :  { %v5103_v45 = vadd.f32 %v5028_v23, %v4892_v15  ;;  %v5105_v42 = vadd.f32 %v5099_v50, %v4894_v40 }
0x11d9   :  { %v7074_v6 = vmul.f32 -1.442695, %v5102_v25 }
0x11da   :  { %v7075_v17 = vmul.f32 -1.442695, %v5103_v45  ;;  %v7076_v43 = vmul.f32 -1.442695, %v5105_v42  ;;  %v5647_v45 = vld [vmem:[#allocation9 + $0x408] sm:$0xff]  ;;  %v5653_v42 = vld [vmem:[#allocation9 + $0x438] sm:$0xff] }
0x11db   :  { %9174 = vpow2.f32 %v7074_v6  ;;  %v5651_v6 = vld [vmem:[#allocation9 + $0x428] sm:$0xff] }
0x11dc   :  { %9176 = vpow2.f32 %v7075_v17  ;;  %v5649_v17 = vld [vmem:[#allocation9 + $0x418] sm:$0xff]  ;;  %v10605_v40 = vpack.c.bf16 %v5651_v6, %v5647_v45  ;;  %v5684_v45 = vld [vmem:[#allocation9 + $0x530] sm:$0xff]  ;;  %v5687_v6 = vld [vmem:[#allocation9 + $0x548] sm:$0xff] }
0x11dd   :  { %9178 = vpow2.f32 %v7076_v43  ;;  %v5650_v43 = vld [vmem:[#allocation9 + $0x420] sm:$0xff] }
0x11de   :  { %9180 = vtanh.f32 %v5104_v22  ;;  %v10607_v22 = vpack.c.bf16 %v5653_v42, %v5649_v17  ;;  %v5691_v17 = vld [vmem:[#allocation9 + $0x568] sm:$0xff] }
0x11e5   :  { %v9175_v28 = vpop.eup %9174 }
0x11e6   :  { %v9177_v24 = vpop.eup %9176  ;;  %v5109_v5 = vadd.f32 1.0, %v9175_v28  ;;  %v10609_v28 = vpack.c.bf16 %v5650_v43, %v5646_v58  ;;  %v10663_v58 = vpack.c.bf16 %v5691_v17, %v5687_v6  ;;  %v5689_v43 = vld [vmem:[#allocation9 + $0x558] sm:$0xff] }
0x11e7   :  { %v5115_v7 = vadd.f32 1.0, %v9177_v24  ;;  %v9179_v9 = vpop.eup %9178  ;;  %v5648_v24 = vld [vmem:[#allocation9 + $0x410] sm:$0xff] }
0x11e8   :  { %9182 = vrcp.f32 %v5109_v5  ;;  %v9181_v27 = vpop.eup %9180  ;;  %v5122_v21 = vadd.f32 1.0, %v9179_v9  ;;  %v5652_v5 = vld [vmem:[#allocation9 + $0x430] sm:$0xff]  ;;  %v5655_v9 = vld [vmem:[#allocation9 + $0x448] sm:$0xff] }
0x11e9   :  { %9184 = vrcp.f32 %v5115_v7  ;;  %v10612_v7 = vpack.c.bf16 %v5652_v5, %v5648_v24  ;;  %v5693_v24 = vld [vmem:[#allocation9 + $0x578] sm:$0xff]  ;;  %v5686_v5 = vld [vmem:[#allocation9 + $0x540] sm:$0xff] }
0x11ea   :  { %9186 = vrcp.f32 %v5122_v21  ;;  %v5654_v21 = vld [vmem:[#allocation9 + $0x440] sm:$0xff] }
0x11f2   :  { %v9183_v30 = vpop.eup %9182 }
0x11f3   :  { %v9185_v18 = vpop.eup %9184  ;;  %v5126_v20 = vmul.f32 %v9183_v30, %v9181_v27  ;;  %v5659_v27 = vld [vmem:[#allocation9 + $0x468] sm:$0xff]  ;;  %v5657_v30 = vld [vmem:[#allocation9 + $0x458] sm:$0xff] }
0x11f4   :  { %v5125_v31 = vmul.f32 0.0, %v9185_v18  ;;  %v9187_v57 = vpop.eup %9186  ;;  %v10617_v18 = vpack.c.bf16 %v5659_v27, %v5655_v9  ;;  %v10665_v9 = vpack.c.bf16 %v5693_v24, %v5689_v43  ;;  %v5690_v27 = vld [vmem:[#allocation9 + $0x560] sm:$0xff] }
0x11f6   :  { %v10564_v11 = vadd.f32 %v5126_v20, %v5125_v31  ;;  %v5661_v20 = vld [vmem:[#allocation9 + $0x478] sm:$0xff]  ;;  %v5658_v31 = vld [vmem:[#allocation9 + $0x460] sm:$0xff] }
0x11f8   :  { %9188 = vtanh.f32 %v10564_v11  ;;  %v5377_v41 = vrot.slane %v10564_v11, 6  ;;  %v10619_v11 = vpack.c.bf16 %v5661_v20, %v5657_v30  ;;  %v5688_v30 = vld [vmem:[#allocation9 + $0x550] sm:$0xff] }
0x11f9   :  { %v5692_v20 = vld [vmem:[#allocation9 + $0x570] sm:$0xff] }
0x1202   :  { %v9189_v14 = vpop.eup %9188 }
0x1203   :  { %v5129_v60 = vmul.f32 %v9189_v14, %v9187_v57  ;;  %v10621_v57 = vpack.c.bf16 %v5658_v31, %v5654_v21  ;;  %v5656_v14 = vld [vmem:[#allocation9 + $0x450] sm:$0xff]  ;;  %v10668_v21 = vpack.c.bf16 %v5690_v27, %v5686_v5  ;;  %v5695_v31 = vld [vmem:[#allocation9 + $0x588] sm:$0xff] }
0x1205   :  { %5130 = vst [vmem:[#allocation2] sm:$0x3] %v5129_v60  ;;  %5264 = vmatmul.mubr.f32.vlgmr.msra.gmra.mrb[46].mxu0 %v5129_v60  ;;  %5335 = vmatmul.mubr.f32.vlgmr.msra.gmra.mrb[46].mxu1 %v5129_v60  ;;  %v5660_v60 = vld [vmem:[#allocation9 + $0x470] sm:$0xff] }
0x1206   :  { %8498 = vmatpush1.bf16.msra.mxu0 %v10411_v36  ;;  %8530 = vmatpush1.bf16.msra.mxu1 %v10414_v1 }
0x1207   :  { %8500 = vmatprep.subr.bf16.mxu0 %v10419_v61  ;;  %8532 = vmatprep.subr.bf16.mxu1 %v10421_v59 }
0x1208   :  { %5520 = vmatprep.mubr.f32.mxu0 %v9453_v0  ;;  %5591 = vmatprep.mubr.f32.mxu1 %v9453_v0 }
0x120a   :  { %8502 = vmatpush1.bf16.msra.mxu0 %v10423_v2  ;;  %8534 = vmatpush1.bf16.msra.mxu1 %v10426_v54  ;;  %v5131_v54 = vld [vmem:[#allocation3] sm:$0xc] }
0x120b   :  { %8504 = vmatprep.subr.bf16.mxu0 %v10431_v51  ;;  %8536 = vmatprep.subr.bf16.mxu1 %v10433_v62 }
0x120e   :  { %8506 = vmatpush1.bf16.msra.mxu0 %v10435_v3  ;;  %8538 = vmatpush1.bf16.msra.mxu1 %v10438_v32  ;;  %v5132_v3 = vld [vmem:[#allocation3 + $0x8] sm:$0xc] }
0x120f   :  { %8508 = vmatprep.subr.bf16.mxu0 %v10443_v56  ;;  %8540 = vmatprep.subr.bf16.mxu1 %v10445_v35 }
0x1212   :  { %8510 = vmatpush1.bf16.msra.mxu0 %v10447_v55  ;;  %8542 = vmatpush1.bf16.msra.mxu1 %v10450_v13  ;;  %v5134_v13 = vld [vmem:[#allocation3 + $0x18] sm:$0xc] }
0x1213   :  { %8512 = vmatprep.subr.bf16.mxu0 %v10455_v34  ;;  %8544 = vmatprep.subr.bf16.mxu1 %v10457_v38 }
0x1216   :  { %8514 = vmatpush1.bf16.msra.mxu0 %v10459_v48  ;;  %8546 = vmatpush1.bf16.msra.mxu1 %v10462_v52  ;;  %v5133_v48 = vld [vmem:[#allocation3 + $0x10] sm:$0xc] }
0x1217   :  { %8516 = vmatprep.subr.bf16.mxu0 %v10466_v29  ;;  %8548 = vmatprep.subr.bf16.mxu1 %v10468_v26 }
0x121a   :  { %8518 = vmatpush1.bf16.msra.mxu0 %v10471_v8  ;;  %8550 = vmatpush1.bf16.msra.mxu1 %v10475_v46 }
0x121b   :  { %8520 = vmatprep.subr.bf16.mxu0 %v10477_v12  ;;  %8552 = vmatprep.subr.bf16.mxu1 %v10479_v39 }
0x121e   :  { %8522 = vmatpush1.bf16.msra.mxu0 %v10482_v4  ;;  %8554 = vmatpush1.bf16.msra.mxu1 %v10486_v49 }
0x121f   :  { %8524 = vmatprep.subr.bf16.mxu0 %v10489_v10  ;;  %8556 = vmatprep.subr.bf16.mxu1 %v10492_v37 }
0x1222   :  { %8526 = vmatpush1.bf16.msra.mxu0 %v10494_v47  ;;  %8558 = vmatpush1.bf16.msra.mxu1 %v10498_v33 }
0x1223   :  { %8560 = vmatprep.subr.bf16.mxu0 %v10605_v40  ;;  %8592 = vmatprep.subr.bf16.mxu1 %v10607_v22 }
0x12d8   :  { %v5265_v36 = vpop.f32.mrb[46].mxu0  ;;  %v5336_v1 = vpop.f32.mrb[46].mxu1 }
0x12d9   :  { %v5345_v61 = vrot.slane %v5265_v36, 6  ;;  %v5267_v59 = vpop.f32.mrb[47].mxu0  ;;  %v5338_v2 = vpop.f32.mrb[47].mxu1  ;;  %v5347_v38 = vrot.slane %v5336_v1, 6  ;;  %v10624_v36 = vpack.c.bf16 %v5660_v60, %v5656_v14  ;;  %v5663_v1 = vld [vmem:[#allocation9 + $0x488] sm:$0xff]  ;;  %v5697_v60 = vld [vmem:[#allocation9 + $0x598] sm:$0xff] }
0x12da   :  { %v5346_v51 = vrot.slane %v5267_v59, 6  ;;  %v5348_v55 = vrot.slane %v5338_v2, 6  ;;  %v5665_v59 = vld [vmem:[#allocation9 + $0x498] sm:$0xff]  ;;  %v5699_v14 = vld [vmem:[#allocation9 + $0x5a8] sm:$0xff] }
0x12db   :  { %v5353_v62 = vadd.f32 %v5345_v61, %v5131_v54  ;;  %v5355_v29 = vadd.f32 %v5347_v38, %v5133_v48  ;;  %v5667_v61 = vld [vmem:[#allocation9 + $0x4a8] sm:$0xff]  ;;  %v5669_v54 = vld [vmem:[#allocation9 + $0x4b8] sm:$0xff] }
0x12dc   :  { %v5354_v32 = vadd.f32 %v5346_v51, %v5132_v3  ;;  %v5356_v34 = vadd.f32 %v5348_v55, %v5134_v13  ;;  %v10629_v2 = vpack.c.bf16 %v5667_v61, %v5663_v1  ;;  %v5662_v51 = vld [vmem:[#allocation9 + $0x480] sm:$0xff]  ;;  %v10631_v3 = vpack.c.bf16 %v5669_v54, %v5665_v59  ;;  %v5671_v13 = vld [vmem:[#allocation9 + $0x4c8] sm:$0xff]  ;;  %v5673_v38 = vld [vmem:[#allocation9 + $0x4d8] sm:$0xff] }
0x12dd   :  { %v7077_v56 = vmul.f32 -1.442695, %v5353_v62  ;;  %v5666_v62 = vld [vmem:[#allocation9 + $0x4a0] sm:$0xff]  ;;  %v10672_v1 = vpack.c.bf16 %v5692_v20, %v5688_v30  ;;  %v10674_v61 = vpack.c.bf16 %v5699_v14, %v5695_v31  ;;  %v5701_v59 = vld [vmem:[#allocation9 + $0x5b8] sm:$0xff] }
0x12de   :  { %v7078_v35 = vmul.f32 -1.442695, %v5354_v32  ;;  %v7079_v52 = vmul.f32 -1.442695, %v5356_v34  ;;  %v10633_v32 = vpack.c.bf16 %v5666_v62, %v5662_v51  ;;  %v5675_v34 = vld [vmem:[#allocation9 + $0x4e8] sm:$0xff]  ;;  %v5694_v54 = vld [vmem:[#allocation9 + $0x580] sm:$0xff]  ;;  %v10677_v62 = vpack.c.bf16 %v5701_v59, %v5697_v60 }
0x12df   :  { %9190 = vpow2.f32 %v7077_v56  ;;  %v5664_v56 = vld [vmem:[#allocation9 + $0x490] sm:$0xff]  ;;  %v10641_v48 = vpack.c.bf16 %v5675_v34, %v5671_v13  ;;  %v5698_v51 = vld [vmem:[#allocation9 + $0x5a0] sm:$0xff] }
0x12e0   :  { %9192 = vpow2.f32 %v7078_v35  ;;  %v5668_v35 = vld [vmem:[#allocation9 + $0x4b0] sm:$0xff]  ;;  %v10680_v13 = vpack.c.bf16 %v5698_v51, %v5694_v54 }
0x12e1   :  { %9194 = vpow2.f32 %v7079_v52  ;;  %v10636_v55 = vpack.c.bf16 %v5668_v35, %v5664_v56  ;;  %v5677_v52 = vld [vmem:[#allocation9 + $0x4f8] sm:$0xff]  ;;  %v5696_v56 = vld [vmem:[#allocation9 + $0x590] sm:$0xff] }
0x12e2   :  { %9196 = vtanh.f32 %v5355_v29  ;;  %v5670_v29 = vld [vmem:[#allocation9 + $0x4c0] sm:$0xff]  ;;  %v5700_v35 = vld [vmem:[#allocation9 + $0x5b0] sm:$0xff] }
0x12e3   :  { %v10684_v34 = vpack.c.bf16 %v5700_v35, %v5696_v56 }
0x12e9   :  { %v9191_v26 = vpop.eup %9190 }
0x12ea   :  { %v9193_v8 = vpop.eup %9192  ;;  %v5360_v46 = vadd.f32 1.0, %v9191_v26  ;;  %v5674_v26 = vld [vmem:[#allocation9 + $0x4e0] sm:$0xff] }
0x12eb   :  { %v5366_v12 = vadd.f32 1.0, %v9193_v8  ;;  %v9195_v39 = vpop.eup %9194  ;;  %v10643_v8 = vpack.c.bf16 %v5677_v52, %v5673_v38 }
0x12ec   :  { %9198 = vrcp.f32 %v5360_v46  ;;  %v9197_v4 = vpop.eup %9196  ;;  %v5373_v44 = vadd.f32 1.0, %v9195_v39  ;;  %v10645_v46 = vpack.c.bf16 %v5674_v26, %v5670_v29  ;;  %v5676_v39 = vld [vmem:[#allocation9 + $0x4f0] sm:$0xff] }
0x12ed   :  { %9200 = vrcp.f32 %v5366_v12  ;;  %v5672_v12 = vld [vmem:[#allocation9 + $0x4d0] sm:$0xff] }
0x12ee   :  { %9202 = vrcp.f32 %v5373_v44 }
0x12f6   :  { %v9199_v49 = vpop.eup %9198 }
0x12f7   :  { %v9201_v53 = vpop.eup %9200  ;;  %v5380_v16 = vmul.f32 %v9199_v49, %v9197_v4  ;;  %v5679_v4 = vld [vmem:[#allocation9 + $0x508] sm:$0xff]  ;;  %v10648_v49 = vpack.c.bf16 %v5676_v39, %v5672_v12  ;;  %v5385_v39 = vld [vmem:[#allocation3] sm:$0x30] }
0x12f8   :  { %v5379_v63 = vmul.f32 %v9201_v53, %v5377_v41  ;;  %v9203_v25 = vpop.eup %9202  ;;  %v5683_v41 = vld [vmem:[#allocation9 + $0x528] sm:$0xff]  ;;  %v5681_v53 = vld [vmem:[#allocation9 + $0x518] sm:$0xff] }
0x12f9   :  { %v10652_v44 = vpack.c.bf16 %v5683_v41, %v5679_v4 }
0x12fa   :  { %v10600_v19 = vadd.f32 %v5380_v16, %v5379_v63  ;;  %v5685_v16 = vld [vmem:[#allocation9 + $0x538] sm:$0xff] }
0x12fb   :  { %v10654_v63 = vpack.c.bf16 %v5685_v16, %v5681_v53  ;;  %v5386_v53 = vld [vmem:[#allocation3 + $0x8] sm:$0x30] }
0x12fc   :  { %9204 = vtanh.f32 %v10600_v19  ;;  %v5634_v31 = vrot.slane %v10600_v19, 6  ;;  %v5960_v19 = vld [vmem:[#allocation9 + $0x5c8] sm:$0xff] }
0x1306   :  { %v9205_v15 = vpop.eup %9204 }
0x1307   :  { %v5383_v23 = vmul.f32 %v9205_v15, %v9203_v25  ;;  %v5678_v25 = vld [vmem:[#allocation9 + $0x500] sm:$0xff] }
0x1308   :  { %v5682_v15 = vld [vmem:[#allocation9 + $0x520] sm:$0xff] }
0x1309   :  { %5384 = vst [vmem:[#allocation2] sm:$0xc] %v5383_v23  ;;  %v5454_v50 = vrot.slane %v5383_v23, 2  ;;  %v5680_v23 = vld [vmem:[#allocation9 + $0x510] sm:$0xff] }
0x130a   :  { %v10661_v42 = vpack.c.bf16 %v5684_v45, %v5680_v23  ;;  %v5387_v23 = vld [vmem:[#allocation3 + $0x10] sm:$0x30] }
0x130b   :  { %5521 = vmatmul.mubr.f32.vlgmr.msra.gmra.mrb[48].mxu0 %v5454_v50  ;;  %5592 = vmatmul.mubr.f32.vlgmr.msra.gmra.mrb[48].mxu1 %v5454_v50  ;;  %v10657_v50 = vpack.c.bf16 %v5682_v15, %v5678_v25 }
0x130c   :  { %5777 = vmatprep.mubr.f32.mxu0 %v9453_v0  ;;  %5848 = vmatprep.mubr.f32.mxu1 %v9453_v0 }
0x130d   :  { %8562 = vmatpush1.bf16.msra.mxu0 %v10609_v28  ;;  %8594 = vmatpush1.bf16.msra.mxu1 %v10612_v7 }
0x130e   :  { %8564 = vmatprep.subr.bf16.mxu0 %v10617_v18  ;;  %8596 = vmatprep.subr.bf16.mxu1 %v10619_v11 }
0x1311   :  { %8566 = vmatpush1.bf16.msra.mxu0 %v10621_v57  ;;  %8598 = vmatpush1.bf16.msra.mxu1 %v10624_v36 }
0x1312   :  { %8568 = vmatprep.subr.bf16.mxu0 %v10629_v2  ;;  %8600 = vmatprep.subr.bf16.mxu1 %v10631_v3 }
0x1315   :  { %8570 = vmatpush1.bf16.msra.mxu0 %v10633_v32  ;;  %8602 = vmatpush1.bf16.msra.mxu1 %v10636_v55 }
0x1316   :  { %8572 = vmatprep.subr.bf16.mxu0 %v10641_v48  ;;  %8604 = vmatprep.subr.bf16.mxu1 %v10643_v8 }
0x1319   :  { %8574 = vmatpush1.bf16.msra.mxu0 %v10645_v46  ;;  %8606 = vmatpush1.bf16.msra.mxu1 %v10648_v49 }
0x131a   :  { %8576 = vmatprep.subr.bf16.mxu0 %v10652_v44  ;;  %8608 = vmatprep.subr.bf16.mxu1 %v10654_v63 }
0x131d   :  { %8578 = vmatpush1.bf16.msra.mxu0 %v10657_v50  ;;  %8610 = vmatpush1.bf16.msra.mxu1 %v10661_v42 }
0x131e   :  { %8580 = vmatprep.subr.bf16.mxu0 %v10663_v58  ;;  %8612 = vmatprep.subr.bf16.mxu1 %v10665_v9 }
0x1321   :  { %8582 = vmatpush1.bf16.msra.mxu0 %v10668_v21  ;;  %8614 = vmatpush1.bf16.msra.mxu1 %v10672_v1 }
0x1322   :  { %8584 = vmatprep.subr.bf16.mxu0 %v10674_v61  ;;  %8616 = vmatprep.subr.bf16.mxu1 %v10677_v62 }
0x1325   :  { %8586 = vmatpush1.bf16.msra.mxu0 %v10680_v13  ;;  %8618 = vmatpush1.bf16.msra.mxu1 %v10684_v34 }
0x1326   :  { %8588 = vmatprep.subr.bf16.mxu0 %v10489_v10  ;;  %8620 = vmatprep.subr.bf16.mxu1 %v10492_v37 }
0x1329   :  { %8590 = vmatpush1.bf16.msra.mxu0 %v10494_v47  ;;  %8622 = vmatpush1.bf16.msra.mxu1 %v10498_v33  ;;  %v5388_v47 = vld [vmem:[#allocation3 + $0x18] sm:$0x30] }
0x132a   :  { %8624 = vmatprep.subr.bf16.mxu0 %v10605_v40  ;;  %8656 = vmatprep.subr.bf16.mxu1 %v10607_v22 }
0x13de   :  { %v5522_v38 = vpop.f32.mrb[48].mxu0  ;;  %v5593_v52 = vpop.f32.mrb[48].mxu1 }
0x13df   :  { %v5602_v29 = vrot.slane %v5522_v38, 4  ;;  %v5524_v26 = vpop.f32.mrb[49].mxu0  ;;  %v5595_v12 = vpop.f32.mrb[49].mxu1  ;;  %v5604_v15 = vrot.slane %v5593_v52, 4 }
0x13e0   :  { %v5603_v4 = vrot.slane %v5524_v26, 4  ;;  %v5605_v25 = vrot.slane %v5595_v12, 4  ;;  %v5962_v26 = vld [vmem:[#allocation9 + $0x5d8] sm:$0xff] }
0x13e1   :  { %v5610_v41 = vadd.f32 %v5602_v29, %v5385_v39  ;;  %v5612_v6 = vadd.f32 %v5604_v15, %v5387_v23  ;;  %v5964_v29 = vld [vmem:[#allocation9 + $0x5e8] sm:$0xff]  ;;  %v5966_v39 = vld [vmem:[#allocation9 + $0x5f8] sm:$0xff] }
0x13e2   :  { %v5611_v10 = vadd.f32 %v5603_v4, %v5386_v53  ;;  %v5613_v33 = vadd.f32 %v5605_v25, %v5388_v47  ;;  %v10727_v12 = vpack.c.bf16 %v5964_v29, %v5960_v19  ;;  %v5959_v4 = vld [vmem:[#allocation9 + $0x5c0] sm:$0xff]  ;;  %v10729_v53 = vpack.c.bf16 %v5966_v39, %v5962_v26 }
0x13e3   :  { %v7080_v16 = vmul.f32 -1.442695, %v5610_v41  ;;  %v5963_v41 = vld [vmem:[#allocation9 + $0x5e0] sm:$0xff] }
0x13e4   :  { %v7081_v37 = vmul.f32 -1.442695, %v5611_v10  ;;  %v7082_v45 = vmul.f32 -1.442695, %v5613_v33  ;;  %v10731_v10 = vpack.c.bf16 %v5963_v41, %v5959_v4 }
0x13e5   :  { %9206 = vpow2.f32 %v7080_v16  ;;  %v5961_v16 = vld [vmem:[#allocation9 + $0x5d0] sm:$0xff] }
0x13e6   :  { %9208 = vpow2.f32 %v7081_v37  ;;  %v5965_v37 = vld [vmem:[#allocation9 + $0x5f0] sm:$0xff] }
0x13e7   :  { %9210 = vpow2.f32 %v7082_v45  ;;  %v10734_v25 = vpack.c.bf16 %v5965_v37, %v5961_v16 }
0x13e8   :  { %9212 = vtanh.f32 %v5612_v6  ;;  %v5642_v6 = vld [vmem:[#allocation3] sm:$0xc0] }
0x13ef   :  { %v9207_v17 = vpop.eup %9206 }
0x13f0   :  { %v9209_v43 = vpop.eup %9208  ;;  %v5617_v24 = vadd.f32 1.0, %v9207_v17 }
0x13f1   :  { %v5623_v5 = vadd.f32 1.0, %v9209_v43  ;;  %v9211_v27 = vpop.eup %9210 }
0x13f2   :  { %9214 = vrcp.f32 %v5617_v24  ;;  %v9213_v30 = vpop.eup %9212  ;;  %v5630_v59 = vadd.f32 1.0, %v9211_v27  ;;  %v5643_v24 = vld [vmem:[#allocation3 + $0x8] sm:$0xc0] }
0x13f3   :  { %9216 = vrcp.f32 %v5623_v5 }
0x13f4   :  { %9218 = vrcp.f32 %v5630_v59  ;;  %v5644_v59 = vld [vmem:[#allocation3 + $0x10] sm:$0xc0] }
0x13fc   :  { %v9215_v20 = vpop.eup %9214 }
0x13fd   :  { %v9217_v14 = vpop.eup %9216  ;;  %v5637_v60 = vmul.f32 %v9215_v20, %v9213_v30 }
0x13fe   :  { %v5636_v54 = vmul.f32 %v9217_v14, %v5634_v31  ;;  %v9219_v56 = vpop.eup %9218  ;;  %v5645_v31 = vld [vmem:[#allocation3 + $0x18] sm:$0xc0] }
0x1400   :  { %v10696_v51 = vadd.f32 %v5637_v60, %v5636_v54 }
0x1402   :  { %9220 = vtanh.f32 %v10696_v51  ;;  %v5891_v4 = vrot.slane %v10696_v51, 6  ;;  %v5899_v51 = vld [vmem:[#allocation3 + $0x20] sm:$0x3] }
0x140c   :  { %v9221_v35 = vpop.eup %9220 }
0x140d   :  { %v5640_v38 = vmul.f32 %v9221_v35, %v9219_v56 }
0x140f   :  { %5641 = vst [vmem:[#allocation2] sm:$0x30] %v5640_v38  ;;  %v5711_v52 = vrot.slane %v5640_v38, 4 }
0x1411   :  { %5778 = vmatmul.mubr.f32.vlgmr.msra.gmra.mrb[50].mxu0 %v5711_v52  ;;  %5849 = vmatmul.mubr.f32.vlgmr.msra.gmra.mrb[50].mxu1 %v5711_v52 }
0x1412   :  { %8626 = vmatpush1.bf16.msra.mxu0 %v10609_v28  ;;  %8658 = vmatpush1.bf16.msra.mxu1 %v10612_v7 }
0x1413   :  { %8628 = vmatprep.subr.bf16.mxu0 %v10617_v18  ;;  %8660 = vmatprep.subr.bf16.mxu1 %v10619_v11 }
0x1414   :  { %6034 = vmatprep.mubr.f32.mxu0 %v9453_v0  ;;  %6105 = vmatprep.mubr.f32.mxu1 %v9453_v0 }
0x1416   :  { %8630 = vmatpush1.bf16.msra.mxu0 %v10621_v57  ;;  %8662 = vmatpush1.bf16.msra.mxu1 %v10624_v36 }
0x1417   :  { %8632 = vmatprep.subr.bf16.mxu0 %v10629_v2  ;;  %8664 = vmatprep.subr.bf16.mxu1 %v10631_v3 }
0x141a   :  { %8634 = vmatpush1.bf16.msra.mxu0 %v10633_v32  ;;  %8666 = vmatpush1.bf16.msra.mxu1 %v10636_v55 }
0x141b   :  { %8636 = vmatprep.subr.bf16.mxu0 %v10641_v48  ;;  %8668 = vmatprep.subr.bf16.mxu1 %v10643_v8 }
0x141e   :  { %8638 = vmatpush1.bf16.msra.mxu0 %v10645_v46  ;;  %8670 = vmatpush1.bf16.msra.mxu1 %v10648_v49 }
0x141f   :  { %8640 = vmatprep.subr.bf16.mxu0 %v10652_v44  ;;  %8672 = vmatprep.subr.bf16.mxu1 %v10654_v63 }
0x1422   :  { %8642 = vmatpush1.bf16.msra.mxu0 %v10657_v50  ;;  %8674 = vmatpush1.bf16.msra.mxu1 %v10661_v42 }
0x1423   :  { %8644 = vmatprep.subr.bf16.mxu0 %v10663_v58  ;;  %8676 = vmatprep.subr.bf16.mxu1 %v10665_v9 }
0x1426   :  { %8646 = vmatpush1.bf16.msra.mxu0 %v10668_v21  ;;  %8678 = vmatpush1.bf16.msra.mxu1 %v10672_v1 }
0x1427   :  { %8648 = vmatprep.subr.bf16.mxu0 %v10674_v61  ;;  %8680 = vmatprep.subr.bf16.mxu1 %v10677_v62 }
0x142a   :  { %8650 = vmatpush1.bf16.msra.mxu0 %v10680_v13  ;;  %8682 = vmatpush1.bf16.msra.mxu1 %v10684_v34 }
0x142b   :  { %8652 = vmatprep.subr.bf16.mxu0 %v10727_v12  ;;  %8684 = vmatprep.subr.bf16.mxu1 %v10729_v53 }
0x142e   :  { %8654 = vmatpush1.bf16.msra.mxu0 %v10731_v10  ;;  %8686 = vmatpush1.bf16.msra.mxu1 %v10734_v25 }
0x142f   :  { %8688 = vmatprep.subr.bf16.mxu0 %v10605_v40  ;;  %8720 = vmatprep.subr.bf16.mxu1 %v10607_v22 }
0x14e4   :  { %v5779_v47 = vpop.f32.mrb[50].mxu0  ;;  %v5850_v33 = vpop.f32.mrb[50].mxu1 }
0x14e5   :  { %v5859_v15 = vrot.slane %v5779_v47, 2  ;;  %v5781_v23 = vpop.f32.mrb[51].mxu0  ;;  %v5852_v45 = vpop.f32.mrb[51].mxu1  ;;  %v5861_v60 = vrot.slane %v5850_v33, 2 }
0x14e6   :  { %v5860_v17 = vrot.slane %v5781_v23, 2  ;;  %v5862_v20 = vrot.slane %v5852_v45, 2 }
0x14e7   :  { %v5867_v43 = vadd.f32 %v5859_v15, %v5642_v6  ;;  %v5869_v56 = vadd.f32 %v5861_v60, %v5644_v59  ;;  %v5902_v60 = vld [vmem:[#allocation3 + $0x38] sm:$0x3] }
0x14e8   :  { %v5868_v5 = vadd.f32 %v5860_v17, %v5643_v24  ;;  %v5870_v14 = vadd.f32 %v5862_v20, %v5645_v31 }
0x14e9   :  { %v7083_v27 = vmul.f32 -1.442695, %v5867_v43 }
0x14ea   :  { %v7084_v30 = vmul.f32 -1.442695, %v5868_v5  ;;  %v7085_v54 = vmul.f32 -1.442695, %v5870_v14  ;;  %v5900_v5 = vld [vmem:[#allocation3 + $0x28] sm:$0x3] }
0x14eb   :  { %9222 = vpow2.f32 %v7083_v27 }
0x14ec   :  { %9224 = vpow2.f32 %v7084_v30 }
0x14ed   :  { %9226 = vpow2.f32 %v7085_v54  ;;  %v5901_v54 = vld [vmem:[#allocation3 + $0x30] sm:$0x3] }
0x14ee   :  { %9228 = vtanh.f32 %v5869_v56 }
0x14f5   :  { %v9223_v35 = vpop.eup %9222 }
0x14f6   :  { %v9225_v38 = vpop.eup %9224  ;;  %v5874_v52 = vadd.f32 1.0, %v9223_v35 }
0x14f7   :  { %v5880_v19 = vadd.f32 1.0, %v9225_v38  ;;  %v9227_v29 = vpop.eup %9226 }
0x14f8   :  { %9230 = vrcp.f32 %v5874_v52  ;;  %v9229_v26 = vpop.eup %9228  ;;  %v5887_v37 = vadd.f32 1.0, %v9227_v29 }
0x14f9   :  { %9232 = vrcp.f32 %v5880_v19 }
0x14fa   :  { %9234 = vrcp.f32 %v5887_v37 }
0x1502   :  { %v9231_v39 = vpop.eup %9230 }
0x1503   :  { %v9233_v41 = vpop.eup %9232  ;;  %v5894_v16 = vmul.f32 %v9231_v39, %v9229_v26 }
0x1504   :  { %v5893_v47 = vmul.f32 %v9233_v41, %v5891_v4  ;;  %v9235_v15 = vpop.eup %9234 }
0x1506   :  { %v10742_v33 = vadd.f32 %v5894_v16, %v5893_v47 }
0x1508   :  { %9236 = vtanh.f32 %v10742_v33  ;;  %v6136_v39 = vrot.slane %v10742_v33, 6 }
0x1512   :  { %v9237_v23 = vpop.eup %9236 }
0x1513   :  { %v5897_v45 = vmul.f32 %v9237_v23, %v9235_v15 }
0x1515   :  { %5898 = vst [vmem:[#allocation2] sm:$0xc0] %v5897_v45  ;;  %v5968_v6 = vrot.slane %v5897_v45, 6 }
0x1517   :  { %6035 = vmatmul.mubr.f32.vlgmr.msra.gmra.mrb[52].mxu0 %v5968_v6  ;;  %6106 = vmatmul.mubr.f32.vlgmr.msra.gmra.mrb[52].mxu1 %v5968_v6 }
0x1518   :  { %8690 = vmatpush1.bf16.msra.mxu0 %v10609_v28  ;;  %8722 = vmatpush1.bf16.msra.mxu1 %v10612_v7 }
0x1519   :  { %8692 = vmatprep.subr.bf16.mxu0 %v10617_v18  ;;  %8724 = vmatprep.subr.bf16.mxu1 %v10619_v11 }
0x151a   :  { %6276 = vmatprep.mubr.f32.mxu0 %v9453_v0  ;;  %6347 = vmatprep.mubr.f32.mxu1 %v9453_v0 }
0x151c   :  { %8694 = vmatpush1.bf16.msra.mxu0 %v10621_v57  ;;  %8726 = vmatpush1.bf16.msra.mxu1 %v10624_v36 }
0x151d   :  { %8696 = vmatprep.subr.bf16.mxu0 %v10629_v2  ;;  %8728 = vmatprep.subr.bf16.mxu1 %v10631_v3 }
0x1520   :  { %8698 = vmatpush1.bf16.msra.mxu0 %v10633_v32  ;;  %8730 = vmatpush1.bf16.msra.mxu1 %v10636_v55 }
0x1521   :  { %8700 = vmatprep.subr.bf16.mxu0 %v10641_v48  ;;  %8732 = vmatprep.subr.bf16.mxu1 %v10643_v8 }
0x1524   :  { %8702 = vmatpush1.bf16.msra.mxu0 %v10645_v46  ;;  %8734 = vmatpush1.bf16.msra.mxu1 %v10648_v49 }
0x1525   :  { %8704 = vmatprep.subr.bf16.mxu0 %v10652_v44  ;;  %8736 = vmatprep.subr.bf16.mxu1 %v10654_v63 }
0x1528   :  { %8706 = vmatpush1.bf16.msra.mxu0 %v10657_v50  ;;  %8738 = vmatpush1.bf16.msra.mxu1 %v10661_v42 }
0x1529   :  { %8708 = vmatprep.subr.bf16.mxu0 %v10663_v58  ;;  %8740 = vmatprep.subr.bf16.mxu1 %v10665_v9 }
0x152c   :  { %8710 = vmatpush1.bf16.msra.mxu0 %v10668_v21  ;;  %8742 = vmatpush1.bf16.msra.mxu1 %v10672_v1 }
0x152d   :  { %8712 = vmatprep.subr.bf16.mxu0 %v10674_v61  ;;  %8744 = vmatprep.subr.bf16.mxu1 %v10677_v62 }
0x1530   :  { %8714 = vmatpush1.bf16.msra.mxu0 %v10680_v13  ;;  %8746 = vmatpush1.bf16.msra.mxu1 %v10684_v34 }
0x1531   :  { %8716 = vmatprep.subr.bf16.mxu0 %v10727_v12  ;;  %8748 = vmatprep.subr.bf16.mxu1 %v10729_v53 }
0x1534   :  { %8718 = vmatpush1.bf16.msra.mxu0 %v10731_v10  ;;  %8750 = vmatpush1.bf16.msra.mxu1 %v10734_v25 }
0x1535   :  { %8752 = vmatprep.subr.bf16.mxu0 %v10605_v40  ;;  %8784 = vmatprep.subr.bf16.mxu1 %v10607_v22 }
0x15ea   :  { %v6036_v17 = vpop.f32.mrb[52].mxu0  ;;  %v6107_v43 = vpop.f32.mrb[52].mxu1 }
0x15eb   :  { %v6112_v24 = vadd.f32 %v6036_v17, %v5899_v51  ;;  %v6038_v27 = vpop.f32.mrb[53].mxu0  ;;  %v6109_v30 = vpop.f32.mrb[53].mxu1  ;;  %v6114_v35 = vadd.f32 %v6107_v43, %v5901_v54  ;;  %v6666_v54 = vld [vmem:[#allocation9 + $0x438] sm:$0xff] }
0x15ec   :  { %v6113_v20 = vadd.f32 %v6038_v27, %v5900_v5  ;;  %v6115_v59 = vadd.f32 %v6109_v30, %v5902_v60  ;;  %v6662_v60 = vld [vmem:[#allocation9 + $0x418] sm:$0xff] }
0x15ed   :  { %v7086_v31 = vmul.f32 -1.442695, %v6112_v24 }
0x15ee   :  { %v7087_v14 = vmul.f32 -1.442695, %v6113_v20  ;;  %v7088_v56 = vmul.f32 -1.442695, %v6115_v59 }
0x15ef   :  { %9238 = vpow2.f32 %v7086_v31  ;;  %v6660_v31 = vld [vmem:[#allocation9 + $0x408] sm:$0xff] }
0x15f0   :  { %9240 = vpow2.f32 %v7087_v14  ;;  %v6664_v14 = vld [vmem:[#allocation9 + $0x428] sm:$0xff] }
0x15f1   :  { %9242 = vpow2.f32 %v7088_v56  ;;  %v8815_v59 = vpack.c.bf16 %v6664_v14, %v6660_v31  ;;  %v6659_v56 = vld [vmem:[#allocation9 + $0x400] sm:$0xff]  ;;  %v6697_v31 = vld [vmem:[#allocation9 + $0x530] sm:$0xff]  ;;  %v6700_v14 = vld [vmem:[#allocation9 + $0x548] sm:$0xff] }
0x15f2   :  { %9244 = vtanh.f32 %v6114_v35  ;;  %v6663_v35 = vld [vmem:[#allocation9 + $0x420] sm:$0xff] }
0x15f9   :  { %v9239_v40 = vpop.eup %9238 }
0x15fa   :  { %v9241_v38 = vpop.eup %9240  ;;  %v6119_v22 = vadd.f32 1.0, %v9239_v40  ;;  %v8847_v40 = vpack.c.bf16 %v6666_v54, %v6662_v60  ;;  %v6704_v60 = vld [vmem:[#allocation9 + $0x568] sm:$0xff] }
0x15fb   :  { %v6125_v52 = vadd.f32 1.0, %v9241_v38  ;;  %v9243_v19 = vpop.eup %9242  ;;  %v8817_v38 = vpack.c.bf16 %v6663_v35, %v6659_v56  ;;  %v8835_v54 = vpack.c.bf16 %v6704_v60, %v6700_v14  ;;  %v6702_v56 = vld [vmem:[#allocation9 + $0x558] sm:$0xff] }
0x15fc   :  { %9246 = vrcp.f32 %v6119_v22  ;;  %v9245_v29 = vpop.eup %9244  ;;  %v6132_v16 = vadd.f32 1.0, %v9243_v19  ;;  %v6661_v22 = vld [vmem:[#allocation9 + $0x410] sm:$0xff]  ;;  %v6706_v35 = vld [vmem:[#allocation9 + $0x578] sm:$0xff] }
0x15fd   :  { %9248 = vrcp.f32 %v6125_v52  ;;  %v6665_v52 = vld [vmem:[#allocation9 + $0x430] sm:$0xff] }
0x15fe   :  { %9250 = vrcp.f32 %v6132_v16  ;;  %v8849_v19 = vpack.c.bf16 %v6665_v52, %v6661_v22  ;;  %v6667_v16 = vld [vmem:[#allocation9 + $0x440] sm:$0xff]  ;;  %v6701_v52 = vld [vmem:[#allocation9 + $0x550] sm:$0xff] }
0x15ff   :  { %v6703_v22 = vld [vmem:[#allocation9 + $0x560] sm:$0xff]  ;;  %v6913_v14 = vld [vmem:[#allocation12 + $0x8] sm:$0xff] }
0x1606   :  { %v9247_v26 = vpop.eup %9246 }
0x1607   :  { %v9249_v4 = vpop.eup %9248  ;;  %v6139_v41 = vmul.f32 %v9247_v26, %v9245_v29  ;;  %v6668_v29 = vld [vmem:[#allocation9 + $0x448] sm:$0xff] }
0x1608   :  { %v6138_v37 = vmul.f32 %v9249_v4, %v6136_v39  ;;  %v9251_v15 = vpop.eup %9250  ;;  %v6672_v26 = vld [vmem:[#allocation9 + $0x468] sm:$0xff]  ;;  %v6670_v39 = vld [vmem:[#allocation9 + $0x458] sm:$0xff] }
0x1609   :  { %v8819_v4 = vpack.c.bf16 %v6672_v26, %v6668_v29  ;;  %v6708_v26 = vld [vmem:[#allocation9 + $0x588] sm:$0xff] }
0x160a   :  { %v10780_v47 = vadd.f32 %v6139_v41, %v6138_v37  ;;  %v6674_v41 = vld [vmem:[#allocation9 + $0x478] sm:$0xff]  ;;  %v6671_v37 = vld [vmem:[#allocation9 + $0x460] sm:$0xff] }
0x160c   :  { %9252 = vtanh.f32 %v10780_v47  ;;  %v6390_v33 = vrot.slane %v10780_v47, 6  ;;  %v8851_v47 = vpack.c.bf16 %v6674_v41, %v6670_v39  ;;  %v6712_v39 = vld [vmem:[#allocation9 + $0x5a8] sm:$0xff] }
0x1616   :  { %v9253_v23 = vpop.eup %9252 }
0x1617   :  { %v6142_v45 = vmul.f32 %v9253_v23, %v9251_v15  ;;  %v8821_v15 = vpack.c.bf16 %v6671_v37, %v6667_v16  ;;  %v6669_v23 = vld [vmem:[#allocation9 + $0x450] sm:$0xff]  ;;  %v8839_v16 = vpack.c.bf16 %v6712_v39, %v6708_v26  ;;  %v6714_v37 = vld [vmem:[#allocation9 + $0x5b8] sm:$0xff] }
0x1618   :  { %v6921_v26 = vld [vmem:[#allocation12 + $0x48] sm:$0xff] }
0x1619   :  { %6143 = vst [vmem:[#allocation2 + $0x8] sm:$0x3] %v6142_v45  ;;  %6277 = vmatmul.mubr.f32.vlgmr.msra.gmra.mrb[54].mxu0 %v6142_v45  ;;  %6348 = vmatmul.mubr.f32.vlgmr.msra.gmra.mrb[54].mxu1 %v6142_v45  ;;  %v6673_v45 = vld [vmem:[#allocation9 + $0x470] sm:$0xff] }
0x161a   :  { %8754 = vmatpush1.bf16.msra.mxu0 %v10609_v28  ;;  %8786 = vmatpush1.bf16.msra.mxu1 %v10612_v7 }
0x161b   :  { %8756 = vmatprep.subr.bf16.mxu0 %v10617_v18  ;;  %8788 = vmatprep.subr.bf16.mxu1 %v10619_v11 }
0x161c   :  { %6533 = vmatprep.mubr.f32.mxu0 %v9453_v0  ;;  %6604 = vmatprep.mubr.f32.mxu1 %v9453_v0 }
0x161e   :  { %8758 = vmatpush1.bf16.msra.mxu0 %v10621_v57  ;;  %8790 = vmatpush1.bf16.msra.mxu1 %v10624_v36  ;;  %v6144_v36 = vld [vmem:[#allocation3 + $0x20] sm:$0xc] }
0x161f   :  { %8760 = vmatprep.subr.bf16.mxu0 %v10629_v2  ;;  %8792 = vmatprep.subr.bf16.mxu1 %v10631_v3 }
0x1622   :  { %8762 = vmatpush1.bf16.msra.mxu0 %v10633_v32  ;;  %8794 = vmatpush1.bf16.msra.mxu1 %v10636_v55  ;;  %v6145_v32 = vld [vmem:[#allocation3 + $0x28] sm:$0xc] }
0x1623   :  { %8764 = vmatprep.subr.bf16.mxu0 %v10641_v48  ;;  %8796 = vmatprep.subr.bf16.mxu1 %v10643_v8 }
0x1626   :  { %8766 = vmatpush1.bf16.msra.mxu0 %v10645_v46  ;;  %8798 = vmatpush1.bf16.msra.mxu1 %v10648_v49  ;;  %v6147_v49 = vld [vmem:[#allocation3 + $0x38] sm:$0xc] }
0x1627   :  { %8768 = vmatprep.subr.bf16.mxu0 %v10652_v44  ;;  %8800 = vmatprep.subr.bf16.mxu1 %v10654_v63 }
0x162a   :  { %8770 = vmatpush1.bf16.msra.mxu0 %v10657_v50  ;;  %8802 = vmatpush1.bf16.msra.mxu1 %v10661_v42  ;;  %v6146_v50 = vld [vmem:[#allocation3 + $0x30] sm:$0xc] }
0x162b   :  { %8772 = vmatprep.subr.bf16.mxu0 %v10663_v58  ;;  %8804 = vmatprep.subr.bf16.mxu1 %v10665_v9 }
0x162e   :  { %8774 = vmatpush1.bf16.msra.mxu0 %v10668_v21  ;;  %8806 = vmatpush1.bf16.msra.mxu1 %v10672_v1 }
0x162f   :  { %8776 = vmatprep.subr.bf16.mxu0 %v10674_v61  ;;  %8808 = vmatprep.subr.bf16.mxu1 %v10677_v62 }
0x1632   :  { %8778 = vmatpush1.bf16.msra.mxu0 %v10680_v13  ;;  %8810 = vmatpush1.bf16.msra.mxu1 %v10684_v34 }
0x1633   :  { %8780 = vmatprep.subr.bf16.mxu0 %v10727_v12  ;;  %8812 = vmatprep.subr.bf16.mxu1 %v10729_v53 }
0x1636   :  { %8782 = vmatpush1.bf16.msra.mxu0 %v10731_v10  ;;  %8814 = vmatpush1.bf16.msra.mxu1 %v10734_v25 }
0x1637   :  { %8816 = vmatprep.subr.bf16.mxu0 %v8815_v59  ;;  %8848 = vmatprep.subr.bf16.mxu1 %v8847_v40  ;;  %v6699_v40 = vld [vmem:[#allocation9 + $0x540] sm:$0xff] }
0x1638   :  { %v8837_v29 = vpack.c.bf16 %v6703_v22, %v6699_v40  ;;  %v6917_v40 = vld [vmem:[#allocation12 + $0x28] sm:$0xff]  ;;  %v6918_v22 = vld [vmem:[#allocation12 + $0x30] sm:$0xff] }
0x16ec   :  { %v6278_v28 = vpop.f32.mrb[54].mxu0  ;;  %v6349_v7 = vpop.f32.mrb[54].mxu1 }
0x16ed   :  { %v6358_v18 = vrot.slane %v6278_v28, 6  ;;  %v6280_v11 = vpop.f32.mrb[55].mxu0  ;;  %v6351_v57 = vpop.f32.mrb[55].mxu1  ;;  %v6360_v63 = vrot.slane %v6349_v7, 6  ;;  %v8853_v28 = vpack.c.bf16 %v6673_v45, %v6669_v23  ;;  %v6676_v7 = vld [vmem:[#allocation9 + $0x488] sm:$0xff]  ;;  %v6709_v45 = vld [vmem:[#allocation9 + $0x590] sm:$0xff] }
0x16ee   :  { %v6359_v2 = vrot.slane %v6280_v11, 6  ;;  %v6361_v46 = vrot.slane %v6351_v57, 6  ;;  %v6678_v11 = vld [vmem:[#allocation9 + $0x498] sm:$0xff] }
0x16ef   :  { %v6366_v3 = vadd.f32 %v6358_v18, %v6144_v36  ;;  %v6368_v58 = vadd.f32 %v6360_v63, %v6146_v50  ;;  %v6680_v18 = vld [vmem:[#allocation9 + $0x4a8] sm:$0xff]  ;;  %v6682_v36 = vld [vmem:[#allocation9 + $0x4b8] sm:$0xff] }
0x16f0   :  { %v6367_v55 = vadd.f32 %v6359_v2, %v6145_v32  ;;  %v6369_v44 = vadd.f32 %v6361_v46, %v6147_v49  ;;  %v8823_v57 = vpack.c.bf16 %v6680_v18, %v6676_v7  ;;  %v6675_v2 = vld [vmem:[#allocation9 + $0x480] sm:$0xff]  ;;  %v8855_v32 = vpack.c.bf16 %v6682_v36, %v6678_v11  ;;  %v6684_v49 = vld [vmem:[#allocation9 + $0x4c8] sm:$0xff]  ;;  %v6686_v63 = vld [vmem:[#allocation9 + $0x4d8] sm:$0xff] }
0x16f1   :  { %v7089_v48 = vmul.f32 -1.442695, %v6366_v3  ;;  %v6679_v3 = vld [vmem:[#allocation9 + $0x4a0] sm:$0xff] }
0x16f2   :  { %v7090_v8 = vmul.f32 -1.442695, %v6367_v55  ;;  %v7091_v42 = vmul.f32 -1.442695, %v6369_v44  ;;  %v8825_v55 = vpack.c.bf16 %v6679_v3, %v6675_v2  ;;  %v6688_v44 = vld [vmem:[#allocation9 + $0x4e8] sm:$0xff] }
0x16f3   :  { %9254 = vpow2.f32 %v7089_v48  ;;  %v6677_v48 = vld [vmem:[#allocation9 + $0x490] sm:$0xff]  ;;  %v8827_v50 = vpack.c.bf16 %v6688_v44, %v6684_v49 }
0x16f4   :  { %9256 = vpow2.f32 %v7090_v8  ;;  %v6681_v8 = vld [vmem:[#allocation9 + $0x4b0] sm:$0xff] }
0x16f5   :  { %9258 = vpow2.f32 %v7091_v42  ;;  %v8857_v46 = vpack.c.bf16 %v6681_v8, %v6677_v48  ;;  %v6690_v42 = vld [vmem:[#allocation9 + $0x4f8] sm:$0xff] }
0x16f6   :  { %9260 = vtanh.f32 %v6368_v58  ;;  %v6683_v58 = vld [vmem:[#allocation9 + $0x4c0] sm:$0xff]  ;;  %v6399_v8 = vld [vmem:[#allocation3 + $0x28] sm:$0x30] }
0x16fd   :  { %v9255_v9 = vpop.eup %9254 }
0x16fe   :  { %v9257_v21 = vpop.eup %9256  ;;  %v6373_v1 = vadd.f32 1.0, %v9255_v9  ;;  %v6687_v9 = vld [vmem:[#allocation9 + $0x4e0] sm:$0xff] }
0x16ff   :  { %v6379_v61 = vadd.f32 1.0, %v9257_v21  ;;  %v9259_v62 = vpop.eup %9258  ;;  %v8859_v21 = vpack.c.bf16 %v6690_v42, %v6686_v63 }
0x1700   :  { %9262 = vrcp.f32 %v6373_v1  ;;  %v9261_v13 = vpop.eup %9260  ;;  %v6386_v17 = vadd.f32 1.0, %v9259_v62  ;;  %v8829_v1 = vpack.c.bf16 %v6687_v9, %v6683_v58  ;;  %v6689_v62 = vld [vmem:[#allocation9 + $0x4f0] sm:$0xff] }
0x1701   :  { %9264 = vrcp.f32 %v6379_v61  ;;  %v6685_v61 = vld [vmem:[#allocation9 + $0x4d0] sm:$0xff] }
0x1702   :  { %9266 = vrcp.f32 %v6386_v17 }
0x170a   :  { %v9263_v34 = vpop.eup %9262 }
0x170b   :  { %v9265_v6 = vpop.eup %9264  ;;  %v6393_v51 = vmul.f32 %v9263_v34, %v9261_v13  ;;  %v6692_v13 = vld [vmem:[#allocation9 + $0x508] sm:$0xff]  ;;  %v8861_v34 = vpack.c.bf16 %v6689_v62, %v6685_v61 }
0x170c   :  { %v6392_v43 = vmul.f32 %v9265_v6, %v6390_v33  ;;  %v9267_v5 = vpop.eup %9266  ;;  %v6696_v33 = vld [vmem:[#allocation9 + $0x528] sm:$0xff]  ;;  %v6694_v6 = vld [vmem:[#allocation9 + $0x518] sm:$0xff] }
0x170d   :  { %v8831_v17 = vpack.c.bf16 %v6696_v33, %v6692_v13 }
0x170e   :  { %v10816_v24 = vadd.f32 %v6393_v51, %v6392_v43  ;;  %v6698_v51 = vld [vmem:[#allocation9 + $0x538] sm:$0xff] }
0x170f   :  { %v8863_v43 = vpack.c.bf16 %v6698_v51, %v6694_v6 }
0x1710   :  { %9268 = vtanh.f32 %v10816_v24 }
0x171a   :  { %v9269_v27 = vpop.eup %9268 }
0x171b   :  { %v6396_v30 = vmul.f32 %v9269_v27, %v9267_v5  ;;  %v6691_v5 = vld [vmem:[#allocation9 + $0x500] sm:$0xff] }
0x171c   :  { %v6695_v27 = vld [vmem:[#allocation9 + $0x520] sm:$0xff] }
0x171d   :  { %6397 = vst [vmem:[#allocation2 + $0x8] sm:$0xc] %v6396_v30  ;;  %v6467_v20 = vrot.slane %v6396_v30, 2  ;;  %v6693_v30 = vld [vmem:[#allocation9 + $0x510] sm:$0xff] }
0x171e   :  { %v8865_v59 = vpack.c.bf16 %v6697_v31, %v6693_v30  ;;  %v6912_v31 = vld [vmem:[#allocation12] sm:$0xff] }
0x171f   :  { %6534 = vmatmul.mubr.f32.vlgmr.msra.gmra.mrb[56].mxu0 %v6467_v20  ;;  %6605 = vmatmul.mubr.f32.vlgmr.msra.gmra.mrb[56].mxu1 %v6467_v20  ;;  %v8833_v20 = vpack.c.bf16 %v6695_v27, %v6691_v5  ;;  %v8880_v60 = vpack.c.bf16 %v6913_v14, %v6912_v31 }
0x1720   :  { %6790 = vmatprep.mubr.f32.mxu0 %v9453_v0  ;;  %6861 = vmatprep.mubr.f32.mxu1 %v9453_v0 }
0x1721   :  { %8818 = vmatpush1.bf16.msra.mxu0 %v8817_v38  ;;  %8850 = vmatpush1.bf16.msra.mxu1 %v8849_v19  ;;  %v8867_v38 = vpack.c.bf16 %v6706_v35, %v6702_v56  ;;  %v6705_v19 = vld [vmem:[#allocation9 + $0x570] sm:$0xff] }
0x1722   :  { %8820 = vmatprep.subr.bf16.mxu0 %v8819_v4  ;;  %8852 = vmatprep.subr.bf16.mxu1 %v8851_v47  ;;  %v6710_v4 = vld [vmem:[#allocation9 + $0x598] sm:$0xff]  ;;  %v8869_v41 = vpack.c.bf16 %v6705_v19, %v6701_v52  ;;  %v6707_v47 = vld [vmem:[#allocation9 + $0x580] sm:$0xff]  ;;  %v6916_v35 = vld [vmem:[#allocation12 + $0x20] sm:$0xff] }
0x1723   :  { %v8871_v23 = vpack.c.bf16 %v6714_v37, %v6710_v4  ;;  %v6919_v52 = vld [vmem:[#allocation12 + $0x38] sm:$0xff]  ;;  %v6922_v4 = vld [vmem:[#allocation12 + $0x50] sm:$0xff]  ;;  %v6924_v37 = vld [vmem:[#allocation12 + $0x60] sm:$0xff] }
0x1724   :  { %v8889_v19 = vpack.c.bf16 %v6919_v52, %v6918_v22 }
0x1725   :  { %8822 = vmatpush1.bf16.msra.mxu0 %v8821_v15  ;;  %8854 = vmatpush1.bf16.msra.mxu1 %v8853_v28  ;;  %v6711_v15 = vld [vmem:[#allocation9 + $0x5a0] sm:$0xff]  ;;  %v6713_v28 = vld [vmem:[#allocation9 + $0x5b0] sm:$0xff] }
0x1726   :  { %8824 = vmatprep.subr.bf16.mxu0 %v8823_v57  ;;  %8856 = vmatprep.subr.bf16.mxu1 %v8855_v32  ;;  %v8841_v7 = vpack.c.bf16 %v6711_v15, %v6707_v47  ;;  %v8873_v18 = vpack.c.bf16 %v6713_v28, %v6709_v45  ;;  %v6398_v32 = vld [vmem:[#allocation3 + $0x20] sm:$0x30]  ;;  %v6927_v45 = vld [vmem:[#allocation12 + $0x78] sm:$0xff] }
0x1727   :  { %v6925_v47 = vld [vmem:[#allocation12 + $0x68] sm:$0xff] }
0x1728   :  { %v8898_v15 = vpack.c.bf16 %v6925_v47, %v6924_v37 }
0x1729   :  { %8826 = vmatpush1.bf16.msra.mxu0 %v8825_v55  ;;  %8858 = vmatpush1.bf16.msra.mxu1 %v8857_v46 }
0x172a   :  { %8828 = vmatprep.subr.bf16.mxu0 %v8827_v50  ;;  %8860 = vmatprep.subr.bf16.mxu1 %v8859_v21  ;;  %v6400_v50 = vld [vmem:[#allocation3 + $0x30] sm:$0x30] }
0x172d   :  { %8830 = vmatpush1.bf16.msra.mxu0 %v8829_v1  ;;  %8862 = vmatpush1.bf16.msra.mxu1 %v8861_v34  ;;  %v6647_v34 = vrot.slane %v10816_v24, 6  ;;  %v9454_v24 = vmov 0.0|0.0  }
0x172e   :  { %8832 = vmatprep.subr.bf16.mxu0 %v8831_v17  ;;  %8864 = vmatprep.subr.bf16.mxu1 %v8863_v43 }
0x1731   :  { %8834 = vmatpush1.bf16.msra.mxu0 %v8833_v20  ;;  %8866 = vmatpush1.bf16.msra.mxu1 %v8865_v59  ;;  %v6914_v59 = vld [vmem:[#allocation12 + $0x10] sm:$0xff] }
0x1732   :  { %8836 = vmatprep.subr.bf16.mxu0 %v8835_v54  ;;  %8868 = vmatprep.subr.bf16.mxu1 %v8867_v38  ;;  %v6915_v54 = vld [vmem:[#allocation12 + $0x18] sm:$0xff]  ;;  %v8886_v38 = vpack.c.bf16 %v6917_v40, %v6916_v35 }
0x1733   :  { %v8883_v56 = vpack.c.bf16 %v6915_v54, %v6914_v59 }
0x1735   :  { %8838 = vmatpush1.bf16.msra.mxu0 %v8837_v29  ;;  %8870 = vmatpush1.bf16.msra.mxu1 %v8869_v41  ;;  %v6920_v29 = vld [vmem:[#allocation12 + $0x40] sm:$0xff]  ;;  %v6923_v41 = vld [vmem:[#allocation12 + $0x58] sm:$0xff] }
0x1736   :  { %8840 = vmatprep.subr.bf16.mxu0 %v8839_v16  ;;  %8872 = vmatprep.subr.bf16.mxu1 %v8871_v23  ;;  %v8892_v39 = vpack.c.bf16 %v6921_v26, %v6920_v29  ;;  %v8895_v16 = vpack.c.bf16 %v6923_v41, %v6922_v4  ;;  %v6926_v23 = vld [vmem:[#allocation12 + $0x70] sm:$0xff] }
0x1737   :  { %v8901_v28 = vpack.c.bf16 %v6927_v45, %v6926_v23 }
0x1739   :  { %8842 = vmatpush1.bf16.msra.mxu0 %v8841_v7  ;;  %8874 = vmatpush1.bf16.msra.mxu1 %v8873_v18 }
0x173a   :  { %8844 = vmatprep.subr.bf16.mxu0 %v10727_v12  ;;  %8876 = vmatprep.subr.bf16.mxu1 %v10729_v53  ;;  %v6401_v12 = vld [vmem:[#allocation3 + $0x38] sm:$0x30] }
0x173d   :  { %8846 = vmatpush1.bf16.msra.mxu0 %v10731_v10  ;;  %8878 = vmatpush1.bf16.msra.mxu1 %v10734_v25 }
0x173e   :  { %8879 = vmatprep.subr.bf16.mxu0 %v9454_v24 }
0x17f2   :  { %v6535_v11 = vpop.f32.mrb[56].mxu0  ;;  %v6606_v57 = vpop.f32.mrb[56].mxu1 }
0x17f3   :  { %v6615_v36 = vrot.slane %v6535_v11, 4  ;;  %v6537_v2 = vpop.f32.mrb[57].mxu0  ;;  %v6608_v3 = vpop.f32.mrb[57].mxu1  ;;  %v6617_v10 = vrot.slane %v6606_v57, 4 }
0x17f4   :  { %v6616_v55 = vrot.slane %v6537_v2, 4  ;;  %v6618_v63 = vrot.slane %v6608_v3, 4 }
0x17f5   :  { %v6623_v48 = vadd.f32 %v6615_v36, %v6398_v32  ;;  %v6625_v42 = vadd.f32 %v6617_v10, %v6400_v50  ;;  %v6655_v36 = vld [vmem:[#allocation3 + $0x20] sm:$0xc0]  ;;  %v6656_v32 = vld [vmem:[#allocation3 + $0x28] sm:$0xc0] }
0x17f6   :  { %v6624_v46 = vadd.f32 %v6616_v55, %v6399_v8  ;;  %v6626_v53 = vadd.f32 %v6618_v63, %v6401_v12  ;;  %v6657_v12 = vld [vmem:[#allocation3 + $0x30] sm:$0xc0] }
0x17f7   :  { %v7092_v49 = vmul.f32 -1.442695, %v6623_v48 }
0x17f8   :  { %v7093_v44 = vmul.f32 -1.442695, %v6624_v46  ;;  %v7094_v25 = vmul.f32 -1.442695, %v6626_v53 }
0x17f9   :  { %9270 = vpow2.f32 %v7092_v49  ;;  %v6658_v49 = vld [vmem:[#allocation3 + $0x38] sm:$0xc0] }
0x17fa   :  { %9272 = vpow2.f32 %v7093_v44 }
0x17fb   :  { %9274 = vpow2.f32 %v7094_v25 }
0x17fc   :  { %9276 = vtanh.f32 %v6625_v42 }
0x1803   :  { %v9271_v58 = vpop.eup %9270 }
0x1804   :  { %v9273_v9 = vpop.eup %9272  ;;  %v6630_v21 = vadd.f32 1.0, %v9271_v58 }
0x1805   :  { %v6636_v1 = vadd.f32 1.0, %v9273_v9  ;;  %v9275_v61 = vpop.eup %9274 }
0x1806   :  { %9278 = vrcp.f32 %v6630_v21  ;;  %v9277_v62 = vpop.eup %9276  ;;  %v6643_v51 = vadd.f32 1.0, %v9275_v61 }
0x1807   :  { %9280 = vrcp.f32 %v6636_v1 }
0x1808   :  { %9282 = vrcp.f32 %v6643_v51 }
0x1810   :  { %v9279_v13 = vpop.eup %9278 }
0x1811   :  { %v9281_v33 = vpop.eup %9280  ;;  %v6650_v6 = vmul.f32 %v9279_v13, %v9277_v62 }
0x1812   :  { %v6649_v17 = vmul.f32 %v9281_v33, %v6647_v34  ;;  %v9283_v5 = vpop.eup %9282 }
0x1814   :  { %v10826_v43 = vadd.f32 %v6650_v6, %v6649_v17 }
0x1816   :  { %9284 = vtanh.f32 %v10826_v43  ;;  %v6904_v61 = vrot.slane %v10826_v43, 6 }
0x1820   :  { %v9285_v27 = vpop.eup %9284 }
0x1821   :  { %v6653_v30 = vmul.f32 %v9285_v27, %v9283_v5 }
0x1823   :  { %6654 = vst [vmem:[#allocation2 + $0x8] sm:$0x30] %v6653_v30  ;;  %v6724_v20 = vrot.slane %v6653_v30, 4  ;;  %v7098_v30 = vld [vmem:[%s10851_s5] ss:$0 sm:$0xff] }
0x1825   :  { %6791 = vmatmul.mubr.f32.vlgmr.msra.gmra.mrb[58].mxu0 %v6724_v20  ;;  %6862 = vmatmul.mubr.f32.vlgmr.msra.gmra.mrb[58].mxu1 %v6724_v20 }
0x1826   :  { %8881 = vmatpush3.bf16.msra.mxu0 %v8880_v60  ;;  %7148 = vmatprep.mubr.msk.f32.mxu0 %vm9455_vm0, %v9453_v0 }
0x1827   :  { %8882 = vmatprep.subr.bf16.mxu0 %v9454_v24 }
0x182a   :  { %8884 = vmatpush3.bf16.msra.mxu0 %v8883_v56 }
0x182b   :  { %8885 = vmatprep.subr.bf16.mxu0 %v9454_v24 }
0x182e   :  { %8887 = vmatpush3.bf16.msra.mxu0 %v8886_v38 }
0x182f   :  { %8888 = vmatprep.subr.bf16.mxu0 %v9454_v24 }
0x1832   :  { %8890 = vmatpush3.bf16.msra.mxu0 %v8889_v19 }
0x1833   :  { %8891 = vmatprep.subr.bf16.mxu0 %v9454_v24 }
0x1836   :  { %8893 = vmatpush3.bf16.msra.mxu0 %v8892_v39 }
0x1837   :  { %8894 = vmatprep.subr.bf16.mxu0 %v9454_v24 }
0x183a   :  { %8896 = vmatpush3.bf16.msra.mxu0 %v8895_v16 }
0x183b   :  { %8897 = vmatprep.subr.bf16.mxu0 %v9454_v24 }
0x183e   :  { %8899 = vmatpush3.bf16.msra.mxu0 %v8898_v15 }
0x183f   :  { %8900 = vmatprep.subr.bf16.mxu0 %v9454_v24 }
0x1842   :  { %8902 = vmatpush3.bf16.msra.mxu0 %v8901_v28 }
0x18f8   :  { %v6792_v7 = vpop.f32.mrb[58].mxu0  ;;  %v6863_v18 = vpop.f32.mrb[58].mxu1 }
0x18f9   :  { %v6872_v0 = vrot.slane %v6792_v7, 2  ;;  %v6794_v11 = vpop.f32.mrb[59].mxu0  ;;  %v6865_v57 = vpop.f32.mrb[59].mxu1  ;;  %v6874_v63 = vrot.slane %v6863_v18, 2 }
0x18fa   :  { %v6873_v2 = vrot.slane %v6794_v11, 2  ;;  %v6875_v46 = vrot.slane %v6865_v57, 2 }
0x18fb   :  { %v6880_v3 = vadd.f32 %v6872_v0, %v6655_v36  ;;  %v6882_v10 = vadd.f32 %v6874_v63, %v6657_v12 }
0x18fc   :  { %v6881_v55 = vadd.f32 %v6873_v2, %v6656_v32  ;;  %v6883_v44 = vadd.f32 %v6875_v46, %v6658_v49 }
0x18fd   :  { %v7095_v48 = vmul.f32 -1.442695, %v6880_v3 }
0x18fe   :  { %v7096_v8 = vmul.f32 -1.442695, %v6881_v55  ;;  %v7097_v53 = vmul.f32 -1.442695, %v6883_v44 }
0x18ff   :  { %9286 = vpow2.f32 %v7095_v48 }
0x1900   :  { %9288 = vpow2.f32 %v7096_v8 }
0x1901   :  { %9290 = vpow2.f32 %v7097_v53 }
0x1902   :  { %9292 = vtanh.f32 %v6882_v10 }
0x1909   :  { %v9287_v50 = vpop.eup %9286 }
0x190a   :  { %v9289_v25 = vpop.eup %9288  ;;  %v6887_v42 = vadd.f32 1.0, %v9287_v50 }
0x190b   :  { %v6893_v58 = vadd.f32 1.0, %v9289_v25  ;;  %v9291_v9 = vpop.eup %9290 }
0x190c   :  { %9294 = vrcp.f32 %v6887_v42  ;;  %v9293_v21 = vpop.eup %9292  ;;  %v6900_v34 = vadd.f32 1.0, %v9291_v9 }
0x190d   :  { %9296 = vrcp.f32 %v6893_v58 }
0x190e   :  { %9298 = vrcp.f32 %v6900_v34 }
0x1916   :  { %v9295_v1 = vpop.eup %9294 }
0x1917   :  { %v9297_v62 = vpop.eup %9296  ;;  %v6907_v13 = vmul.f32 %v9295_v1, %v9293_v21 }
0x1918   :  { %v6906_v33 = vmul.f32 %v9297_v62, %v6904_v61  ;;  %v9299_v51 = vpop.eup %9298 }
0x191a   :  { %v6908_v6 = vadd.f32 %v6907_v13, %v6906_v33 }
0x191c   :  { %9300 = vtanh.f32 %v6908_v6 }
0x1926   :  { %v9301_v17 = vpop.eup %9300 }
0x1927   :  { %v6910_v5 = vmul.f32 %v9301_v17, %v9299_v51 }
0x1929   :  { %6911 = vst [vmem:[#allocation2 + $0x8] sm:$0xc0] %v6910_v5  ;;  %v6936_v27 = vrot.slane %v6910_v5, 6 }
0x192b   :  { %7149 = vmatmul.mubr.f32.vlgmr.msra.gmra.mrb[60].mxu0 %v6936_v27 }
0x19fe   :  { %v7004_v43 = vpop.f32.mrb[60].mxu0 }
0x19ff   :  { %v7005_v20 = vadd.f32 %v7098_v30, %v7004_v43  ;;  %v7150_v31 = vpop.f32.mrb[61].mxu0 }
0x1a01   :  { %7008 = vst [vmem:[#allocation13] sm:$0x3] %v7005_v20 }
0x1a02   :  { %9423 = shalt.err (!%p9420_p2)
}
0x1a03   :  { %s9424_s17 = scalar_lea.hbm %s10852_s6, 32 }
0x1a04   :  { %p9425_p3 = scmp.ne.s32.totalorder %s10852_s6, %s9424_s17  ;;  %p9428_p4 = scmp.lt.u32.totalorder %s9424_s17, %s10852_s6 }
0x1a06   :  { %p9430_p5 = pnand %p9428_p4, %p9425_p3 }
0x1a08   :  { %9433 = shalt.err (!%p9430_p5)
}
0x1a09   :  { %7018 = dma.vmem_to_hbm [thread:$0]  %s7016_s12, 32, %s10852_s6, [#allocation6]  }
0x1a0a   :  { %9440 = dma.done.wait [#allocation6], 32  }
0x1a0b   :  { %9441 = vsyncadd [#allocation6], 4294967264 }
0x1a0c   :  { %7022 = vsyncpa [#allocation5], 1 }
0x1a0d   :  { %7023 = vsyncpa [#allocation8], 1 }
0x1a0e   :  { %7024 = vsyncpa [#allocation11], 1 }
0x1a0f   :  { %7025 = vsyncpa [#allocation6], 1 }

</bundles_post_ra>
